<compile_context>
chip_gen: v7x
topology: tpu7x:2x2x1
jax: 0.10.0
libtpu: 0.0.40
codegen_flags: <defaults>
</compile_context>

<pallas_src>
import numpy as np
import jax
import jax.numpy as jnp
from jax.experimental import pallas as pl
from jax.experimental.pallas import tpu as pltpu

BN_EPS = 1e-5

# ----------------------------------------------------------------------------
# Generation-aware tiling helpers
# ----------------------------------------------------------------------------
_CFG = None


def _budgets():
    """VMEM budgets per TPU generation (v5e/v6e: 128 MiB VMEM, v7x: 64 MiB)."""
    global _CFG
    if _CFG is not None:
        return _CFG
    cap = None
    try:
        cap = int(pltpu.get_tpu_info().vmem_capacity_bytes)
    except Exception:
        cap = None
    if cap is None:
        try:
            kind = jax.devices()[0].device_kind.lower()
        except Exception:
            kind = ""
        cap = (64 if "7" in kind else 128) * 1024 * 1024
    mib = 1024 * 1024
    if cap >= 96 * mib:
        # v5e / v6e: 128 MiB physical VMEM -> large scoped limit, big tiles.
        cfg = dict(vmem_limit=96 * mib, conv_budget=64 * mib,
                   weight_budget=40 * mib, ew_budget=16 * mib, m_target=512)
    else:
        # v7x: only 64 MiB physical VMEM -> keep the working set conservative.
        cfg = dict(vmem_limit=44 * mib, conv_budget=24 * mib,
                   weight_budget=12 * mib, ew_budget=8 * mib, m_target=512)
    _CFG = cfg
    return cfg


def _divisor_at_most(n, cap):
    d = max(1, min(n, int(cap)))
    while n % d:
        d -= 1
    return d


def _pick_cout_tile(cin, cout, cfg):
    """Largest out-channel tile whose double-buffered weight fits the budget.
    Full Cout whenever possible -> constant weight index (fetched once)."""
    if cout <= 128:
        return cout
    best, t = 128, 128
    while t <= cout:
        if cout % t == 0 and 4 * 9 * cin * t <= cfg["weight_budget"]:
            best = t
        t *= 2
    return best


def _conv_row_tile(N, H, W, Cin, tile_c, cfg):
    # bf16 bytes per row of H: x block (x2 buffers) + halo'd scratch + im2col
    # scratch + y block (x2 buffers).
    per_row = 2 * N * W * (12 * Cin + 2 * tile_c)
    fixed = 4 * 9 * Cin * tile_c                    # weight tile, double-buffered
    cap = max(1, (cfg["conv_budget"] - fixed) // max(per_row, 1))
    target = max(1, cfg["m_target"] // max(N * W, 1))   # aim for ~512-row matmul M
    return _divisor_at_most(H, min(cap, target))


def _ew_row_tile(n_rows, bytes_per_row, budget):
    return _divisor_at_most(n_rows, max(1, budget // max(1, bytes_per_row)))


# ----------------------------------------------------------------------------
# Pallas kernels
# ----------------------------------------------------------------------------
def conv3x3_stats(x, w2, scale=None, shift=None):
    """Conv2d(k=3, pad=1, bias=False) on bf16 NHWC input.

    If (scale, shift) are given, `x` is the raw pre-BN output of the previous
    conv and relu(x * scale + shift) is applied on the fly while the im2col
    patches are built (fused BN+ReLU -> no standalone apply pass in between).

    Returns:
      y_raw : (N, H, W, Cout) bf16 raw conv output (pre-BN).
      stats : (n_rb, n_cb, 2, tile_c) f32 per-row-block partial sums
              ([..., 0, :] = sum, [..., 1, :] = sum of squares).
    """
    N, H, W, Cin = x.shape
    Cout = w2.shape[1]
    cfg = _budgets()
    tile_c = _pick_cout_tile(Cin, Cout, cfg)
    n_cb = Cout // tile_c
    TH = _conv_row_tile(N, H, W, Cin, tile_c, cfg)
    n_rb = H // TH
    R = N * TH * W
    fused = scale is not None

    def kernel(*refs):
        if fused:
            (x_ref, top_ref, bot_ref, w_ref, sc_ref, sh_ref,
             y_ref, st_ref, xpad_ref, xcol_ref) = refs
        else:
            (x_ref, top_ref, bot_ref, w_ref,
             y_ref, st_ref, xpad_ref, xcol_ref) = refs
        i = pl.program_id(0)   # row block  (megacore-parallel)
        j = pl.program_id(1)   # out-channel block (sequential: reuses scratch)

        def act(v):
            if not fused:
                return v
            a = v.astype(jnp.float32) * sc_ref[0, :] + sh_ref[0, :]
            return jnp.maximum(a, 0.0).astype(v.dtype)

        # Build the halo'd tile + im2col patch once per row block; every
        # out-channel tile of this row block reuses it.
        @pl.when(j == 0)
        def _build_patches():
            # Only the two W-border columns are never overwritten -> zero those
            # (no full-scratch zero fill).
            zcol = jnp.zeros((N, TH + 2, 1, Cin), xpad_ref.dtype)
            xpad_ref[:, :, 0:1, :] = zcol
            xpad_ref[:, :, W + 1:W + 2, :] = zcol
            xpad_ref[:, 1:TH + 1, 1:W + 1, :] = act(x_ref[...])
            top = act(top_ref[...])
            bot = act(bot_ref[...])
            xpad_ref[:, 0:1, 1:W + 1, :] = jnp.where(
                i == 0, jnp.zeros_like(top), top)
            xpad_ref[:, TH + 1:TH + 2, 1:W + 1, :] = jnp.where(
                i == n_rb - 1, jnp.zeros_like(bot), bot)
            # TODO(synk): replace the offset-1 sublane slices below with
            # pltpu.roll-based shifts (and drop the W-padded scratch) to move
            # the build off the masked load/store path.
            for kh in range(3):
                for kw in range(3):
                    k = kh * 3 + kw
                    xcol_ref[:, k * Cin:(k + 1) * Cin] = (
                        xpad_ref[:, kh:kh + TH, kw:kw + W, :].reshape(R, Cin))

        # One big-K matmul per (row block, out-channel tile).
        acc = jnp.dot(xcol_ref[...], w_ref[...],
                      preferred_element_type=jnp.float32)          # (R, tile_c)
        # TODO(synk): for 64-channel outputs, regroup to a lane-dense
        # (N, TH, W/2, 128) store to avoid masked partial stores.
        y_ref[...] = acc.reshape(N, TH, W, tile_c).astype(y_ref.dtype)

        # Per-row-block BatchNorm partial sums (reduced in f32 glue outside).
        s = jnp.sum(acc, axis=0, keepdims=True)
        ss = jnp.sum(acc * acc, axis=0, keepdims=True)
        st_ref[...] = jnp.concatenate([s, ss], axis=0).reshape(1, 1, 2, tile_c)

    in_specs = [
        # main row block
        pl.BlockSpec((N, TH, W, Cin), lambda i, j: (0, i, 0, 0)),
        # one-row top halo (clamped; zeroed in-kernel at the image edge)
        pl.BlockSpec((N, 1, W, Cin),
                     lambda i, j: (0, jnp.maximum(i * TH - 1, 0), 0, 0)),
        # one-row bottom halo
        pl.BlockSpec((N, 1, W, Cin),
                     lambda i, j: (0, jnp.minimum(i * TH + TH, H - 1), 0, 0)),
        # weight tile (constant index when n_cb == 1 -> fetched once)
        pl.BlockSpec((9 * Cin, tile_c), lambda i, j: (0, j)),
    ]
    args = [x, x, x, w2]
    if fused:
        in_specs += [pl.BlockSpec((1, Cin), lambda i, j: (0, 0)),
                     pl.BlockSpec((1, Cin), lambda i, j: (0, 0))]
        args += [scale.reshape(1, Cin).astype(jnp.float32),
                 shift.reshape(1, Cin).astype(jnp.float32)]

    y, stats = pl.pallas_call(
        kernel,
        out_shape=(jax.ShapeDtypeStruct((N, H, W, Cout), jnp.bfloat16),
                   jax.ShapeDtypeStruct((n_rb, n_cb, 2, tile_c), jnp.float32)),
        grid=(n_rb, n_cb),
        in_specs=in_specs,
        out_specs=(
            pl.BlockSpec((N, TH, W, tile_c), lambda i, j: (0, i, 0, j)),
            pl.BlockSpec((1, 1, 2, tile_c), lambda i, j: (i, j, 0, 0)),
        ),
        scratch_shapes=[
            pltpu.VMEM((N, TH + 2, W + 2, Cin), jnp.bfloat16),   # halo'd tile
            pltpu.VMEM((R, 9 * Cin), jnp.bfloat16),              # im2col patch
        ],
        compiler_params=pltpu.CompilerParams(
            # Row axis has no cross-iteration state (per-row-block stats) ->
            # megacore-parallel; out-channel axis reuses scratch -> sequential.
            dimension_semantics=("parallel", "arbitrary"),
            vmem_limit_bytes=cfg["vmem_limit"]),
    )(*args)
    return y, stats


def _bn_scale_shift(stats, gamma, beta, count):
    """Fold training-mode BatchNorm into per-channel scale/shift (f32 glue).
    Note: E[x^2]-E[x]^2 with f32 sums; fine for these extents (clamped >= 0)."""
    s = stats.sum(axis=0)                      # (n_cb, 2, tile_c)
    ssum = s[:, 0, :].reshape(-1)
    ssq = s[:, 1, :].reshape(-1)
    mean = ssum / count
    var = jnp.maximum(ssq / count - mean * mean, 0.0)
    inv = jax.lax.rsqrt(var + BN_EPS)
    scale = gamma * inv
    shift = beta - mean * scale
    return scale, shift


def bn_relu(y_raw, scale, shift):
    """Apply folded BN (scale/shift) + ReLU; bf16 output. Row-blocked grid."""
    N, H, W, C = y_raw.shape
    cfg = _budgets()
    th = _ew_row_tile(H, 12 * N * W * C, cfg["ew_budget"])
    sc = scale.reshape(1, C).astype(jnp.float32)
    sh = shift.reshape(1, C).astype(jnp.float32)

    def kernel(y_ref, sc_ref, sh_ref, o_ref):
        y = y_ref[...].astype(jnp.float32) * sc_ref[0, :] + sh_ref[0, :]
        o_ref[...] = jnp.maximum(y, 0.0).astype(o_ref.dtype)

    return pl.pallas_call(
        kernel,
        out_shape=jax.ShapeDtypeStruct((N, H, W, C), jnp.bfloat16),
        grid=(H // th,),
        in_specs=[pl.BlockSpec((N, th, W, C), lambda i: (0, i, 0, 0)),
                  pl.BlockSpec((1, C), lambda i: (0, 0)),
                  pl.BlockSpec((1, C), lambda i: (0, 0))],
        out_specs=pl.BlockSpec((N, th, W, C), lambda i: (0, i, 0, 0)),
        compiler_params=pltpu.CompilerParams(
            dimension_semantics=("parallel",),
            vmem_limit_bytes=cfg["vmem_limit"]),
    )(y_raw, sc, sh)


def bn_relu_pool(y_raw, scale, shift):
    """Folded BN + ReLU with a fused 2x2 MaxPool epilogue.

    Returns (full activation (N,H,W,C), pooled (N,H/2,W/2,C)), both bf16.
    The W-direction pool works on lane halves by viewing the row-major data as
    (N, H, W/2, 2*C) (a free view); assumes even H and W (true for this net).
    """
    N, H, W, C = y_raw.shape
    Hp, Wp = H // 2, W // 2
    C2 = 2 * C
    cfg = _budgets()
    yv = y_raw.reshape(N, H, Wp, C2)                   # free row-major regroup
    sc2 = jnp.concatenate([scale, scale]).reshape(1, C2).astype(jnp.float32)
    sh2 = jnp.concatenate([shift, shift]).reshape(1, C2).astype(jnp.float32)
    tho = _ew_row_tile(Hp, 24 * N * Wp * C2, cfg["ew_budget"])

    def kernel(y_ref, sc_ref, sh_ref, full_ref, pool_ref):
        y = y_ref[...].astype(jnp.float32) * sc_ref[0, :] + sh_ref[0, :]
        y = jnp.maximum(y, 0.0)
        full_ref[...] = y.astype(full_ref.dtype)
        yr = y.reshape(N, tho, 2, Wp, C2)              # split H pairs
        m = jnp.maximum(yr[:, :, 0], yr[:, :, 1])      # max over the H pair
        p = jnp.maximum(m[..., :C], m[..., C:])        # max over the W pair
        pool_ref[...] = p.astype(pool_ref.dtype)

    full, pooled = pl.pallas_call(
        kernel,
        out_shape=(jax.ShapeDtypeStruct((N, H, Wp, C2), jnp.bfloat16),
                   jax.ShapeDtypeStruct((N, Hp, Wp, C), jnp.bfloat16)),
        grid=(Hp // tho,),
        in_specs=[pl.BlockSpec((N, 2 * tho, Wp, C2), lambda i: (0, i, 0, 0)),
                  pl.BlockSpec((1, C2), lambda i: (0, 0)),
                  pl.BlockSpec((1, C2), lambda i: (0, 0))],
        out_specs=(pl.BlockSpec((N, 2 * tho, Wp, C2), lambda i: (0, i, 0, 0)),
                   pl.BlockSpec((N, tho, Wp, C), lambda i: (0, i, 0, 0))),
        compiler_params=pltpu.CompilerParams(
            dimension_semantics=("parallel",),
            vmem_limit_bytes=cfg["vmem_limit"]),
    )(yv, sc2, sh2)
    return full.reshape(N, H, W, C), pooled


def conv_transpose2x2(x, w_dy, b2):
    """ConvTranspose2d(k=2, s=2, bias=True).

    w_dy: (2, Cin, 2*Cout) — rows indexed by the H-phase dy, columns ordered
    (dx, cout).  The two H-phases are written interleaved from the kernel so
    the final (N, 2H, 2W, Cout) view is a free row-major reshape (no XLA
    reshape/transpose pass over the upsampled tensor).
    """
    N, H, W, Cin = x.shape
    C2 = w_dy.shape[2]
    Cout = C2 // 2
    cfg = _budgets()
    per_row = 2 * N * W * (2 * Cin + 4 * C2) + 8 * N * W * C2
    th = _ew_row_tile(H, per_row, cfg["ew_budget"])
    R = N * th * W

    def kernel(x_ref, w_ref, b_ref, o_ref):
        xf = x_ref[...].reshape(R, Cin)
        b = b_ref[0, :]
        y0 = jnp.dot(xf, w_ref[0], preferred_element_type=jnp.float32) + b
        y1 = jnp.dot(xf, w_ref[1], preferred_element_type=jnp.float32) + b
        o_ref[:, :, 0:1, :, :] = y0.reshape(N, th, 1, W, C2).astype(o_ref.dtype)
        o_ref[:, :, 1:2, :, :] = y1.reshape(N, th, 1, W, C2).astype(o_ref.dtype)

    out = pl.pallas_call(
        kernel,
        out_shape=jax.ShapeDtypeStruct((N, H, 2, W, C2), jnp.bfloat16),
        grid=(H // th,),
        in_specs=[pl.BlockSpec((N, th, W, Cin), lambda i: (0, i, 0, 0)),
                  pl.BlockSpec((2, Cin, C2), lambda i: (0, 0, 0)),
                  pl.BlockSpec((1, C2), lambda i: (0, 0))],
        out_specs=pl.BlockSpec((N, th, 2, W, C2), lambda i: (0, i, 0, 0, 0)),
        compiler_params=pltpu.CompilerParams(
            dimension_semantics=("parallel",),
            vmem_limit_bytes=cfg["vmem_limit"]),
    )(x, w_dy, b2)
    return out.reshape(N, 2 * H, 2 * W, Cout)          # free row-major view


def conv1x1_padded(x, w, b):
    """OutConv: 1x1 conv + bias.  w/b are zero-padded on Cout to 128 lanes so
    output stores are lane-dense; the real classes are sliced outside."""
    N, H, W, Cin = x.shape
    Cp = w.shape[1]
    cfg = _budgets()
    th = _ew_row_tile(H, 2 * N * W * (2 * Cin + 4 * Cp), cfg["ew_budget"])
    R = N * th * W

    def kernel(x_ref, w_ref, b_ref, o_ref):
        xf = x_ref[...].reshape(R, Cin)
        y = jnp.dot(xf, w_ref[...], preferred_element_type=jnp.float32) + b_ref[0, :]
        o_ref[...] = y.reshape(N, th, W, Cp)

    return pl.pallas_call(
        kernel,
        out_shape=jax.ShapeDtypeStruct((N, H, W, Cp), jnp.float32),
        grid=(H // th,),
        in_specs=[pl.BlockSpec((N, th, W, Cin), lambda i: (0, i, 0, 0)),
                  pl.BlockSpec((Cin, Cp), lambda i: (0, 0)),
                  pl.BlockSpec((1, Cp), lambda i: (0, 0))],
        out_specs=pl.BlockSpec((N, th, W, Cp), lambda i: (0, i, 0, 0)),
        compiler_params=pltpu.CompilerParams(
            dimension_semantics=("parallel",),
            vmem_limit_bytes=cfg["vmem_limit"]),
    )(x, w, b)


# ----------------------------------------------------------------------------
# Parameter init (deterministic, synthetic)
# ----------------------------------------------------------------------------
def _init_double_conv(key, cin, cout, cmid=None):
    if cmid is None:
        cmid = cout
    ks = jax.random.split(key, 6)

    def conv_w(k, ci, co):
        w = jax.random.normal(k, (3, 3, ci, co), jnp.float32) * np.sqrt(2.0 / (9 * ci))
        return w.reshape(9 * ci, co).astype(jnp.bfloat16)

    return {
        "w1": conv_w(ks[0], cin, cmid),
        "g1": 1.0 + 0.1 * jax.random.normal(ks[1], (cmid,), jnp.float32),
        "b1": 0.1 * jax.random.normal(ks[2], (cmid,), jnp.float32),
        "w2": conv_w(ks[3], cmid, cout),
        "g2": 1.0 + 0.1 * jax.random.normal(ks[4], (cout,), jnp.float32),
        "b2": 0.1 * jax.random.normal(ks[5], (cout,), jnp.float32),
    }


def _init_up(key, cin, cout):
    k1, k2, k3 = jax.random.split(key, 3)
    cu = cin // 2
    w = jax.random.normal(k1, (2, cin, 2 * cu), jnp.float32) * np.sqrt(1.0 / (4 * cin))
    b = 0.1 * jax.random.normal(k2, (cu,), jnp.float32)
    return {
        "up_w": w.astype(jnp.bfloat16),                       # (2, Cin, 2*Cout)
        "up_b2": jnp.tile(b, 2).reshape(1, 2 * cu).astype(jnp.float32),
        "conv": _init_double_conv(k3, cin, cout),
    }


def init_unet_params(key, n_channels, n_classes):
    ks = jax.random.split(key, 11)
    cpad = int(np.ceil(n_classes / 128.0) * 128)
    ow = jax.random.normal(ks[9], (64, n_classes), jnp.float32) * np.sqrt(1.0 / 64)
    ob = 0.1 * jax.random.normal(ks[10], (n_classes,), jnp.float32)
    ow_pad = jnp.zeros((64, cpad), jnp.float32).at[:, :n_classes].set(ow).astype(jnp.bfloat16)
    ob_pad = jnp.zeros((1, cpad), jnp.float32).at[0, :n_classes].set(ob)
    return {
        "inc": _init_double_conv(ks[0], n_channels, 64),
        "down1": _init_double_conv(ks[1], 64, 128),
        "down2": _init_double_conv(ks[2], 128, 256),
        "down3": _init_double_conv(ks[3], 256, 512),
        "down4": _init_double_conv(ks[4], 512, 1024),
        "up1": _init_up(ks[5], 1024, 512),
        "up2": _init_up(ks[6], 512, 256),
        "up3": _init_up(ks[7], 256, 128),
        "up4": _init_up(ks[8], 128, 64),
        "outc_w": ow_pad,
        "outc_b": ob_pad,
        "n_classes": n_classes,
    }


# ----------------------------------------------------------------------------
# UNet forward
# ----------------------------------------------------------------------------
def _double_conv(x, p, pool=False):
    """(conv => BN => ReLU) * 2.  The BN+ReLU of conv1 is fused into conv2's
    im2col build (no standalone mid-activation HBM pass); only the block output
    gets an apply pass (fused with the 2x2 MaxPool where a Down block follows)."""
    count = float(x.shape[0] * x.shape[1] * x.shape[2])
    y1_raw, st1 = conv3x3_stats(x, p["w1"])
    sc1, sh1 = _bn_scale_shift(st1, p["g1"], p["b1"], count)
    y2_raw, st2 = conv3x3_stats(y1_raw, p["w2"], sc1, sh1)      # fused BN1+ReLU
    sc2, sh2 = _bn_scale_shift(st2, p["g2"], p["b2"], count)
    if pool:
        return bn_relu_pool(y2_raw, sc2, sh2)
    return bn_relu(y2_raw, sc2, sh2)


def _up(x_small, x_skip, p):
    u = conv_transpose2x2(x_small, p["up_w"], p["up_b2"])
    dy = x_skip.shape[1] - u.shape[1]
    dx = x_skip.shape[2] - u.shape[2]
    if dy or dx:
        u = jnp.pad(u, ((0, 0), (dy // 2, dy - dy // 2),
                        (dx // 2, dx - dx // 2), (0, 0)))
    # TODO(synk): split the first Up-conv weight into skip/up halves and feed
    # both tensors to conv3x3_stats directly (two accumulated K-matmuls) to
    # remove this concat's HBM round-trip of the widest decoder tensor.
    cat = jnp.concatenate([x_skip, u], axis=-1)
    return _double_conv(cat, p["conv"], pool=False)


def unet_forward(params, x_nchw):
    # TODO(synk): bilinear=True upsample path (nn.Upsample, align_corners) not
    # implemented; this follows the default UNet(..., bilinear=False) path.
    n_classes = params["n_classes"]
    x = jnp.transpose(x_nchw, (0, 2, 3, 1)).astype(jnp.bfloat16)   # NCHW -> NHWC
    x1, x1p = _double_conv(x, params["inc"], pool=True)
    x2, x2p = _double_conv(x1p, params["down1"], pool=True)
    x3, x3p = _double_conv(x2p, params["down2"], pool=True)
    x4, x4p = _double_conv(x3p, params["down3"], pool=True)
    x5 = _double_conv(x4p, params["down4"], pool=False)
    y = _up(x5, x4, params["up1"])
    y = _up(y, x3, params["up2"])
    y = _up(y, x2, params["up3"])
    y = _up(y, x1, params["up4"])
    logits = conv1x1_padded(y, params["outc_w"], params["outc_b"])
    logits = logits[:, :, :, :n_classes]
    return jnp.transpose(logits, (0, 3, 1, 2))                      # back to NCHW


if __name__ == "__main__":
    key = jax.random.PRNGKey(0)
    kp, kx = jax.random.split(key)
    n_channels, n_classes = 4, 3
    params = init_unet_params(kp, n_channels, n_classes)
    x = jax.random.normal(kx, (2, n_channels, 16, 16), jnp.float32)

    logits = unet_forward(params, x)
    logits = jax.block_until_ready(logits)

    assert logits.shape == (2, n_classes, 16, 16), logits.shape
    assert bool(jnp.all(jnp.isfinite(logits)))
    print("KERNEL_OK")
</pallas_src>

<mosaic_0001>
module attributes {stable_mosaic.version = 11 : i64} {
  func.func @kernel(%arg0: i32, %arg1: i32, %arg2: memref<2x16x16x4xbf16, #tpu.memory_space<vmem>>, %arg3: memref<2x1x16x4xbf16, #tpu.memory_space<vmem>>, %arg4: memref<2x1x16x4xbf16, #tpu.memory_space<vmem>>, %arg5: memref<36x64xbf16, #tpu.memory_space<vmem>>, %arg6: memref<2x16x16x64xbf16, #tpu.memory_space<vmem>>, %arg7: memref<1x1x2x64xf32, #tpu.memory_space<vmem>>, %arg8: memref<2x18x18x4xbf16, #tpu.memory_space<vmem>>, %arg9: memref<512x36xbf16, #tpu.memory_space<vmem>>) attributes {dimension_semantics = [#tpu.dimension_semantics<parallel>, #tpu.dimension_semantics<arbitrary>], iteration_bounds = array<i64: 1, 1>, scalar_prefetch = 0 : i64, scratch_operands = 2 : i64, tpu.core_type = #tpu.core_type<tc>, window_params = [{transform_indices = @transform_0, window_bounds = array<i64: 2, 16, 16, 4>}, {transform_indices = @transform_1, window_bounds = array<i64: 2, 1, 16, 4>}, {transform_indices = @transform_2, window_bounds = array<i64: 2, 1, 16, 4>}, {transform_indices = @transform_3, window_bounds = array<i64: 36, 64>}, {transform_indices = @transform_4, window_bounds = array<i64: 2, 16, 16, 64>}, {transform_indices = @transform_5, window_bounds = array<i64: 1, 1, 2, 64>}]} {
    %c0_i32 = arith.constant 0 : i32
    %0 = arith.cmpi eq, %arg1, %c0_i32 : i32
    %1 = arith.extui %0 : i1 to i32
    %c0_i32_0 = arith.constant 0 : i32
    %2 = arith.cmpi ne, %1, %c0_i32_0 : i32
    scf.if %2 {
      %cst_14 = arith.constant 0.000000e+00 : bf16
      %17 = vector.broadcast %cst_14 : bf16 to vector<2x18x1x4xbf16>
      %c0_15 = arith.constant 0 : index
      %c0_16 = arith.constant 0 : index
      %c0_17 = arith.constant 0 : index
      %c0_18 = arith.constant 0 : index
      %18 = vector.load %arg8[%c0_15, %c0_16, %c0_17, %c0_18] : memref<2x18x18x4xbf16, #tpu.memory_space<vmem>>, vector<2x18x1x4xbf16>
      tpu.vector_store %arg8[%c0_15, %c0_16, %c0_17, %c0_18], %17 {strides = array<i32>} : memref<2x18x18x4xbf16, #tpu.memory_space<vmem>>, vector<2x18x1x4xbf16>,
      %c0_19 = arith.constant 0 : index
      %c0_20 = arith.constant 0 : index
      %c17 = arith.constant 17 : index
      %c0_21 = arith.constant 0 : index
      %19 = vector.load %arg8[%c0_19, %c0_20, %c17, %c0_21] : memref<2x18x18x4xbf16, #tpu.memory_space<vmem>>, vector<2x18x1x4xbf16>
      tpu.vector_store %arg8[%c0_19, %c0_20, %c17, %c0_21], %17 {strides = array<i32>} : memref<2x18x18x4xbf16, #tpu.memory_space<vmem>>, vector<2x18x1x4xbf16>,
      %c0_22 = arith.constant 0 : index
      %c0_23 = arith.constant 0 : index
      %c0_24 = arith.constant 0 : index
      %c0_25 = arith.constant 0 : index
      %20 = vector.load %arg2[%c0_22, %c0_23, %c0_24, %c0_25] : memref<2x16x16x4xbf16, #tpu.memory_space<vmem>>, vector<2x16x16x4xbf16>
      %c0_26 = arith.constant 0 : index
      %c1 = arith.constant 1 : index
      %c1_27 = arith.constant 1 : index
      %c0_28 = arith.constant 0 : index
      %21 = vector.load %arg8[%c0_26, %c1, %c1_27, %c0_28] : memref<2x18x18x4xbf16, #tpu.memory_space<vmem>>, vector<2x16x16x4xbf16>
      tpu.vector_store %arg8[%c0_26, %c1, %c1_27, %c0_28], %20 {strides = array<i32>} : memref<2x18x18x4xbf16, #tpu.memory_space<vmem>>, vector<2x16x16x4xbf16>,
      %c0_29 = arith.constant 0 : index
      %c0_30 = arith.constant 0 : index
      %c0_31 = arith.constant 0 : index
      %c0_32 = arith.constant 0 : index
      %22 = vector.load %arg3[%c0_29, %c0_30, %c0_31, %c0_32] : memref<2x1x16x4xbf16, #tpu.memory_space<vmem>>, vector<2x1x16x4xbf16>
      %c0_33 = arith.constant 0 : index
      %c0_34 = arith.constant 0 : index
      %c0_35 = arith.constant 0 : index
      %c0_36 = arith.constant 0 : index
      %23 = vector.load %arg4[%c0_33, %c0_34, %c0_35, %c0_36] : memref<2x1x16x4xbf16, #tpu.memory_space<vmem>>, vector<2x1x16x4xbf16>
      %c0_i32_37 = arith.constant 0 : i32
      %24 = arith.cmpi eq, %arg0, %c0_i32_37 : i32
      %cst_38 = arith.constant 0.000000e+00 : bf16
      %25 = vector.broadcast %cst_38 : bf16 to vector<2x1x16x4xbf16>
      %26 = arith.select %24, %25, %22 : vector<2x1x16x4xbf16>
      %c0_39 = arith.constant 0 : index
      %c0_40 = arith.constant 0 : index
      %c1_41 = arith.constant 1 : index
      %c0_42 = arith.constant 0 : index
      %27 = vector.load %arg8[%c0_39, %c0_40, %c1_41, %c0_42] : memref<2x18x18x4xbf16, #tpu.memory_space<vmem>>, vector<2x1x16x4xbf16>
      tpu.vector_store %arg8[%c0_39, %c0_40, %c1_41, %c0_42], %26 {strides = array<i32>} : memref<2x18x18x4xbf16, #tpu.memory_space<vmem>>, vector<2x1x16x4xbf16>,
      %c0_i32_43 = arith.constant 0 : i32
      %28 = arith.cmpi eq, %arg0, %c0_i32_43 : i32
      %cst_44 = arith.constant 0.000000e+00 : bf16
      %29 = vector.broadcast %cst_44 : bf16 to vector<2x1x16x4xbf16>
      %30 = arith.select %28, %29, %23 : vector<2x1x16x4xbf16>
      %c0_45 = arith.constant 0 : index
      %c17_46 = arith.constant 17 : index
      %c1_47 = arith.constant 1 : index
      %c0_48 = arith.constant 0 : index
      %31 = vector.load %arg8[%c0_45, %c17_46, %c1_47, %c0_48] : memref<2x18x18x4xbf16, #tpu.memory_space<vmem>>, vector<2x1x16x4xbf16>
      tpu.vector_store %arg8[%c0_45, %c17_46, %c1_47, %c0_48], %30 {strides = array<i32>} : memref<2x18x18x4xbf16, #tpu.memory_space<vmem>>, vector<2x1x16x4xbf16>,
      %c0_49 = arith.constant 0 : index
      %c0_50 = arith.constant 0 : index
      %c0_51 = arith.constant 0 : index
      %c0_52 = arith.constant 0 : index
      %32 = vector.load %arg8[%c0_49, %c0_50, %c0_51, %c0_52] : memref<2x18x18x4xbf16, #tpu.memory_space<vmem>>, vector<2x16x16x4xbf16>
      %33 = vector.shape_cast %32 : vector<2x16x16x4xbf16> to vector<512x4xbf16>
      %c0_53 = arith.constant 0 : index
      %c0_54 = arith.constant 0 : index
      %34 = vector.load %arg9[%c0_53, %c0_54] : memref<512x36xbf16, #tpu.memory_space<vmem>>, vector<512x4xbf16>
      tpu.vector_store %arg9[%c0_53, %c0_54], %33 {strides = array<i32>} : memref<512x36xbf16, #tpu.memory_space<vmem>>, vector<512x4xbf16>,
      %c0_55 = arith.constant 0 : index
      %c0_56 = arith.constant 0 : index
      %c1_57 = arith.constant 1 : index
      %c0_58 = arith.constant 0 : index
      %35 = vector.load %arg8[%c0_55, %c0_56, %c1_57, %c0_58] : memref<2x18x18x4xbf16, #tpu.memory_space<vmem>>, vector<2x16x16x4xbf16>
      %36 = vector.shape_cast %35 : vector<2x16x16x4xbf16> to vector<512x4xbf16>
      %c0_59 = arith.constant 0 : index
      %c4 = arith.constant 4 : index
      %37 = vector.load %arg9[%c0_59, %c4] : memref<512x36xbf16, #tpu.memory_space<vmem>>, vector<512x4xbf16>
      tpu.vector_store %arg9[%c0_59, %c4], %36 {strides = array<i32>} : memref<512x36xbf16, #tpu.memory_space<vmem>>, vector<512x4xbf16>,
      %c0_60 = arith.constant 0 : index
      %c0_61 = arith.constant 0 : index
      %c2 = arith.constant 2 : index
      %c0_62 = arith.constant 0 : index
      %38 = vector.load %arg8[%c0_60, %c0_61, %c2, %c0_62] : memref<2x18x18x4xbf16, #tpu.memory_space<vmem>>, vector<2x16x16x4xbf16>
      %39 = vector.shape_cast %38 : vector<2x16x16x4xbf16> to vector<512x4xbf16>
      %c0_63 = arith.constant 0 : index
      %c8 = arith.constant 8 : index
      %40 = vector.load %arg9[%c0_63, %c8] : memref<512x36xbf16, #tpu.memory_space<vmem>>, vector<512x4xbf16>
      tpu.vector_store %arg9[%c0_63, %c8], %39 {strides = array<i32>} : memref<512x36xbf16, #tpu.memory_space<vmem>>, vector<512x4xbf16>,
      %c0_64 = arith.constant 0 : index
      %c1_65 = arith.constant 1 : index
      %c0_66 = arith.constant 0 : index
      %c0_67 = arith.constant 0 : index
      %41 = vector.load %arg8[%c0_64, %c1_65, %c0_66, %c0_67] : memref<2x18x18x4xbf16, #tpu.memory_space<vmem>>, vector<2x16x16x4xbf16>
      %42 = vector.shape_cast %41 : vector<2x16x16x4xbf16> to vector<512x4xbf16>
      %c0_68 = arith.constant 0 : index
      %c12 = arith.constant 12 : index
      %43 = vector.load %arg9[%c0_68, %c12] : memref<512x36xbf16, #tpu.memory_space<vmem>>, vector<512x4xbf16>
      tpu.vector_store %arg9[%c0_68, %c12], %42 {strides = array<i32>} : memref<512x36xbf16, #tpu.memory_space<vmem>>, vector<512x4xbf16>,
      %c0_69 = arith.constant 0 : index
      %c1_70 = arith.constant 1 : index
      %c1_71 = arith.constant 1 : index
      %c0_72 = arith.constant 0 : index
      %44 = vector.load %arg8[%c0_69, %c1_70, %c1_71, %c0_72] : memref<2x18x18x4xbf16, #tpu.memory_space<vmem>>, vector<2x16x16x4xbf16>
      %45 = vector.shape_cast %44 : vector<2x16x16x4xbf16> to vector<512x4xbf16>
      %c0_73 = arith.constant 0 : index
      %c16 = arith.constant 16 : index
      %46 = vector.load %arg9[%c0_73, %c16] : memref<512x36xbf16, #tpu.memory_space<vmem>>, vector<512x4xbf16>
      tpu.vector_store %arg9[%c0_73, %c16], %45 {strides = array<i32>} : memref<512x36xbf16, #tpu.memory_space<vmem>>, vector<512x4xbf16>,
      %c0_74 = arith.constant 0 : index
      %c1_75 = arith.constant 1 : index
      %c2_76 = arith.constant 2 : index
      %c0_77 = arith.constant 0 : index
      %47 = vector.load %arg8[%c0_74, %c1_75, %c2_76, %c0_77] : memref<2x18x18x4xbf16, #tpu.memory_space<vmem>>, vector<2x16x16x4xbf16>
      %48 = vector.shape_cast %47 : vector<2x16x16x4xbf16> to vector<512x4xbf16>
      %c0_78 = arith.constant 0 : index
      %c20 = arith.constant 20 : index
      %49 = vector.load %arg9[%c0_78, %c20] : memref<512x36xbf16, #tpu.memory_space<vmem>>, vector<512x4xbf16>
      tpu.vector_store %arg9[%c0_78, %c20], %48 {strides = array<i32>} : memref<512x36xbf16, #tpu.memory_space<vmem>>, vector<512x4xbf16>,
      %c0_79 = arith.constant 0 : index
      %c2_80 = arith.constant 2 : index
      %c0_81 = arith.constant 0 : index
      %c0_82 = arith.constant 0 : index
      %50 = vector.load %arg8[%c0_79, %c2_80, %c0_81, %c0_82] : memref<2x18x18x4xbf16, #tpu.memory_space<vmem>>, vector<2x16x16x4xbf16>
      %51 = vector.shape_cast %50 : vector<2x16x16x4xbf16> to vector<512x4xbf16>
      %c0_83 = arith.constant 0 : index
      %c24 = arith.constant 24 : index
      %52 = vector.load %arg9[%c0_83, %c24] : memref<512x36xbf16, #tpu.memory_space<vmem>>, vector<512x4xbf16>
      tpu.vector_store %arg9[%c0_83, %c24], %51 {strides = array<i32>} : memref<512x36xbf16, #tpu.memory_space<vmem>>, vector<512x4xbf16>,
      %c0_84 = arith.constant 0 : index
      %c2_85 = arith.constant 2 : index
      %c1_86 = arith.constant 1 : index
      %c0_87 = arith.constant 0 : index
      %53 = vector.load %arg8[%c0_84, %c2_85, %c1_86, %c0_87] : memref<2x18x18x4xbf16, #tpu.memory_space<vmem>>, vector<2x16x16x4xbf16>
      %54 = vector.shape_cast %53 : vector<2x16x16x4xbf16> to vector<512x4xbf16>
      %c0_88 = arith.constant 0 : index
      %c28 = arith.constant 28 : index
      %55 = vector.load %arg9[%c0_88, %c28] : memref<512x36xbf16, #tpu.memory_space<vmem>>, vector<512x4xbf16>
      tpu.vector_store %arg9[%c0_88, %c28], %54 {strides = array<i32>} : memref<512x36xbf16, #tpu.memory_space<vmem>>, vector<512x4xbf16>,
      %c0_89 = arith.constant 0 : index
      %c2_90 = arith.constant 2 : index
      %c2_91 = arith.constant 2 : index
      %c0_92 = arith.constant 0 : index
      %56 = vector.load %arg8[%c0_89, %c2_90, %c2_91, %c0_92] : memref<2x18x18x4xbf16, #tpu.memory_space<vmem>>, vector<2x16x16x4xbf16>
      %57 = vector.shape_cast %56 : vector<2x16x16x4xbf16> to vector<512x4xbf16>
      %c0_93 = arith.constant 0 : index
      %c32 = arith.constant 32 : index
      %58 = vector.load %arg9[%c0_93, %c32] : memref<512x36xbf16, #tpu.memory_space<vmem>>, vector<512x4xbf16>
      tpu.vector_store %arg9[%c0_93, %c32], %57 {strides = array<i32>} : memref<512x36xbf16, #tpu.memory_space<vmem>>, vector<512x4xbf16>,
    } else {
    }
    %c0 = arith.constant 0 : index
    %c0_1 = arith.constant 0 : index
    %3 = vector.load %arg9[%c0, %c0_1] : memref<512x36xbf16, #tpu.memory_space<vmem>>, vector<512x36xbf16>
    %c0_2 = arith.constant 0 : index
    %c0_3 = arith.constant 0 : index
    %4 = vector.load %arg5[%c0_2, %c0_3] : memref<36x64xbf16, #tpu.memory_space<vmem>>, vector<36x64xbf16>
    %cst = arith.constant dense<0.000000e+00> : vector<512x64xf32>
    %5 = tpu.matmul %3, %4, %cst {dimension_numbers = #tpu.dot_dimension_numbers<[1], [0], [0], [1], [0, 0, 1, 1], [], []>} : vector<512x36xbf16>, vector<36x64xbf16>, vector<512x64xf32> -> vector<512x64xf32>
    %6 = vector.shape_cast %5 : vector<512x64xf32> to vector<2x16x16x64xf32>
    %7 = arith.truncf %6 : vector<2x16x16x64xf32> to vector<2x16x16x64xbf16>
    %c0_4 = arith.constant 0 : index
    %c0_5 = arith.constant 0 : index
    %c0_6 = arith.constant 0 : index
    %c0_7 = arith.constant 0 : index
    %8 = vector.load %arg6[%c0_4, %c0_5, %c0_6, %c0_7] : memref<2x16x16x64xbf16, #tpu.memory_space<vmem>>, vector<2x16x16x64xbf16>
    tpu.vector_store %arg6[%c0_4, %c0_5, %c0_6, %c0_7], %7 {strides = array<i32>} : memref<2x16x16x64xbf16, #tpu.memory_space<vmem>>, vector<2x16x16x64xbf16>,
    %cst_8 = arith.constant dense<0.000000e+00> : vector<64xf32>
    %9 = vector.multi_reduction <add>, %5, %cst_8 [0] : vector<512x64xf32> to vector<64xf32>
    %10 = vector.shape_cast %9 : vector<64xf32> to vector<1x64xf32>
    %11 = arith.mulf %5, %5 : vector<512x64xf32>
    %cst_9 = arith.constant dense<0.000000e+00> : vector<64xf32>
    %12 = vector.multi_reduction <add>, %11, %cst_9 [0] : vector<512x64xf32> to vector<64xf32>
    %13 = vector.shape_cast %12 : vector<64xf32> to vector<1x64xf32>
    %14 = tpu.concatenate %10, %13 in 0 : vector<1x64xf32>, vector<1x64xf32> -> vector<2x64xf32>
    %15 = vector.shape_cast %14 : vector<2x64xf32> to vector<1x1x2x64xf32>
    %c0_10 = arith.constant 0 : index
    %c0_11 = arith.constant 0 : index
    %c0_12 = arith.constant 0 : index
    %c0_13 = arith.constant 0 : index
    %16 = vector.load %arg7[%c0_10, %c0_11, %c0_12, %c0_13] : memref<1x1x2x64xf32, #tpu.memory_space<vmem>>, vector<1x1x2x64xf32>
    tpu.vector_store %arg7[%c0_10, %c0_11, %c0_12, %c0_13], %15 {strides = array<i32>} : memref<1x1x2x64xf32, #tpu.memory_space<vmem>>, vector<1x1x2x64xf32>,
    return
  }
  func.func @transform_0(%arg0: i32, %arg1: i32) -> (i32, i32, i32, i32) {
    %c0_i32 = arith.constant 0 : i32
    %c0_i32_0 = arith.constant 0 : i32
    %c0_i32_1 = arith.constant 0 : i32
    %c0_i32_2 = arith.constant 0 : i32
    return %c0_i32, %arg0, %c0_i32_0, %c0_i32_1 : i32, i32, i32, i32
  }
  func.func @transform_1(%arg0: i32, %arg1: i32) -> (i32, i32, i32, i32) {
    %c16_i32 = arith.constant 16 : i32
    %0 = arith.muli %arg0, %c16_i32 : i32
    %c1_i32 = arith.constant 1 : i32
    %1 = arith.subi %0, %c1_i32 : i32
    %c0_i32 = arith.constant 0 : i32
    %2 = arith.maxsi %1, %c0_i32 : i32
    %c0_i32_0 = arith.constant 0 : i32
    %c0_i32_1 = arith.constant 0 : i32
    %c0_i32_2 = arith.constant 0 : i32
    %c0_i32_3 = arith.constant 0 : i32
    return %c0_i32_0, %2, %c0_i32_1, %c0_i32_2 : i32, i32, i32, i32
  }
  func.func @transform_2(%arg0: i32, %arg1: i32) -> (i32, i32, i32, i32) {
    %c16_i32 = arith.constant 16 : i32
    %0 = arith.muli %arg0, %c16_i32 : i32
    %c16_i32_0 = arith.constant 16 : i32
    %1 = arith.addi %0, %c16_i32_0 : i32
    %c15_i32 = arith.constant 15 : i32
    %2 = arith.minsi %1, %c15_i32 : i32
    %c0_i32 = arith.constant 0 : i32
    %c0_i32_1 = arith.constant 0 : i32
    %c0_i32_2 = arith.constant 0 : i32
    %c0_i32_3 = arith.constant 0 : i32
    return %c0_i32, %2, %c0_i32_1, %c0_i32_2 : i32, i32, i32, i32
  }
  func.func @transform_3(%arg0: i32, %arg1: i32) -> (i32, i32) {
    %c0_i32 = arith.constant 0 : i32
    %c0_i32_0 = arith.constant 0 : i32
    return %c0_i32, %arg1 : i32, i32
  }
  func.func @transform_4(%arg0: i32, %arg1: i32) -> (i32, i32, i32, i32) {
    %c0_i32 = arith.constant 0 : i32
    %c0_i32_0 = arith.constant 0 : i32
    %c0_i32_1 = arith.constant 0 : i32
    return %c0_i32, %arg0, %c0_i32_0, %arg1 : i32, i32, i32, i32
  }
  func.func @transform_5(%arg0: i32, %arg1: i32) -> (i32, i32, i32, i32) {
    %c0_i32 = arith.constant 0 : i32
    %c0_i32_0 = arith.constant 0 : i32
    %c0_i32_1 = arith.constant 0 : i32
    return %arg0, %arg1, %c0_i32, %c0_i32_0 : i32, i32, i32, i32
  }
}

</mosaic_0001>

<bundles_post_ra>
// kernel: tpu_custom_call.1
= control target key start
LH: loop header
LB: loop body
LE: loop exit
PB: predicated region body
PF: predicated region fallthrough
CT: control target
= control target key end

     0   :  { %11 = vsyncpa [#allocation5], 0  ;;  %s12760_s0 = inlined_call_operand.hbm [shape: bf16[2,16,16,4], index: 0, kind: input, shape index: {}]   ;;  %s12761_s1 = inlined_call_operand.hbm [shape: bf16[2,16,16,4], index: 1, kind: input, shape index: {}]   ;;  %s12762_s2 = inlined_call_operand.hbm [shape: bf16[2,16,16,4], index: 2, kind: input, shape index: {}]   ;;  %s12763_s3 = inlined_call_operand.hbm [shape: bf16[36,64], index: 3, kind: input, shape index: {}]   ;;  %s12764_s4 = inlined_call_operand.hbm [shape: bf16[2,16,16,64], index: 4, kind: output, shape index: {0}]   ;;  %s12765_s5 = inlined_call_operand.hbm [shape: f32[1,1,2,64], index: 5, kind: output, shape index: {1}]  }
   0x1   :  { %12 = vsyncpa [#allocation8], 0 }
   0x2   :  { %13 = vsyncpa [#allocation11], 0 }
   0x3   :  { %14 = vsyncpa [#allocation6], 0 }
   0x4   :  { %15 = vsyncpa [#allocation14], 0  ;;  %s9655_s18 = smov [#allocation4]   ;;  %s9557_s22 = scalar_lea.hbm %s12760_s0, 4096 }
   0x5   :  { %s21_s19 = sshll.u32 %s9655_s18, 4  ;;  %p9558_p0 = scmp.ne.s32.totalorder %s12760_s0, %s9557_s22  ;;  %s22_s19 = int_to_ptr.vmem [resolvable:$true] %s21_s19 }
   0x6   :  { %p9561_p1 = scmp.lt.u32.totalorder %s9557_s22, %s12760_s0 }
   0x8   :  { %p9563_p2 = pnand %p9561_p1, %p9558_p0 }
   0xa   :  { %9566 = shalt.err (!%p9563_p2)
}
   0xb   :  { %s9567_s27 = scalar_lea.vmem %s22_s19, 4096  ;;  %p9572_p4 = scmp.lt.s32.totalorder %s22_s19, %s22_s19 }
   0xc   :  { %p9568_p3 = scmp.ne.s32.totalorder %s22_s19, %s9567_s27  ;;  %p9573_p5 = scmp.lt.s32.totalorder %s9567_s27, %s9567_s27 }
   0xe   :  { %p9574_p6 = por %p9573_p5, %p9572_p4 }
  0x10   :  { %p9575_p7 = pnand %p9574_p6, %p9568_p3 }
  0x12   :  { %9578 = shalt.err (!%p9575_p7)
}
  0x13   :  { %s9656_s28 = smov 64   ;;  %s9657_s29 = smov 4  }
  0x14   :  { %27 = dma.hbm_to_vmem [thread:$0]  %s12760_s0, 4096, %s22_s19, [#allocation5], %s9656_s28, %s9656_s28, %s9657_s29  }
  0x15   :  { %s44_s7 = sld [smem:[#allocation0]]   ;;  %s9658_s8 = smov [#allocation7]  }
  0x16   :  { %s52_s9 = sshll.u32 %s9658_s8, 4  ;;  %s9659_s10 = smov 2048   ;;  %s53_s9 = int_to_ptr.vmem [resolvable:$true] %s52_s9 }
  0x17   :  { %59 = sst [smem:[#allocation16]] %s9659_s10  ;;  %s9660_s11 = smov 128  }
  0x18   :  { %61 = sst [smem:[#allocation16 + $0x1]] %s9660_s11  ;;  %s9661_s12 = smov 2  }
  0x19   :  { %63 = sst [smem:[#allocation16 + $0x2]] %s9661_s12  ;;  %s9662_s14 = smov 64  }
  0x1a   :  { %65 = sst [smem:[#allocation16 + $0x3]] %s9662_s14  ;;  %s9663_s16 = smov 4  }
  0x1b   :  { %s8764_s13 = sshll.u32 %s44_s7, 26  ;;  %67 = sst [smem:[#allocation16 + $0x4]] %s9662_s14 }
  0x1c   :  { %s8765_s15 = sadd.s32 134217728, %s8764_s13  ;;  %69 = sst [smem:[#allocation16 + $0x5]] %s9663_s16 }
  0x1d   :  { %s9664_s17 = smov [#allocation8]   ;;  %s9665_s18 = smov [#allocation15]  }
  0x1e   :  { %71 = dma.general %s12761_s1, 256, %s53_s9, %s9664_s17, %s9665_s18, [#allocation16], %s8765_s15, 0  }
  0x1f   :  { %s83_s22 = scalar_lea.hbm %s12762_s2, 1920  ;;  %s88_s23 = sld [smem:[#allocation0]]  }
  0x20   :  { %s9666_s24 = smov [#allocation9]   ;;  %s9667_s26 = smov 2048  }
  0x21   :  { %s96_s25 = sshll.u32 %s9666_s24, 4  ;;  %103 = sst [smem:[#allocation18]] %s9667_s26  ;;  %s97_s25 = int_to_ptr.vmem [resolvable:$true] %s96_s25 }
  0x22   :  { %s9668_s27 = smov 128   ;;  %s9669_s30 = smov 2  }
  0x23   :  { %105 = sst [smem:[#allocation18 + $0x1]] %s9668_s27  ;;  %s9670_s7 = smov 64  }
  0x24   :  { %107 = sst [smem:[#allocation18 + $0x2]] %s9669_s30  ;;  %s9671_s1 = smov 4  }
  0x25   :  { %s8766_s6 = sshll.u32 %s88_s23, 26  ;;  %109 = sst [smem:[#allocation18 + $0x3]] %s9670_s7 }
  0x26   :  { %s8767_s8 = sadd.s32 134217728, %s8766_s6  ;;  %111 = sst [smem:[#allocation18 + $0x4]] %s9670_s7 }
  0x27   :  { %113 = sst [smem:[#allocation18 + $0x5]] %s9671_s1  ;;  %s9672_s9 = smov [#allocation8]  }
  0x28   :  { %s9673_s10 = smov [#allocation17]   ;;  %s9674_s2 = smov [#allocation10]  }
  0x29   :  { %115 = dma.general %s83_s22, 256, %s97_s25, %s9672_s9, %s9673_s10, [#allocation18], %s8767_s8, 0  }
  0x2a   :  { %s121_s11 = sshll.u32 %s9674_s2, 4  ;;  %s9579_s14 = scalar_lea.hbm %s12763_s3, 320  ;;  %s122_s11 = int_to_ptr.vmem [resolvable:$true] %s121_s11 }
  0x2b   :  { %p9580_p8 = scmp.ne.s32.totalorder %s12763_s3, %s9579_s14  ;;  %p9583_p9 = scmp.lt.u32.totalorder %s9579_s14, %s12763_s3 }
  0x2d   :  { %p9585_p10 = pnand %p9583_p9, %p9580_p8 }
  0x2f   :  { %9588 = shalt.err (!%p9585_p10)
}
  0x30   :  { %s9589_s0 = scalar_lea.vmem %s122_s11, 320  ;;  %p9594_p12 = scmp.lt.s32.totalorder %s122_s11, %s122_s11 }
  0x31   :  { %p9590_p11 = scmp.ne.s32.totalorder %s122_s11, %s9589_s0  ;;  %p9595_p13 = scmp.lt.s32.totalorder %s9589_s0, %s9589_s0 }
  0x33   :  { %p9596_p0 = por %p9595_p13, %p9594_p12 }
  0x35   :  { %p9597_p1 = pnand %p9596_p0, %p9590_p11 }
  0x37   :  { %9600 = shalt.err (!%p9597_p1)
}
  0x38   :  { %127 = dma.hbm_to_vmem [thread:$0]  %s12763_s3, 320, %s122_s11, [#allocation11], %s9656_s28, %s9656_s28, %s9657_s29  }
  0x39   :  { %9645 = dma.done.wait [#allocation5], 4096  }
  0x3a   :  { %9646 = vsyncadd [#allocation5], 4294963200 }
  0x3b   :  { %9647 = dma.done.wait [#allocation8], 512  }
  0x3c   :  { %9648 = vsyncadd [#allocation8], 4294966784 }
  0x3d   :  { %9649 = dma.done.wait [#allocation11], 320  }
  0x3e   :  { %9650 = vsyncadd [#allocation11], 4294966976  ;;  %vm153_vm0 = vcmask 24576   ;;  %vm154_vm1 = vsmask.f32 256  ;;  %v9675_v0 = vmov 0  }
  0x3f   :  { %vm438_vm2 = vsmask.f32 4368  ;;  %vm264_vm3 = vsmask.f32 7938  ;;  %v9751_v1 = vrot.slane %v9675_v0, 7  ;;  %v12783_v2 = vmov 0  ;;  %vm9757_vm5 = vmand %vm153_vm0, %vm154_vm1 }
  0x40   :  { %vm9753_vm4 = vmor %vm154_vm1, %vm438_vm2  ;;  %v12786_v3 = vmov 0  ;;  %v12790_v5 = vmov 0  ;;  %vm12780_vm7 = vcmask 27648   ;;  %v156_v7 = vld [vmem:[#allocation2] sm:$0x1]  ;;  %v12793_v33 = vmov 0 }
  0x41   :  { %12782 = vst [vmem:[#allocation24_spill] sm:$0xff] %v9751_v1  ;;  %v12784_v2 = vsel %vm9753_vm4, 4294967295, %v12783_v2  ;;  %v12787_v3 = vsel %vm9757_vm5, 4294967295, %v12786_v3  ;;  %v9762_v4 = vrot.slane %v9751_v1, 4  ;;  %vm9765_vm6 = vmand %vm153_vm0, %vm264_vm3  ;;  %v266_v8 = vld [vmem:[#allocation2 + $0x8] sm:$0x1] }
  0x42   :  { %12785 = vst [vmem:[#allocation25_spill] sm:$0xff] %v12784_v2  ;;  %12788 = vst [vmem:[#allocation26_spill] sm:$0xff] %v12787_v3  ;;  %v12791_v5 = vsel %vm9765_vm6, 4294967295, %v12790_v5  ;;  %v162_v9 = vld [vmem:[#allocation2 + $0x18] sm:$0x1]  ;;  %v157_v10 = vsel %vm9757_vm5, 0, %v156_v7 }
  0x43   :  { %12789 = vst [vmem:[#allocation27_spill] sm:$0xff] %v9762_v4  ;;  %12792 = vst [vmem:[#allocation28_spill] sm:$0xff] %v12791_v5  ;;  %v1339_v6 = vsel %vm9753_vm4, %v9762_v4, %v9751_v1  ;;  %v267_v11 = vsel %vm9765_vm6, 0, %v266_v8  ;;  %v163_v12 = vsel %vm9757_vm5, 0, %v162_v9  ;;  %v272_v13 = vld [vmem:[#allocation2 + $0x20] sm:$0x1] }
  0x44   :  { %1367 = vst.msk [vmem:[#allocation2 + $0x4] sm:$0xf] %vm12780_vm7, %v1339_v6  ;;  %1374 = vst.msk [vmem:[#allocation2 + $0xdc] sm:$0xf] %vm12780_vm7, %v1339_v6  ;;  %v273_v14 = vsel %vm9765_vm6, 0, %v272_v13  ;;  %vm3010_vm12 = vcmask 1042432  }
  0x45   :  { %1426 = vst.msk [vmem:[#allocation2 + $0xd0] sm:$0xf] %vm12780_vm7, %v1339_v6  ;;  %1433 = vst.msk [vmem:[#allocation2 + $0x1a8] sm:$0xf] %vm12780_vm7, %v1339_v6  ;;  %v376_v15 = vld [vmem:[#allocation4 + $0x8] sm:$0xf] }
  0x46   :  { %158 = vst [vmem:[#allocation2] sm:$0x1] %v157_v10  ;;  %268 = vst [vmem:[#allocation2 + $0x8] sm:$0x1] %v267_v11  ;;  %v377_v16 = vld [vmem:[#allocation4 + $0xc] sm:$0xf] }
  0x47   :  { %164 = vst [vmem:[#allocation2 + $0x18] sm:$0x1] %v163_v12  ;;  %274 = vst [vmem:[#allocation2 + $0x20] sm:$0x1] %v273_v14  ;;  %v458_v17 = vshrl.u32 %v376_v15, 16  ;;  %v461_v18 = vshll.u32 %v376_v15, 16 }
  0x48   :  { %v466_v19 = vshrl.u32 %v377_v16, 16  ;;  %v469_v20 = vshll.u32 %v377_v16, 16  ;;  %v159_v21 = vld [vmem:[#allocation2 + $0xc] sm:$0x1]  ;;  %v269_v23 = vld [vmem:[#allocation2 + $0x14] sm:$0x1]  ;;  %vm9791_vm8 = vmand %vm12780_vm7, %vm264_vm3 }
  0x49   :  { %v160_v22 = vsel %vm9757_vm5, 0, %v159_v21  ;;  %v374_v24 = vld [vmem:[#allocation4] sm:$0xf]  ;;  %v460_v25 = vrot.slane %v458_v17, 7  ;;  %v270_v27 = vsel %vm9765_vm6, 0, %v269_v23  ;;  %v12794_v33 = vsel %vm9791_vm8, 4294967295, %v12793_v33 }
  0x4a   :  { %v468_v26 = vrot.slane %v466_v19, 7  ;;  %161 = vst [vmem:[#allocation2 + $0xc] sm:$0x1] %v160_v22  ;;  %v375_v28 = vld [vmem:[#allocation4 + $0x4] sm:$0xf]  ;;  %v441_v29 = vshrl.u32 %v374_v24, 16 }
  0x4b   :  { %271 = vst [vmem:[#allocation2 + $0x14] sm:$0x1] %v270_v27  ;;  %v444_v30 = vshll.u32 %v374_v24, 16  ;;  %v449_v31 = vshrl.u32 %v375_v28, 16  ;;  %v452_v32 = vshll.u32 %v375_v28, 16  ;;  %12795 = vst [vmem:[#allocation29_spill] sm:$0xff] %v12794_v33  ;;  %v463_v35 = vor.u32 %v461_v18, %v460_v25 }
  0x4c   :  { %v1727_v34 = vld [vmem:[#allocation2 + $0x4] sm:$0xf]  ;;  %v464_v36 = vrot.slane %v460_v25, 4  ;;  %v471_v37 = vor.u32 %v469_v20, %v468_v26  ;;  %v473_v38 = vrot.slane %v468_v26, 4  ;;  %v443_v42 = vrot.slane %v441_v29, 7  ;;  %s9676_s3 = smov 8  }
  0x4d   :  { %v165_v39 = vld [vmem:[#allocation2 + $0x24] sm:$0x1]  ;;  %v1835_v40 = vshll.u32 %v1727_v34, 16  ;;  %v1839_v41 = vshrl.u32 %v1727_v34, 16  ;;  %v451_v43 = vrot.slane %v449_v31, 7  ;;  %vm3011_vm13 = vcmask 1046532  }
  0x4e   :  { %v275_v44 = vld [vmem:[#allocation2 + $0x2c] sm:$0x1]  ;;  %v1364_v45 = vld [vmem:[#allocation2] sm:$0xf]  ;;  %v1368_v46 = vld [vmem:[#allocation2 + $0x8] sm:$0x1]  ;;  %v472_v47 = vsel %vm9753_vm4, %v464_v36, %v471_v37  ;;  %v446_v57 = vor.u32 %v444_v30, %v443_v42 }
  0x4f   :  { %vm1822_vm9 = vsmask.f32 3328  ;;  %vm1823_vm10 = vsmask.f32 7440  ;;  %v1091_v48 = vld [vmem:[#allocation2 + $0x18] sm:$0xf]  ;;  %v1365_v49 = vsel %vm9791_vm8, %v9751_v1, %v1364_v45  ;;  %v1369_v50 = vsel %vm9757_vm5, %v9762_v4, %v1368_v46  ;;  %vm10368_vm14 = vmor %vm3010_vm12, %vm3011_vm13 }
  0x50   :  { %v9803_v51 = vrot.slane %v1835_v40, 5  ;;  %v1841_v52 = vrot.slane %v1839_v41, 4  ;;  %1094 = vst.msk [vmem:[#allocation2 + $0x1c] sm:$0xf] %vm12780_vm7, %v472_v47  ;;  %v1095_v53 = vld [vmem:[#allocation2 + $0x20] sm:$0x1]  ;;  %v1092_v55 = vsel %vm9791_vm8, %v463_v35, %v1091_v48  ;;  %v454_v62 = vor.u32 %v452_v32, %v451_v43  ;;  %vm9844_vm11 = vmor %vm1822_vm9, %vm1823_vm10 }
  0x51   :  { %v378_v54 = vld [vmem:[#allocation4 + $0x10] sm:$0xf]  ;;  %1366 = vst [vmem:[#allocation2] sm:$0xf] %v1365_v49  ;;  %1370 = vst [vmem:[#allocation2 + $0x8] sm:$0x1] %v1369_v50  ;;  %v1096_v56 = vsel %vm9757_vm5, %v473_v38, %v1095_v53 }
  0x52   :  { %v447_v58 = vrot.slane %v443_v42, 4  ;;  %v379_v59 = vld [vmem:[#allocation4 + $0x14] sm:$0xf]  ;;  %v168_v60 = vld [vmem:[#allocation2 + $0x30] sm:$0x1]  ;;  %v1842_v61 = vor.u32 %v1841_v52, %v9803_v51  ;;  %v456_v63 = vrot.slane %v451_v43, 4 }
  0x53   :  { %1093 = vst [vmem:[#allocation2 + $0x18] sm:$0xf] %v1092_v55  ;;  %1097 = vst [vmem:[#allocation2 + $0x20] sm:$0x1] %v1096_v56  ;;  %v1083_v0 = vld [vmem:[#allocation2 + $0xc] sm:$0xf] }
  0x54   :  { %v166_v6 = vsel %vm9757_vm5, 0, %v165_v39  ;;  %v278_v7 = vld [vmem:[#allocation2 + $0x38] sm:$0x1]  ;;  %v1084_v8 = vsel %vm9791_vm8, %v446_v57, %v1083_v0  ;;  %v1088_v9 = vld [vmem:[#allocation2 + $0x14] sm:$0x1]  ;;  %v276_v10 = vsel %vm9765_vm6, 0, %v275_v44  ;;  %v455_v13 = vsel %vm9753_vm4, %v447_v58, %v454_v62 }
  0x55   :  { %167 = vst [vmem:[#allocation2 + $0x24] sm:$0x1] %v166_v6  ;;  %v475_v11 = vshrl.u32 %v378_v54, 16  ;;  %v9817_v12 = vld [vmem:[#allocation4 + $0x18] sm:$0xf]  ;;  %v1089_v14 = vsel %vm9757_vm5, %v456_v63, %v1088_v9  ;;  %v478_v15 = vshll.u32 %v378_v54, 16 }
  0x56   :  { %1085 = vst [vmem:[#allocation2 + $0xc] sm:$0xf] %v1084_v8  ;;  %277 = vst [vmem:[#allocation2 + $0x2c] sm:$0x1] %v276_v10  ;;  %v483_v16 = vshrl.u32 %v379_v59, 16  ;;  %v486_v20 = vshll.u32 %v379_v59, 16 }
  0x57   :  { %v9823_v17 = vld [vmem:[#allocation4 + $0x1c] sm:$0xf]  ;;  %v171_v18 = vld [vmem:[#allocation2 + $0x3c] sm:$0x1]  ;;  %1087 = vst.msk [vmem:[#allocation2 + $0x10] sm:$0xf] %vm12780_vm7, %v455_v13 }
  0x58   :  { %1090 = vst [vmem:[#allocation2 + $0x14] sm:$0x1] %v1089_v14  ;;  %v477_v19 = vrot.slane %v475_v11, 7  ;;  %v169_v21 = vsel %vm9757_vm5, 0, %v168_v60  ;;  %v279_v22 = vsel %vm9765_vm6, 0, %v278_v7  ;;  %v9830_v23 = vrot.slane %v1842_v61, 4 }
  0x59   :  { %v9832_v24 = vrot.slane %v483_v16, 7  ;;  %170 = vst [vmem:[#allocation2 + $0x30] sm:$0x1] %v169_v21  ;;  %280 = vst [vmem:[#allocation2 + $0x38] sm:$0x1] %v279_v22  ;;  %v492_v25 = vshrl.u32 %v9817_v12, 16 }
  0x5a   :  { %v495_v26 = vshll.u32 %v9817_v12, 16  ;;  %v1733_v27 = vld [vmem:[#allocation2 + $0x1c] sm:$0xf]  ;;  %v481_v28 = vrot.slane %v477_v19, 4  ;;  %v500_v29 = vshrl.u32 %v9823_v17, 16  ;;  %v503_v30 = vshll.u32 %v9823_v17, 16 }
  0x5b   :  { %v172_v31 = vsel %vm9757_vm5, 0, %v171_v18  ;;  %v1726_v32 = vld [vmem:[#allocation2] sm:$0xf]  ;;  %v1728_v34 = vld [vmem:[#allocation2 + $0x8] sm:$0x1]  ;;  %v1883_v35 = vshll.u32 %v1733_v27, 16  ;;  %v480_v37 = vor.u32 %v478_v15, %v477_v19  ;;  %v488_v38 = vor.u32 %v486_v20, %v9832_v24 }
  0x5c   :  { %v1887_v36 = vshrl.u32 %v1733_v27, 16  ;;  %173 = vst [vmem:[#allocation2 + $0x3c] sm:$0x1] %v172_v31  ;;  %v1826_v39 = vshrl.u32 %v1726_v32, 16  ;;  %v1829_v40 = vshll.u32 %v1726_v32, 16  ;;  %v1845_v41 = vshll.u32 %v1728_v34, 16 }
  0x5d   :  { %v1732_v42 = vld [vmem:[#allocation2 + $0x18] sm:$0xf]  ;;  %v490_v43 = vrot.slane %v9832_v24, 4  ;;  %v1734_v45 = vld [vmem:[#allocation2 + $0x20] sm:$0x1]  ;;  %v1885_v48 = vrot.slane %v1883_v35, 5  ;;  %v489_v61 = vsel %vm9753_vm4, %v481_v28, %v488_v38 }
  0x5e   :  { %v1874_v46 = vshrl.u32 %v1732_v42, 16  ;;  %v1877_v47 = vshll.u32 %v1732_v42, 16  ;;  %v1889_v49 = vrot.slane %v1887_v36, 4  ;;  %v1828_v50 = vrot.slane %v1826_v39, 4  ;;  %v1729_v55 = vld [vmem:[#allocation2 + $0xc] sm:$0xf] }
  0x5f   :  { %v1831_v52 = vrot.slane %v1829_v40, 5  ;;  %v1847_v53 = vrot.slane %v1845_v41, 5  ;;  %v1893_v54 = vshll.u32 %v1734_v45, 16  ;;  %v1730_v59 = vld [vmem:[#allocation2 + $0x10] sm:$0xf]  ;;  %v1850_v6 = vshrl.u32 %v1729_v55, 16 }
  0x60   :  { %v1876_v56 = vrot.slane %v1874_v46, 4  ;;  %v1879_v57 = vrot.slane %v1877_v47, 5  ;;  %v1890_v58 = vor.u32 %v1889_v49, %v1885_v48  ;;  %v1731_v60 = vld [vmem:[#allocation2 + $0x14] sm:$0x1]  ;;  %1101 = vst.msk [vmem:[#allocation2 + $0x28] sm:$0xf] %vm12780_vm7, %v489_v61 }
  0x61   :  { %v1832_v62 = vor.u32 %v1831_v52, %v1828_v50  ;;  %v1848_v63 = vsel %vm9844_vm11, %v9830_v23, %v1847_v53  ;;  %v1895_v0 = vrot.slane %v1893_v54, 5  ;;  %v1853_v9 = vshll.u32 %v1729_v55, 16  ;;  %v1098_v11 = vld [vmem:[#allocation2 + $0x24] sm:$0xf]  ;;  %v1102_v18 = vld [vmem:[#allocation2 + $0x2c] sm:$0x1] }
  0x62   :  { %v1880_v7 = vor.u32 %v1879_v57, %v1876_v56  ;;  %v1891_v8 = vrot.slane %v1890_v58, 4  ;;  %v1859_v10 = vshll.u32 %v1730_v59, 16  ;;  %v1852_v14 = vrot.slane %v1850_v6, 4  ;;  %v281_v31 = vld [vmem:[#allocation2 + $0x44] sm:$0x1]  ;;  %s9677_s21 = smov 12  }
  0x63   :  { %v1833_v13 = vrot.slane %v1832_v62, 4  ;;  %v1863_v15 = vshrl.u32 %v1730_v59, 16  ;;  %v1869_v16 = vshll.u32 %v1731_v60, 16  ;;  %v1855_v21 = vrot.slane %v1853_v9, 5  ;;  %v382_v32 = vld [vmem:[#allocation4 + $0x20] sm:$0xf] }
  0x64   :  { %v1881_v19 = vrot.slane %v1880_v7, 4  ;;  %v1896_v20 = vsel %vm9844_vm11, %v1891_v8, %v1895_v0  ;;  %v1861_v22 = vrot.slane %v1859_v10, 5  ;;  %v1099_v28 = vsel %vm9791_vm8, %v480_v37, %v1098_v11  ;;  %v1105_v41 = vld [vmem:[#allocation2 + $0x30] sm:$0xf]  ;;  %v1109_v52 = vld [vmem:[#allocation2 + $0x38] sm:$0x1] }
  0x65   :  { %v1838_v23 = vsel %vm9844_vm11, %v1833_v13, %v9803_v51  ;;  %v1865_v24 = vrot.slane %v1863_v15, 4  ;;  %v1871_v27 = vrot.slane %v1869_v16, 5  ;;  %v1856_v36 = vor.u32 %v1855_v21, %v1852_v14  ;;  %1100 = vst [vmem:[#allocation2 + $0x24] sm:$0xf] %v1099_v28  ;;  %v383_v56 = vld [vmem:[#allocation4 + $0x24] sm:$0xf] }
  0x66   :  { %v8800_v34 = vcombine.low %v1838_v23, %v1848_v63  ;;  %v1886_v35 = vsel %vm9844_vm11, %v1881_v19, %v1885_v48  ;;  %v1103_v38 = vsel %vm9757_vm5, %v490_v43, %v1102_v18  ;;  %v494_v51 = vrot.slane %v492_v25, 7  ;;  %v174_v57 = vld [vmem:[#allocation2 + $0x48] sm:$0x1]  ;;  %v284_v63 = vld [vmem:[#allocation2 + $0x50] sm:$0x1]  ;;  %s9678_s22 = smov 16  }
  0x67   :  { %v8802_v39 = vcombine.low %v1886_v35, %v1896_v20  ;;  %v1866_v40 = vor.u32 %v1865_v24, %v1861_v22  ;;  %1104 = vst [vmem:[#allocation2 + $0x2c] sm:$0x1] %v1103_v38  ;;  %v502_v37 = vrot.slane %v500_v29, 7  ;;  %v1857_v42 = vrot.slane %v1856_v36, 4  ;;  %v1736_v45 = vld [vmem:[#allocation2 + $0x28] sm:$0xf] }
  0x68   :  { %2689 = vrot.lane.b32.xlu0 %v8800_v34, %s9657_s29  ;;  %v282_v46 = vsel %vm9765_vm6, 0, %v281_v31  ;;  %v509_v47 = vshrl.u32 %v382_v32, 16  ;;  %v512_v48 = vshll.u32 %v382_v32, 16  ;;  %v1907_v49 = vshll.u32 %v1736_v45, 16  ;;  %v384_v0 = vld [vmem:[#allocation4 + $0x28] sm:$0xf] }
  0x69   :  { %2693 = vrot.lane.b32.xlu1 %v8802_v39, %s9657_s29  ;;  %v1867_v43 = vrot.slane %v1866_v40, 4  ;;  %v1911_v50 = vshrl.u32 %v1736_v45, 16  ;;  %v497_v25 = vor.u32 %v495_v26, %v494_v51  ;;  %283 = vst [vmem:[#allocation2 + $0x44] sm:$0x1] %v282_v46  ;;  %v1862_v29 = vsel %vm9844_vm11, %v1857_v42, %v1861_v22  ;;  %v1112_v26 = vld [vmem:[#allocation2 + $0x3c] sm:$0xf] }
  0x6a   :  { %v498_v53 = vrot.slane %v494_v51, 4  ;;  %v505_v54 = vor.u32 %v503_v30, %v502_v37  ;;  %v507_v55 = vrot.slane %v502_v37, 4  ;;  %v9881_v59 = vrot.slane %v1907_v49, 5  ;;  %v385_v11 = vld [vmem:[#allocation4 + $0x2c] sm:$0xf]  ;;  %s9679_s23 = smov 20  }
  0x6b   :  { %v1872_v58 = vsel %vm9844_vm11, %v1867_v43, %v1871_v27  ;;  %v1913_v60 = vrot.slane %v1911_v50, 4  ;;  %v1106_v12 = vsel %vm9791_vm8, %v497_v25, %v1105_v41  ;;  %v511_v30 = vrot.slane %v509_v47, 7  ;;  %v177_v23 = vld [vmem:[#allocation2 + $0x54] sm:$0x1]  ;;  %s9680_s24 = smov 24   ;;  %s9681_s25 = smov 28  }
  0x6c   :  { %v8801_v61 = vcombine.low %v1862_v29, %v1872_v58  ;;  %v506_v62 = vsel %vm9753_vm4, %v498_v53, %v505_v54  ;;  %1107 = vst [vmem:[#allocation2 + $0x30] sm:$0xf] %v1106_v12  ;;  %v1110_v17 = vsel %vm9757_vm5, %v507_v55, %v1109_v52  ;;  %v1735_v6 = vld [vmem:[#allocation2 + $0x24] sm:$0xf]  ;;  %v517_v8 = vshrl.u32 %v383_v56, 16  ;;  %s9682_s26 = smov 32  }
  0x6d   :  { %v1914_v7 = vor.u32 %v1913_v60, %v9881_v59  ;;  %1108 = vst.msk [vmem:[#allocation2 + $0x34] sm:$0xf] %vm12780_vm7, %v506_v62  ;;  %1111 = vst [vmem:[#allocation2 + $0x38] sm:$0x1] %v1110_v17  ;;  %v520_v9 = vshll.u32 %v383_v56, 16  ;;  %v175_v10 = vsel %vm9757_vm5, 0, %v174_v57  ;;  %v514_v16 = vor.u32 %v512_v48, %v511_v30 }
  0x6e   :  { %2691 = vrot.lane.b32.xlu0 %v8801_v61, %s9657_s29  ;;  %v1737_v13 = vld [vmem:[#allocation2 + $0x2c] sm:$0x1]  ;;  %v1898_v14 = vshrl.u32 %v1735_v6, 16  ;;  %v1901_v15 = vshll.u32 %v1735_v6, 16  ;;  %v515_v18 = vrot.slane %v511_v30, 4  ;;  %v519_v21 = vrot.slane %v517_v8, 7 }
  0x6f   :  { %176 = vst [vmem:[#allocation2 + $0x48] sm:$0x1] %v175_v10  ;;  %v1915_v19 = vrot.slane %v1914_v7, 4  ;;  %v1917_v20 = vshll.u32 %v1737_v13, 16  ;;  %v285_v22 = vsel %vm9765_vm6, 0, %v284_v63  ;;  %v1113_v28 = vsel %vm9791_vm8, %v514_v16, %v1112_v26  ;;  %s9683_s27 = smov [#allocation12]  }
  0x70   :  { %v1900_v24 = vrot.slane %v1898_v14, 4  ;;  %v1903_v27 = vrot.slane %v1901_v15, 5  ;;  %v1116_v31 = vld [vmem:[#allocation2 + $0x44] sm:$0x1]  ;;  %286 = vst [vmem:[#allocation2 + $0x50] sm:$0x1] %v285_v22  ;;  %v522_v35 = vor.u32 %v520_v9, %v519_v21 }
  0x71   :  { %v526_v32 = vshrl.u32 %v384_v0, 16  ;;  %v1919_v34 = vrot.slane %v1917_v20, 5  ;;  %v524_v36 = vrot.slane %v519_v21, 4  ;;  %1114 = vst [vmem:[#allocation2 + $0x3c] sm:$0xf] %v1113_v28  ;;  %v529_v38 = vshll.u32 %v384_v0, 16 }
  0x72   :  { %v1904_v39 = vor.u32 %v1903_v27, %v1900_v24  ;;  %v534_v51 = vshrl.u32 %v385_v11, 16  ;;  %v523_v41 = vsel %vm9753_vm4, %v515_v18, %v522_v35  ;;  %v537_v45 = vshll.u32 %v385_v11, 16  ;;  %v287_v56 = vld [vmem:[#allocation2 + $0x5c] sm:$0x1]  ;;  %v9910_v26 = vld [vmem:[#allocation4 + $0x30] sm:$0xf] }
  0x73   :  { %v528_v40 = vrot.slane %v526_v32, 7  ;;  %v1738_v37 = vld [vmem:[#allocation2 + $0x30] sm:$0xf]  ;;  %v1117_v42 = vsel %vm9757_vm5, %v524_v36, %v1116_v31  ;;  %v178_v46 = vsel %vm9757_vm5, 0, %v177_v23  ;;  %v1920_v48 = vsel %vm9844_vm11, %v1915_v19, %v1919_v34  ;;  %1115 = vst.msk [vmem:[#allocation2 + $0x40] sm:$0xf] %vm12780_vm7, %v523_v41 }
  0x74   :  { %v1905_v47 = vrot.slane %v1904_v39, 4  ;;  %v1739_v43 = vld [vmem:[#allocation2 + $0x34] sm:$0xf]  ;;  %v1740_v49 = vld [vmem:[#allocation2 + $0x38] sm:$0x1]  ;;  %v1922_v50 = vshrl.u32 %v1738_v37, 16 }
  0x75   :  { %1118 = vst [vmem:[#allocation2 + $0x44] sm:$0x1] %v1117_v42  ;;  %v531_v25 = vor.u32 %v529_v38, %v528_v40  ;;  %179 = vst [vmem:[#allocation2 + $0x54] sm:$0x1] %v178_v46  ;;  %v1925_v52 = vshll.u32 %v1738_v37, 16  ;;  %v1931_v29 = vshll.u32 %v1739_v43, 16 }
  0x76   :  { %v1935_v53 = vshrl.u32 %v1739_v43, 16  ;;  %v1941_v54 = vshll.u32 %v1740_v49, 16  ;;  %v1119_v55 = vld [vmem:[#allocation2 + $0x48] sm:$0xf]  ;;  %v1910_v57 = vsel %vm9844_vm11, %v1905_v47, %v9881_v59  ;;  %v1924_v58 = vrot.slane %v1922_v50, 4  ;;  %s8732_s30 = sshll.u32 %s9683_s27, 4  ;;  %s8733_s30 = int_to_ptr.vmem [resolvable:$true] %s8732_s30 }
  0x77   :  { %v532_v60 = vrot.slane %v528_v40, 4  ;;  %v536_v12 = vrot.slane %v534_v51, 7  ;;  %v8803_v61 = vcombine.low %v1910_v57, %v1920_v48  ;;  %v1927_v62 = vrot.slane %v1925_v52, 5  ;;  %v1123_v63 = vld [vmem:[#allocation2 + $0x50] sm:$0x1]  ;;  %s9601_s6 = scalar_lea.vmem %s8733_s30, 4096  ;;  %p9606_p3 = scmp.lt.s32.totalorder %s8733_s30, %s8733_s30 }
  0x78   :  { %v1933_v17 = vrot.slane %v1931_v29, 5  ;;  %v1937_v30 = vrot.slane %v1935_v53, 4  ;;  %v1943_v0 = vrot.slane %v1941_v54, 5  ;;  %v1741_v6 = vld [vmem:[#allocation2 + $0x3c] sm:$0xf]  ;;  %v1120_v9 = vsel %vm9791_vm8, %v531_v25, %v1119_v55  ;;  %p9602_p2 = scmp.ne.s32.totalorder %s8733_s30, %s9601_s6  ;;  %p9607_p4 = scmp.lt.s32.totalorder %s9601_s6, %s9601_s6 }
  0x79   :  { %v539_v7 = vor.u32 %v537_v45, %v536_v12  ;;  %v541_v8 = vrot.slane %v536_v12, 4  ;;  %2695 = vrot.lane.b32.xlu1 %v8803_v61, %s9657_s29  ;;  %v1928_v59 = vor.u32 %v1927_v62, %v1924_v58  ;;  %v1946_v11 = vshrl.u32 %v1741_v6, 16  ;;  %1121 = vst [vmem:[#allocation2 + $0x48] sm:$0xf] %v1120_v9  ;;  %v387_v31 = vld [vmem:[#allocation4 + $0x34] sm:$0xf] }
  0x7a   :  { %v1938_v10 = vor.u32 %v1937_v30, %v1933_v17  ;;  %v1949_v13 = vshll.u32 %v1741_v6, 16  ;;  %v288_v16 = vsel %vm9765_vm6, 0, %v287_v56  ;;  %v543_v18 = vshrl.u32 %v9910_v26, 16  ;;  %v1742_v21 = vld [vmem:[#allocation2 + $0x40] sm:$0xf]  ;;  %p9608_p5 = por %p9607_p4, %p9606_p3 }
  0x7b   :  { %v540_v14 = vsel %vm9753_vm4, %v532_v60, %v539_v7  ;;  %v1124_v15 = vsel %vm9757_vm5, %v541_v8, %v1123_v63  ;;  %v1929_v19 = vrot.slane %v1928_v59, 4  ;;  %289 = vst [vmem:[#allocation2 + $0x5c] sm:$0x1] %v288_v16  ;;  %v1948_v23 = vrot.slane %v1946_v11, 4  ;;  %v180_v38 = vld [vmem:[#allocation2 + $0x60] sm:$0x1] }
  0x7c   :  { %v1939_v20 = vrot.slane %v1938_v10, 4  ;;  %v1743_v22 = vld [vmem:[#allocation2 + $0x44] sm:$0x1]  ;;  %1122 = vst.msk [vmem:[#allocation2 + $0x4c] sm:$0xf] %vm12780_vm7, %v540_v14  ;;  %v1951_v24 = vrot.slane %v1949_v13, 5  ;;  %p9609_p6 = pnand %p9608_p5, %p9602_p2 }
  0x7d   :  { %1125 = vst [vmem:[#allocation2 + $0x50] sm:$0x1] %v1124_v15  ;;  %v1955_v27 = vshll.u32 %v1742_v21, 16  ;;  %v1959_v28 = vshrl.u32 %v1742_v21, 16  ;;  %v1934_v32 = vsel %vm9844_vm11, %v1929_v19, %v1933_v17  ;;  %v1965_v35 = vshll.u32 %v1743_v22, 16 }
  0x7e   :  { %v1944_v34 = vsel %vm9844_vm11, %v1939_v20, %v1943_v0  ;;  %v545_v36 = vrot.slane %v543_v18, 7  ;;  %v1952_v40 = vor.u32 %v1951_v24, %v1948_v23  ;;  %v546_v42 = vshll.u32 %v9910_v26, 16  ;;  %v290_v46 = vld [vmem:[#allocation2 + $0x68] sm:$0x1]  ;;  %v1126_v54 = vld [vmem:[#allocation2 + $0x54] sm:$0xf] }
  0x7f   :  { %v8804_v39 = vcombine.low %v1934_v32, %v1944_v34  ;;  %v1957_v51 = vrot.slane %v1955_v27, 5  ;;  %v1961_v37 = vrot.slane %v1959_v28, 4  ;;  %v1967_v41 = vrot.slane %v1965_v35, 5  ;;  %v388_v8 = vld [vmem:[#allocation4 + $0x38] sm:$0xf] }
  0x80   :  { %v551_v45 = vshrl.u32 %v387_v31, 16  ;;  %v1953_v47 = vrot.slane %v1952_v40, 4  ;;  %v1744_v43 = vld [vmem:[#allocation2 + $0x48] sm:$0xf]  ;;  %v554_v49 = vshll.u32 %v387_v31, 16  ;;  %v181_v50 = vsel %vm9757_vm5, 0, %v180_v38 }
  0x81   :  { %2697 = vrot.lane.b32.xlu0 %v8804_v39, %s9657_s29  ;;  %v1962_v48 = vor.u32 %v1961_v37, %v1957_v51  ;;  %v1970_v25 = vshrl.u32 %v1744_v43, 16  ;;  %v1973_v52 = vshll.u32 %v1744_v43, 16  ;;  %v549_v29 = vrot.slane %v545_v36, 4  ;;  %182 = vst [vmem:[#allocation2 + $0x60] sm:$0x1] %v181_v50 }
  0x82   :  { %v553_v53 = vrot.slane %v551_v45, 7  ;;  %v1958_v55 = vsel %vm9844_vm11, %v1953_v47, %v1957_v51  ;;  %v548_v60 = vor.u32 %v546_v42, %v545_v36  ;;  %v291_v12 = vsel %vm9765_vm6, 0, %v290_v46  ;;  %v1130_v30 = vld [vmem:[#allocation2 + $0x5c] sm:$0x1]  ;;  %v389_v9 = vld [vmem:[#allocation4 + $0x3c] sm:$0xf] }
  0x83   :  { %v1963_v56 = vrot.slane %v1962_v48, 4  ;;  %v1745_v57 = vld [vmem:[#allocation2 + $0x4c] sm:$0xf]  ;;  %v1972_v26 = vrot.slane %v1970_v25, 4  ;;  %v1975_v61 = vrot.slane %v1973_v52, 5  ;;  %v560_v24 = vshrl.u32 %v388_v8, 16 }
  0x84   :  { %v1746_v58 = vld [vmem:[#allocation2 + $0x50] sm:$0x1]  ;;  %v1979_v62 = vshll.u32 %v1745_v57, 16  ;;  %v1983_v17 = vshrl.u32 %v1745_v57, 16  ;;  %292 = vst [vmem:[#allocation2 + $0x68] sm:$0x1] %v291_v12  ;;  %v556_v6 = vor.u32 %v554_v49, %v553_v53  ;;  %v1127_v19 = vsel %vm9791_vm8, %v548_v60, %v1126_v54 }
  0x85   :  { %v1968_v63 = vsel %vm9844_vm11, %v1963_v56, %v1967_v41  ;;  %v1989_v0 = vshll.u32 %v1746_v58, 16  ;;  %v558_v7 = vrot.slane %v553_v53, 4  ;;  %v1976_v10 = vor.u32 %v1975_v61, %v1972_v26  ;;  %v183_v14 = vld [vmem:[#allocation2 + $0x6c] sm:$0x1]  ;;  %v293_v15 = vld [vmem:[#allocation2 + $0x74] sm:$0x1] }
  0x86   :  { %v8805_v59 = vcombine.low %v1958_v55, %v1968_v63  ;;  %v1981_v11 = vrot.slane %v1979_v62, 5  ;;  %v1985_v13 = vrot.slane %v1983_v17, 4  ;;  %v557_v18 = vsel %vm9753_vm4, %v549_v29, %v556_v6  ;;  %v390_v21 = vld [vmem:[#allocation4 + $0x40] sm:$0xf]  ;;  %1128 = vst [vmem:[#allocation2 + $0x54] sm:$0xf] %v1127_v19 }
  0x87   :  { %v1991_v16 = vrot.slane %v1989_v0, 5  ;;  %v1131_v20 = vsel %vm9757_vm5, %v558_v7, %v1130_v30  ;;  %v1977_v22 = vrot.slane %v1976_v10, 4  ;;  %1129 = vst.msk [vmem:[#allocation2 + $0x58] sm:$0xf] %vm12780_vm7, %v557_v18  ;;  %v563_v27 = vshll.u32 %v388_v8, 16 }
  0x88   :  { %2699 = vrot.lane.b32.xlu1 %v8805_v59, %s9657_s29  ;;  %v1986_v23 = vor.u32 %v1985_v13, %v1981_v11  ;;  %1132 = vst [vmem:[#allocation2 + $0x5c] sm:$0x1] %v1131_v20  ;;  %v391_v28 = vld [vmem:[#allocation4 + $0x44] sm:$0xf]  ;;  %v568_v31 = vshrl.u32 %v389_v9, 16  ;;  %v571_v32 = vshll.u32 %v389_v9, 16 }
  0x89   :  { %v184_v34 = vsel %vm9757_vm5, 0, %v183_v14  ;;  %v294_v35 = vsel %vm9765_vm6, 0, %v293_v15  ;;  %v1982_v36 = vsel %vm9844_vm11, %v1977_v22, %v1981_v11  ;;  %v562_v39 = vrot.slane %v560_v24, 7  ;;  %v186_v51 = vld [vmem:[#allocation2 + $0x78] sm:$0x1] }
  0x8a   :  { %v1987_v38 = vrot.slane %v1986_v23, 4  ;;  %185 = vst [vmem:[#allocation2 + $0x6c] sm:$0x1] %v184_v34  ;;  %295 = vst [vmem:[#allocation2 + $0x74] sm:$0x1] %v294_v35  ;;  %v577_v40 = vshrl.u32 %v390_v21, 16 }
  0x8b   :  { %v570_v37 = vrot.slane %v568_v31, 7  ;;  %v1133_v41 = vld [vmem:[#allocation2 + $0x60] sm:$0xf]  ;;  %v580_v42 = vshll.u32 %v390_v21, 16  ;;  %v585_v45 = vshrl.u32 %v391_v28, 16  ;;  %v588_v46 = vshll.u32 %v391_v28, 16 }
  0x8c   :  { %v1992_v47 = vsel %vm9844_vm11, %v1987_v38, %v1991_v16  ;;  %v565_v48 = vor.u32 %v563_v27, %v562_v39  ;;  %v566_v43 = vrot.slane %v562_v39, 4  ;;  %v1137_v49 = vld [vmem:[#allocation2 + $0x68] sm:$0x1]  ;;  %v579_v50 = vrot.slane %v577_v40, 7  ;;  %v296_v57 = vld [vmem:[#allocation2 + $0x80] sm:$0x1] }
  0x8d   :  { %v8806_v25 = vcombine.low %v1982_v36, %v1992_v47  ;;  %v573_v52 = vor.u32 %v571_v32, %v570_v37  ;;  %v575_v29 = vrot.slane %v570_v37, 4  ;;  %v587_v53 = vrot.slane %v585_v45, 7  ;;  %v1747_v58 = vld [vmem:[#allocation2 + $0x54] sm:$0xf]  ;;  %v9962_v30 = vld [vmem:[#allocation4 + $0x48] sm:$0xf] }
  0x8e   :  { %v1134_v54 = vsel %vm9791_vm8, %v565_v48, %v1133_v41  ;;  %v583_v55 = vrot.slane %v579_v50, 4  ;;  %v187_v56 = vsel %vm9757_vm5, 0, %v186_v51  ;;  %v1748_v60 = vld [vmem:[#allocation2 + $0x58] sm:$0xf]  ;;  %v582_v62 = vor.u32 %v580_v42, %v579_v50  ;;  %v9965_v8 = vld [vmem:[#allocation4 + $0x4c] sm:$0xf] }
  0x8f   :  { %2701 = vrot.lane.b32.xlu0 %v8806_v25, %s9657_s29  ;;  %v1749_v12 = vld [vmem:[#allocation2 + $0x5c] sm:$0x1]  ;;  %v574_v26 = vsel %vm9753_vm4, %v566_v43, %v573_v52  ;;  %1135 = vst [vmem:[#allocation2 + $0x60] sm:$0xf] %v1134_v54  ;;  %v1138_v61 = vsel %vm9757_vm5, %v575_v29, %v1137_v49  ;;  %v590_v17 = vor.u32 %v588_v46, %v587_v53  ;;  %188 = vst [vmem:[#allocation2 + $0x78] sm:$0x1] %v187_v56 }
  0x90   :  { %v1994_v63 = vshrl.u32 %v1747_v58, 16  ;;  %v1997_v0 = vshll.u32 %v1747_v58, 16  ;;  %v2003_v6 = vshll.u32 %v1748_v60, 16  ;;  %v2007_v7 = vshrl.u32 %v1748_v60, 16  ;;  %1136 = vst.msk [vmem:[#allocation2 + $0x64] sm:$0xf] %vm12780_vm7, %v574_v26 }
  0x91   :  { %1139 = vst [vmem:[#allocation2 + $0x68] sm:$0x1] %v1138_v61  ;;  %v189_v9 = vld [vmem:[#allocation2 + $0x84] sm:$0x1]  ;;  %v2013_v59 = vshll.u32 %v1749_v12, 16  ;;  %v591_v10 = vsel %vm9753_vm4, %v583_v55, %v590_v17  ;;  %v592_v11 = vrot.slane %v587_v53, 4 }
  0x92   :  { %v1140_v13 = vld [vmem:[#allocation2 + $0x6c] sm:$0xf]  ;;  %v1144_v14 = vld [vmem:[#allocation2 + $0x74] sm:$0x1]  ;;  %v1996_v15 = vrot.slane %v1994_v63, 4  ;;  %v1999_v16 = vrot.slane %v1997_v0, 5 }
  0x93   :  { %v2005_v18 = vrot.slane %v2003_v6, 5  ;;  %v2009_v19 = vrot.slane %v2007_v7, 4  ;;  %1143 = vst.msk [vmem:[#allocation2 + $0x70] sm:$0xf] %vm12780_vm7, %v591_v10  ;;  %v299_v20 = vld [vmem:[#allocation2 + $0x8c] sm:$0x1]  ;;  %v1141_v22 = vsel %vm9791_vm8, %v582_v62, %v1140_v13  ;;  %v1145_v23 = vsel %vm9757_vm5, %v592_v11, %v1144_v14 }
  0x94   :  { %v2015_v21 = vrot.slane %v2013_v59, 5  ;;  %v297_v24 = vsel %vm9765_vm6, 0, %v296_v57  ;;  %v9976_v27 = vld [vmem:[#allocation4 + $0x50] sm:$0xf]  ;;  %v2000_v28 = vor.u32 %v1999_v16, %v1996_v15  ;;  %1142 = vst [vmem:[#allocation2 + $0x6c] sm:$0xf] %v1141_v22 }
  0x95   :  { %v2010_v31 = vor.u32 %v2009_v19, %v2005_v18  ;;  %1146 = vst [vmem:[#allocation2 + $0x74] sm:$0x1] %v1145_v23  ;;  %298 = vst [vmem:[#allocation2 + $0x80] sm:$0x1] %v297_v24  ;;  %v594_v32 = vshrl.u32 %v9962_v30, 16  ;;  %v597_v34 = vshll.u32 %v9962_v30, 16 }
  0x96   :  { %v602_v35 = vshrl.u32 %v9965_v8, 16  ;;  %v605_v36 = vshll.u32 %v9965_v8, 16  ;;  %v190_v38 = vsel %vm9757_vm5, 0, %v189_v9  ;;  %v300_v39 = vsel %vm9765_vm6, 0, %v299_v20  ;;  %v1750_v37 = vld [vmem:[#allocation2 + $0x60] sm:$0xf] }
  0x97   :  { %v2001_v40 = vrot.slane %v2000_v28, 4  ;;  %v2011_v51 = vrot.slane %v2010_v31, 4  ;;  %v596_v41 = vrot.slane %v594_v32, 7  ;;  %191 = vst [vmem:[#allocation2 + $0x84] sm:$0x1] %v190_v38  ;;  %v611_v42 = vshrl.u32 %v9976_v27, 16 }
  0x98   :  { %301 = vst [vmem:[#allocation2 + $0x8c] sm:$0x1] %v300_v39  ;;  %v1751_v45 = vld [vmem:[#allocation2 + $0x64] sm:$0xf]  ;;  %v1752_v46 = vld [vmem:[#allocation2 + $0x68] sm:$0x1] }
  0x99   :  { %v2018_v47 = vshrl.u32 %v1750_v37, 16  ;;  %v2021_v48 = vshll.u32 %v1750_v37, 16  ;;  %v2006_v43 = vsel %vm9844_vm11, %v2001_v40, %v2005_v18  ;;  %v2016_v49 = vsel %vm9844_vm11, %v2011_v51, %v2015_v21  ;;  %v1147_v12 = vld [vmem:[#allocation2 + $0x78] sm:$0xf]  ;;  %v395_v23 = vld [vmem:[#allocation4 + $0x54] sm:$0xf] }
  0x9a   :  { %v2027_v50 = vshll.u32 %v1751_v45, 16  ;;  %v2031_v25 = vshrl.u32 %v1751_v45, 16  ;;  %v8807_v52 = vcombine.low %v2006_v43, %v2016_v49  ;;  %v2037_v54 = vshll.u32 %v1752_v46, 16  ;;  %v1754_v55 = vld [vmem:[#allocation2 + $0x70] sm:$0xf] }
  0x9b   :  { %v2020_v29 = vrot.slane %v2018_v47, 4  ;;  %v2023_v53 = vrot.slane %v2021_v48, 5  ;;  %v2051_v58 = vshll.u32 %v1754_v55, 16  ;;  %v2055_v60 = vshrl.u32 %v1754_v55, 16  ;;  %v1753_v62 = vld [vmem:[#allocation2 + $0x6c] sm:$0xf] }
  0x9c   :  { %v2029_v56 = vrot.slane %v2027_v50, 5  ;;  %v2033_v57 = vrot.slane %v2031_v25, 4  ;;  %2703 = vrot.lane.b32.xlu1 %v8807_v52, %s9657_s29  ;;  %v2039_v61 = vrot.slane %v2037_v54, 5  ;;  %v1755_v17 = vld [vmem:[#allocation2 + $0x74] sm:$0x1]  ;;  %v599_v30 = vor.u32 %v597_v34, %v596_v41 }
  0x9d   :  { %v2024_v26 = vor.u32 %v2023_v53, %v2020_v29  ;;  %v600_v63 = vrot.slane %v596_v41, 4  ;;  %v2042_v6 = vshrl.u32 %v1753_v62, 16  ;;  %v2045_v7 = vshll.u32 %v1753_v62, 16  ;;  %v1151_v22 = vld [vmem:[#allocation2 + $0x80] sm:$0x1] }
  0x9e   :  { %v2034_v0 = vor.u32 %v2033_v57, %v2029_v56  ;;  %v2053_v8 = vrot.slane %v2051_v58, 5  ;;  %v2057_v59 = vrot.slane %v2055_v60, 4  ;;  %v2061_v10 = vshll.u32 %v1755_v17, 16  ;;  %v192_v34 = vld [vmem:[#allocation2 + $0x90] sm:$0x1] }
  0x9f   :  { %v2025_v9 = vrot.slane %v2024_v26, 4  ;;  %v604_v11 = vrot.slane %v602_v35, 7  ;;  %v2044_v14 = vrot.slane %v2042_v6, 4  ;;  %v2047_v15 = vrot.slane %v2045_v7, 5  ;;  %v302_v35 = vld [vmem:[#allocation2 + $0x98] sm:$0x1] }
  0xa0   :  { %v2035_v13 = vrot.slane %v2034_v0, 4  ;;  %v1148_v16 = vsel %vm9791_vm8, %v599_v30, %v1147_v12  ;;  %v2058_v19 = vor.u32 %v2057_v59, %v2053_v8  ;;  %v2063_v20 = vrot.slane %v2061_v10, 5  ;;  %v396_v37 = vld [vmem:[#allocation4 + $0x58] sm:$0xf]  ;;  %v195_v53 = vld [vmem:[#allocation2 + $0x9c] sm:$0x1] }
  0xa1   :  { %v2030_v18 = vsel %vm9844_vm11, %v2025_v9, %v2029_v56  ;;  %v607_v21 = vor.u32 %v605_v36, %v604_v11  ;;  %1149 = vst [vmem:[#allocation2 + $0x78] sm:$0xf] %v1148_v16  ;;  %v2048_v28 = vor.u32 %v2047_v15, %v2044_v14  ;;  %v609_v31 = vrot.slane %v604_v11, 4  ;;  %v397_v36 = vld [vmem:[#allocation4 + $0x5c] sm:$0xf] }
  0xa2   :  { %v2040_v24 = vsel %vm9844_vm11, %v2035_v13, %v2039_v61  ;;  %v613_v32 = vrot.slane %v611_v42, 7  ;;  %v2059_v39 = vrot.slane %v2058_v19, 4  ;;  %v614_v51 = vshll.u32 %v9976_v27, 16  ;;  %v1154_v42 = vld [vmem:[#allocation2 + $0x84] sm:$0xf] }
  0xa3   :  { %v8808_v38 = vcombine.low %v2030_v18, %v2040_v24  ;;  %v608_v40 = vsel %vm9753_vm4, %v600_v63, %v607_v21  ;;  %v2049_v41 = vrot.slane %v2048_v28, 4  ;;  %v1152_v45 = vsel %vm9757_vm5, %v609_v31, %v1151_v22  ;;  %v1158_v56 = vld [vmem:[#allocation2 + $0x8c] sm:$0x1]  ;;  %v305_v60 = vld [vmem:[#allocation2 + $0xa4] sm:$0x1] }
  0xa4   :  { %1150 = vst.msk [vmem:[#allocation2 + $0x7c] sm:$0xf] %vm12780_vm7, %v608_v40  ;;  %v617_v46 = vrot.slane %v613_v32, 4  ;;  %v619_v47 = vshrl.u32 %v395_v23, 16  ;;  %v2064_v48 = vsel %vm9844_vm11, %v2059_v39, %v2063_v20  ;;  %1153 = vst [vmem:[#allocation2 + $0x80] sm:$0x1] %v1152_v45  ;;  %v616_v43 = vor.u32 %v614_v51, %v613_v32 }
  0xa5   :  { %2705 = vrot.lane.b32.xlu0 %v8808_v38, %s9657_s29  ;;  %v622_v49 = vshll.u32 %v395_v23, 16  ;;  %v193_v27 = vsel %vm9757_vm5, 0, %v192_v34  ;;  %v2054_v50 = vsel %vm9844_vm11, %v2049_v41, %v2053_v8  ;;  %v303_v52 = vsel %vm9765_vm6, 0, %v302_v35  ;;  %v398_v7 = vld [vmem:[#allocation4 + $0x60] sm:$0xf] }
  0xa6   :  { %v621_v25 = vrot.slane %v619_v47, 7  ;;  %194 = vst [vmem:[#allocation2 + $0x90] sm:$0x1] %v193_v27  ;;  %v628_v29 = vshrl.u32 %v396_v37, 16  ;;  %v8809_v54 = vcombine.low %v2054_v50, %v2064_v48  ;;  %v1155_v55 = vsel %vm9791_vm8, %v616_v43, %v1154_v42  ;;  %304 = vst [vmem:[#allocation2 + $0x98] sm:$0x1] %v303_v52 }
  0xa7   :  { %v631_v57 = vshll.u32 %v396_v37, 16  ;;  %v636_v58 = vshrl.u32 %v397_v36, 16  ;;  %1156 = vst [vmem:[#allocation2 + $0x84] sm:$0xf] %v1155_v55  ;;  %v639_v17 = vshll.u32 %v397_v36, 16  ;;  %v196_v6 = vsel %vm9757_vm5, 0, %v195_v53 }
  0xa8   :  { %v1756_v12 = vld [vmem:[#allocation2 + $0x78] sm:$0xf]  ;;  %v624_v26 = vor.u32 %v622_v49, %v621_v25  ;;  %v626_v61 = vrot.slane %v621_v25, 4  ;;  %v630_v62 = vrot.slane %v628_v29, 7  ;;  %2707 = vrot.lane.b32.xlu1 %v8809_v54, %s9657_s29  ;;  %197 = vst [vmem:[#allocation2 + $0x9c] sm:$0x1] %v196_v6 }
  0xa9   :  { %v2066_v30 = vshrl.u32 %v1756_v12, 16  ;;  %v2069_v63 = vshll.u32 %v1756_v12, 16  ;;  %v638_v0 = vrot.slane %v636_v58, 7  ;;  %v399_v11 = vld [vmem:[#allocation4 + $0x64] sm:$0xf]  ;;  %v306_v22 = vsel %vm9765_vm6, 0, %v305_v60 }
  0xaa   :  { %v625_v8 = vsel %vm9753_vm4, %v617_v46, %v624_v26  ;;  %v1159_v9 = vsel %vm9757_vm5, %v626_v61, %v1158_v56  ;;  %v633_v59 = vor.u32 %v631_v57, %v630_v62  ;;  %v634_v10 = vrot.slane %v630_v62, 4  ;;  %307 = vst [vmem:[#allocation2 + $0xa4] sm:$0x1] %v306_v22  ;;  %v198_v49 = vld [vmem:[#allocation2 + $0xa8] sm:$0x1] }
  0xab   :  { %v1757_v13 = vld [vmem:[#allocation2 + $0x7c] sm:$0xf]  ;;  %v2068_v14 = vrot.slane %v2066_v30, 4  ;;  %v2071_v15 = vrot.slane %v2069_v63, 5  ;;  %1157 = vst.msk [vmem:[#allocation2 + $0x88] sm:$0xf] %vm12780_vm7, %v625_v8  ;;  %v641_v16 = vor.u32 %v639_v17, %v638_v0 }
  0xac   :  { %1160 = vst [vmem:[#allocation2 + $0x8c] sm:$0x1] %v1159_v9  ;;  %v643_v18 = vrot.slane %v638_v0, 4  ;;  %v1758_v19 = vld [vmem:[#allocation2 + $0x80] sm:$0x1]  ;;  %v2075_v20 = vshll.u32 %v1757_v13, 16 }
  0xad   :  { %v2079_v21 = vshrl.u32 %v1757_v13, 16  ;;  %v645_v23 = vshrl.u32 %v398_v7, 16  ;;  %v2072_v24 = vor.u32 %v2071_v15, %v2068_v14  ;;  %v2085_v28 = vshll.u32 %v1758_v19, 16  ;;  %v1161_v32 = vld [vmem:[#allocation2 + $0x90] sm:$0xf] }
  0xae   :  { %v642_v31 = vsel %vm9753_vm4, %v634_v10, %v641_v16  ;;  %v648_v34 = vshll.u32 %v398_v7, 16  ;;  %v2077_v35 = vrot.slane %v2075_v20, 5  ;;  %v1162_v39 = vsel %vm9791_vm8, %v633_v59, %v1161_v32  ;;  %v1165_v40 = vld [vmem:[#allocation2 + $0x98] sm:$0x1]  ;;  %v1759_v41 = vld [vmem:[#allocation2 + $0x84] sm:$0xf] }
  0xaf   :  { %v2081_v38 = vrot.slane %v2079_v21, 4  ;;  %1164 = vst.msk [vmem:[#allocation2 + $0x94] sm:$0xf] %vm12780_vm7, %v642_v31  ;;  %v647_v51 = vrot.slane %v645_v23, 7  ;;  %v2073_v37 = vrot.slane %v2072_v24, 4  ;;  %v2087_v36 = vrot.slane %v2085_v28, 5 }
  0xb0   :  { %1163 = vst [vmem:[#allocation2 + $0x90] sm:$0xf] %v1162_v39  ;;  %v1166_v45 = vsel %vm9757_vm5, %v643_v18, %v1165_v40  ;;  %v653_v46 = vshrl.u32 %v399_v11, 16  ;;  %v2090_v42 = vshrl.u32 %v1759_v41, 16  ;;  %v2093_v48 = vshll.u32 %v1759_v41, 16 }
  0xb1   :  { %v2082_v47 = vor.u32 %v2081_v38, %v2077_v35  ;;  %1167 = vst [vmem:[#allocation2 + $0x98] sm:$0x1] %v1166_v45  ;;  %v650_v43 = vor.u32 %v648_v34, %v647_v51  ;;  %v651_v27 = vrot.slane %v647_v51, 4  ;;  %v656_v25 = vshll.u32 %v399_v11, 16  ;;  %v1168_v52 = vld [vmem:[#allocation2 + $0x9c] sm:$0xf] }
  0xb2   :  { %v655_v50 = vrot.slane %v653_v46, 7  ;;  %v2078_v29 = vsel %vm9844_vm11, %v2073_v37, %v2077_v35  ;;  %v1760_v54 = vld [vmem:[#allocation2 + $0x88] sm:$0xf]  ;;  %v2092_v56 = vrot.slane %v2090_v42, 4  ;;  %v2095_v58 = vrot.slane %v2093_v48, 5 }
  0xb3   :  { %v2083_v53 = vrot.slane %v2082_v47, 4  ;;  %v1761_v55 = vld [vmem:[#allocation2 + $0x8c] sm:$0x1]  ;;  %v1169_v57 = vsel %vm9791_vm8, %v650_v43, %v1168_v52  ;;  %v2099_v60 = vshll.u32 %v1760_v54, 16  ;;  %v2103_v12 = vshrl.u32 %v1760_v54, 16 }
  0xb4   :  { %v2109_v26 = vshll.u32 %v1761_v55, 16  ;;  %1170 = vst [vmem:[#allocation2 + $0x9c] sm:$0xf] %v1169_v57  ;;  %v658_v62 = vor.u32 %v656_v25, %v655_v50  ;;  %v660_v17 = vrot.slane %v655_v50, 4  ;;  %v199_v30 = vsel %vm9757_vm5, 0, %v198_v49 }
  0xb5   :  { %v2088_v61 = vsel %vm9844_vm11, %v2083_v53, %v2087_v36  ;;  %v2096_v0 = vor.u32 %v2095_v58, %v2092_v56  ;;  %v2101_v6 = vrot.slane %v2099_v60, 5  ;;  %v2105_v7 = vrot.slane %v2103_v12, 4  ;;  %v1172_v9 = vld [vmem:[#allocation2 + $0xa4] sm:$0x1]  ;;  %200 = vst [vmem:[#allocation2 + $0xa8] sm:$0x1] %v199_v30 }
  0xb6   :  { %v8810_v63 = vcombine.low %v2078_v29, %v2088_v61  ;;  %v1763_v8 = vld [vmem:[#allocation2 + $0x94] sm:$0xf]  ;;  %v308_v59 = vld [vmem:[#allocation2 + $0xb0] sm:$0x1]  ;;  %v400_v10 = vld [vmem:[#allocation4 + $0x68] sm:$0xf]  ;;  %v659_v16 = vsel %vm9753_vm4, %v651_v27, %v658_v62  ;;  %v1173_v31 = vsel %vm9757_vm5, %v660_v17, %v1172_v9 }
  0xb7   :  { %v2111_v11 = vrot.slane %v2109_v26, 5  ;;  %v1762_v13 = vld [vmem:[#allocation2 + $0x90] sm:$0xf]  ;;  %v2123_v14 = vshll.u32 %v1763_v8, 16  ;;  %v2127_v15 = vshrl.u32 %v1763_v8, 16  ;;  %v2097_v18 = vrot.slane %v2096_v0, 4 }
  0xb8   :  { %2709 = vrot.lane.b32.xlu0 %v8810_v63, %s9657_s29  ;;  %v2106_v19 = vor.u32 %v2105_v7, %v2101_v6  ;;  %v1764_v20 = vld [vmem:[#allocation2 + $0x98] sm:$0x1]  ;;  %v2114_v21 = vshrl.u32 %v1762_v13, 16  ;;  %v2117_v22 = vshll.u32 %v1762_v13, 16  ;;  %1171 = vst.msk [vmem:[#allocation2 + $0xa0] sm:$0xf] %vm12780_vm7, %v659_v16 }
  0xb9   :  { %v2125_v23 = vrot.slane %v2123_v14, 5  ;;  %v2129_v24 = vrot.slane %v2127_v15, 4  ;;  %v2133_v28 = vshll.u32 %v1764_v20, 16  ;;  %v2102_v32 = vsel %vm9844_vm11, %v2097_v18, %v2101_v6  ;;  %1174 = vst [vmem:[#allocation2 + $0xa4] sm:$0x1] %v1173_v31 }
  0xba   :  { %v2107_v34 = vrot.slane %v2106_v19, 4  ;;  %v2116_v35 = vrot.slane %v2114_v21, 4  ;;  %v2119_v38 = vrot.slane %v2117_v22, 5  ;;  %v401_v39 = vld [vmem:[#allocation4 + $0x6c] sm:$0xf]  ;;  %v309_v36 = vsel %vm9765_vm6, 0, %v308_v59 }
  0xbb   :  { %v2130_v40 = vor.u32 %v2129_v24, %v2125_v23  ;;  %v2135_v51 = vrot.slane %v2133_v28, 5  ;;  %v1765_v37 = vld [vmem:[#allocation2 + $0x9c] sm:$0xf]  ;;  %v662_v41 = vshrl.u32 %v400_v10, 16  ;;  %310 = vst [vmem:[#allocation2 + $0xb0] sm:$0x1] %v309_v36 }
  0xbc   :  { %v2112_v45 = vsel %vm9844_vm11, %v2107_v34, %v2111_v11  ;;  %v2120_v46 = vor.u32 %v2119_v38, %v2116_v35  ;;  %v2138_v47 = vshrl.u32 %v1765_v37, 16  ;;  %v2141_v42 = vshll.u32 %v1765_v37, 16  ;;  %v201_v50 = vld [vmem:[#allocation2 + $0xb4] sm:$0x1]  ;;  %v1175_v54 = vld [vmem:[#allocation2 + $0xa8] sm:$0xf] }
  0xbd   :  { %v8811_v48 = vcombine.low %v2102_v32, %v2112_v45  ;;  %v2131_v43 = vrot.slane %v2130_v40, 4  ;;  %v664_v49 = vrot.slane %v662_v41, 7  ;;  %v665_v27 = vshll.u32 %v400_v10, 16  ;;  %v311_v12 = vld [vmem:[#allocation2 + $0xbc] sm:$0x1] }
  0xbe   :  { %v2121_v25 = vrot.slane %v2120_v46, 4  ;;  %v2140_v52 = vrot.slane %v2138_v47, 4  ;;  %v2143_v29 = vrot.slane %v2141_v42, 5  ;;  %v670_v53 = vshrl.u32 %v401_v39, 16  ;;  %v402_v30 = vld [vmem:[#allocation4 + $0x70] sm:$0xf] }
  0xbf   :  { %2711 = vrot.lane.b32.xlu1 %v8811_v48, %s9657_s29  ;;  %v2136_v55 = vsel %vm9844_vm11, %v2131_v43, %v2135_v51  ;;  %v1766_v56 = vld [vmem:[#allocation2 + $0xa0] sm:$0xf]  ;;  %v667_v57 = vor.u32 %v665_v27, %v664_v49  ;;  %v668_v58 = vrot.slane %v664_v49, 4  ;;  %v673_v60 = vshll.u32 %v401_v39, 16  ;;  %v403_v63 = vld [vmem:[#allocation4 + $0x74] sm:$0xf] }
  0xc0   :  { %v2126_v26 = vsel %vm9844_vm11, %v2121_v25, %v2125_v23  ;;  %v2144_v61 = vor.u32 %v2143_v29, %v2140_v52  ;;  %v2147_v62 = vshll.u32 %v1766_v56, 16  ;;  %v2151_v17 = vshrl.u32 %v1766_v56, 16  ;;  %v1767_v6 = vld [vmem:[#allocation2 + $0xa4] sm:$0x1]  ;;  %v210_v59 = vld [vmem:[#allocation2 + $0xd8] sm:$0x1] }
  0xc1   :  { %v8812_v0 = vcombine.low %v2126_v26, %v2136_v55  ;;  %v672_v7 = vrot.slane %v670_v53, 7  ;;  %v1176_v8 = vsel %vm9791_vm8, %v667_v57, %v1175_v54  ;;  %v202_v9 = vsel %vm9757_vm5, 0, %v201_v50  ;;  %v320_v15 = vld [vmem:[#allocation2 + $0xe0] sm:$0x1]  ;;  %v1775_v31 = vld [vmem:[#allocation2 + $0xdc] sm:$0xf] }
  0xc2   :  { %v2145_v10 = vrot.slane %v2144_v61, 4  ;;  %v2149_v11 = vrot.slane %v2147_v62, 5  ;;  %v2153_v13 = vrot.slane %v2151_v17, 4  ;;  %v2157_v14 = vshll.u32 %v1767_v6, 16  ;;  %1177 = vst [vmem:[#allocation2 + $0xa8] sm:$0xf] %v1176_v8 }
  0xc3   :  { %203 = vst [vmem:[#allocation2 + $0xb4] sm:$0x1] %v202_v9  ;;  %2713 = vrot.lane.b32.xlu0 %v8812_v0, %s9657_s29  ;;  %v675_v16 = vor.u32 %v673_v60, %v672_v7  ;;  %v677_v18 = vrot.slane %v672_v7, 4  ;;  %v1179_v19 = vld [vmem:[#allocation2 + $0xb0] sm:$0x1]  ;;  %v312_v20 = vsel %vm9765_vm6, 0, %v311_v12 }
  0xc4   :  { %v679_v21 = vshrl.u32 %v402_v30, 16  ;;  %v2150_v22 = vsel %vm9844_vm11, %v2145_v10, %v2149_v11  ;;  %v2154_v23 = vor.u32 %v2153_v13, %v2149_v11  ;;  %v2159_v24 = vrot.slane %v2157_v14, 5  ;;  %313 = vst [vmem:[#allocation2 + $0xbc] sm:$0x1] %v312_v20  ;;  %v213_v39 = vld [vmem:[#allocation2 + $0xe4] sm:$0x1] }
  0xc5   :  { %v682_v28 = vshll.u32 %v402_v30, 16  ;;  %v676_v32 = vsel %vm9753_vm4, %v668_v58, %v675_v16  ;;  %v1180_v34 = vsel %vm9757_vm5, %v677_v18, %v1179_v19  ;;  %v687_v38 = vshrl.u32 %v403_v63, 16  ;;  %v323_v40 = vld [vmem:[#allocation2 + $0xec] sm:$0x1]  ;;  %v406_v48 = vld [vmem:[#allocation4 + $0x80] sm:$0xf] }
  0xc6   :  { %v681_v35 = vrot.slane %v679_v21, 7  ;;  %v2155_v51 = vrot.slane %v2154_v23, 4  ;;  %1178 = vst.msk [vmem:[#allocation2 + $0xac] sm:$0xf] %vm12780_vm7, %v676_v32  ;;  %1181 = vst [vmem:[#allocation2 + $0xb0] sm:$0x1] %v1180_v34 }
  0xc7   :  { %v690_v37 = vshll.u32 %v403_v63, 16  ;;  %v211_v36 = vsel %vm9757_vm5, 0, %v210_v59  ;;  %v321_v41 = vsel %vm9765_vm6, 0, %v320_v15  ;;  %v689_v47 = vrot.slane %v687_v38, 7  ;;  %v10081_v25 = vld [vmem:[#allocation4 + $0x84] sm:$0xf] }
  0xc8   :  { %v684_v45 = vor.u32 %v682_v28, %v681_v35  ;;  %v685_v46 = vrot.slane %v681_v35, 4  ;;  %212 = vst [vmem:[#allocation2 + $0xd8] sm:$0x1] %v211_v36  ;;  %322 = vst [vmem:[#allocation2 + $0xe0] sm:$0x1] %v321_v41  ;;  %v2219_v42 = vshll.u32 %v1775_v31, 16  ;;  %v2160_v43 = vsel %vm9844_vm11, %v2155_v51, %v2159_v24 }
  0xc9   :  { %v2223_v49 = vshrl.u32 %v1775_v31, 16  ;;  %v214_v27 = vsel %vm9757_vm5, 0, %v213_v39  ;;  %v324_v50 = vsel %vm9765_vm6, 0, %v323_v40  ;;  %v8813_v52 = vcombine.low %v2150_v22, %v2160_v43  ;;  %v1768_v29 = vld [vmem:[#allocation2 + $0xa8] sm:$0xf] }
  0xca   :  { %v692_v53 = vor.u32 %v690_v37, %v689_v47  ;;  %v694_v54 = vrot.slane %v689_v47, 4  ;;  %v1182_v55 = vld [vmem:[#allocation2 + $0xb4] sm:$0xf]  ;;  %v10083_v56 = vrot.slane %v2219_v42, 5  ;;  %215 = vst [vmem:[#allocation2 + $0xe4] sm:$0x1] %v214_v27 }
  0xcb   :  { %325 = vst [vmem:[#allocation2 + $0xec] sm:$0x1] %v324_v50  ;;  %v2162_v57 = vshrl.u32 %v1768_v29, 16  ;;  %v2165_v58 = vshll.u32 %v1768_v29, 16  ;;  %v1183_v60 = vsel %vm9791_vm8, %v684_v45, %v1182_v55  ;;  %v2225_v12 = vrot.slane %v2223_v49, 4  ;;  %2715 = vrot.lane.b32.xlu1 %v8813_v52, %s9657_s29 }
  0xcc   :  { %v693_v26 = vsel %vm9753_vm4, %v685_v46, %v692_v53  ;;  %1184 = vst [vmem:[#allocation2 + $0xb4] sm:$0xf] %v1183_v60  ;;  %v1186_v61 = vld [vmem:[#allocation2 + $0xbc] sm:$0x1]  ;;  %v713_v62 = vshrl.u32 %v406_v48, 16  ;;  %v716_v17 = vshll.u32 %v406_v48, 16 }
  0xcd   :  { %v721_v30 = vshrl.u32 %v10081_v25, 16  ;;  %v2164_v63 = vrot.slane %v2162_v57, 4  ;;  %v2167_v0 = vrot.slane %v2165_v58, 5  ;;  %1185 = vst.msk [vmem:[#allocation2 + $0xb8] sm:$0xf] %vm12780_vm7, %v693_v26  ;;  %v1187_v6 = vsel %vm9757_vm5, %v694_v54, %v1186_v61 }
  0xce   :  { %v2226_v7 = vor.u32 %v2225_v12, %v10083_v56  ;;  %v1769_v8 = vld [vmem:[#allocation2 + $0xac] sm:$0xf]  ;;  %v1770_v9 = vld [vmem:[#allocation2 + $0xb0] sm:$0x1]  ;;  %1188 = vst [vmem:[#allocation2 + $0xbc] sm:$0x1] %v1187_v6 }
  0xcf   :  { %v715_v59 = vrot.slane %v713_v62, 7  ;;  %v723_v10 = vrot.slane %v721_v30, 7  ;;  %v216_v11 = vld [vmem:[#allocation2 + $0xf0] sm:$0x1]  ;;  %v2168_v13 = vor.u32 %v2167_v0, %v2164_v63  ;;  %v2171_v14 = vshll.u32 %v1769_v8, 16 }
  0xd0   :  { %v2175_v15 = vshrl.u32 %v1769_v8, 16  ;;  %v2181_v16 = vshll.u32 %v1770_v9, 16  ;;  %v1371_v18 = vld [vmem:[#allocation2 + $0xd8] sm:$0xf]  ;;  %v1375_v20 = vld [vmem:[#allocation2 + $0xe0] sm:$0x1] }
  0xd1   :  { %v1372_v19 = vsel %vm9791_vm8, %v9751_v1, %v1371_v18  ;;  %v10098_v21 = vrot.slane %v2226_v7, 4  ;;  %v718_v22 = vor.u32 %v716_v17, %v715_v59  ;;  %v719_v23 = vrot.slane %v715_v59, 4  ;;  %v326_v24 = vld [vmem:[#allocation2 + $0xf8] sm:$0x1]  ;;  %v1196_v35 = vld [vmem:[#allocation2 + $0xe4] sm:$0xf] }
  0xd2   :  { %v2169_v28 = vrot.slane %v2168_v13, 4  ;;  %v2173_v31 = vrot.slane %v2171_v14, 5  ;;  %v2177_v32 = vrot.slane %v2175_v15, 4  ;;  %v2183_v34 = vrot.slane %v2181_v16, 5  ;;  %1373 = vst [vmem:[#allocation2 + $0xd8] sm:$0xf] %v1372_v19 }
  0xd3   :  { %v1376_v38 = vsel %vm9757_vm5, %v9762_v4, %v1375_v20  ;;  %v724_v39 = vshll.u32 %v10081_v25, 16  ;;  %v728_v40 = vrot.slane %v723_v10, 4  ;;  %v1197_v51 = vsel %vm9791_vm8, %v718_v22, %v1196_v35  ;;  %v1200_v37 = vld [vmem:[#allocation2 + $0xec] sm:$0x1]  ;;  %v408_v36 = vld [vmem:[#allocation4 + $0x88] sm:$0xf] }
  0xd4   :  { %v2174_v41 = vsel %vm9844_vm11, %v2169_v28, %v2173_v31  ;;  %v2178_v45 = vor.u32 %v2177_v32, %v2173_v31  ;;  %v1771_v46 = vld [vmem:[#allocation2 + $0xb4] sm:$0xf]  ;;  %1377 = vst [vmem:[#allocation2 + $0xe0] sm:$0x1] %v1376_v38  ;;  %1198 = vst [vmem:[#allocation2 + $0xe4] sm:$0xf] %v1197_v51 }
  0xd5   :  { %v217_v47 = vsel %vm9757_vm5, 0, %v216_v11  ;;  %v327_v42 = vsel %vm9765_vm6, 0, %v326_v24  ;;  %v1772_v48 = vld [vmem:[#allocation2 + $0xb8] sm:$0xf]  ;;  %v2186_v43 = vshrl.u32 %v1771_v46, 16  ;;  %v2189_v49 = vshll.u32 %v1771_v46, 16 }
  0xd6   :  { %v726_v27 = vor.u32 %v724_v39, %v723_v10  ;;  %v1201_v50 = vsel %vm9757_vm5, %v728_v40, %v1200_v37  ;;  %218 = vst [vmem:[#allocation2 + $0xf0] sm:$0x1] %v217_v47  ;;  %328 = vst [vmem:[#allocation2 + $0xf8] sm:$0x1] %v327_v42  ;;  %v2179_v25 = vrot.slane %v2178_v45, 4  ;;  %v2195_v29 = vshll.u32 %v1772_v48, 16 }
  0xd7   :  { %v1773_v52 = vld [vmem:[#allocation2 + $0xbc] sm:$0x1]  ;;  %v2199_v53 = vshrl.u32 %v1772_v48, 16  ;;  %1202 = vst [vmem:[#allocation2 + $0xec] sm:$0x1] %v1201_v50  ;;  %v730_v54 = vshrl.u32 %v408_v36, 16 }
  0xd8   :  { %v2188_v55 = vrot.slane %v2186_v43, 4  ;;  %v2191_v57 = vrot.slane %v2189_v49, 5  ;;  %v2205_v58 = vshll.u32 %v1773_v52, 16  ;;  %v727_v60 = vsel %vm9753_vm4, %v719_v23, %v726_v27  ;;  %v409_v62 = vld [vmem:[#allocation4 + $0x8c] sm:$0xf] }
  0xd9   :  { %v2184_v12 = vsel %vm9844_vm11, %v2179_v25, %v2183_v34  ;;  %v2197_v26 = vrot.slane %v2195_v29, 5  ;;  %v2201_v61 = vrot.slane %v2199_v53, 4  ;;  %1199 = vst.msk [vmem:[#allocation2 + $0xe8] sm:$0xf] %vm12780_vm7, %v727_v60  ;;  %v732_v17 = vrot.slane %v730_v54, 7  ;;  %v10634_v4 = vld [vmem:[#allocation2 + $0xd8] sm:$0xff]  }
  0xda   :  { %v8814_v30 = vcombine.low %v2174_v41, %v2184_v12  ;;  %v2192_v63 = vor.u32 %v2191_v57, %v2188_v55  ;;  %v2207_v0 = vrot.slane %v2205_v58, 5  ;;  %v1774_v6 = vld [vmem:[#allocation2 + $0xd8] sm:$0xf]  ;;  %v733_v7 = vshll.u32 %v408_v36, 16  ;;  %v219_v46 = vld [vmem:[#allocation2 + $0xfc] sm:$0x1] }
  0xdb   :  { %v2202_v8 = vor.u32 %v2201_v61, %v2197_v26  ;;  %v2210_v9 = vshrl.u32 %v1774_v6, 16  ;;  %v2213_v59 = vshll.u32 %v1774_v6, 16  ;;  %v736_v10 = vrot.slane %v732_v17, 4  ;;  %v1776_v13 = vld [vmem:[#allocation2 + $0xe0] sm:$0x1] }
  0xdc   :  { %2717 = vrot.lane.b32.xlu0 %v8814_v30, %s9657_s29  ;;  %v2193_v11 = vrot.slane %v2192_v63, 4  ;;  %v1777_v14 = vld [vmem:[#allocation2 + $0xe4] sm:$0xf]  ;;  %v735_v15 = vor.u32 %v733_v7, %v732_v17  ;;  %v738_v16 = vshrl.u32 %v409_v62, 16  ;;  %v2229_v22 = vshll.u32 %v1776_v13, 16 }
  0xdd   :  { %v2203_v18 = vrot.slane %v2202_v8, 4  ;;  %v2212_v19 = vrot.slane %v2210_v9, 4  ;;  %v2215_v20 = vrot.slane %v2213_v59, 5  ;;  %v2234_v28 = vshrl.u32 %v1777_v14, 16  ;;  %v1203_v40 = vld [vmem:[#allocation2 + $0xf0] sm:$0xf] }
  0xde   :  { %v2198_v23 = vsel %vm9844_vm11, %v2193_v11, %v2197_v26  ;;  %v1779_v24 = vld [vmem:[#allocation2 + $0xec] sm:$0x1]  ;;  %v2237_v31 = vshll.u32 %v1777_v14, 16  ;;  %v740_v32 = vrot.slane %v738_v16, 7  ;;  %v2231_v38 = vrot.slane %v2229_v22, 5 }
  0xdf   :  { %v2208_v34 = vsel %vm9844_vm11, %v2203_v18, %v2207_v0  ;;  %v2216_v35 = vor.u32 %v2215_v20, %v2212_v19  ;;  %v2253_v39 = vshll.u32 %v1779_v24, 16  ;;  %v2236_v36 = vrot.slane %v2234_v28, 4  ;;  %v1207_v49 = vld [vmem:[#allocation2 + $0xf8] sm:$0x1]  ;;  %v329_v29 = vld [vmem:[#allocation2 + $0x104] sm:$0x1] }
  0xe0   :  { %v8815_v51 = vcombine.low %v2198_v23, %v2208_v34  ;;  %v1778_v37 = vld [vmem:[#allocation2 + $0xe8] sm:$0xf]  ;;  %v2239_v41 = vrot.slane %v2237_v31, 5  ;;  %v741_v45 = vshll.u32 %v409_v62, 16  ;;  %v2232_v42 = vsel %vm9844_vm11, %v10098_v21, %v2231_v38  ;;  %v410_v53 = vld [vmem:[#allocation4 + $0x90] sm:$0xf] }
  0xe1   :  { %v2217_v47 = vrot.slane %v2216_v35, 4  ;;  %v2243_v48 = vshll.u32 %v1778_v37, 16  ;;  %v2247_v43 = vshrl.u32 %v1778_v37, 16  ;;  %v2255_v50 = vrot.slane %v2253_v39, 5  ;;  %v411_v58 = vld [vmem:[#allocation4 + $0x94] sm:$0xf] }
  0xe2   :  { %2719 = vrot.lane.b32.xlu1 %v8815_v51, %s9657_s29  ;;  %v2240_v27 = vor.u32 %v2239_v41, %v2236_v36  ;;  %v743_v25 = vor.u32 %v741_v45, %v740_v32  ;;  %v745_v52 = vrot.slane %v740_v32, 4  ;;  %v1204_v21 = vsel %vm9791_vm8, %v735_v15, %v1203_v40  ;;  %v222_v60 = vld [vmem:[#allocation2 + $0x108] sm:$0x1]  ;;  %v332_v17 = vld [vmem:[#allocation2 + $0x110] sm:$0x1] }
  0xe3   :  { %v2222_v54 = vsel %vm9844_vm11, %v2217_v47, %v10083_v56  ;;  %v2245_v55 = vrot.slane %v2243_v48, 5  ;;  %v2249_v57 = vrot.slane %v2247_v43, 4  ;;  %1205 = vst [vmem:[#allocation2 + $0xf0] sm:$0xf] %v1204_v21  ;;  %v412_v30 = vld [vmem:[#allocation4 + $0x98] sm:$0xf] }
  0xe4   :  { %v8816_v12 = vcombine.low %v2222_v54, %v2232_v42  ;;  %v2241_v26 = vrot.slane %v2240_v27, 4  ;;  %v744_v61 = vsel %vm9753_vm4, %v736_v10, %v743_v25  ;;  %v1208_v62 = vsel %vm9757_vm5, %v745_v52, %v1207_v49  ;;  %v413_v7 = vld [vmem:[#allocation4 + $0x9c] sm:$0xf]  ;;  %v225_v11 = vld [vmem:[#allocation2 + $0x114] sm:$0x1]  ;;  %v10636_v1 = vld [vmem:[#allocation2 + $0xe4] sm:$0xff]  }
  0xe5   :  { %v2250_v63 = vor.u32 %v2249_v57, %v2245_v55  ;;  %1206 = vst.msk [vmem:[#allocation2 + $0xf4] sm:$0xf] %vm12780_vm7, %v744_v61  ;;  %1209 = vst [vmem:[#allocation2 + $0xf8] sm:$0x1] %v1208_v62  ;;  %v220_v56 = vsel %vm9757_vm5, 0, %v219_v46  ;;  %v330_v0 = vsel %vm9765_vm6, 0, %v329_v29 }
  0xe6   :  { %v747_v6 = vshrl.u32 %v410_v53, 16  ;;  %2721 = vrot.lane.b32.xlu0 %v8816_v12, %s9657_s29  ;;  %v2246_v8 = vsel %vm9844_vm11, %v2241_v26, %v2245_v55  ;;  %221 = vst [vmem:[#allocation2 + $0xfc] sm:$0x1] %v220_v56  ;;  %331 = vst [vmem:[#allocation2 + $0x104] sm:$0x1] %v330_v0  ;;  %v750_v9 = vshll.u32 %v410_v53, 16 }
  0xe7   :  { %v755_v59 = vshrl.u32 %v411_v58, 16  ;;  %v758_v10 = vshll.u32 %v411_v58, 16  ;;  %v2251_v13 = vrot.slane %v2250_v63, 4  ;;  %v223_v15 = vsel %vm9757_vm5, 0, %v222_v60  ;;  %v335_v18 = vld [vmem:[#allocation2 + $0x11c] sm:$0x1] }
  0xe8   :  { %v749_v14 = vrot.slane %v747_v6, 7  ;;  %v333_v16 = vsel %vm9765_vm6, 0, %v332_v17  ;;  %224 = vst [vmem:[#allocation2 + $0x108] sm:$0x1] %v223_v15  ;;  %v764_v20 = vshrl.u32 %v412_v30, 16  ;;  %v767_v22 = vshll.u32 %v412_v30, 16 }
  0xe9   :  { %v757_v19 = vrot.slane %v755_v59, 7  ;;  %334 = vst [vmem:[#allocation2 + $0x110] sm:$0x1] %v333_v16  ;;  %v772_v23 = vshrl.u32 %v413_v7, 16  ;;  %v10149_v24 = vld [vmem:[#allocation4 + $0xa0] sm:$0xf]  ;;  %v2256_v28 = vsel %vm9844_vm11, %v2251_v13, %v2255_v50 }
  0xea   :  { %v752_v31 = vor.u32 %v750_v9, %v749_v14  ;;  %v753_v32 = vrot.slane %v749_v14, 4  ;;  %v775_v34 = vshll.u32 %v413_v7, 16  ;;  %v8817_v35 = vcombine.low %v2246_v8, %v2256_v28  ;;  %v1780_v51 = vld [vmem:[#allocation2 + $0xf0] sm:$0xf]  ;;  %v415_v27 = vld [vmem:[#allocation4 + $0xa4] sm:$0xf] }
  0xeb   :  { %v760_v38 = vor.u32 %v758_v10, %v757_v19  ;;  %v762_v39 = vrot.slane %v757_v19, 4  ;;  %v766_v40 = vrot.slane %v764_v20, 7  ;;  %v774_v37 = vrot.slane %v772_v23, 7  ;;  %v228_v60 = vld [vmem:[#allocation2 + $0x120] sm:$0x1] }
  0xec   :  { %v226_v36 = vsel %vm9757_vm5, 0, %v225_v11  ;;  %v336_v41 = vsel %vm9765_vm6, 0, %v335_v18  ;;  %v781_v45 = vshrl.u32 %v10149_v24, 16  ;;  %2723 = vrot.lane.b32.xlu1 %v8817_v35, %s9657_s29  ;;  %v1781_v46 = vld [vmem:[#allocation2 + $0xf4] sm:$0xf]  ;;  %v2258_v42 = vshrl.u32 %v1780_v51, 16 }
  0xed   :  { %v1782_v47 = vld [vmem:[#allocation2 + $0xf8] sm:$0x1]  ;;  %v2261_v48 = vshll.u32 %v1780_v51, 16  ;;  %v761_v43 = vsel %vm9753_vm4, %v753_v32, %v760_v38  ;;  %v769_v49 = vor.u32 %v767_v22, %v766_v40  ;;  %227 = vst [vmem:[#allocation2 + $0x114] sm:$0x1] %v226_v36  ;;  %v2267_v50 = vshll.u32 %v1781_v46, 16 }
  0xee   :  { %337 = vst [vmem:[#allocation2 + $0x11c] sm:$0x1] %v336_v41  ;;  %v2271_v25 = vshrl.u32 %v1781_v46, 16  ;;  %v2277_v52 = vshll.u32 %v1782_v47, 16  ;;  %v1210_v29 = vld [vmem:[#allocation2 + $0xfc] sm:$0xf]  ;;  %v777_v58 = vor.u32 %v775_v34, %v774_v37 }
  0xef   :  { %1213 = vst.msk [vmem:[#allocation2 + $0x100] sm:$0xf] %vm12780_vm7, %v761_v43  ;;  %v770_v53 = vrot.slane %v766_v40, 4  ;;  %v2260_v54 = vrot.slane %v2258_v42, 4  ;;  %v2263_v55 = vrot.slane %v2261_v48, 5  ;;  %v1211_v57 = vsel %vm9791_vm8, %v752_v31, %v1210_v29  ;;  %v10638_v33 = vld [vmem:[#allocation2 + $0xf0] sm:$0xff]  }
  0xf0   :  { %v1214_v21 = vld [vmem:[#allocation2 + $0x104] sm:$0x1]  ;;  %v2269_v12 = vrot.slane %v2267_v50, 5  ;;  %v2273_v26 = vrot.slane %v2271_v25, 4  ;;  %v2279_v61 = vrot.slane %v2277_v52, 5  ;;  %v779_v56 = vrot.slane %v774_v37, 4 }
  0xf1   :  { %1212 = vst [vmem:[#allocation2 + $0xfc] sm:$0xf] %v1211_v57  ;;  %v1215_v62 = vsel %vm9757_vm5, %v762_v39, %v1214_v21  ;;  %v1217_v17 = vld [vmem:[#allocation2 + $0x108] sm:$0xf]  ;;  %v2264_v30 = vor.u32 %v2263_v55, %v2260_v54  ;;  %v778_v63 = vsel %vm9753_vm4, %v770_v53, %v777_v58  ;;  %v1221_v6 = vld [vmem:[#allocation2 + $0x110] sm:$0x1] }
  0xf2   :  { %1216 = vst [vmem:[#allocation2 + $0x104] sm:$0x1] %v1215_v62  ;;  %v1218_v0 = vsel %vm9791_vm8, %v769_v49, %v1217_v17  ;;  %v338_v7 = vld [vmem:[#allocation2 + $0x128] sm:$0x1]  ;;  %v2274_v8 = vor.u32 %v2273_v26, %v2269_v12  ;;  %1220 = vst.msk [vmem:[#allocation2 + $0x10c] sm:$0xf] %vm12780_vm7, %v778_v63  ;;  %v1222_v14 = vsel %vm9757_vm5, %v779_v56, %v1221_v6 }
  0xf3   :  { %1219 = vst [vmem:[#allocation2 + $0x108] sm:$0xf] %v1218_v0  ;;  %v783_v9 = vrot.slane %v781_v45, 7  ;;  %v784_v59 = vshll.u32 %v10149_v24, 16  ;;  %v789_v10 = vshrl.u32 %v415_v27, 16  ;;  %v2265_v13 = vrot.slane %v2264_v30, 4 }
  0xf4   :  { %v416_v11 = vld [vmem:[#allocation4 + $0xa8] sm:$0xf]  ;;  %v792_v15 = vshll.u32 %v415_v27, 16  ;;  %v229_v16 = vsel %vm9757_vm5, 0, %v228_v60  ;;  %v2275_v18 = vrot.slane %v2274_v8, 4  ;;  %v339_v31 = vsel %vm9765_vm6, 0, %v338_v7 }
  0xf5   :  { %1223 = vst [vmem:[#allocation2 + $0x110] sm:$0x1] %v1222_v14  ;;  %v786_v19 = vor.u32 %v784_v59, %v783_v9  ;;  %v791_v20 = vrot.slane %v789_v10, 7  ;;  %v1224_v22 = vld [vmem:[#allocation2 + $0x114] sm:$0xf]  ;;  %v2270_v23 = vsel %vm9844_vm11, %v2265_v13, %v2269_v12  ;;  %v787_v28 = vrot.slane %v783_v9, 4 }
  0xf6   :  { %230 = vst [vmem:[#allocation2 + $0x120] sm:$0x1] %v229_v16  ;;  %v1784_v24 = vld [vmem:[#allocation2 + $0x100] sm:$0xf]  ;;  %v798_v32 = vshrl.u32 %v416_v11, 16  ;;  %v2280_v34 = vsel %vm9844_vm11, %v2275_v18, %v2279_v61  ;;  %v801_v29 = vshll.u32 %v416_v11, 16 }
  0xf7   :  { %v2291_v35 = vshll.u32 %v1784_v24, 16  ;;  %v2295_v38 = vshrl.u32 %v1784_v24, 16  ;;  %v794_v39 = vor.u32 %v792_v15, %v791_v20  ;;  %v1228_v40 = vld [vmem:[#allocation2 + $0x11c] sm:$0x1]  ;;  %340 = vst [vmem:[#allocation2 + $0x128] sm:$0x1] %v339_v31  ;;  %v8818_v51 = vcombine.low %v2270_v23, %v2280_v34 }
  0xf8   :  { %v1783_v37 = vld [vmem:[#allocation2 + $0xfc] sm:$0xf]  ;;  %v796_v36 = vrot.slane %v791_v20, 4  ;;  %v1225_v41 = vsel %vm9791_vm8, %v786_v19, %v1224_v22  ;;  %v10184_v45 = vrot.slane %v798_v32, 7  ;;  %v231_v24 = vld [vmem:[#allocation2 + $0x12c] sm:$0x1] }
  0xf9   :  { %v1785_v46 = vld [vmem:[#allocation2 + $0x104] sm:$0x1]  ;;  %v2282_v47 = vshrl.u32 %v1783_v37, 16  ;;  %v2285_v42 = vshll.u32 %v1783_v37, 16  ;;  %v2293_v48 = vrot.slane %v2291_v35, 5  ;;  %v2297_v43 = vrot.slane %v2295_v38, 4  ;;  %2725 = vrot.lane.b32.xlu0 %v8818_v51, %s9657_s29 }
  0xfa   :  { %1226 = vst [vmem:[#allocation2 + $0x114] sm:$0xf] %v1225_v41  ;;  %v2301_v49 = vshll.u32 %v1785_v46, 16  ;;  %v1786_v27 = vld [vmem:[#allocation2 + $0x108] sm:$0xf]  ;;  %v795_v25 = vsel %vm9753_vm4, %v787_v28, %v794_v39  ;;  %v1229_v52 = vsel %vm9757_vm5, %v796_v36, %v1228_v40  ;;  %v803_v7 = vor.u32 %v801_v29, %v10184_v45  ;;  %v10640_v5 = vld [vmem:[#allocation2 + $0xfc] sm:$0xff]  }
  0xfb   :  { %v1787_v50 = vld [vmem:[#allocation2 + $0x10c] sm:$0xf]  ;;  %v2284_v53 = vrot.slane %v2282_v47, 4  ;;  %v2287_v54 = vrot.slane %v2285_v42, 5  ;;  %v2298_v55 = vor.u32 %v2297_v43, %v2293_v48  ;;  %v2306_v57 = vshrl.u32 %v1786_v27, 16 }
  0xfc   :  { %1227 = vst.msk [vmem:[#allocation2 + $0x118] sm:$0xf] %vm12780_vm7, %v795_v25  ;;  %1230 = vst [vmem:[#allocation2 + $0x11c] sm:$0x1] %v1229_v52  ;;  %v2303_v21 = vrot.slane %v2301_v49, 5  ;;  %v2309_v60 = vshll.u32 %v1786_v27, 16 }
  0xfd   :  { %v1788_v58 = vld [vmem:[#allocation2 + $0x110] sm:$0x1]  ;;  %v2315_v12 = vshll.u32 %v1787_v50, 16  ;;  %v2319_v26 = vshrl.u32 %v1787_v50, 16  ;;  %v2288_v61 = vor.u32 %v2287_v54, %v2284_v53  ;;  %v2299_v62 = vrot.slane %v2298_v55, 4  ;;  %v10642_v2 = vld [vmem:[#allocation2 + $0x108] sm:$0xff]  }
  0xfe   :  { %v2308_v17 = vrot.slane %v2306_v57, 4  ;;  %v2325_v30 = vshll.u32 %v1788_v58, 16  ;;  %v417_v63 = vld [vmem:[#allocation4 + $0xac] sm:$0xf]  ;;  %v2311_v56 = vrot.slane %v2309_v60, 5  ;;  %v804_v11 = vrot.slane %v10184_v45, 4 }
  0xff   :  { %v2317_v0 = vrot.slane %v2315_v12, 5  ;;  %v2321_v6 = vrot.slane %v2319_v26, 4  ;;  %v1231_v8 = vld [vmem:[#allocation2 + $0x120] sm:$0xf]  ;;  %v2289_v9 = vrot.slane %v2288_v61, 4  ;;  %v2304_v59 = vsel %vm9844_vm11, %v2299_v62, %v2303_v21 }
 0x100   :  { %v2327_v10 = vrot.slane %v2325_v30, 5  ;;  %v2312_v13 = vor.u32 %v2311_v56, %v2308_v17  ;;  %v806_v16 = vshrl.u32 %v417_v63, 16  ;;  %v809_v18 = vshll.u32 %v417_v63, 16  ;;  %v341_v38 = vld [vmem:[#allocation2 + $0x134] sm:$0x1] }
 0x101   :  { %v2322_v14 = vor.u32 %v2321_v6, %v2317_v0  ;;  %v1789_v15 = vld [vmem:[#allocation2 + $0x114] sm:$0xf]  ;;  %v2294_v19 = vsel %vm9844_vm11, %v2289_v9, %v2293_v48  ;;  %v1232_v23 = vsel %vm9791_vm8, %v803_v7, %v1231_v8  ;;  %v418_v39 = vld [vmem:[#allocation4 + $0xb0] sm:$0xf]  ;;  %v1235_v41 = vld [vmem:[#allocation2 + $0x128] sm:$0x1] }
 0x102   :  { %v2330_v20 = vshrl.u32 %v1789_v15, 16  ;;  %v2333_v22 = vshll.u32 %v1789_v15, 16  ;;  %v8819_v28 = vcombine.low %v2294_v19, %v2304_v59  ;;  %v2313_v31 = vrot.slane %v2312_v13, 4  ;;  %1233 = vst [vmem:[#allocation2 + $0x120] sm:$0xf] %v1232_v23 }
 0x103   :  { %v2323_v32 = vrot.slane %v2322_v14, 4  ;;  %v1790_v34 = vld [vmem:[#allocation2 + $0x118] sm:$0xf]  ;;  %v1791_v35 = vld [vmem:[#allocation2 + $0x11c] sm:$0x1]  ;;  %v808_v48 = vrot.slane %v806_v16, 7 }
 0x104   :  { %v2332_v40 = vrot.slane %v2330_v20, 4  ;;  %v2335_v51 = vrot.slane %v2333_v22, 5  ;;  %v2339_v37 = vshll.u32 %v1790_v34, 16  ;;  %v2343_v36 = vshrl.u32 %v1790_v34, 16  ;;  %v419_v45 = vld [vmem:[#allocation4 + $0xb4] sm:$0xf]  ;;  %2727 = vrot.lane.b32.xlu1 %v8819_v28, %s9657_s29 }
 0x105   :  { %v2318_v46 = vsel %vm9844_vm11, %v2313_v31, %v2317_v0  ;;  %v2328_v47 = vsel %vm9844_vm11, %v2323_v32, %v2327_v10  ;;  %v2349_v42 = vshll.u32 %v1791_v35, 16  ;;  %v811_v52 = vor.u32 %v809_v18, %v808_v48  ;;  %v234_v58 = vld [vmem:[#allocation2 + $0x138] sm:$0x1]  ;;  %v344_v62 = vld [vmem:[#allocation2 + $0x140] sm:$0x1] }
 0x106   :  { %v8820_v43 = vcombine.low %v2318_v46, %v2328_v47  ;;  %v2336_v49 = vor.u32 %v2335_v51, %v2332_v40  ;;  %v2341_v27 = vrot.slane %v2339_v37, 5  ;;  %v2345_v50 = vrot.slane %v2343_v36, 4  ;;  %v420_v17 = vld [vmem:[#allocation4 + $0xb8] sm:$0xf]  ;;  %v421_v10 = vld [vmem:[#allocation4 + $0xbc] sm:$0xf] }
 0x107   :  { %v2351_v25 = vrot.slane %v2349_v42, 5  ;;  %v813_v29 = vrot.slane %v808_v48, 4  ;;  %v232_v53 = vsel %vm9757_vm5, 0, %v231_v24  ;;  %v342_v57 = vsel %vm9765_vm6, 0, %v341_v38  ;;  %v237_v16 = vld [vmem:[#allocation2 + $0x144] sm:$0x1] }
 0x108   :  { %2729 = vrot.lane.b32.xlu0 %v8820_v43, %s9657_s29  ;;  %v2337_v54 = vrot.slane %v2336_v49, 4  ;;  %v2346_v55 = vor.u32 %v2345_v50, %v2341_v27  ;;  %233 = vst [vmem:[#allocation2 + $0x12c] sm:$0x1] %v232_v53  ;;  %v815_v21 = vshrl.u32 %v418_v39, 16  ;;  %v812_v60 = vsel %vm9753_vm4, %v804_v11, %v811_v52  ;;  %343 = vst [vmem:[#allocation2 + $0x134] sm:$0x1] %v342_v57 }
 0x109   :  { %v1236_v12 = vsel %vm9757_vm5, %v813_v29, %v1235_v41  ;;  %v818_v26 = vshll.u32 %v418_v39, 16  ;;  %v823_v61 = vshrl.u32 %v419_v45, 16  ;;  %1234 = vst.msk [vmem:[#allocation2 + $0x124] sm:$0xf] %vm12780_vm7, %v812_v60  ;;  %v1792_v56 = vld [vmem:[#allocation2 + $0x120] sm:$0xf] }
 0x10a   :  { %v2342_v30 = vsel %vm9844_vm11, %v2337_v54, %v2341_v27  ;;  %v2347_v63 = vrot.slane %v2346_v55, 4  ;;  %1237 = vst [vmem:[#allocation2 + $0x128] sm:$0x1] %v1236_v12  ;;  %v817_v0 = vrot.slane %v815_v21, 7  ;;  %v826_v6 = vshll.u32 %v419_v45, 16  ;;  %v10644_v3 = vld [vmem:[#allocation2 + $0x114] sm:$0xff]  }
 0x10b   :  { %v2354_v7 = vshrl.u32 %v1792_v56, 16  ;;  %v2357_v8 = vshll.u32 %v1792_v56, 16  ;;  %v825_v9 = vrot.slane %v823_v61, 7  ;;  %v235_v59 = vsel %vm9757_vm5, 0, %v234_v58  ;;  %v347_v23 = vld [vmem:[#allocation2 + $0x14c] sm:$0x1] }
 0x10c   :  { %v2352_v11 = vsel %vm9844_vm11, %v2347_v63, %v2351_v25  ;;  %v820_v13 = vor.u32 %v818_v26, %v817_v0  ;;  %v821_v14 = vrot.slane %v817_v0, 4  ;;  %236 = vst [vmem:[#allocation2 + $0x138] sm:$0x1] %v235_v59  ;;  %v345_v15 = vsel %vm9765_vm6, 0, %v344_v62  ;;  %v422_v34 = vld [vmem:[#allocation4 + $0xc0] sm:$0xf] }
 0x10d   :  { %v8821_v18 = vcombine.low %v2342_v30, %v2352_v11  ;;  %v2356_v19 = vrot.slane %v2354_v7, 4  ;;  %v2359_v20 = vrot.slane %v2357_v8, 5  ;;  %v828_v22 = vor.u32 %v826_v6, %v825_v9  ;;  %346 = vst [vmem:[#allocation2 + $0x140] sm:$0x1] %v345_v15  ;;  %v423_v49 = vld [vmem:[#allocation4 + $0xc4] sm:$0xf] }
 0x10e   :  { %v830_v24 = vrot.slane %v825_v9, 4  ;;  %v832_v28 = vshrl.u32 %v420_v17, 16  ;;  %v835_v31 = vshll.u32 %v420_v17, 16  ;;  %v840_v32 = vshrl.u32 %v421_v10, 16  ;;  %v240_v53 = vld [vmem:[#allocation2 + $0x150] sm:$0x1] }
 0x10f   :  { %2731 = vrot.lane.b32.xlu1 %v8821_v18, %s9657_s29  ;;  %v2360_v35 = vor.u32 %v2359_v20, %v2356_v19  ;;  %v829_v38 = vsel %vm9753_vm4, %v821_v14, %v828_v22  ;;  %v1238_v39 = vld [vmem:[#allocation2 + $0x12c] sm:$0xf]  ;;  %v843_v40 = vshll.u32 %v421_v10, 16  ;;  %v238_v51 = vsel %vm9757_vm5, 0, %v237_v16  ;;  %v1242_v36 = vld [vmem:[#allocation2 + $0x134] sm:$0x1] }
 0x110   :  { %v1239_v37 = vsel %vm9791_vm8, %v820_v13, %v1238_v39  ;;  %1241 = vst.msk [vmem:[#allocation2 + $0x130] sm:$0xf] %vm12780_vm7, %v829_v38  ;;  %v834_v41 = vrot.slane %v832_v28, 7  ;;  %v842_v45 = vrot.slane %v840_v32, 7  ;;  %239 = vst [vmem:[#allocation2 + $0x144] sm:$0x1] %v238_v51  ;;  %v1243_v43 = vsel %vm9757_vm5, %v830_v24, %v1242_v36 }
 0x111   :  { %v348_v46 = vsel %vm9765_vm6, 0, %v347_v23  ;;  %v1793_v47 = vld [vmem:[#allocation2 + $0x124] sm:$0xf]  ;;  %v1794_v42 = vld [vmem:[#allocation2 + $0x128] sm:$0x1]  ;;  %v2361_v48 = vrot.slane %v2360_v35, 4 }
 0x112   :  { %1240 = vst [vmem:[#allocation2 + $0x12c] sm:$0xf] %v1239_v37  ;;  %349 = vst [vmem:[#allocation2 + $0x14c] sm:$0x1] %v348_v46  ;;  %v849_v27 = vshrl.u32 %v422_v34, 16  ;;  %v2363_v50 = vshll.u32 %v1793_v47, 16  ;;  %v837_v29 = vor.u32 %v835_v31, %v834_v41  ;;  %v845_v55 = vor.u32 %v843_v40, %v842_v45 }
 0x113   :  { %v2367_v25 = vshrl.u32 %v1793_v47, 16  ;;  %v2373_v52 = vshll.u32 %v1794_v42, 16  ;;  %1244 = vst [vmem:[#allocation2 + $0x134] sm:$0x1] %v1243_v43  ;;  %v838_v54 = vrot.slane %v834_v41, 4  ;;  %v847_v57 = vrot.slane %v842_v45, 4 }
 0x114   :  { %v1245_v21 = vld [vmem:[#allocation2 + $0x138] sm:$0xf]  ;;  %v851_v58 = vrot.slane %v849_v27, 7  ;;  %v2365_v60 = vrot.slane %v2363_v50, 5  ;;  %v1249_v61 = vld [vmem:[#allocation2 + $0x140] sm:$0x1] }
 0x115   :  { %v2369_v12 = vrot.slane %v2367_v25, 4  ;;  %v1246_v26 = vsel %vm9791_vm8, %v837_v29, %v1245_v21  ;;  %v350_v62 = vld [vmem:[#allocation2 + $0x158] sm:$0x1]  ;;  %v2375_v17 = vrot.slane %v2373_v52, 5  ;;  %v846_v30 = vsel %vm9753_vm4, %v838_v54, %v845_v55 }
 0x116   :  { %1247 = vst [vmem:[#allocation2 + $0x138] sm:$0xf] %v1246_v26  ;;  %v1250_v63 = vsel %vm9757_vm5, %v847_v57, %v1249_v61  ;;  %v852_v56 = vshll.u32 %v422_v34, 16  ;;  %1248 = vst.msk [vmem:[#allocation2 + $0x13c] sm:$0xf] %vm12780_vm7, %v846_v30  ;;  %v857_v6 = vshrl.u32 %v423_v49, 16  ;;  %v2366_v8 = vsel %vm9844_vm11, %v2361_v48, %v2365_v60 }
 0x117   :  { %v2370_v0 = vor.u32 %v2369_v12, %v2365_v60  ;;  %1251 = vst [vmem:[#allocation2 + $0x140] sm:$0x1] %v1250_v63  ;;  %v860_v7 = vshll.u32 %v423_v49, 16  ;;  %v1796_v9 = vld [vmem:[#allocation2 + $0x130] sm:$0xf]  ;;  %v241_v11 = vsel %vm9757_vm5, 0, %v240_v53 }
 0x118   :  { %v854_v59 = vor.u32 %v852_v56, %v851_v58  ;;  %v1252_v10 = vld [vmem:[#allocation2 + $0x144] sm:$0xf]  ;;  %v351_v13 = vsel %vm9765_vm6, 0, %v350_v62  ;;  %v10248_v14 = vld [vmem:[#allocation4 + $0xc8] sm:$0xf]  ;;  %v2387_v18 = vshll.u32 %v1796_v9, 16 }
 0x119   :  { %v2371_v15 = vrot.slane %v2370_v0, 4  ;;  %v1795_v16 = vld [vmem:[#allocation2 + $0x12c] sm:$0xf]  ;;  %v2391_v19 = vshrl.u32 %v1796_v9, 16  ;;  %v859_v20 = vrot.slane %v857_v6, 7  ;;  %v855_v28 = vrot.slane %v851_v58, 4 }
 0x11a   :  { %242 = vst [vmem:[#allocation2 + $0x150] sm:$0x1] %v241_v11  ;;  %352 = vst [vmem:[#allocation2 + $0x158] sm:$0x1] %v351_v13  ;;  %v1797_v22 = vld [vmem:[#allocation2 + $0x134] sm:$0x1]  ;;  %v1253_v31 = vsel %vm9791_vm8, %v854_v59, %v1252_v10 }
 0x11b   :  { %v2378_v23 = vshrl.u32 %v1795_v16, 16  ;;  %v2381_v24 = vshll.u32 %v1795_v16, 16  ;;  %v2376_v32 = vsel %vm9844_vm11, %v2371_v15, %v2375_v17  ;;  %v2389_v34 = vrot.slane %v2387_v18, 5  ;;  %1254 = vst [vmem:[#allocation2 + $0x144] sm:$0xf] %v1253_v31 }
 0x11c   :  { %v2393_v35 = vrot.slane %v2391_v19, 4  ;;  %v2397_v38 = vshll.u32 %v1797_v22, 16  ;;  %v8822_v39 = vcombine.low %v2366_v8, %v2376_v32  ;;  %v862_v37 = vor.u32 %v860_v7, %v859_v20  ;;  %v1256_v36 = vld [vmem:[#allocation2 + $0x14c] sm:$0x1]  ;;  %v425_v62 = vld [vmem:[#allocation4 + $0xcc] sm:$0xf] }
 0x11d   :  { %v2380_v40 = vrot.slane %v2378_v23, 4  ;;  %v2383_v51 = vrot.slane %v2381_v24, 5  ;;  %v1798_v46 = vld [vmem:[#allocation2 + $0x138] sm:$0xf]  ;;  %v864_v47 = vrot.slane %v859_v20, 4  ;;  %v866_v42 = vshrl.u32 %v10248_v14, 16 }
 0x11e   :  { %v2394_v41 = vor.u32 %v2393_v35, %v2389_v34  ;;  %v2399_v45 = vrot.slane %v2397_v38, 5  ;;  %2733 = vrot.lane.b32.xlu0 %v8822_v39, %s9657_s29  ;;  %v1799_v43 = vld [vmem:[#allocation2 + $0x13c] sm:$0xf]  ;;  %v1800_v49 = vld [vmem:[#allocation2 + $0x140] sm:$0x1]  ;;  %v2402_v27 = vshrl.u32 %v1798_v46, 16  ;;  %v863_v25 = vsel %vm9753_vm4, %v855_v28, %v862_v37 }
 0x11f   :  { %v2384_v48 = vor.u32 %v2383_v51, %v2380_v40  ;;  %v2405_v50 = vshll.u32 %v1798_v46, 16  ;;  %v2411_v29 = vshll.u32 %v1799_v43, 16  ;;  %v2415_v53 = vshrl.u32 %v1799_v43, 16  ;;  %1255 = vst.msk [vmem:[#allocation2 + $0x148] sm:$0xf] %vm12780_vm7, %v863_v25 }
 0x120   :  { %v2395_v52 = vrot.slane %v2394_v41, 4  ;;  %v2421_v54 = vshll.u32 %v1800_v49, 16  ;;  %v2404_v57 = vrot.slane %v2402_v27, 4  ;;  %v1257_v58 = vsel %vm9757_vm5, %v864_v47, %v1256_v36  ;;  %v243_v10 = vld [vmem:[#allocation2 + $0x15c] sm:$0x1] }
 0x121   :  { %v2385_v55 = vrot.slane %v2384_v48, 4  ;;  %v2407_v21 = vrot.slane %v2405_v50, 5  ;;  %v2413_v12 = vrot.slane %v2411_v29, 5  ;;  %v2417_v26 = vrot.slane %v2415_v53, 4  ;;  %1258 = vst [vmem:[#allocation2 + $0x14c] sm:$0x1] %v1257_v58 }
 0x122   :  { %v2400_v60 = vsel %vm9844_vm11, %v2395_v52, %v2399_v45  ;;  %v2423_v61 = vrot.slane %v2421_v54, 5  ;;  %v1801_v63 = vld [vmem:[#allocation2 + $0x144] sm:$0xf]  ;;  %v868_v56 = vrot.slane %v866_v42, 7  ;;  %v869_v0 = vshll.u32 %v10248_v14, 16 }
 0x123   :  { %v2390_v17 = vsel %vm9844_vm11, %v2385_v55, %v2389_v34  ;;  %v2408_v30 = vor.u32 %v2407_v21, %v2404_v57  ;;  %v2418_v7 = vor.u32 %v2417_v26, %v2413_v12  ;;  %v2426_v8 = vshrl.u32 %v1801_v63, 16  ;;  %v1259_v59 = vld [vmem:[#allocation2 + $0x150] sm:$0xf]  ;;  %v353_v18 = vld [vmem:[#allocation2 + $0x164] sm:$0x1] }
 0x124   :  { %v8823_v6 = vcombine.low %v2390_v17, %v2400_v60  ;;  %v2429_v9 = vshll.u32 %v1801_v63, 16  ;;  %v871_v13 = vor.u32 %v869_v0, %v868_v56  ;;  %v872_v15 = vrot.slane %v868_v56, 4  ;;  %v426_v24 = vld [vmem:[#allocation4 + $0xd0] sm:$0xf]  ;;  %v427_v35 = vld [vmem:[#allocation4 + $0xd4] sm:$0xf] }
 0x125   :  { %v2409_v11 = vrot.slane %v2408_v30, 4  ;;  %v874_v16 = vshrl.u32 %v425_v62, 16  ;;  %v2419_v19 = vrot.slane %v2418_v7, 4  ;;  %v2428_v20 = vrot.slane %v2426_v8, 4  ;;  %v1263_v37 = vld [vmem:[#allocation2 + $0x158] sm:$0x1] }
 0x126   :  { %2735 = vrot.lane.b32.xlu1 %v8823_v6, %s9657_s29  ;;  %v2431_v22 = vrot.slane %v2429_v9, 5  ;;  %v877_v23 = vshll.u32 %v425_v62, 16  ;;  %v1802_v28 = vld [vmem:[#allocation2 + $0x148] sm:$0xf]  ;;  %v1260_v32 = vsel %vm9791_vm8, %v871_v13, %v1259_v59  ;;  %v244_v34 = vsel %vm9757_vm5, 0, %v243_v10 }
 0x127   :  { %v2414_v14 = vsel %vm9844_vm11, %v2409_v11, %v2413_v12  ;;  %v876_v31 = vrot.slane %v874_v16, 7  ;;  %v2424_v38 = vsel %vm9844_vm11, %v2419_v19, %v2423_v61  ;;  %v2435_v40 = vshll.u32 %v1802_v28, 16  ;;  %1261 = vst [vmem:[#allocation2 + $0x150] sm:$0xf] %v1260_v32  ;;  %245 = vst [vmem:[#allocation2 + $0x15c] sm:$0x1] %v244_v34 }
 0x128   :  { %v2432_v39 = vor.u32 %v2431_v22, %v2428_v20  ;;  %v2439_v51 = vshrl.u32 %v1802_v28, 16  ;;  %v246_v36 = vld [vmem:[#allocation2 + $0x168] sm:$0x1]  ;;  %v356_v41 = vld [vmem:[#allocation2 + $0x170] sm:$0x1]  ;;  %v8824_v45 = vcombine.low %v2414_v14, %v2424_v38  ;;  %v354_v48 = vsel %vm9765_vm6, 0, %v353_v18 }
 0x129   :  { %v1803_v46 = vld [vmem:[#allocation2 + $0x14c] sm:$0x1]  ;;  %v879_v47 = vor.u32 %v877_v23, %v876_v31  ;;  %v881_v42 = vrot.slane %v876_v31, 4  ;;  %v428_v43 = vld [vmem:[#allocation4 + $0xd8] sm:$0xf]  ;;  %v2437_v27 = vrot.slane %v2435_v40, 5 }
 0x12a   :  { %v2433_v49 = vrot.slane %v2432_v39, 4  ;;  %v2441_v50 = vrot.slane %v2439_v51, 4  ;;  %v2445_v25 = vshll.u32 %v1803_v46, 16  ;;  %355 = vst [vmem:[#allocation2 + $0x164] sm:$0x1] %v354_v48  ;;  %2737 = vrot.lane.b32.xlu0 %v8824_v45, %s9657_s29  ;;  %v883_v53 = vshrl.u32 %v426_v24, 16 }
 0x12b   :  { %v880_v52 = vsel %vm9753_vm4, %v872_v15, %v879_v47  ;;  %v1264_v29 = vsel %vm9757_vm5, %v881_v42, %v1263_v37  ;;  %v886_v54 = vshll.u32 %v426_v24, 16  ;;  %v891_v58 = vshrl.u32 %v427_v35, 16  ;;  %v429_v60 = vld [vmem:[#allocation4 + $0xdc] sm:$0xf]  ;;  %v249_v22 = vld [vmem:[#allocation2 + $0x174] sm:$0x1] }
 0x12c   :  { %v2438_v55 = vsel %vm9844_vm11, %v2433_v49, %v2437_v27  ;;  %v2442_v57 = vor.u32 %v2441_v50, %v2437_v27  ;;  %v2447_v21 = vrot.slane %v2445_v25, 5  ;;  %1262 = vst.msk [vmem:[#allocation2 + $0x154] sm:$0xf] %vm12780_vm7, %v880_v52  ;;  %1265 = vst [vmem:[#allocation2 + $0x158] sm:$0x1] %v1264_v29  ;;  %v885_v12 = vrot.slane %v883_v53, 7 }
 0x12d   :  { %v894_v26 = vshll.u32 %v427_v35, 16  ;;  %v247_v61 = vsel %vm9757_vm5, 0, %v246_v36  ;;  %v357_v62 = vsel %vm9765_vm6, 0, %v356_v41  ;;  %v893_v30 = vrot.slane %v891_v58, 7  ;;  %v359_v31 = vld [vmem:[#allocation2 + $0x17c] sm:$0x1] }
 0x12e   :  { %v2443_v17 = vrot.slane %v2442_v57, 4  ;;  %248 = vst [vmem:[#allocation2 + $0x168] sm:$0x1] %v247_v61  ;;  %358 = vst [vmem:[#allocation2 + $0x170] sm:$0x1] %v357_v62  ;;  %v900_v63 = vshrl.u32 %v428_v43, 16  ;;  %v888_v6 = vor.u32 %v886_v54, %v885_v12 }
 0x12f   :  { %v903_v56 = vshll.u32 %v428_v43, 16  ;;  %v1804_v0 = vld [vmem:[#allocation2 + $0x150] sm:$0xf]  ;;  %v889_v7 = vrot.slane %v885_v12, 4  ;;  %v1266_v8 = vld [vmem:[#allocation2 + $0x15c] sm:$0xf]  ;;  %v896_v13 = vor.u32 %v894_v26, %v893_v30 }
 0x130   :  { %v908_v9 = vshrl.u32 %v429_v60, 16  ;;  %v2448_v59 = vsel %vm9844_vm11, %v2443_v17, %v2447_v21  ;;  %v2450_v10 = vshrl.u32 %v1804_v0, 16  ;;  %v2453_v11 = vshll.u32 %v1804_v0, 16  ;;  %v430_v51 = vld [vmem:[#allocation4 + $0xe0] sm:$0xf] }
 0x131   :  { %v8825_v15 = vcombine.low %v2438_v55, %v2448_v59  ;;  %v898_v16 = vrot.slane %v893_v30, 4  ;;  %v1267_v18 = vsel %vm9791_vm8, %v888_v6, %v1266_v8  ;;  %v1270_v19 = vld [vmem:[#allocation2 + $0x164] sm:$0x1]  ;;  %v902_v20 = vrot.slane %v900_v63, 7  ;;  %v431_v46 = vld [vmem:[#allocation4 + $0xe4] sm:$0xf] }
 0x132   :  { %v2452_v23 = vrot.slane %v2450_v10, 4  ;;  %v2455_v24 = vrot.slane %v2453_v11, 5  ;;  %v897_v14 = vsel %vm9753_vm4, %v889_v7, %v896_v13  ;;  %1268 = vst [vmem:[#allocation2 + $0x15c] sm:$0xf] %v1267_v18  ;;  %v910_v28 = vrot.slane %v908_v9, 7 }
 0x133   :  { %2739 = vrot.lane.b32.xlu1 %v8825_v15, %s9657_s29  ;;  %v1805_v32 = vld [vmem:[#allocation2 + $0x154] sm:$0xf]  ;;  %v1806_v34 = vld [vmem:[#allocation2 + $0x158] sm:$0x1]  ;;  %1269 = vst.msk [vmem:[#allocation2 + $0x160] sm:$0xf] %vm12780_vm7, %v897_v14  ;;  %v1271_v35 = vsel %vm9757_vm5, %v898_v16, %v1270_v19  ;;  %v905_v38 = vor.u32 %v903_v56, %v902_v20 }
 0x134   :  { %v906_v39 = vrot.slane %v902_v20, 4  ;;  %v911_v40 = vshll.u32 %v429_v60, 16  ;;  %v2456_v37 = vor.u32 %v2455_v24, %v2452_v23  ;;  %v2459_v36 = vshll.u32 %v1805_v32, 16  ;;  %1272 = vst [vmem:[#allocation2 + $0x164] sm:$0x1] %v1271_v35 }
 0x135   :  { %v2463_v41 = vshrl.u32 %v1805_v32, 16  ;;  %v2469_v45 = vshll.u32 %v1806_v34, 16  ;;  %v252_v47 = vld [vmem:[#allocation2 + $0x180] sm:$0x1]  ;;  %v362_v42 = vld [vmem:[#allocation2 + $0x188] sm:$0x1] }
 0x136   :  { %v913_v48 = vor.u32 %v911_v40, %v910_v28  ;;  %v915_v43 = vrot.slane %v910_v28, 4  ;;  %v1273_v49 = vld [vmem:[#allocation2 + $0x168] sm:$0xf]  ;;  %v1277_v27 = vld [vmem:[#allocation2 + $0x170] sm:$0x1]  ;;  %v250_v50 = vsel %vm9757_vm5, 0, %v249_v22 }
 0x137   :  { %v2457_v25 = vrot.slane %v2456_v37, 4  ;;  %v2461_v52 = vrot.slane %v2459_v36, 5  ;;  %v2465_v29 = vrot.slane %v2463_v41, 4  ;;  %v2471_v53 = vrot.slane %v2469_v45, 5  ;;  %251 = vst [vmem:[#allocation2 + $0x174] sm:$0x1] %v250_v50 }
 0x138   :  { %v914_v54 = vsel %vm9753_vm4, %v906_v39, %v913_v48  ;;  %v1274_v55 = vsel %vm9791_vm8, %v905_v38, %v1273_v49  ;;  %v1278_v57 = vsel %vm9757_vm5, %v915_v43, %v1277_v27  ;;  %v360_v21 = vsel %vm9765_vm6, 0, %v359_v31  ;;  %v10312_v61 = vld [vmem:[#allocation4 + $0xe8] sm:$0xf]  ;;  %v255_v27 = vld [vmem:[#allocation2 + $0x18c] sm:$0x1] }
 0x139   :  { %v2462_v58 = vsel %vm9844_vm11, %v2457_v25, %v2461_v52  ;;  %v2466_v60 = vor.u32 %v2465_v29, %v2461_v52  ;;  %1275 = vst [vmem:[#allocation2 + $0x168] sm:$0xf] %v1274_v55  ;;  %1276 = vst.msk [vmem:[#allocation2 + $0x16c] sm:$0xf] %vm12780_vm7, %v914_v54  ;;  %v917_v12 = vshrl.u32 %v430_v51, 16  ;;  %v920_v26 = vshll.u32 %v430_v51, 16 }
 0x13a   :  { %1279 = vst [vmem:[#allocation2 + $0x170] sm:$0x1] %v1278_v57  ;;  %361 = vst [vmem:[#allocation2 + $0x17c] sm:$0x1] %v360_v21  ;;  %v1807_v62 = vld [vmem:[#allocation2 + $0x15c] sm:$0xf] }
 0x13b   :  { %v925_v17 = vshrl.u32 %v431_v46, 16  ;;  %v928_v30 = vshll.u32 %v431_v46, 16  ;;  %v253_v63 = vsel %vm9757_vm5, 0, %v252_v47  ;;  %v363_v56 = vsel %vm9765_vm6, 0, %v362_v42  ;;  %v1808_v6 = vld [vmem:[#allocation2 + $0x160] sm:$0xf] }
 0x13c   :  { %v2467_v0 = vrot.slane %v2466_v60, 4  ;;  %v2474_v7 = vshrl.u32 %v1807_v62, 16  ;;  %v2477_v8 = vshll.u32 %v1807_v62, 16  ;;  %v919_v9 = vrot.slane %v917_v12, 7  ;;  %254 = vst [vmem:[#allocation2 + $0x180] sm:$0x1] %v253_v63 }
 0x13d   :  { %364 = vst [vmem:[#allocation2 + $0x188] sm:$0x1] %v363_v56  ;;  %v1809_v59 = vld [vmem:[#allocation2 + $0x164] sm:$0x1]  ;;  %v2483_v10 = vshll.u32 %v1808_v6, 16  ;;  %v2487_v11 = vshrl.u32 %v1808_v6, 16 }
 0x13e   :  { %v927_v13 = vrot.slane %v925_v17, 7  ;;  %v934_v15 = vshrl.u32 %v10312_v61, 16  ;;  %v2472_v16 = vsel %vm9844_vm11, %v2467_v0, %v2471_v53  ;;  %v2476_v18 = vrot.slane %v2474_v7, 4  ;;  %v1280_v28 = vld [vmem:[#allocation2 + $0x174] sm:$0xf] }
 0x13f   :  { %v2479_v19 = vrot.slane %v2477_v8, 5  ;;  %v2493_v20 = vshll.u32 %v1809_v59, 16  ;;  %v8826_v22 = vcombine.low %v2462_v58, %v2472_v16  ;;  %v2485_v23 = vrot.slane %v2483_v10, 5  ;;  %v433_v47 = vld [vmem:[#allocation4 + $0xec] sm:$0xf] }
 0x140   :  { %v2489_v24 = vrot.slane %v2487_v11, 4  ;;  %v922_v14 = vor.u32 %v920_v26, %v919_v9  ;;  %v923_v34 = vrot.slane %v919_v9, 4  ;;  %v930_v35 = vor.u32 %v928_v30, %v927_v13  ;;  %v1810_v39 = vld [vmem:[#allocation2 + $0x168] sm:$0xf]  ;;  %v1811_v40 = vld [vmem:[#allocation2 + $0x16c] sm:$0xf] }
 0x141   :  { %v2480_v31 = vor.u32 %v2479_v19, %v2476_v18  ;;  %v2495_v32 = vrot.slane %v2493_v20, 5  ;;  %2741 = vrot.lane.b32.xlu0 %v8826_v22, %s9657_s29  ;;  %v1812_v51 = vld [vmem:[#allocation2 + $0x170] sm:$0x1]  ;;  %v2498_v41 = vshrl.u32 %v1810_v39, 16  ;;  %v2501_v45 = vshll.u32 %v1810_v39, 16 }
 0x142   :  { %v2490_v38 = vor.u32 %v2489_v24, %v2485_v23  ;;  %v1281_v37 = vsel %vm9791_vm8, %v922_v14, %v1280_v28  ;;  %v2507_v46 = vshll.u32 %v1811_v40, 16  ;;  %v2511_v48 = vshrl.u32 %v1811_v40, 16  ;;  %v1284_v53 = vld [vmem:[#allocation2 + $0x17c] sm:$0x1]  ;;  %v365_v54 = vld [vmem:[#allocation2 + $0x194] sm:$0x1] }
 0x143   :  { %v2481_v36 = vrot.slane %v2480_v31, 4  ;;  %1282 = vst [vmem:[#allocation2 + $0x174] sm:$0xf] %v1281_v37  ;;  %v2517_v43 = vshll.u32 %v1812_v51, 16  ;;  %v931_v49 = vsel %vm9753_vm4, %v923_v34, %v930_v35  ;;  %v2500_v25 = vrot.slane %v2498_v41, 4 }
 0x144   :  { %v2491_v42 = vrot.slane %v2490_v38, 4  ;;  %v2503_v52 = vrot.slane %v2501_v45, 5  ;;  %v2509_v29 = vrot.slane %v2507_v46, 5  ;;  %1283 = vst.msk [vmem:[#allocation2 + $0x178] sm:$0xf] %vm12780_vm7, %v931_v49  ;;  %v2513_v21 = vrot.slane %v2511_v48, 4 }
 0x145   :  { %v2486_v50 = vsel %vm9844_vm11, %v2481_v36, %v2485_v23  ;;  %v434_v55 = vld [vmem:[#allocation4 + $0xf0] sm:$0xf]  ;;  %v2519_v58 = vrot.slane %v2517_v43, 5  ;;  %v932_v60 = vrot.slane %v927_v13, 4  ;;  %v936_v17 = vrot.slane %v934_v15, 7 }
 0x146   :  { %v2496_v57 = vsel %vm9844_vm11, %v2491_v42, %v2495_v32  ;;  %v1287_v12 = vld [vmem:[#allocation2 + $0x180] sm:$0xf]  ;;  %v2504_v62 = vor.u32 %v2503_v52, %v2500_v25  ;;  %v937_v30 = vshll.u32 %v10312_v61, 16  ;;  %v2514_v63 = vor.u32 %v2513_v21, %v2509_v29  ;;  %v1291_v22 = vld [vmem:[#allocation2 + $0x188] sm:$0x1]  ;;  %v10353_v25 = vpop.permute.xlu0 %2689  ;;  %v10355_v52 = vpop.permute.xlu1 %2693 }
 0x147   :  { %v8827_v26 = vcombine.low %v2486_v50, %v2496_v57  ;;  %v1285_v56 = vsel %vm9757_vm5, %v932_v60, %v1284_v53  ;;  %v942_v0 = vshrl.u32 %v433_v47, 16  ;;  %v945_v6 = vshll.u32 %v433_v47, 16  ;;  %v435_v31 = vld [vmem:[#allocation4 + $0xf4] sm:$0xf]  ;;  %v10349_v41 = vld [vmem:[#allocation2] sm:$0xe] }
 0x148   :  { %v2505_v7 = vrot.slane %v2504_v62, 4  ;;  %1286 = vst [vmem:[#allocation2 + $0x17c] sm:$0x1] %v1285_v56  ;;  %v939_v8 = vor.u32 %v937_v30, %v936_v17  ;;  %v940_v9 = vrot.slane %v936_v17, 4  ;;  %v256_v59 = vsel %vm9757_vm5, 0, %v255_v27 }
 0x149   :  { %2743 = vrot.lane.b32.xlu1 %v8827_v26, %s9657_s29  ;;  %v2515_v10 = vrot.slane %v2514_v63, 4  ;;  %v944_v13 = vrot.slane %v942_v0, 7  ;;  %257 = vst [vmem:[#allocation2 + $0x18c] sm:$0x1] %v256_v59  ;;  %v366_v61 = vsel %vm9765_vm6, 0, %v365_v54  ;;  %v951_v15 = vshrl.u32 %v434_v55, 16 }
 0x14a   :  { %v1813_v11 = vld [vmem:[#allocation2 + $0x174] sm:$0xf]  ;;  %v2510_v16 = vsel %vm9844_vm11, %v2505_v7, %v2509_v29  ;;  %v1288_v20 = vsel %vm9791_vm8, %v939_v8, %v1287_v12  ;;  %367 = vst [vmem:[#allocation2 + $0x194] sm:$0x1] %v366_v61  ;;  %v954_v36 = vshll.u32 %v434_v55, 16  ;;  %v959_v47 = vshrl.u32 %v435_v31, 16 }
 0x14b   :  { %v2522_v18 = vshrl.u32 %v1813_v11, 16  ;;  %v2525_v19 = vshll.u32 %v1813_v11, 16  ;;  %v2520_v23 = vsel %vm9844_vm11, %v2515_v10, %v2519_v58  ;;  %v1814_v24 = vld [vmem:[#allocation2 + $0x178] sm:$0xf]  ;;  %v947_v14 = vor.u32 %v945_v6, %v944_v13  ;;  %1289 = vst [vmem:[#allocation2 + $0x180] sm:$0xf] %v1288_v20 }
 0x14c   :  { %v949_v28 = vrot.slane %v944_v13, 4  ;;  %v953_v32 = vrot.slane %v951_v15, 7  ;;  %v8828_v34 = vcombine.low %v2510_v16, %v2520_v23  ;;  %v2531_v39 = vshll.u32 %v1814_v24, 16  ;;  %v2819_v42 = vld [vmem:[#allocation2 + $0x4] sm:$0xf] }
 0x14d   :  { %v2524_v35 = vrot.slane %v2522_v18, 4  ;;  %v2527_v38 = vrot.slane %v2525_v19, 5  ;;  %v2535_v40 = vshrl.u32 %v1814_v24, 16  ;;  %v948_v51 = vsel %vm9753_vm4, %v940_v9, %v947_v14  ;;  %v2820_v60 = vld [vmem:[#allocation2 + $0x8] sm:$0x1]  ;;  %v10375_v24 = vpop.permute.xlu0 %2691  ;;  %v10377_v14 = vpop.permute.xlu1 %2695 }
 0x14e   :  { %v1292_v37 = vsel %vm9757_vm5, %v949_v28, %v1291_v22  ;;  %2745 = vrot.lane.b32.xlu0 %v8828_v34, %s9657_s29  ;;  %v2533_v46 = vrot.slane %v2531_v39, 5  ;;  %1290 = vst.msk [vmem:[#allocation2 + $0x184] sm:$0xf] %vm12780_vm7, %v948_v51  ;;  %v956_v49 = vor.u32 %v954_v36, %v953_v32  ;;  %v957_v27 = vrot.slane %v953_v32, 4  ;;  %v2821_v8 = vld [vmem:[#allocation2 + $0xc] sm:$0xe] }
 0x14f   :  { %v2528_v45 = vor.u32 %v2527_v38, %v2524_v35  ;;  %1293 = vst [vmem:[#allocation2 + $0x188] sm:$0x1] %v1292_v37  ;;  %v1815_v48 = vld [vmem:[#allocation2 + $0x17c] sm:$0x1]  ;;  %v2537_v43 = vrot.slane %v2535_v40, 4  ;;  %v962_v50 = vshll.u32 %v435_v31, 16 }
 0x150   :  { %v2541_v53 = vshll.u32 %v1815_v48, 16  ;;  %v961_v54 = vrot.slane %v959_v47, 7  ;;  %v1294_v55 = vld [vmem:[#allocation2 + $0x18c] sm:$0xf]  ;;  %v3015_v12 = vrot.slane %v2819_v42, 5  ;;  %v8832_v63 = vrot.slane %v10349_v41, 9 }
 0x151   :  { %v2529_v29 = vrot.slane %v2528_v45, 4  ;;  %v2538_v57 = vor.u32 %v2537_v43, %v2533_v46  ;;  %v1295_v21 = vsel %vm9791_vm8, %v956_v49, %v1294_v55  ;;  %v1298_v58 = vld [vmem:[#allocation2 + $0x194] sm:$0x1]  ;;  %v3018_v13 = vrot.slane %v2820_v60, 5  ;;  %v2822_v61 = vld [vmem:[#allocation2 + $0x10] sm:$0xf] }
 0x152   :  { %v2543_v26 = vrot.slane %v2541_v53, 5  ;;  %v1816_v62 = vld [vmem:[#allocation2 + $0x180] sm:$0xf]  ;;  %v964_v17 = vor.u32 %v962_v50, %v961_v54  ;;  %v966_v30 = vrot.slane %v961_v54, 4  ;;  %1296 = vst [vmem:[#allocation2 + $0x18c] sm:$0xf] %v1295_v21  ;;  %v10381_v40 = vsel %vm10368_vm14, %v8832_v63, %v3015_v12 }
 0x153   :  { %v2534_v56 = vsel %vm9844_vm11, %v2529_v29, %v2533_v46  ;;  %v2539_v0 = vrot.slane %v2538_v57, 4  ;;  %v2546_v6 = vshrl.u32 %v1816_v62, 16  ;;  %v2549_v7 = vshll.u32 %v1816_v62, 16  ;;  %v2823_v15 = vld [vmem:[#allocation2 + $0x14] sm:$0x1]  ;;  %12800 = vst [vmem:[#allocation30_spill] sm:$0xff] %v10377_v14  ;;  %v10400_v62 = vpop.permute.xlu1 %2699 }
 0x154   :  { %v965_v9 = vsel %vm9753_vm4, %v957_v27, %v964_v17  ;;  %v1299_v59 = vsel %vm9757_vm5, %v966_v30, %v1298_v58  ;;  %v3017_v11 = vrot.slane %v3015_v12, 4  ;;  %v2824_v23 = vld [vmem:[#allocation2 + $0x18] sm:$0xe]  ;;  %v2825_v35 = vld [vmem:[#allocation2 + $0x1c] sm:$0xf]  ;;  %v8833_v51 = vrot.slane %v2821_v8, 9 }
 0x155   :  { %v2544_v16 = vsel %vm9844_vm11, %v2539_v0, %v2543_v26  ;;  %v1817_v18 = vld [vmem:[#allocation2 + $0x184] sm:$0xf]  ;;  %v2548_v20 = vrot.slane %v2546_v6, 4  ;;  %v2551_v22 = vrot.slane %v2549_v7, 5  ;;  %1297 = vst.msk [vmem:[#allocation2 + $0x190] sm:$0xf] %vm12780_vm7, %v965_v9  ;;  %v10398_v26 = vpop.permute.xlu0 %2697 }
 0x156   :  { %v1818_v19 = vld [vmem:[#allocation2 + $0x188] sm:$0x1]  ;;  %1300 = vst [vmem:[#allocation2 + $0x194] sm:$0x1] %v1299_v59  ;;  %v8829_v28 = vcombine.low %v2534_v56, %v2544_v16  ;;  %v2555_v31 = vshll.u32 %v1817_v18, 16  ;;  %v2559_v32 = vshrl.u32 %v1817_v18, 16  ;;  %v10386_v46 = vsel %vm10368_vm14, %v3017_v11, %v3018_v13 }
 0x157   :  { %v2565_v34 = vshll.u32 %v1818_v19, 16  ;;  %v2826_v38 = vld [vmem:[#allocation2 + $0x20] sm:$0x1]  ;;  %v2552_v39 = vor.u32 %v2551_v22, %v2548_v20  ;;  %v3022_v37 = vrot.slane %v2822_v61, 5  ;;  %v3025_v49 = vrot.slane %v2823_v15, 5  ;;  %12801 = vst [vmem:[#allocation31_spill] sm:$0xff] %v10398_v26 }
 0x158   :  { %2747 = vrot.lane.b32.xlu1 %v8829_v28, %s9657_s29  ;;  %v2557_v36 = vrot.slane %v2555_v31, 5  ;;  %v2561_v41 = vrot.slane %v2559_v32, 4  ;;  %v2827_v27 = vld [vmem:[#allocation2 + $0x24] sm:$0xe]  ;;  %v8834_v54 = vrot.slane %v2824_v23, 9  ;;  %v8864_v55 = vcombine.low %v10381_v40, %v10386_v46  ;;  %12802 = vst [vmem:[#allocation32_spill] sm:$0xff] %v10400_v62 }
 0x159   :  { %v2567_v45 = vrot.slane %v2565_v34, 5  ;;  %v2553_v47 = vrot.slane %v2552_v39, 4  ;;  %v1819_v42 = vld [vmem:[#allocation2 + $0x18c] sm:$0xf]  ;;  %v10390_v48 = vsel %vm10368_vm14, %v8833_v51, %v3022_v37  ;;  %v3024_v43 = vrot.slane %v3022_v37, 4 }
 0x15a   :  { %v2562_v50 = vor.u32 %v2561_v41, %v2557_v36  ;;  %v2570_v29 = vshrl.u32 %v1819_v42, 16  ;;  %v2573_v53 = vshll.u32 %v1819_v42, 16  ;;  %v3029_v21 = vrot.slane %v2825_v35, 5  ;;  %v2828_v60 = vld [vmem:[#allocation2 + $0x28] sm:$0xf] }
 0x15b   :  { %v10396_v57 = vsel %vm10368_vm14, %v3024_v43, %v3025_v49  ;;  %v3032_v58 = vrot.slane %v2826_v38, 5  ;;  %v2829_v12 = vld [vmem:[#allocation2 + $0x2c] sm:$0x1]  ;;  %v2558_v17 = vsel %vm9844_vm11, %v2553_v47, %v2557_v36  ;;  %v2830_v7 = vld [vmem:[#allocation2 + $0x30] sm:$0xe]  ;;  %v8835_v19 = vrot.slane %v2827_v27, 9  ;;  %v10416_v43 = vpop.permute.xlu0 %2701  ;;  %v10418_v49 = vpop.permute.xlu1 %2703 }
 0x15c   :  { %v2563_v30 = vrot.slane %v2562_v50, 4  ;;  %v1820_v63 = vld [vmem:[#allocation2 + $0x190] sm:$0xf]  ;;  %v2572_v0 = vrot.slane %v2570_v29, 4  ;;  %v8865_v6 = vcombine.low %v10390_v48, %v10396_v57  ;;  %v2575_v8 = vrot.slane %v2573_v53, 5  ;;  %12803 = vst [vmem:[#allocation33_spill] sm:$0xff] %v10416_v43 }
 0x15d   :  { %v1821_v56 = vld [vmem:[#allocation2 + $0x194] sm:$0x1]  ;;  %v2579_v9 = vshll.u32 %v1820_v63, 16  ;;  %v2583_v59 = vshrl.u32 %v1820_v63, 16  ;;  %v2832_v61 = vld [vmem:[#allocation2 + $0x38] sm:$0x1]  ;;  %v10410_v16 = vsel %vm10368_vm14, %v8834_v54, %v3029_v21 }
 0x15e   :  { %v2589_v11 = vshll.u32 %v1821_v56, 16  ;;  %v2831_v13 = vld [vmem:[#allocation2 + $0x34] sm:$0xf]  ;;  %v2568_v15 = vsel %vm9844_vm11, %v2563_v30, %v2567_v45  ;;  %v3031_v18 = vrot.slane %v3029_v21, 4  ;;  %v2833_v20 = vld [vmem:[#allocation2 + $0x3c] sm:$0xe]  ;;  %v2576_v28 = vor.u32 %v2575_v8, %v2572_v0 }
 0x15f   :  { %v2834_v22 = vld [vmem:[#allocation2 + $0x40] sm:$0xf]  ;;  %v8830_v23 = vcombine.low %v2558_v17, %v2568_v15  ;;  %v2581_v31 = vrot.slane %v2579_v9, 5  ;;  %v2585_v32 = vrot.slane %v2583_v59, 4  ;;  %v2835_v34 = vld [vmem:[#allocation2 + $0x44] sm:$0x1] }
 0x160   :  { %v2591_v35 = vrot.slane %v2589_v11, 5  ;;  %v3033_v38 = vsel %vm10368_vm14, %v3031_v18, %v3032_v58  ;;  %v3036_v39 = vrot.slane %v2828_v60, 5  ;;  %v3039_v51 = vrot.slane %v2829_v12, 5  ;;  %v2836_v47 = vld [vmem:[#allocation2 + $0x48] sm:$0xe]  ;;  %12804 = vst [vmem:[#allocation34_spill] sm:$0xff] %v10418_v49 }
 0x161   :  { %2749 = vrot.lane.b32.xlu0 %v8830_v23, %s9657_s29  ;;  %v2577_v37 = vrot.slane %v2576_v28, 4  ;;  %v2586_v36 = vor.u32 %v2585_v32, %v2581_v31  ;;  %v8866_v41 = vcombine.low %v10410_v16, %v3033_v38  ;;  %v8836_v45 = vrot.slane %v2830_v7, 9  ;;  %v2837_v42 = vld [vmem:[#allocation2 + $0x4c] sm:$0xf]  ;;  %v2838_v54 = vld [vmem:[#allocation2 + $0x50] sm:$0x1]  ;;  %v10452_v32 = vpop.permute.xlu1 %2707 }
 0x162   :  { %v10422_v27 = vsel %vm10368_vm14, %v8835_v19, %v3036_v39  ;;  %v3038_v50 = vrot.slane %v3036_v39, 4  ;;  %v3043_v29 = vrot.slane %v2831_v13, 5  ;;  %v3046_v53 = vrot.slane %v2832_v61, 5  ;;  %v2839_v21 = vld [vmem:[#allocation2 + $0x54] sm:$0xe]  ;;  %12806 = vst [vmem:[#allocation36_spill] sm:$0xff] %v10452_v32 }
 0x163   :  { %v2582_v58 = vsel %vm9844_vm11, %v2577_v37, %v2581_v31  ;;  %v2587_v60 = vrot.slane %v2586_v36, 4  ;;  %v8837_v12 = vrot.slane %v2833_v20, 9  ;;  %v3050_v17 = vrot.slane %v2834_v22, 5  ;;  %v2840_v30 = vld [vmem:[#allocation2 + $0x58] sm:$0xf]  ;;  %v10450_v31 = vpop.permute.xlu0 %2705 }
 0x164   :  { %v10428_v63 = vsel %vm10368_vm14, %v3038_v50, %v3039_v51  ;;  %v3044_v56 = vsel %vm10368_vm14, %v8836_v45, %v3043_v29  ;;  %v3045_v0 = vrot.slane %v3043_v29, 4  ;;  %v3053_v7 = vrot.slane %v2835_v34, 5  ;;  %v2841_v8 = vld [vmem:[#allocation2 + $0x5c] sm:$0x1]  ;;  %v2842_v9 = vld [vmem:[#allocation2 + $0x60] sm:$0xe] }
 0x165   :  { %v2843_v59 = vld [vmem:[#allocation2 + $0x64] sm:$0xf]  ;;  %v2844_v11 = vld [vmem:[#allocation2 + $0x68] sm:$0x1]  ;;  %v2592_v13 = vsel %vm9844_vm11, %v2587_v60, %v2591_v35  ;;  %3333 = vrot.lane.b32.xlu0 %v8864_v55, %s9676_s3  ;;  %v8867_v61 = vcombine.low %v10422_v27, %v10428_v63  ;;  %v10442_v15 = vsel %vm10368_vm14, %v8837_v12, %v3050_v17  ;;  %v3052_v16 = vrot.slane %v3050_v17, 4  ;;  %12805 = vst [vmem:[#allocation35_spill] sm:$0xff] %v10450_v31 }
 0x166   :  { %v8831_v18 = vcombine.low %v2582_v58, %v2592_v13  ;;  %v3047_v19 = vsel %vm10368_vm14, %v3045_v0, %v3046_v53  ;;  %v8838_v20 = vrot.slane %v2836_v47, 9  ;;  %v3057_v22 = vrot.slane %v2837_v42, 5  ;;  %v3815_v55 = vld [vmem:[#allocation2 + $0xc] sm:$0xf]  ;;  %v3816_v51 = vld [vmem:[#allocation2 + $0x10] sm:$0xf] }
 0x167   :  { %v8868_v23 = vcombine.low %v3044_v56, %v3047_v19  ;;  %v10448_v28 = vsel %vm10368_vm14, %v3052_v16, %v3053_v7  ;;  %v3060_v40 = vrot.slane %v2838_v54, 5  ;;  %v8839_v46 = vrot.slane %v2839_v21, 9  ;;  %v3817_v37 = vld [vmem:[#allocation2 + $0x14] sm:$0x1]  ;;  %v3818_v27 = vld [vmem:[#allocation2 + $0x18] sm:$0xf]  ;;  %v10481_v57 = vpop.permute.xlu0 %2709 }
 0x168   :  { %2751 = vrot.lane.b32.xlu1 %v8831_v18, %s9657_s29  ;;  %v8869_v34 = vcombine.low %v10442_v15, %v10448_v28  ;;  %v3058_v35 = vsel %vm10368_vm14, %v8838_v20, %v3057_v22  ;;  %v3059_v38 = vrot.slane %v3057_v22, 4  ;;  %v3064_v39 = vrot.slane %v2840_v30, 5  ;;  %v3819_v21 = vld [vmem:[#allocation2 + $0x1c] sm:$0xf]  ;;  %v3820_v17 = vld [vmem:[#allocation2 + $0x20] sm:$0x1] }
 0x169   :  { %3337 = vrot.lane.b32.xlu0 %v8866_v41, %s9676_s3  ;;  %v3067_v36 = vrot.slane %v2841_v8, 5  ;;  %v8840_v45 = vrot.slane %v2842_v9, 9  ;;  %v3071_v47 = vrot.slane %v2843_v59, 5  ;;  %v3074_v42 = vrot.slane %v2844_v11, 5  ;;  %v4904_v11 = vld [vmem:[#allocation2 + $0xc] sm:$0xe] }
 0x16a   :  { %v3061_v50 = vsel %vm10368_vm14, %v3059_v38, %v3060_v40  ;;  %v10464_v29 = vsel %vm10368_vm14, %v8839_v46, %v3064_v39  ;;  %v3066_v53 = vrot.slane %v3064_v39, 4  ;;  %v3912_v54 = vshrl.u32 %v3815_v55, 16  ;;  %v4905_v48 = vld [vmem:[#allocation2 + $0x10] sm:$0xf]  ;;  %12807 = vst [vmem:[#allocation37_spill] sm:$0xff] %v10481_v57 }
 0x16b   :  { %v8870_v58 = vcombine.low %v3058_v35, %v3061_v50  ;;  %v3072_v60 = vsel %vm10368_vm14, %v8840_v45, %v3071_v47  ;;  %v3073_v41 = vrot.slane %v3071_v47, 4  ;;  %v3915_v12 = vshll.u32 %v3815_v55, 16  ;;  %v4906_v20 = vld [vmem:[#allocation2 + $0x14] sm:$0x1]  ;;  %v4907_v22 = vld [vmem:[#allocation2 + $0x18] sm:$0xe] }
 0x16c   :  { %3335 = vrot.lane.b32.xlu1 %v8865_v6, %s9676_s3  ;;  %v10474_v30 = vsel %vm10368_vm14, %v3066_v53, %v3067_v36  ;;  %v3914_v63 = vrot.slane %v3912_v54, 4  ;;  %v3921_v56 = vshll.u32 %v3816_v51, 16  ;;  %v3925_v0 = vshrl.u32 %v3816_v51, 16  ;;  %v10483_v6 = vpop.permute.xlu1 %2711  ;;  %v4909_v36 = vld [vmem:[#allocation2 + $0x20] sm:$0x1]  ;;  %v9458_v28 = vld [vmem:[#allocation2 + $0xc] sm:$0xff]  }
 0x16d   :  { %3341 = vrot.lane.b32.xlu0 %v8868_v23, %s9676_s3  ;;  %v8871_v7 = vcombine.low %v10464_v29, %v10474_v30  ;;  %v3075_v8 = vsel %vm10368_vm14, %v3073_v41, %v3074_v42  ;;  %v3917_v9 = vrot.slane %v3915_v12, 5  ;;  %v3931_v59 = vshll.u32 %v3817_v37, 16  ;;  %12808 = vst [vmem:[#allocation38_spill] sm:$0xff] %v10483_v6  ;;  %v4908_v37 = vld [vmem:[#allocation2 + $0x1c] sm:$0xf] }
 0x16e   :  { %v8872_v13 = vcombine.low %v3072_v60, %v3075_v8  ;;  %v3923_v16 = vrot.slane %v3921_v56, 5  ;;  %v3927_v18 = vrot.slane %v3925_v0, 4  ;;  %v3936_v19 = vshrl.u32 %v3818_v27, 16  ;;  %v5899_v53 = vld [vmem:[#allocation2 + $0x18] sm:$0xf]  ;;  %v10489_v56 = vpop.permute.xlu0 %2713 }
 0x16f   :  { %v3918_v23 = vor.u32 %v3917_v9, %v3914_v63  ;;  %v3933_v40 = vrot.slane %v3931_v59, 5  ;;  %v3939_v46 = vshll.u32 %v3818_v27, 16  ;;  %v3945_v55 = vshll.u32 %v3819_v21, 16  ;;  %12809 = vst [vmem:[#allocation39_spill] sm:$0xff] %v10489_v56  ;;  %v5902_v15 = vld [vmem:[#allocation2 + $0x24] sm:$0xf] }
 0x170   :  { %3339 = vrot.lane.b32.xlu1 %v8867_v61, %s9676_s3  ;;  %v3928_v35 = vor.u32 %v3927_v18, %v3923_v16  ;;  %v3938_v38 = vrot.slane %v3936_v19, 4  ;;  %v3949_v39 = vshrl.u32 %v3819_v21, 16  ;;  %v3955_v51 = vshll.u32 %v3820_v17, 16  ;;  %v5900_v17 = vld [vmem:[#allocation2 + $0x1c] sm:$0xf]  ;;  %v10491_v0 = vpop.permute.xlu1 %2715 }
 0x171   :  { %3345 = vrot.lane.b32.xlu0 %v8870_v58, %s9676_s3  ;;  %v3919_v45 = vrot.slane %v3918_v23, 4  ;;  %v3941_v47 = vrot.slane %v3939_v46, 5  ;;  %v3947_v42 = vrot.slane %v3945_v55, 5  ;;  %v8960_v50 = vrot.slane %v4904_v11, 9  ;;  %12810 = vst [vmem:[#allocation40_spill] sm:$0xff] %v10491_v0 }
 0x172   :  { %v3929_v54 = vrot.slane %v3928_v35, 4  ;;  %v3951_v60 = vrot.slane %v3949_v39, 4  ;;  %v3957_v41 = vrot.slane %v3955_v51, 5  ;;  %v5098_v27 = vrot.slane %v4905_v48, 5  ;;  %v5901_v11 = vld [vmem:[#allocation2 + $0x20] sm:$0x1] }
 0x173   :  { %v3924_v61 = vsel %vm9844_vm11, %v3919_v45, %v3923_v16  ;;  %v3942_v12 = vor.u32 %v3941_v47, %v3938_v38  ;;  %v5101_v63 = vrot.slane %v4906_v20, 5  ;;  %v8961_v21 = vrot.slane %v4907_v22, 9  ;;  %v9459_v48 = vld [vmem:[#allocation2 + $0x18] sm:$0xff]   ;;  %v5903_v46 = vld [vmem:[#allocation2 + $0x28] sm:$0xf] }
 0x174   :  { %3343 = vrot.lane.b32.xlu1 %v8869_v34, %s9676_s3  ;;  %v3934_v58 = vsel %vm9844_vm11, %v3929_v54, %v3933_v40  ;;  %v3952_v8 = vor.u32 %v3951_v60, %v3947_v42  ;;  %v10501_v9 = vsel %vm10368_vm14, %v8960_v50, %v5098_v27  ;;  %v5100_v59 = vrot.slane %v5098_v27, 4  ;;  %v5904_v39 = vld [vmem:[#allocation2 + $0x2c] sm:$0x1]  ;;  %v6988_v47 = vld [vmem:[#allocation2 + $0x18] sm:$0xe]  ;;  %v10525_v60 = vpop.permute.xlu0 %2717  ;;  %v10527_v29 = vpop.permute.xlu1 %2719 }
 0x175   :  { %3349 = vrot.lane.b32.xlu0 %v8872_v13, %s9676_s3  ;;  %v10504_v16 = vcombine.low %v3924_v61, %v3934_v58  ;;  %v3943_v18 = vrot.slane %v3942_v12, 4  ;;  %v5105_v19 = vrot.slane %v4908_v37, 5  ;;  %v5108_v20 = vrot.slane %v4909_v36, 5  ;;  %12811 = vst [vmem:[#allocation41_spill] sm:$0xff] %v10525_v60  ;;  %12812 = vst [vmem:[#allocation42_spill] sm:$0xff] %v10527_v29  ;;  %v10658_v29 = vld [vmem:[#allocation2 + $0x168] sm:$0xff]  }
 0x176   :  { %v3953_v34 = vrot.slane %v3952_v8, 4  ;;  %v10508_v22 = vsel %vm10368_vm14, %v5100_v59, %v5101_v63  ;;  %v5996_v23 = vshrl.u32 %v5899_v53, 16  ;;  %v5999_v40 = vshll.u32 %v5899_v53, 16  ;;  %v6989_v61 = vld [vmem:[#allocation2 + $0x1c] sm:$0xf] }
 0x177   :  { %v3948_v55 = vsel %vm9844_vm11, %v3943_v18, %v3947_v42  ;;  %v8992_v13 = vcombine.low %v10501_v9, %v10508_v22  ;;  %v5106_v35 = vsel %vm10368_vm14, %v8961_v21, %v5105_v19  ;;  %v5107_v38 = vrot.slane %v5105_v19, 4  ;;  %v6990_v12 = vld [vmem:[#allocation2 + $0x20] sm:$0x1]  ;;  %v6991_v59 = vld [vmem:[#allocation2 + $0x24] sm:$0xe] }
 0x178   :  { %3347 = vrot.lane.b32.xlu1 %v8871_v7, %s9676_s3  ;;  %v3958_v51 = vsel %vm9844_vm11, %v3953_v34, %v3957_v41  ;;  %v5998_v37 = vrot.slane %v5996_v23, 4  ;;  %v6001_v36 = vrot.slane %v5999_v40, 5  ;;  %v6005_v45 = vshll.u32 %v5900_v17, 16  ;;  %v6992_v19 = vld [vmem:[#allocation2 + $0x28] sm:$0xf] }
 0x179   :  { %3688 = vrot.lane.b32.xlu0 %v9459_v48, %s9677_s21  ;;  %v8929_v42 = vcombine.low %v3948_v55, %v3958_v51  ;;  %v5109_v50 = vsel %vm10368_vm14, %v5107_v38, %v5108_v20  ;;  %v6009_v53 = vshrl.u32 %v5900_v17, 16  ;;  %v6015_v54 = vshll.u32 %v5901_v11, 16  ;;  %v6993_v55 = vld [vmem:[#allocation2 + $0x2c] sm:$0x1]  ;;  %v10671_v43 = vld [vmem:[#allocation2 + $0x30] sm:$0xe] }
 0x17a   :  { %v8993_v30 = vcombine.low %v5106_v35, %v5109_v50  ;;  %v6002_v7 = vor.u32 %v6001_v36, %v5998_v37  ;;  %v6007_v41 = vrot.slane %v6005_v45, 5  ;;  %v6020_v27 = vshrl.u32 %v5902_v15, 16  ;;  %v3822_v45 = vld [vmem:[#allocation2 + $0x28] sm:$0xf]  ;;  %v10533_v50 = vpop.permute.xlu0 %2721  ;;  %v10677_v26 = vld [vmem:[#allocation2 + $0x38] sm:$0x1] }
 0x17b   :  { %v6011_v63 = vrot.slane %v6009_v53, 4  ;;  %v6017_v21 = vrot.slane %v6015_v54, 5  ;;  %v6023_v58 = vshll.u32 %v5902_v15, 16  ;;  %v6029_v8 = vshll.u32 %v5903_v46, 16  ;;  %12813 = vst [vmem:[#allocation43_spill] sm:$0xff] %v10533_v50  ;;  %v10656_v50 = vld [vmem:[#allocation2 + $0x15c] sm:$0xff]  }
 0x17c   :  { %3686 = vrot.lane.b32.xlu1 %v9458_v28, %s9677_s21  ;;  %v6003_v48 = vrot.slane %v6002_v7, 4  ;;  %v6022_v17 = vrot.slane %v6020_v27, 4  ;;  %v6033_v11 = vshrl.u32 %v5903_v46, 16  ;;  %v6039_v18 = vshll.u32 %v5904_v39, 16  ;;  %v3821_v28 = vld [vmem:[#allocation2 + $0x24] sm:$0xf] }
 0x17d   :  { %4777 = vrot.lane.b32.xlu0 %v8929_v42, %s9678_s22  ;;  %v6012_v20 = vor.u32 %v6011_v63, %v6007_v41  ;;  %v6025_v34 = vrot.slane %v6023_v58, 5  ;;  %v6031_v23 = vrot.slane %v6029_v8, 5  ;;  %v9088_v40 = vrot.slane %v6988_v47, 9  ;;  %v10535_v42 = vpop.permute.xlu1 %2723  ;;  %v9461_v27 = vld [vmem:[#allocation2 + $0x24] sm:$0xff]   ;;  %v10546_v8 = vld [vmem:[#allocation2 + $0x18] sm:$0xff]  }
 0x17e   :  { %v6008_v15 = vsel %vm9844_vm11, %v6003_v48, %v6007_v41  ;;  %v6035_v35 = vrot.slane %v6033_v11, 4  ;;  %v6041_v38 = vrot.slane %v6039_v18, 5  ;;  %v7182_v51 = vrot.slane %v6989_v61, 5  ;;  %12814 = vst [vmem:[#allocation44_spill] sm:$0xff] %v10535_v42  ;;  %v3823_v41 = vld [vmem:[#allocation2 + $0x2c] sm:$0x1] }
 0x17f   :  { %v6013_v37 = vrot.slane %v6012_v20, 4  ;;  %v6026_v36 = vor.u32 %v6025_v34, %v6022_v17  ;;  %v7185_v46 = vrot.slane %v6990_v12, 5  ;;  %v9089_v39 = vrot.slane %v6991_v59, 9  ;;  %v10560_v11 = vld [vmem:[#allocation2 + $0x34] sm:$0xf]  ;;  %v10630_v18 = vld [vmem:[#allocation2 + $0xa8] sm:$0xff]  }
 0x180   :  { %4775 = vrot.lane.b32.xlu1 %v10504_v16, %s9678_s22  ;;  %v6036_v47 = vor.u32 %v6035_v35, %v6031_v23  ;;  %v10541_v53 = vsel %vm10368_vm14, %v9088_v40, %v7182_v51  ;;  %v7184_v54 = vrot.slane %v7182_v51, 4  ;;  %v7189_v7 = vrot.slane %v6992_v19, 5  ;;  %v10568_v34 = vld [vmem:[#allocation2 + $0x38] sm:$0x1]  ;;  %v10578_v51 = vld [vmem:[#allocation2 + $0x28] sm:$0xf] }
 0x181   :  { %12815 = vst [vmem:[#allocation45_spill] sm:$0xff] %v10541_v53  ;;  %5418 = vrot.lane.b32.xlu0 %v8993_v30, %s9679_s23  ;;  %v6018_v61 = vsel %vm9844_vm11, %v6013_v37, %v6017_v21  ;;  %v6027_v12 = vrot.slane %v6026_v36, 4  ;;  %v7192_v63 = vrot.slane %v6993_v55, 5  ;;  %v3960_v58 = vshrl.u32 %v3821_v28, 16  ;;  %v10558_v30 = vld [vmem:[#allocation2 + $0x30] sm:$0xf] }
 0x182   :  { %v10548_v16 = vcombine.low %v6008_v15, %v6018_v61  ;;  %v6037_v59 = vrot.slane %v6036_v47, 4  ;;  %v10552_v48 = vsel %vm10368_vm14, %v7184_v54, %v7185_v46  ;;  %v10556_v17 = vsel %vm10368_vm14, %v9089_v39, %v7189_v7  ;;  %v10594_v47 = vld [vmem:[#allocation2 + $0x2c] sm:$0x1]  ;;  %v10602_v61 = vld [vmem:[#allocation2] sm:$0xff]   ;;  %v10654_v42 = vld [vmem:[#allocation2 + $0x150] sm:$0xff]  }
 0x183   :  { %12816 = vst [vmem:[#allocation46_spill] sm:$0xff] %v10552_v48  ;;  %v6032_v21 = vsel %vm9844_vm11, %v6027_v12, %v6031_v23  ;;  %v7191_v19 = vrot.slane %v7189_v7, 4  ;;  %v10566_v20 = vrot.slane %v3960_v58, 4  ;;  %v3963_v55 = vshll.u32 %v3821_v28, 16  ;;  %v10576_v23 = vld [vmem:[#allocation2 + $0x24] sm:$0xe] }
 0x184   :  { %5416 = vrot.lane.b32.xlu1 %v8992_v13, %s9679_s23  ;;  %v6042_v40 = vsel %vm9844_vm11, %v6037_v59, %v6041_v38  ;;  %v3969_v15 = vshll.u32 %v3822_v45, 16  ;;  %v3973_v35 = vshrl.u32 %v3822_v45, 16  ;;  %v3979_v9 = vshll.u32 %v3823_v41, 16  ;;  %v10586_v13 = vpop.permute.xlu0 %2725  ;;  %v10588_v38 = vpop.permute.xlu1 %2727  ;;  %v10604_v12 = vld [vmem:[#allocation2 + $0x18] sm:$0xff]   ;;  %v10608_v58 = vld [vmem:[#allocation2 + $0x24] sm:$0xff]   ;;  %v10610_v59 = vld [vmem:[#allocation2 + $0x30] sm:$0xff]  }
 0x185   :  { %5772 = vrot.lane.b32.xlu0 %v9461_v27, %s9680_s24  ;;  %v9057_v37 = vcombine.low %v6032_v21, %v6042_v40  ;;  %v10583_v36 = vsel %vm10368_vm14, %v7191_v19, %v7192_v63  ;;  %v3984_v22 = vshrl.u32 %v10558_v30, 16  ;;  %12817 = vst [vmem:[#allocation47_spill] sm:$0xff] %v10586_v13  ;;  %12818 = vst [vmem:[#allocation48_spill] sm:$0xff] %v10588_v38  ;;  %v3965_v46 = vrot.slane %v3963_v55, 5  ;;  %v10606_v63 = vld [vmem:[#allocation2 + $0xc] sm:$0xff]   ;;  %v10612_v21 = vld [vmem:[#allocation2 + $0x3c] sm:$0xff]  }
 0x186   :  { %v10592_v39 = vrot.slane %v3969_v15, 5  ;;  %v3975_v45 = vrot.slane %v3973_v35, 4  ;;  %v10596_v54 = vrot.slane %v3979_v9, 5  ;;  %v3987_v41 = vshll.u32 %v10558_v30, 16  ;;  %v10614_v19 = vld [vmem:[#allocation2 + $0x48] sm:$0xff]   ;;  %v10616_v40 = vld [vmem:[#allocation2 + $0x54] sm:$0xff]  }
 0x187   :  { %v10598_v7 = vrot.slane %v3984_v22, 4  ;;  %v3993_v27 = vshll.u32 %v10560_v11, 16  ;;  %v10618_v55 = vld [vmem:[#allocation2 + $0x60] sm:$0xff]   ;;  %v10620_v30 = vld [vmem:[#allocation2 + $0x6c] sm:$0xff]   ;;  %v10622_v15 = vld [vmem:[#allocation2 + $0x78] sm:$0xff]   ;;  %v3966_v60 = vor.u32 %v3965_v46, %v10566_v20  ;;  %v3997_v56 = vshrl.u32 %v10560_v11, 16 }
 0x188   :  { %v10624_v35 = vld [vmem:[#allocation2 + $0x84] sm:$0xff]   ;;  %v10626_v9 = vld [vmem:[#allocation2 + $0x90] sm:$0xff]   ;;  %v10628_v22 = vld [vmem:[#allocation2 + $0x9c] sm:$0xff]   ;;  %5770 = vrot.lane.b32.xlu1 %v10546_v8, %s9680_s24  ;;  %v3976_v0 = vor.u32 %v3975_v45, %v10592_v39  ;;  %v4003_v6 = vshll.u32 %v10568_v34, 16  ;;  %v3989_v57 = vrot.slane %v3987_v41, 5  ;;  %v8962_v31 = vrot.slane %v10576_v23, 9 }
 0x189   :  { %v10632_v28 = vld [vmem:[#allocation2 + $0xb4] sm:$0xff]   ;;  %v10646_v48 = vld [vmem:[#allocation2 + $0x120] sm:$0xff]   ;;  %v10648_v53 = vld [vmem:[#allocation2 + $0x12c] sm:$0xff]   ;;  %6861 = vrot.lane.b32.xlu0 %v9057_v37, %s9681_s25  ;;  %v10667_v32 = vrot.slane %v3993_v27, 5  ;;  %v5112_v49 = vrot.slane %v10578_v51, 5  ;;  %v3967_v45 = vrot.slane %v3966_v60, 4  ;;  %v10689_v60 = vpop.permute.xlu0 %2729 }
 0x18a   :  { %v10650_v38 = vld [vmem:[#allocation2 + $0x138] sm:$0xff]   ;;  %v10652_v13 = vld [vmem:[#allocation2 + $0x144] sm:$0xff]   ;;  %v10673_v8 = vld [vmem:[#allocation2 + $0x34] sm:$0xf]  ;;  %v3977_v11 = vrot.slane %v3976_v0, 4  ;;  %v3999_v62 = vrot.slane %v3997_v56, 4  ;;  %v3990_v41 = vor.u32 %v3989_v57, %v10598_v7  ;;  %v10691_v56 = vpop.permute.xlu1 %2731  ;;  %v12819_v0 = vcombine.low %v10556_v17, %v10583_v36 }
 0x18b   :  { %v9503_v20 = vld [vmem:[#allocation2 + $0x174] sm:$0xff]   ;;  %v9504_v46 = vld [vmem:[#allocation2 + $0x180] sm:$0xff]   ;;  %v10675_v34 = vrot.slane %v4003_v6, 5  ;;  %v10684_v23 = vsel %vm10368_vm14, %v8962_v31, %v5112_v49  ;;  %v5114_v51 = vrot.slane %v5112_v49, 4  ;;  %v5115_v27 = vrot.slane %v10594_v47, 5  ;;  %v10702_v6 = vld [vmem:[#allocation2 + $0x18c] sm:$0xff]  }
 0x18c   :  { %v10679_v37 = vld [vmem:[#allocation2 + $0x30] sm:$0xff]   ;;  %6859 = vrot.lane.b32.xlu1 %v10548_v16, %s9681_s25  ;;  %v3972_v57 = vsel %vm9844_vm11, %v3967_v45, %v10592_v39  ;;  %v3982_v31 = vsel %vm9844_vm11, %v3977_v11, %v10596_v54  ;;  %v4000_v49 = vor.u32 %v3999_v62, %v10667_v32  ;;  %vm1693_vm15 = vcmask 31744   ;;  %v12830_v17 = vld [vmem:[#allocation40_spill] sm:$0xff] }
 0x18d   :  { %v10687_v14 = vld [vmem:[#allocation2 + $0x30] sm:$0xf]  ;;  %7502 = vrot.lane.b32.xlu0 %v12819_v0, %s9682_s26  ;;  %v10708_v16 = vcombine.low %v3972_v57, %v3982_v31  ;;  %v10710_v47 = vrot.slane %v3990_v41, 4  ;;  %v10714_v39 = vsel %vm10368_vm14, %v5114_v51, %v5115_v27  ;;  %vm2785_vm0 = vcmask 64544   ;;  %1694 = vst.msk [vmem:[#allocation3] sm:$0xff] %vm1693_vm15, %v10602_v61  ;;  %1696 = vst.msk [vmem:[#allocation3 + $0x10] sm:$0xff] %vm1693_vm15, %v10604_v12 }
 0x18e   :  { %1695 = vst.msk [vmem:[#allocation3 + $0x8] sm:$0xff] %vm1693_vm15, %v10606_v63  ;;  %1697 = vst.msk [vmem:[#allocation3 + $0x18] sm:$0xff] %vm1693_vm15, %v10608_v58  ;;  %v10724_v62 = vld [vmem:[#allocation2 + $0x34] sm:$0xf]  ;;  %v12836_v54 = vld [vmem:[#allocation48_spill] sm:$0xff]  ;;  %v5122_v12 = vrot.slane %v10677_v26, 5 }
 0x18f   :  { %1698 = vst.msk [vmem:[#allocation3 + $0x20] sm:$0xff] %vm1693_vm15, %v10610_v59  ;;  %1699 = vst.msk [vmem:[#allocation3 + $0x28] sm:$0xff] %vm1693_vm15, %v10612_v21  ;;  %v12832_v36 = vld [vmem:[#allocation42_spill] sm:$0xff]  ;;  %v9462_v7 = vld [vmem:[#allocation2 + $0x24] sm:$0xff]   ;;  %v3996_v61 = vsel %vm9844_vm11, %v10710_v47, %v10667_v32  ;;  %v6044_v63 = vshrl.u32 %v10687_v14, 16  ;;  %v6047_v58 = vshll.u32 %v10687_v14, 16 }
 0x190   :  { %1700 = vst.msk [vmem:[#allocation3 + $0x30] sm:$0xff] %vm1693_vm15, %v10614_v19  ;;  %1701 = vst.msk [vmem:[#allocation3 + $0x38] sm:$0xff] %vm1693_vm15, %v10616_v40  ;;  %v5908_v59 = vld [vmem:[#allocation2 + $0x3c] sm:$0xf]  ;;  %v12837_v21 = vld [vmem:[#allocation45_spill] sm:$0xff]  ;;  %v6053_v26 = vshll.u32 %v10724_v62, 16  ;;  %v2734_v31 = vpop.permute.xlu0 %2733 }
 0x191   :  { %1702 = vst.msk [vmem:[#allocation3 + $0x40] sm:$0xff] %vm1693_vm15, %v10618_v55  ;;  %1703 = vst.msk [vmem:[#allocation3 + $0x48] sm:$0xff] %vm1693_vm15, %v10620_v30  ;;  %v12838_v19 = vld [vmem:[#allocation46_spill] sm:$0xff]  ;;  %3692 = vrot.lane.b32.xlu0 %v10679_v37, %s9677_s21  ;;  %v6068_v41 = vshrl.u32 %v5908_v59, 16  ;;  %vm3429_vm1 = vcmask 97344   ;;  %vm3782_vm2 = vcmask 130144  }
 0x192   :  { %1704 = vst.msk [vmem:[#allocation3 + $0x50] sm:$0xff] %vm1693_vm15, %v10622_v15  ;;  %1705 = vst.msk [vmem:[#allocation3 + $0x58] sm:$0xff] %vm1693_vm15, %v10624_v35  ;;  %v12839_v40 = vcombine.low %v12837_v21, %v12838_v19  ;;  %v5909_v15 = vld [vmem:[#allocation2 + $0x40] sm:$0xf]  ;;  %v5910_v35 = vld [vmem:[#allocation2 + $0x44] sm:$0x1] }
 0x193   :  { %1706 = vst.msk [vmem:[#allocation3 + $0x60] sm:$0xff] %vm1693_vm15, %v10626_v9  ;;  %1707 = vst.msk [vmem:[#allocation3 + $0x68] sm:$0xff] %vm1693_vm15, %v10628_v22  ;;  %v6046_v9 = vrot.slane %v6044_v63, 4  ;;  %v6049_v22 = vrot.slane %v6047_v58, 5  ;;  %v6055_v11 = vrot.slane %v6053_v26, 5  ;;  %v6081_v0 = vshrl.u32 %v5909_v15, 16 }
 0x194   :  { %1708 = vst.msk [vmem:[#allocation3 + $0x70] sm:$0xff] %vm1693_vm15, %v10630_v18  ;;  %1709 = vst.msk [vmem:[#allocation3 + $0x78] sm:$0xff] %vm1693_vm15, %v10632_v28  ;;  %v12831_v18 = vld [vmem:[#allocation41_spill] sm:$0xff]  ;;  %v12835_v28 = vld [vmem:[#allocation47_spill] sm:$0xff]  ;;  %7500 = vrot.lane.b32.xlu1 %v12839_v40, %s9682_s26  ;;  %vm4871_vm3 = vcmask 162944   ;;  %vm5512_vm9 = vcmask 195744  }
 0x195   :  { %1710 = vst.msk [vmem:[#allocation3 + $0x80] sm:$0xff] %vm1693_vm15, %v10634_v4  ;;  %1711 = vst.msk [vmem:[#allocation3 + $0x88] sm:$0xff] %vm1693_vm15, %v10636_v1  ;;  %v4001_v1 = vrot.slane %v4000_v49, 4  ;;  %v5119_v4 = vrot.slane %v10673_v8, 5  ;;  %v6057_v8 = vshrl.u32 %v10724_v62, 16  ;;  %v6050_v27 = vor.u32 %v6049_v22, %v6046_v9  ;;  %v9466_v58 = vld [vmem:[#allocation2 + $0x30] sm:$0xff]  }
 0x196   :  { %1712 = vst.msk [vmem:[#allocation3 + $0x90] sm:$0xff] %vm1693_vm15, %v10638_v33  ;;  %1713 = vst.msk [vmem:[#allocation3 + $0x98] sm:$0xff] %vm1693_vm15, %v10640_v5  ;;  %v12820_v5 = vld [vmem:[#allocation30_spill] sm:$0xff]  ;;  %v6070_v49 = vrot.slane %v6068_v41, 4  ;;  %v3830_v40 = vld [vmem:[#allocation2 + $0x48] sm:$0xf] }
 0x197   :  { %1714 = vst.msk [vmem:[#allocation3 + $0xa0] sm:$0xff] %vm1693_vm15, %v10642_v2  ;;  %1715 = vst.msk [vmem:[#allocation3 + $0xa8] sm:$0xff] %vm1693_vm15, %v10644_v3  ;;  %v8994_v2 = vcombine.low %v10684_v23, %v10714_v39  ;;  %v8963_v3 = vrot.slane %v10671_v43, 9  ;;  %v5907_v33 = vld [vmem:[#allocation2 + $0x38] sm:$0x1]  ;;  %v12825_v43 = vld [vmem:[#allocation35_spill] sm:$0xff]  ;;  %v4006_v55 = vsel %vm9844_vm11, %v4001_v1, %v10675_v34 }
 0x198   :  { %1716 = vst.msk [vmem:[#allocation3 + $0xb0] sm:$0xff] %vm1693_vm15, %v10646_v48  ;;  %1717 = vst.msk [vmem:[#allocation3 + $0xb8] sm:$0xff] %vm1693_vm15, %v10648_v53  ;;  %v12828_v53 = vld [vmem:[#allocation38_spill] sm:$0xff]  ;;  %v12829_v48 = vld [vmem:[#allocation39_spill] sm:$0xff]  ;;  %v5121_v32 = vrot.slane %v5119_v4, 4  ;;  %v8931_v14 = vcombine.low %v3996_v61, %v4006_v55  ;;  %v6063_v34 = vshll.u32 %v5907_v33, 16  ;;  %3690 = vrot.lane.b32.xlu1 %v9462_v7, %s9677_s21  ;;  %v2736_v55 = vpop.permute.xlu1 %2735 }
 0x199   :  { %1718 = vst.msk [vmem:[#allocation3 + $0xc0] sm:$0xff] %vm1693_vm15, %v10650_v38  ;;  %1719 = vst.msk [vmem:[#allocation3 + $0xc8] sm:$0xff] %vm1693_vm15, %v10652_v13  ;;  %v12833_v13 = vld [vmem:[#allocation43_spill] sm:$0xff]  ;;  %v12834_v38 = vld [vmem:[#allocation44_spill] sm:$0xff]  ;;  %v5120_v30 = vsel %vm10368_vm14, %v8963_v3, %v5119_v4  ;;  %v6051_v62 = vrot.slane %v6050_v27, 4  ;;  %v6087_v4 = vshll.u32 %v5910_v35, 16 }
 0x19a   :  { %1720 = vst.msk [vmem:[#allocation3 + $0xd0] sm:$0xff] %vm1693_vm15, %v10654_v42  ;;  %1721 = vst.msk [vmem:[#allocation3 + $0xd8] sm:$0xff] %vm1693_vm15, %v10656_v50  ;;  %v12822_v50 = vld [vmem:[#allocation32_spill] sm:$0xff]  ;;  %v12827_v42 = vld [vmem:[#allocation37_spill] sm:$0xff]  ;;  %v5123_v45 = vsel %vm10368_vm14, %v5121_v32, %v5122_v12  ;;  %v6065_v37 = vrot.slane %v6063_v34, 5  ;;  %4781 = vrot.lane.b32.xlu0 %v8931_v14, %s9678_s22  ;;  %vm5866_vm10 = vcmask 228544  }
 0x19b   :  { %1722 = vst.msk [vmem:[#allocation3 + $0xe0] sm:$0xff] %vm1693_vm15, %v10658_v29  ;;  %1723 = vst.msk [vmem:[#allocation3 + $0xe8] sm:$0xff] %vm1693_vm15, %v9503_v20  ;;  %v12821_v29 = vld [vmem:[#allocation31_spill] sm:$0xff]  ;;  %v6994_v20 = vld [vmem:[#allocation2 + $0x30] sm:$0xe]  ;;  %v8995_v51 = vcombine.low %v5120_v30, %v5123_v45  ;;  %vm6955_vm12 = vcmask 261344  }
 0x19c   :  { %1724 = vst.msk [vmem:[#allocation3 + $0xf0] sm:$0xff] %vm1693_vm15, %v9504_v46  ;;  %1725 = vst.msk [vmem:[#allocation3 + $0xf8] sm:$0xff] %vm1693_vm15, %v10702_v6  ;;  %v6995_v46 = vld [vmem:[#allocation2 + $0x34] sm:$0xf]  ;;  %v6996_v57 = vld [vmem:[#allocation2 + $0x38] sm:$0x1]  ;;  %4779 = vrot.lane.b32.xlu1 %v10708_v16, %s9678_s22 }
 0x19d   :  { %2786 = vst.msk [vmem:[#allocation3] sm:$0xff] %vm2785_vm0, %v10353_v25  ;;  %2788 = vst.msk [vmem:[#allocation3 + $0x10] sm:$0xff] %vm2785_vm0, %v10355_v52  ;;  %v12823_v25 = vld [vmem:[#allocation33_spill] sm:$0xff]  ;;  %v12824_v52 = vld [vmem:[#allocation34_spill] sm:$0xff]  ;;  %v6077_v6 = vshll.u32 %v5909_v15, 16  ;;  %vm7778_vm13 = vcmask 1041408  }
 0x19e   :  { %2787 = vst.msk [vmem:[#allocation3 + $0x8] sm:$0xff] %vm2785_vm0, %v10375_v24  ;;  %2789 = vst.msk [vmem:[#allocation3 + $0x18] sm:$0xff] %vm2785_vm0, %v12820_v5  ;;  %v12826_v24 = vld [vmem:[#allocation36_spill] sm:$0xff]  ;;  %v6997_v47 = vld [vmem:[#allocation2 + $0x3c] sm:$0xe]  ;;  %5422 = vrot.lane.b32.xlu0 %v8995_v51, %s9679_s23  ;;  %vm7596_vm15 = vcmask 294144  }
 0x19f   :  { %2790 = vst.msk [vmem:[#allocation3 + $0x20] sm:$0xff] %vm2785_vm0, %v12821_v29  ;;  %2791 = vst.msk [vmem:[#allocation3 + $0x28] sm:$0xff] %vm2785_vm0, %v12822_v50  ;;  %v6998_v5 = vld [vmem:[#allocation2 + $0x40] sm:$0xf]  ;;  %v6079_v33 = vrot.slane %v6077_v6, 5  ;;  %v6083_v29 = vrot.slane %v6081_v0, 4 }
 0x1a0   :  { %2792 = vst.msk [vmem:[#allocation3 + $0x30] sm:$0xff] %vm2785_vm0, %v12823_v25  ;;  %2793 = vst.msk [vmem:[#allocation3 + $0x38] sm:$0xff] %vm2785_vm0, %v12824_v52  ;;  %v9090_v50 = vrot.slane %v6994_v20, 9  ;;  %v7196_v25 = vrot.slane %v6995_v46, 5  ;;  %v6999_v52 = vld [vmem:[#allocation2 + $0x44] sm:$0x1]  ;;  %5420 = vrot.lane.b32.xlu1 %v8994_v2, %s9679_s23 }
 0x1a1   :  { %2794 = vst.msk [vmem:[#allocation3 + $0x40] sm:$0xff] %vm2785_vm0, %v12825_v43  ;;  %2795 = vst.msk [vmem:[#allocation3 + $0x48] sm:$0xff] %vm2785_vm0, %v12826_v24  ;;  %v6056_v43 = vsel %vm9844_vm11, %v6051_v62, %v6055_v11  ;;  %v9091_v12 = vrot.slane %v6997_v47, 9  ;;  %v7203_v63 = vrot.slane %v6998_v5, 5  ;;  %v7206_v19 = vrot.slane %v6999_v52, 5  ;;  %v9512_v35 = vld [vmem:[#allocation10] sm:$0xff]   ;;  %v2738_v62 = vpop.permute.xlu0 %2737 }
 0x1a2   :  { %2796 = vst.msk [vmem:[#allocation3 + $0x50] sm:$0xff] %vm2785_vm0, %v12827_v42  ;;  %2797 = vst.msk [vmem:[#allocation3 + $0x58] sm:$0xff] %vm2785_vm0, %v12828_v53  ;;  %v6089_v53 = vrot.slane %v6087_v4, 5  ;;  %v3831_v20 = vld [vmem:[#allocation2 + $0x4c] sm:$0xf]  ;;  %v9513_v46 = vld [vmem:[#allocation10 + $0x8] sm:$0xff]   ;;  %9350 = vmatprep.subr.bf16.mxu0 %v9512_v35  ;;  %9420 = vmatprep.subr.bf16.mxu1 %v9512_v35 }
 0x1a3   :  { %2798 = vst.msk [vmem:[#allocation3 + $0x60] sm:$0xff] %vm2785_vm0, %v12829_v48  ;;  %2799 = vst.msk [vmem:[#allocation3 + $0x68] sm:$0xff] %vm2785_vm0, %v12830_v17  ;;  %v3827_v48 = vld [vmem:[#allocation2 + $0x3c] sm:$0xf]  ;;  %v3828_v17 = vld [vmem:[#allocation2 + $0x40] sm:$0xf]  ;;  %v10876_v26 = vsel %vm10368_vm14, %v9091_v12, %v7203_v63  ;;  %9351 = vmatpush3.bf16.msra.mxu0 %v9512_v35  ;;  %9423 = vmatpush3.bf16.msra.mxu1 %v9512_v35 }
 0x1a4   :  { %2800 = vst.msk [vmem:[#allocation3 + $0x70] sm:$0xff] %vm2785_vm0, %v12831_v18  ;;  %2801 = vst.msk [vmem:[#allocation3 + $0x78] sm:$0xff] %vm2785_vm0, %v12832_v36  ;;  %v6084_v18 = vor.u32 %v6083_v29, %v6079_v33  ;;  %v10859_v36 = vsel %vm10368_vm14, %v9090_v50, %v7196_v25  ;;  %v7205_v15 = vrot.slane %v7203_v63, 4  ;;  %v4008_v9 = vshrl.u32 %v3827_v48, 16  ;;  %v3832_v51 = vld [vmem:[#allocation2 + $0x50] sm:$0x1]  ;;  %9352 = vmatprep.subr.bf16.mxu0 %v9513_v46 }
 0x1a5   :  { %2802 = vst.msk [vmem:[#allocation3 + $0x80] sm:$0xff] %vm2785_vm0, %v12833_v13  ;;  %2803 = vst.msk [vmem:[#allocation3 + $0x88] sm:$0xff] %vm2785_vm0, %v12834_v38  ;;  %v7198_v13 = vrot.slane %v7196_v25, 4  ;;  %v7199_v38 = vrot.slane %v6996_v57, 5  ;;  %v4011_v22 = vshll.u32 %v3827_v48, 16  ;;  %v4021_v34 = vshrl.u32 %v3828_v17, 16  ;;  %5774 = vrot.lane.b32.xlu1 %v9466_v58, %s9680_s24  ;;  %9421 = vmatprep.subr.bf16.mxu1 %v9513_v46 }
 0x1a6   :  { %2804 = vst.msk [vmem:[#allocation3 + $0x90] sm:$0xff] %vm2785_vm0, %v12835_v28  ;;  %2805 = vst.msk [vmem:[#allocation3 + $0x98] sm:$0xff] %vm2785_vm0, %v12836_v54  ;;  %v3829_v28 = vld [vmem:[#allocation2 + $0x44] sm:$0x1]  ;;  %v9469_v54 = vld [vmem:[#allocation2 + $0x3c] sm:$0xff]   ;;  %v6085_v16 = vrot.slane %v6084_v18, 4 }
 0x1a7   :  { %2806 = vst.msk [vmem:[#allocation3 + $0xa0] sm:$0xff] %vm2785_vm0, %v10689_v60  ;;  %2807 = vst.msk [vmem:[#allocation3 + $0xa8] sm:$0xff] %vm2785_vm0, %v10691_v56  ;;  %v6059_v60 = vrot.slane %v6057_v8, 4  ;;  %v6071_v56 = vshll.u32 %v5908_v59, 16  ;;  %v10868_v21 = vsel %vm10368_vm14, %v7198_v13, %v7199_v38  ;;  %v4017_v8 = vshll.u32 %v3828_v17, 16  ;;  %5776 = vrot.lane.b32.xlu0 %v9469_v54, %s9680_s24  ;;  %9353 = vmatpush3.bf16.msra.mxu0 %v9513_v46 }
 0x1a8   :  { %2808 = vst.msk [vmem:[#allocation3 + $0xb0] sm:$0xff] %vm2785_vm0, %v2734_v31  ;;  %v9122_v32 = vcombine.low %v10859_v36, %v10868_v21  ;;  %2809 = vst.msk [vmem:[#allocation3 + $0xb8] sm:$0xff] %vm2785_vm0, %v2736_v55  ;;  %v6090_v14 = vsel %vm9844_vm11, %v6085_v16, %v6089_v53  ;;  %v4027_v41 = vshll.u32 %v3829_v28, 16  ;;  %v4916_v27 = vld [vmem:[#allocation2 + $0x3c] sm:$0xe]  ;;  %v4010_v39 = vrot.slane %v4008_v9, 4  ;;  %9424 = vmatpush3.bf16.msra.mxu1 %v9513_v46 }
 0x1a9   :  { %v6060_v1 = vor.u32 %v6059_v60, %v6055_v11  ;;  %v6073_v3 = vrot.slane %v6071_v56, 5  ;;  %v7207_v11 = vsel %vm10368_vm14, %v7205_v15, %v7206_v19  ;;  %v4013_v2 = vrot.slane %v4011_v22, 5  ;;  %v4917_v56 = vld [vmem:[#allocation2 + $0x40] sm:$0xf]  ;;  %v4918_v57 = vld [vmem:[#allocation2 + $0x44] sm:$0x1] }
 0x1aa   :  { %v9123_v23 = vcombine.low %v10876_v26, %v7207_v11  ;;  %v4019_v60 = vrot.slane %v4017_v8, 5  ;;  %v4023_v31 = vrot.slane %v4021_v34, 4  ;;  %v4035_v6 = vshll.u32 %v3830_v40, 16  ;;  %v4919_v0 = vld [vmem:[#allocation2 + $0x48] sm:$0xe]  ;;  %2810 = vst.msk [vmem:[#allocation3 + $0xc0] sm:$0xff] %vm2785_vm0, %v2738_v62 }
 0x1ab   :  { %v6061_v24 = vrot.slane %v6060_v1, 4  ;;  %v6074_v42 = vor.u32 %v6073_v3, %v6070_v49  ;;  %v4032_v49 = vshrl.u32 %v3830_v40, 16  ;;  %v4920_v47 = vld [vmem:[#allocation2 + $0x4c] sm:$0xf]  ;;  %v4014_v1 = vor.u32 %v4013_v2, %v4010_v39  ;;  %v4921_v54 = vld [vmem:[#allocation2 + $0x50] sm:$0x1] }
 0x1ac   :  { %v4041_v3 = vshll.u32 %v3831_v20, 16  ;;  %v4045_v4 = vshrl.u32 %v3831_v20, 16  ;;  %v4051_v5 = vshll.u32 %v3832_v51, 16  ;;  %v4037_v50 = vrot.slane %v4035_v6, 5  ;;  %v9477_v53 = vld [vmem:[#allocation2 + $0x48] sm:$0xff]   ;;  %v9474_v55 = vld [vmem:[#allocation2 + $0x3c] sm:$0xff]   ;;  %v2740_v20 = vpop.permute.xlu1 %2739 }
 0x1ad   :  { %v6066_v7 = vsel %vm9844_vm11, %v6061_v24, %v6065_v37  ;;  %v6075_v61 = vrot.slane %v6074_v42, 4  ;;  %v4029_v37 = vrot.slane %v4027_v41, 5  ;;  %v4034_v29 = vrot.slane %v4032_v49, 4  ;;  %v5911_v12 = vld [vmem:[#allocation2 + $0x48] sm:$0xf]  ;;  %2811 = vst.msk [vmem:[#allocation3 + $0xc8] sm:$0xff] %vm2785_vm0, %v2740_v20 }
 0x1ae   :  { %v10864_v59 = vcombine.low %v6056_v43, %v6066_v7  ;;  %v8964_v25 = vrot.slane %v4916_v27, 9  ;;  %v4015_v52 = vrot.slane %v4014_v1, 4  ;;  %v4043_v43 = vrot.slane %v4041_v3, 5  ;;  %v5913_v40 = vld [vmem:[#allocation2 + $0x50] sm:$0x1] }
 0x1af   :  { %v6080_v30 = vsel %vm9844_vm11, %v6075_v61, %v6079_v33  ;;  %v4024_v33 = vor.u32 %v4023_v31, %v4019_v60  ;;  %v4047_v24 = vrot.slane %v4045_v4, 4  ;;  %v4053_v42 = vrot.slane %v4051_v5, 5  ;;  %v5914_v41 = vld [vmem:[#allocation2 + $0x54] sm:$0xf]  ;;  %v5915_v51 = vld [vmem:[#allocation2 + $0x58] sm:$0xf] }
 0x1b0   :  { %v9059_v45 = vcombine.low %v6080_v30, %v6090_v14  ;;  %v4038_v17 = vor.u32 %v4037_v50, %v4034_v29  ;;  %v5126_v18 = vrot.slane %v4917_v56, 5  ;;  %v5129_v13 = vrot.slane %v4918_v57, 5  ;;  %6863 = vrot.lane.b32.xlu1 %v10864_v59, %s9681_s25  ;;  %v5912_v59 = vld [vmem:[#allocation2 + $0x4c] sm:$0xf]  ;;  %v7000_v39 = vld [vmem:[#allocation2 + $0x48] sm:$0xe] }
 0x1b1   :  { %v4025_v48 = vrot.slane %v4024_v33, 4  ;;  %v4020_v38 = vsel %vm9844_vm11, %v4015_v52, %v4019_v60  ;;  %v4048_v28 = vor.u32 %v4047_v24, %v4043_v43  ;;  %v8965_v7 = vrot.slane %v4919_v0, 9  ;;  %v7001_v31 = vld [vmem:[#allocation2 + $0x4c] sm:$0xf]  ;;  %v7003_v62 = vld [vmem:[#allocation2 + $0x54] sm:$0xe] }
 0x1b2   :  { %6865 = vrot.lane.b32.xlu0 %v9059_v45, %s9681_s25  ;;  %v5133_v61 = vrot.slane %v4920_v47, 5  ;;  %v4039_v58 = vrot.slane %v4038_v17, 4  ;;  %v10901_v16 = vsel %vm10368_vm14, %v8964_v25, %v5126_v18  ;;  %v5128_v19 = vrot.slane %v5126_v18, 4  ;;  %v7004_v1 = vld [vmem:[#allocation2 + $0x58] sm:$0xf] }
 0x1b3   :  { %v4030_v63 = vsel %vm9844_vm11, %v4025_v48, %v4029_v37  ;;  %v4049_v26 = vrot.slane %v4048_v28, 4  ;;  %v5136_v22 = vrot.slane %v4921_v54, 5  ;;  %v6092_v8 = vshrl.u32 %v5911_v12, 16  ;;  %v7002_v37 = vld [vmem:[#allocation2 + $0x50] sm:$0x1] }
 0x1b4   :  { %v8932_v30 = vcombine.low %v4020_v38, %v4030_v63  ;;  %v5134_v15 = vsel %vm10368_vm14, %v8965_v7, %v5133_v61  ;;  %v5135_v35 = vrot.slane %v5133_v61, 4  ;;  %v4044_v14 = vsel %vm9844_vm11, %v4039_v58, %v4043_v43  ;;  %7504 = vrot.lane.b32.xlu1 %v9122_v32, %s9682_s26  ;;  %v5916_v32 = vld [vmem:[#allocation2 + $0x5c] sm:$0x1]  ;;  %v9485_v63 = vld [vmem:[#allocation2 + $0x54] sm:$0xff]  }
 0x1b5   :  { %v10909_v9 = vsel %vm10368_vm14, %v5128_v19, %v5129_v13  ;;  %v4054_v46 = vsel %vm9844_vm11, %v4049_v26, %v4053_v42  ;;  %v6095_v11 = vshll.u32 %v5911_v12, 16  ;;  %v6101_v34 = vshll.u32 %v5912_v59, 16  ;;  %v7005_v54 = vld [vmem:[#allocation2 + $0x5c] sm:$0x1]  ;;  %v3833_v12 = vld [vmem:[#allocation2 + $0x54] sm:$0xf] }
 0x1b6   :  { %7506 = vrot.lane.b32.xlu0 %v9123_v23, %s9682_s26  ;;  %v8996_v45 = vcombine.low %v10901_v16, %v10909_v9  ;;  %v8933_v27 = vcombine.low %v4044_v14, %v4054_v46  ;;  %v5137_v23 = vsel %vm10368_vm14, %v5135_v35, %v5136_v22  ;;  %v6094_v36 = vrot.slane %v6092_v8, 4  ;;  %v9482_v14 = vld [vmem:[#allocation2 + $0x48] sm:$0xff]   ;;  %v3835_v46 = vld [vmem:[#allocation2 + $0x5c] sm:$0x1] }
 0x1b7   :  { %v6105_v21 = vshrl.u32 %v5912_v59, 16  ;;  %v8997_v2 = vcombine.low %v5134_v15, %v5137_v23  ;;  %v6097_v60 = vrot.slane %v6095_v11, 5  ;;  %v6103_v56 = vrot.slane %v6101_v34, 5  ;;  %v2742_v34 = vpop.permute.xlu0 %2741 }
 0x1b8   :  { %v6111_v57 = vshll.u32 %v5913_v40, 16  ;;  %v6116_v6 = vshrl.u32 %v5914_v41, 16  ;;  %v6119_v0 = vshll.u32 %v5914_v41, 16  ;;  %v6125_v47 = vshll.u32 %v5915_v51, 16  ;;  %3694 = vrot.lane.b32.xlu1 %v9474_v55, %s9677_s21  ;;  %v3834_v55 = vld [vmem:[#allocation2 + $0x58] sm:$0xf] }
 0x1b9   :  { %v6107_v49 = vrot.slane %v6105_v21, 4  ;;  %v6098_v3 = vor.u32 %v6097_v60, %v6094_v36  ;;  %v6129_v5 = vshrl.u32 %v5915_v51, 16  ;;  %v6135_v33 = vshll.u32 %v5916_v32, 16  ;;  %v3836_v36 = vld [vmem:[#allocation2 + $0x60] sm:$0xf]  ;;  %2812 = vst.msk [vmem:[#allocation3 + $0xd0] sm:$0xff] %vm2785_vm0, %v2742_v34 }
 0x1ba   :  { %3696 = vrot.lane.b32.xlu0 %v9477_v53, %s9677_s21  ;;  %v6113_v4 = vrot.slane %v6111_v57, 5  ;;  %v6118_v50 = vrot.slane %v6116_v6, 4  ;;  %v6121_v25 = vrot.slane %v6119_v0, 5  ;;  %v6127_v52 = vrot.slane %v6125_v47, 5  ;;  %v3837_v21 = vld [vmem:[#allocation2 + $0x64] sm:$0xf] }
 0x1bb   :  { %v6108_v29 = vor.u32 %v6107_v49, %v6103_v56  ;;  %v6099_v43 = vrot.slane %v6098_v3, 4  ;;  %v6131_v24 = vrot.slane %v6129_v5, 4  ;;  %v6137_v42 = vrot.slane %v6135_v33, 5  ;;  %v4924_v49 = vld [vmem:[#allocation2 + $0x5c] sm:$0x1] }
 0x1bc   :  { %v9092_v53 = vrot.slane %v7000_v39, 9  ;;  %v6122_v17 = vor.u32 %v6121_v25, %v6118_v50  ;;  %v7210_v18 = vrot.slane %v7001_v31, 5  ;;  %v7213_v13 = vrot.slane %v7002_v37, 5  ;;  %4783 = vrot.lane.b32.xlu1 %v8932_v30, %s9678_s22  ;;  %v4923_v37 = vld [vmem:[#allocation2 + $0x58] sm:$0xf] }
 0x1bd   :  { %v6109_v48 = vrot.slane %v6108_v29, 4  ;;  %v6104_v38 = vsel %vm9844_vm11, %v6099_v43, %v6103_v56  ;;  %v6132_v28 = vor.u32 %v6131_v24, %v6127_v52  ;;  %v9093_v7 = vrot.slane %v7003_v62, 9  ;;  %v4926_v3 = vld [vmem:[#allocation2 + $0x64] sm:$0xf] }
 0x1be   :  { %4785 = vrot.lane.b32.xlu0 %v8933_v27, %s9678_s22  ;;  %v7217_v61 = vrot.slane %v7004_v1, 5  ;;  %v6123_v19 = vrot.slane %v6122_v17, 4  ;;  %v10933_v59 = vsel %vm10368_vm14, %v9092_v53, %v7210_v18  ;;  %v7212_v40 = vrot.slane %v7210_v18, 4  ;;  %v4925_v1 = vld [vmem:[#allocation2 + $0x60] sm:$0xe]  ;;  %v2744_v17 = vpop.permute.xlu1 %2743 }
 0x1bf   :  { %v6114_v58 = vsel %vm9844_vm11, %v6109_v48, %v6113_v4  ;;  %v6133_v26 = vrot.slane %v6132_v28, 4  ;;  %v7220_v20 = vrot.slane %v7005_v54, 5  ;;  %v4056_v11 = vshrl.u32 %v3833_v12, 16  ;;  %2813 = vst.msk [vmem:[#allocation3 + $0xd8] sm:$0xff] %vm2785_vm0, %v2744_v17 }
 0x1c0   :  { %v9060_v30 = vcombine.low %v6104_v38, %v6114_v58  ;;  %v10937_v15 = vsel %vm10368_vm14, %v9093_v7, %v7217_v61  ;;  %v7219_v35 = vrot.slane %v7217_v61, 4  ;;  %v6128_v22 = vsel %vm9844_vm11, %v6123_v19, %v6127_v52  ;;  %5424 = vrot.lane.b32.xlu1 %v8996_v45, %s9679_s23  ;;  %v3838_v45 = vld [vmem:[#allocation2 + $0x68] sm:$0x1]  ;;  %v5917_v58 = vld [vmem:[#allocation2 + $0x60] sm:$0xf] }
 0x1c1   :  { %v10943_v8 = vsel %vm10368_vm14, %v7212_v40, %v7213_v13  ;;  %v6138_v41 = vsel %vm9844_vm11, %v6133_v26, %v6137_v42  ;;  %v4059_v27 = vshll.u32 %v3833_v12, 16  ;;  %v4065_v23 = vshll.u32 %v3834_v55, 16  ;;  %v4927_v61 = vld [vmem:[#allocation2 + $0x68] sm:$0x1]  ;;  %v9493_v19 = vld [vmem:[#allocation2 + $0x60] sm:$0xff]  }
 0x1c2   :  { %5426 = vrot.lane.b32.xlu0 %v8997_v2, %s9679_s23  ;;  %v9124_v51 = vcombine.low %v10933_v59, %v10943_v8  ;;  %v9061_v32 = vcombine.low %v6128_v22, %v6138_v41  ;;  %v7221_v39 = vsel %vm10368_vm14, %v7219_v35, %v7220_v20  ;;  %v4058_v16 = vrot.slane %v4056_v11, 4  ;;  %v4922_v2 = vld [vmem:[#allocation2 + $0x54] sm:$0xe]  ;;  %v5919_v41 = vld [vmem:[#allocation2 + $0x68] sm:$0x1] }
 0x1c3   :  { %v4069_v9 = vshrl.u32 %v3834_v55, 16  ;;  %v9125_v60 = vcombine.low %v10937_v15, %v7221_v39  ;;  %v4061_v56 = vrot.slane %v4059_v27, 5  ;;  %v4067_v57 = vrot.slane %v4065_v23, 5  ;;  %v5918_v15 = vld [vmem:[#allocation2 + $0x64] sm:$0xf]  ;;  %v9490_v20 = vld [vmem:[#allocation2 + $0x54] sm:$0xff]   ;;  %v2746_v39 = vpop.permute.xlu0 %2745 }
 0x1c4   :  { %v4075_v31 = vshll.u32 %v3835_v46, 16  ;;  %v4080_v0 = vshrl.u32 %v3836_v36, 16  ;;  %v4083_v47 = vshll.u32 %v3836_v36, 16  ;;  %v4089_v62 = vshll.u32 %v3837_v21, 16  ;;  %5778 = vrot.lane.b32.xlu1 %v9482_v14, %s9680_s24  ;;  %2814 = vst.msk [vmem:[#allocation3 + $0xe0] sm:$0xff] %vm2785_vm0, %v2746_v39 }
 0x1c5   :  { %v4071_v6 = vrot.slane %v4069_v9, 4  ;;  %v4062_v4 = vor.u32 %v4061_v56, %v4058_v16  ;;  %v4093_v33 = vshrl.u32 %v3837_v21, 16  ;;  %v4099_v29 = vshll.u32 %v3838_v45, 16  ;;  %v5920_v16 = vld [vmem:[#allocation2 + $0x6c] sm:$0xf] }
 0x1c6   :  { %5780 = vrot.lane.b32.xlu0 %v9485_v63, %s9680_s24  ;;  %v4077_v5 = vrot.slane %v4075_v31, 5  ;;  %v4082_v25 = vrot.slane %v4080_v0, 4  ;;  %v4085_v52 = vrot.slane %v4083_v47, 5  ;;  %v4091_v43 = vrot.slane %v4089_v62, 5  ;;  %v5921_v9 = vld [vmem:[#allocation2 + $0x70] sm:$0xf] }
 0x1c7   :  { %v4072_v50 = vor.u32 %v4071_v6, %v4067_v57  ;;  %v4063_v24 = vrot.slane %v4062_v4, 4  ;;  %v4095_v42 = vrot.slane %v4093_v33, 4  ;;  %v4101_v53 = vrot.slane %v4099_v29, 5  ;;  %v7009_v29 = vld [vmem:[#allocation2 + $0x6c] sm:$0xe] }
 0x1c8   :  { %v8966_v48 = vrot.slane %v4922_v2, 9  ;;  %v4086_v13 = vor.u32 %v4085_v52, %v4082_v25  ;;  %v5140_v38 = vrot.slane %v4923_v37, 5  ;;  %v5143_v28 = vrot.slane %v4924_v49, 5  ;;  %6867 = vrot.lane.b32.xlu1 %v9060_v30, %s9681_s25  ;;  %v7007_v49 = vld [vmem:[#allocation2 + $0x64] sm:$0xf] }
 0x1c9   :  { %v4073_v18 = vrot.slane %v4072_v50, 4  ;;  %v4068_v54 = vsel %vm9844_vm11, %v4063_v24, %v4067_v57  ;;  %v4096_v7 = vor.u32 %v4095_v42, %v4091_v43  ;;  %v8967_v12 = vrot.slane %v4925_v1, 9  ;;  %v7008_v1 = vld [vmem:[#allocation2 + $0x68] sm:$0x1]  ;;  %v7010_v24 = vld [vmem:[#allocation2 + $0x70] sm:$0xf] }
 0x1ca   :  { %6869 = vrot.lane.b32.xlu0 %v9061_v32, %s9681_s25  ;;  %v5147_v63 = vrot.slane %v4926_v3, 5  ;;  %v4087_v55 = vrot.slane %v4086_v13, 4  ;;  %v5142_v26 = vrot.slane %v5140_v38, 4  ;;  %v10969_v30 = vsel %vm10368_vm14, %v8966_v48, %v5140_v38  ;;  %v9501_v13 = vld [vmem:[#allocation2 + $0x6c] sm:$0xff]  }
 0x1cb   :  { %v4078_v40 = vsel %vm9844_vm11, %v4073_v18, %v4077_v5  ;;  %v4097_v14 = vrot.slane %v4096_v7, 4  ;;  %v5150_v34 = vrot.slane %v4927_v61, 5  ;;  %v6140_v27 = vshrl.u32 %v5917_v58, 16  ;;  %v7011_v18 = vld [vmem:[#allocation2 + $0x74] sm:$0x1] }
 0x1cc   :  { %v8934_v35 = vcombine.low %v4068_v54, %v4078_v40  ;;  %v5149_v22 = vrot.slane %v5147_v63, 4  ;;  %v4092_v46 = vsel %vm9844_vm11, %v4087_v55, %v4091_v43  ;;  %v5148_v11 = vsel %vm10368_vm14, %v8967_v12, %v5147_v63  ;;  %7508 = vrot.lane.b32.xlu1 %v9124_v51, %s9682_s26  ;;  %v5922_v51 = vld [vmem:[#allocation2 + $0x74] sm:$0x1] }
 0x1cd   :  { %v4102_v23 = vsel %vm9844_vm11, %v4097_v14, %v4101_v53  ;;  %v10983_v36 = vsel %vm10368_vm14, %v5142_v26, %v5143_v28  ;;  %v6143_v21 = vshll.u32 %v5917_v58, 16  ;;  %v6149_v32 = vshll.u32 %v5918_v15, 16  ;;  %v2846_v14 = vld [vmem:[#allocation2 + $0x70] sm:$0xf] }
 0x1ce   :  { %7510 = vrot.lane.b32.xlu0 %v9125_v60, %s9682_s26  ;;  %v8935_v45 = vcombine.low %v4092_v46, %v4102_v23  ;;  %v5151_v2 = vsel %vm10368_vm14, %v5149_v22, %v5150_v34  ;;  %v6142_v59 = vrot.slane %v6140_v27, 4  ;;  %v6153_v8 = vshrl.u32 %v5918_v15, 16  ;;  %v7006_v60 = vld [vmem:[#allocation2 + $0x60] sm:$0xe]  ;;  %v2845_v15 = vld [vmem:[#allocation2 + $0x6c] sm:$0xe]  ;;  %v2748_v22 = vpop.permute.xlu1 %2747 }
 0x1cf   :  { %v8999_v56 = vcombine.low %v5148_v11, %v5151_v2  ;;  %v6145_v57 = vrot.slane %v6143_v21, 5  ;;  %v6151_v31 = vrot.slane %v6149_v32, 5  ;;  %v6159_v37 = vshll.u32 %v5919_v41, 16  ;;  %v2847_v46 = vld [vmem:[#allocation2 + $0x74] sm:$0x1]  ;;  %v9498_v34 = vld [vmem:[#allocation2 + $0x60] sm:$0xff]  }
 0x1d0   :  { %v6155_v6 = vrot.slane %v6153_v8, 4  ;;  %v6164_v0 = vshrl.u32 %v5920_v16, 16  ;;  %v6167_v47 = vshll.u32 %v5920_v16, 16  ;;  %v6173_v62 = vshll.u32 %v5921_v9, 16  ;;  %3698 = vrot.lane.b32.xlu1 %v9490_v20, %s9677_s21  ;;  %v3839_v11 = vld [vmem:[#allocation2 + $0x6c] sm:$0xf] }
 0x1d1   :  { %v6146_v3 = vor.u32 %v6145_v57, %v6142_v59  ;;  %v6161_v4 = vrot.slane %v6159_v37, 5  ;;  %v6177_v5 = vshrl.u32 %v5921_v9, 16  ;;  %v6183_v33 = vshll.u32 %v5922_v51, 16  ;;  %2815 = vst.msk [vmem:[#allocation3 + $0xe8] sm:$0xff] %vm2785_vm0, %v2748_v22  ;;  %v3840_v21 = vld [vmem:[#allocation2 + $0x70] sm:$0xf] }
 0x1d2   :  { %3700 = vrot.lane.b32.xlu0 %v9493_v19, %s9677_s21  ;;  %v6156_v50 = vor.u32 %v6155_v6, %v6151_v31  ;;  %v6166_v25 = vrot.slane %v6164_v0, 4  ;;  %v6169_v52 = vrot.slane %v6167_v47, 5  ;;  %v6175_v43 = vrot.slane %v6173_v62, 5  ;;  %v3841_v32 = vld [vmem:[#allocation2 + $0x74] sm:$0x1] }
 0x1d3   :  { %v6147_v42 = vrot.slane %v6146_v3, 4  ;;  %v6179_v53 = vrot.slane %v6177_v5, 4  ;;  %v6185_v48 = vrot.slane %v6183_v33, 5  ;;  %v9094_v17 = vrot.slane %v7006_v60, 9  ;;  %v3842_v60 = vld [vmem:[#allocation2 + $0x78] sm:$0xf] }
 0x1d4   :  { %v6157_v38 = vrot.slane %v6156_v50, 4  ;;  %v6170_v28 = vor.u32 %v6169_v52, %v6166_v25  ;;  %v7224_v54 = vrot.slane %v7007_v49, 5  ;;  %v7227_v7 = vrot.slane %v7008_v1, 5  ;;  %4787 = vrot.lane.b32.xlu1 %v8934_v35, %s9678_s22  ;;  %v3844_v6 = vld [vmem:[#allocation2 + $0x80] sm:$0x1] }
 0x1d5   :  { %v8998_v61 = vcombine.low %v10969_v30, %v10983_v36  ;;  %v6180_v12 = vor.u32 %v6179_v53, %v6175_v43  ;;  %v9095_v63 = vrot.slane %v7009_v29, 9  ;;  %v7231_v58 = vrot.slane %v7010_v24, 5  ;;  %v4928_v0 = vld [vmem:[#allocation2 + $0x6c] sm:$0xe]  ;;  %v4930_v25 = vld [vmem:[#allocation2 + $0x74] sm:$0x1] }
 0x1d6   :  { %4789 = vrot.lane.b32.xlu0 %v8935_v45, %s9678_s22  ;;  %v6152_v19 = vsel %vm9844_vm11, %v6147_v42, %v6151_v31  ;;  %v6162_v40 = vsel %vm9844_vm11, %v6157_v38, %v6161_v4  ;;  %v6171_v55 = vrot.slane %v6170_v28, 4  ;;  %v7226_v26 = vrot.slane %v7224_v54, 4  ;;  %v4929_v4 = vld [vmem:[#allocation2 + $0x70] sm:$0xf]  ;;  %v2750_v38 = vpop.permute.xlu0 %2749 }
 0x1d7   :  { %v6181_v35 = vrot.slane %v6180_v12, 4  ;;  %v11001_v30 = vsel %vm10368_vm14, %v9094_v17, %v7224_v54  ;;  %v7233_v20 = vrot.slane %v7231_v58, 4  ;;  %v7232_v23 = vsel %vm10368_vm14, %v9095_v63, %v7231_v58  ;;  %v4931_v12 = vld [vmem:[#allocation2 + $0x78] sm:$0xe]  ;;  %v4933_v63 = vld [vmem:[#allocation2 + $0x80] sm:$0x1] }
 0x1d8   :  { %v6176_v41 = vsel %vm9844_vm11, %v6171_v55, %v6175_v43  ;;  %v11008_v27 = vsel %vm10368_vm14, %v7226_v26, %v7227_v7  ;;  %v7234_v36 = vrot.slane %v7011_v18, 5  ;;  %5428 = vrot.lane.b32.xlu1 %v8998_v61, %s9679_s23  ;;  %v9062_v39 = vcombine.low %v6152_v19, %v6162_v40  ;;  %2816 = vst.msk [vmem:[#allocation3 + $0xf0] sm:$0xff] %vm2785_vm0, %v2750_v38  ;;  %v9506_v58 = vld [vmem:[#allocation2 + $0x6c] sm:$0xff]  }
 0x1d9   :  { %v6186_v16 = vsel %vm9844_vm11, %v6181_v35, %v6185_v48  ;;  %v8841_v9 = vrot.slane %v2845_v15, 9  ;;  %v3078_v45 = vrot.slane %v2846_v14, 5  ;;  %v3081_v8 = vrot.slane %v2847_v46, 5 }
 0x1da   :  { %5430 = vrot.lane.b32.xlu0 %v8999_v56, %s9679_s23  ;;  %v9063_v2 = vcombine.low %v6176_v41, %v6186_v16  ;;  %v7235_v59 = vsel %vm10368_vm14, %v7233_v20, %v7234_v36  ;;  %v4104_v51 = vshrl.u32 %v3839_v11, 16  ;;  %v3843_v56 = vld [vmem:[#allocation2 + $0x7c] sm:$0xf]  ;;  %v9126_v57 = vcombine.low %v11001_v30, %v11008_v27  ;;  %v5923_v36 = vld [vmem:[#allocation2 + $0x78] sm:$0xf] }
 0x1db   :  { %v9127_v31 = vcombine.low %v7232_v23, %v7235_v59  ;;  %v3080_v37 = vrot.slane %v3078_v45, 4  ;;  %v4107_v49 = vshll.u32 %v3839_v11, 16  ;;  %v4113_v62 = vshll.u32 %v3840_v21, 16  ;;  %v3334_v11 = vpop.permute.xlu0 %3333 }
 0x1dc   :  { %v4106_v47 = vrot.slane %v4104_v51, 4  ;;  %v4117_v1 = vshrl.u32 %v3840_v21, 16  ;;  %v4123_v3 = vshll.u32 %v3841_v32, 16  ;;  %5782 = vrot.lane.b32.xlu1 %v9498_v34, %s9680_s24  ;;  %v11023_v5 = vsel %vm10368_vm14, %v8841_v9, %v3078_v45  ;;  %v5924_v21 = vld [vmem:[#allocation2 + $0x7c] sm:$0xf]  ;;  %3430 = vst.msk [vmem:[#allocation3] sm:$0xff] %vm3429_vm1, %v3334_v11  ;;  %v2752_v51 = vpop.permute.xlu1 %2751 }
 0x1dd   :  { %v4109_v33 = vrot.slane %v4107_v49, 5  ;;  %v4128_v29 = vshrl.u32 %v3842_v60, 16  ;;  %v4131_v50 = vshll.u32 %v3842_v60, 16  ;;  %v11028_v52 = vsel %vm10368_vm14, %v3080_v37, %v3081_v8  ;;  %v5925_v45 = vld [vmem:[#allocation2 + $0x80] sm:$0x1]  ;;  %v9507_v60 = vld [vmem:[#allocation2 + $0x78] sm:$0xff]  }
 0x1de   :  { %5784 = vrot.lane.b32.xlu0 %v9501_v13, %s9680_s24  ;;  %v4115_v43 = vrot.slane %v4113_v62, 5  ;;  %v4119_v24 = vrot.slane %v4117_v1, 4  ;;  %v4125_v42 = vrot.slane %v4123_v3, 5  ;;  %v4137_v18 = vshll.u32 %v3843_v56, 16  ;;  %v4932_v13 = vld [vmem:[#allocation2 + $0x7c] sm:$0xf] }
 0x1df   :  { %v4110_v53 = vor.u32 %v4109_v33, %v4106_v47  ;;  %v4130_v48 = vrot.slane %v4128_v29, 4  ;;  %v4133_v17 = vrot.slane %v4131_v50, 5  ;;  %v4141_v54 = vshrl.u32 %v3843_v56, 16  ;;  %v5926_v49 = vld [vmem:[#allocation2 + $0x84] sm:$0xf]  ;;  %2817 = vst.msk [vmem:[#allocation3 + $0xf8] sm:$0xff] %vm2785_vm0, %v2752_v51 }
 0x1e0   :  { %v4120_v28 = vor.u32 %v4119_v24, %v4115_v43  ;;  %v4147_v7 = vshll.u32 %v3844_v6, 16  ;;  %v8968_v61 = vrot.slane %v4928_v0, 9  ;;  %6871 = vrot.lane.b32.xlu1 %v9062_v39, %s9681_s25  ;;  %v4139_v55 = vrot.slane %v4137_v18, 5  ;;  %v3338_v6 = vpop.permute.xlu0 %3337  ;;  %v5927_v3 = vld [vmem:[#allocation2 + $0x88] sm:$0xf] }
 0x1e1   :  { %v4111_v19 = vrot.slane %v4110_v53, 4  ;;  %v4134_v40 = vor.u32 %v4133_v17, %v4130_v48  ;;  %v5154_v26 = vrot.slane %v4929_v4, 5  ;;  %v4143_v14 = vrot.slane %v4141_v54, 4  ;;  %v5928_v4 = vld [vmem:[#allocation2 + $0x8c] sm:$0x1]  ;;  %3432 = vst.msk [vmem:[#allocation3 + $0x10] sm:$0xff] %vm3429_vm1, %v3338_v6  ;;  %v3336_v17 = vpop.permute.xlu1 %3335 }
 0x1e2   :  { %6873 = vrot.lane.b32.xlu0 %v9063_v2, %s9681_s25  ;;  %v4121_v15 = vrot.slane %v4120_v28, 4  ;;  %v5157_v22 = vrot.slane %v4930_v25, 5  ;;  %v8873_v35 = vcombine.low %v11023_v5, %v11028_v52  ;;  %v4149_v27 = vrot.slane %v4147_v7, 5  ;;  %v7012_v25 = vld [vmem:[#allocation2 + $0x78] sm:$0xe]  ;;  %3431 = vst.msk [vmem:[#allocation3 + $0x8] sm:$0xff] %vm3429_vm1, %v3336_v17 }
 0x1e3   :  { %v4116_v30 = vsel %vm9844_vm11, %v4111_v19, %v4115_v43  ;;  %v4135_v20 = vrot.slane %v4134_v40, 4  ;;  %v5156_v46 = vrot.slane %v5154_v26, 4  ;;  %v4144_v41 = vor.u32 %v4143_v14, %v4139_v55  ;;  %v7013_v52 = vld [vmem:[#allocation2 + $0x7c] sm:$0xf]  ;;  %v7014_v48 = vld [vmem:[#allocation2 + $0x80] sm:$0x1] }
 0x1e4   :  { %v4126_v34 = vsel %vm9844_vm11, %v4121_v15, %v4125_v42  ;;  %v5161_v23 = vrot.slane %v4932_v13, 5  ;;  %7512 = vrot.lane.b32.xlu1 %v9126_v57, %s9682_s26  ;;  %v5155_v32 = vsel %vm10368_vm14, %v8968_v61, %v5154_v26  ;;  %v8969_v16 = vrot.slane %v4931_v12, 9  ;;  %v7015_v54 = vld [vmem:[#allocation2 + $0x84] sm:$0xe]  ;;  %v3342_v7 = vpop.permute.xlu0 %3341  ;;  %v9508_v61 = vld [vmem:[#allocation2 + $0x78] sm:$0xff]  }
 0x1e5   :  { %v5158_v39 = vsel %vm10368_vm14, %v5156_v46, %v5157_v22  ;;  %v5164_v9 = vrot.slane %v4933_v63, 5  ;;  %v8936_v2 = vcombine.low %v4116_v30, %v4126_v34  ;;  %v4145_v59 = vrot.slane %v4144_v41, 4  ;;  %v7016_v40 = vld [vmem:[#allocation2 + $0x88] sm:$0xf]  ;;  %3434 = vst.msk [vmem:[#allocation3 + $0x20] sm:$0xff] %vm3429_vm1, %v3342_v7  ;;  %v3340_v34 = vpop.permute.xlu1 %3339 }
 0x1e6   :  { %7514 = vrot.lane.b32.xlu0 %v9127_v31, %s9682_s26  ;;  %v5163_v8 = vrot.slane %v5161_v23, 4  ;;  %v4140_v56 = vsel %vm9844_vm11, %v4135_v20, %v4139_v55  ;;  %v6188_v57 = vshrl.u32 %v5923_v36, 16  ;;  %v6191_v31 = vshll.u32 %v5923_v36, 16  ;;  %v7017_v22 = vld [vmem:[#allocation2 + $0x8c] sm:$0x1]  ;;  %3433 = vst.msk [vmem:[#allocation3 + $0x18] sm:$0xff] %vm3429_vm1, %v3340_v34 }
 0x1e7   :  { %v6197_v37 = vshll.u32 %v5924_v21, 16  ;;  %v4150_v0 = vsel %vm9844_vm11, %v4145_v59, %v4149_v27  ;;  %v9000_v47 = vcombine.low %v5155_v32, %v5158_v39  ;;  %v6201_v62 = vshrl.u32 %v5924_v21, 16  ;;  %v2848_v11 = vld [vmem:[#allocation2 + $0x78] sm:$0xe]  ;;  %v2849_v21 = vld [vmem:[#allocation2 + $0x7c] sm:$0xf] }
 0x1e8   :  { %v6207_v1 = vshll.u32 %v5925_v45, 16  ;;  %3351 = vrot.lane.b32.xlu1 %v8873_v35, %s9676_s3  ;;  %v11055_v5 = vsel %vm10368_vm14, %v8969_v16, %v5161_v23  ;;  %v11059_v33 = vsel %vm10368_vm14, %v5163_v8, %v5164_v9  ;;  %v6190_v29 = vrot.slane %v6188_v57, 4  ;;  %v2850_v32 = vld [vmem:[#allocation2 + $0x80] sm:$0x1]  ;;  %v3346_v16 = vpop.permute.xlu0 %3345  ;;  %v2851_v59 = vld [vmem:[#allocation2 + $0x84] sm:$0xe] }
 0x1e9   :  { %v6193_v50 = vrot.slane %v6191_v31, 5  ;;  %v8937_v43 = vcombine.low %v4140_v56, %v4150_v0  ;;  %v6199_v24 = vrot.slane %v6197_v37, 5  ;;  %v6203_v42 = vrot.slane %v6201_v62, 4  ;;  %v2852_v8 = vld [vmem:[#allocation2 + $0x88] sm:$0xf]  ;;  %3436 = vst.msk [vmem:[#allocation3 + $0x30] sm:$0xff] %vm3429_vm1, %v3346_v16 }
 0x1ea   :  { %3702 = vrot.lane.b32.xlu0 %v9506_v58, %s9677_s21  ;;  %v6212_v53 = vshrl.u32 %v5926_v49, 16  ;;  %v6215_v13 = vshll.u32 %v5926_v49, 16  ;;  %v6221_v38 = vshll.u32 %v5927_v3, 16  ;;  %v6225_v28 = vshrl.u32 %v5927_v3, 16  ;;  %v2853_v0 = vld [vmem:[#allocation2 + $0x8c] sm:$0x1] }
 0x1eb   :  { %v6194_v18 = vor.u32 %v6193_v50, %v6190_v29  ;;  %v6204_v12 = vor.u32 %v6203_v42, %v6199_v24  ;;  %v6209_v63 = vrot.slane %v6207_v1, 5  ;;  %v6231_v19 = vshll.u32 %v5928_v4, 16  ;;  %v3845_v50 = vld [vmem:[#allocation2 + $0x84] sm:$0xf]  ;;  %v3846_v42 = vld [vmem:[#allocation2 + $0x88] sm:$0xf] }
 0x1ec   :  { %v6214_v58 = vrot.slane %v6212_v53, 4  ;;  %3704 = vrot.lane.b32.xlu1 %v9507_v60, %s9677_s21  ;;  %v6217_v26 = vrot.slane %v6215_v13, 5  ;;  %v11065_v15 = vrot.slane %v6221_v38, 5  ;;  %v6227_v14 = vrot.slane %v6225_v28, 4  ;;  %v3350_v3 = vpop.permute.xlu0 %3349  ;;  %v3847_v13 = vld [vmem:[#allocation2 + $0x8c] sm:$0x1] }
 0x1ed   :  { %v6195_v55 = vrot.slane %v6194_v18, 4  ;;  %v6205_v35 = vrot.slane %v6204_v12, 4  ;;  %v6233_v30 = vrot.slane %v6231_v19, 5  ;;  %v9096_v20 = vrot.slane %v7012_v25, 9  ;;  %v9509_v25 = vld [vmem:[#allocation2 + $0x84] sm:$0xff]   ;;  %3438 = vst.msk [vmem:[#allocation3 + $0x40] sm:$0xff] %vm3429_vm1, %v3350_v3 }
 0x1ee   :  { %4791 = vrot.lane.b32.xlu0 %v8936_v2, %s9678_s22  ;;  %v7238_v46 = vrot.slane %v7013_v52, 5  ;;  %v6218_v27 = vor.u32 %v6217_v26, %v6214_v58  ;;  %v6228_v23 = vor.u32 %v6227_v14, %v11065_v15  ;;  %v7241_v36 = vrot.slane %v7014_v48, 5  ;;  %v3848_v12 = vld [vmem:[#allocation2 + $0x90] sm:$0xf]  ;;  %v3849_v26 = vld [vmem:[#allocation2 + $0x94] sm:$0xf] }
 0x1ef   :  { %v6200_v41 = vsel %vm9844_vm11, %v6195_v55, %v6199_v24  ;;  %v9001_v39 = vcombine.low %v11055_v5, %v11059_v33  ;;  %v6210_v9 = vsel %vm9844_vm11, %v6205_v35, %v6209_v63  ;;  %v9097_v2 = vrot.slane %v7015_v54, 9 }
 0x1f0   :  { %v7240_v45 = vrot.slane %v7238_v46, 4  ;;  %4793 = vrot.lane.b32.xlu1 %v8937_v43, %s9678_s22  ;;  %v6219_v51 = vrot.slane %v6218_v27, 4  ;;  %v6229_v60 = vrot.slane %v6228_v23, 4  ;;  %v7239_v56 = vsel %vm10368_vm14, %v9096_v20, %v7238_v46  ;;  %v3689_v63 = vpop.permute.xlu0 %3688  ;;  %v4935_v27 = vld [vmem:[#allocation2 + $0x88] sm:$0xf] }
 0x1f1   :  { %v7245_v57 = vrot.slane %v7016_v40, 5  ;;  %v9064_v31 = vcombine.low %v6200_v41, %v6210_v9  ;;  %v7248_v49 = vrot.slane %v7017_v22, 5  ;;  %v8842_v6 = vrot.slane %v2848_v11, 9  ;;  %3784 = vst.msk [vmem:[#allocation3 + $0x8] sm:$0xff] %vm3782_vm2, %v3689_v63  ;;  %v4934_v41 = vld [vmem:[#allocation2 + $0x84] sm:$0xe] }
 0x1f2   :  { %5432 = vrot.lane.b32.xlu0 %v9000_v47, %s9679_s23  ;;  %v7242_v37 = vsel %vm10368_vm14, %v7240_v45, %v7241_v36  ;;  %v3344_v47 = vpop.permute.xlu1 %3343  ;;  %v6224_v62 = vsel %vm9844_vm11, %v6219_v51, %v11065_v15  ;;  %v6234_v1 = vsel %vm9844_vm11, %v6229_v60, %v6233_v30  ;;  %v3085_v33 = vrot.slane %v2849_v21, 5  ;;  %v3850_v30 = vld [vmem:[#allocation2 + $0x98] sm:$0x1]  ;;  %v4936_v23 = vld [vmem:[#allocation2 + $0x8c] sm:$0x1] }
 0x1f3   :  { %3435 = vst.msk [vmem:[#allocation3 + $0x28] sm:$0xff] %vm3429_vm1, %v3344_v47  ;;  %v11091_v4 = vsel %vm10368_vm14, %v9097_v2, %v7245_v57  ;;  %v7247_v5 = vrot.slane %v7245_v57, 4  ;;  %v3088_v29 = vrot.slane %v2850_v32, 5  ;;  %v9128_v52 = vcombine.low %v7239_v56, %v7242_v37  ;;  %v4937_v9 = vld [vmem:[#allocation2 + $0x90] sm:$0xe]  ;;  %v9510_v56 = vld [vmem:[#allocation2 + $0x84] sm:$0xff]  }
 0x1f4   :  { %5434 = vrot.lane.b32.xlu1 %v9001_v39, %s9679_s23  ;;  %v8843_v43 = vrot.slane %v2851_v59, 9  ;;  %v3092_v24 = vrot.slane %v2852_v8, 5  ;;  %v3086_v48 = vsel %vm10368_vm14, %v8842_v6, %v3085_v33  ;;  %v3087_v17 = vrot.slane %v3085_v33, 4  ;;  %v4778_v45 = vpop.permute.xlu0 %4777  ;;  %v4939_v6 = vld [vmem:[#allocation2 + $0x98] sm:$0x1] }
 0x1f5   :  { %v11098_v53 = vsel %vm10368_vm14, %v7247_v5, %v7248_v49  ;;  %v3095_v18 = vrot.slane %v2853_v0, 5  ;;  %v9065_v28 = vcombine.low %v6224_v62, %v6234_v1  ;;  %v4155_v19 = vshll.u32 %v3845_v50, 16  ;;  %4873 = vst.msk [vmem:[#allocation3 + $0x8] sm:$0xff] %vm4871_vm3, %v4778_v45  ;;  %v4938_v49 = vld [vmem:[#allocation2 + $0x94] sm:$0xf] }
 0x1f6   :  { %5786 = vrot.lane.b32.xlu0 %v9508_v61, %s9680_s24  ;;  %v3348_v38 = vpop.permute.xlu1 %3347  ;;  %v9129_v54 = vcombine.low %v11091_v4, %v11098_v53  ;;  %v3094_v7 = vrot.slane %v3092_v24, 4  ;;  %v4152_v61 = vshrl.u32 %v3845_v50, 16  ;;  %v3089_v58 = vsel %vm10368_vm14, %v3087_v17, %v3088_v29  ;;  %v5929_v17 = vld [vmem:[#allocation2 + $0x90] sm:$0xf]  ;;  %v5930_v63 = vld [vmem:[#allocation2 + $0x94] sm:$0xf] }
 0x1f7   :  { %3437 = vst.msk [vmem:[#allocation3 + $0x38] sm:$0xff] %vm3429_vm1, %v3348_v38  ;;  %v4161_v40 = vshll.u32 %v3846_v42, 16  ;;  %v4165_v55 = vshrl.u32 %v3846_v42, 16  ;;  %v8874_v15 = vcombine.low %v3086_v48, %v3089_v58  ;;  %v11111_v14 = vsel %vm10368_vm14, %v8843_v43, %v3092_v24 }
 0x1f8   :  { %5788 = vrot.lane.b32.xlu1 %v9509_v25, %s9680_s24  ;;  %v4154_v22 = vrot.slane %v4152_v61, 4  ;;  %v4171_v35 = vshll.u32 %v3847_v13, 16  ;;  %v11116_v20 = vsel %vm10368_vm14, %v3094_v7, %v3095_v18  ;;  %v4157_v46 = vrot.slane %v4155_v19, 5  ;;  %v9516_v25 = vld [vmem:[#allocation10 + $0x10] ss:$0 sps:$4 sm:$0x33]  }
 0x1f9   :  { %v4163_v11 = vrot.slane %v4161_v40, 5  ;;  %v4167_v34 = vrot.slane %v4165_v55, 4  ;;  %v4176_v32 = vshrl.u32 %v3848_v12, 16  ;;  %v4179_v39 = vshll.u32 %v3848_v12, 16  ;;  %9426 = vmatprep.subr.msk.bf16.mxu0 %vm7778_vm13, %v9516_v25  ;;  %v5931_v19 = vld [vmem:[#allocation2 + $0x98] sm:$0x1]  ;;  %9427 = vmatprep.subr.msk.bf16.mxu1 %vm7778_vm13, %v9516_v25 }
 0x1fa   :  { %6875 = vrot.lane.b32.xlu0 %v9064_v31, %s9681_s25  ;;  %v3687_v36 = vpop.permute.xlu1 %3686  ;;  %v4173_v21 = vrot.slane %v4171_v35, 5  ;;  %v4185_v16 = vshll.u32 %v3849_v26, 16  ;;  %v4158_v2 = vor.u32 %v4157_v46, %v4154_v22  ;;  %v4189_v8 = vshrl.u32 %v3849_v26, 16  ;;  %v5932_v22 = vld [vmem:[#allocation2 + $0x9c] sm:$0xf] }
 0x1fb   :  { %3783 = vst.msk [vmem:[#allocation3] sm:$0xff] %vm3782_vm2, %v3687_v36  ;;  %v4168_v59 = vor.u32 %v4167_v34, %v4163_v11  ;;  %v4195_v51 = vshll.u32 %v3850_v30, 16  ;;  %v8875_v60 = vcombine.low %v11111_v14, %v11116_v20  ;;  %v4178_v57 = vrot.slane %v4176_v32, 4  ;;  %v5933_v35 = vld [vmem:[#allocation2 + $0xa0] sm:$0xf]  ;;  %v9511_v30 = vld [vmem:[#allocation2 + $0x90] sm:$0xff]  }
 0x1fc   :  { %6877 = vrot.lane.b32.xlu1 %v9065_v28, %s9681_s25  ;;  %v4181_v31 = vrot.slane %v4179_v39, 5  ;;  %v4187_v37 = vrot.slane %v4185_v16, 5  ;;  %v4159_v0 = vrot.slane %v4158_v2, 4  ;;  %v4191_v62 = vrot.slane %v4189_v8, 4  ;;  %v7018_v32 = vld [vmem:[#allocation2 + $0x90] sm:$0xe] }
 0x1fd   :  { %v4169_v47 = vrot.slane %v4168_v59, 4  ;;  %v4197_v1 = vrot.slane %v4195_v51, 5  ;;  %v8970_v33 = vrot.slane %v4934_v41, 9  ;;  %v5168_v29 = vrot.slane %v4935_v27, 5  ;;  %v5934_v41 = vld [vmem:[#allocation2 + $0xa4] sm:$0x1] }
 0x1fe   :  { %7516 = vrot.lane.b32.xlu0 %v9128_v52, %s9682_s26  ;;  %v4776_v3 = vpop.permute.xlu1 %4775  ;;  %v4182_v5 = vor.u32 %v4181_v31, %v4178_v57  ;;  %v5171_v50 = vrot.slane %v4936_v23, 5  ;;  %v5419_v52 = vpop.permute.xlu0 %5418  ;;  %v4164_v43 = vsel %vm9844_vm11, %v4159_v0, %v4163_v11  ;;  %v4192_v42 = vor.u32 %v4191_v62, %v4187_v37  ;;  %v7019_v39 = vld [vmem:[#allocation2 + $0x94] sm:$0xf]  ;;  %v7020_v8 = vld [vmem:[#allocation2 + $0x98] sm:$0x1] }
 0x1ff   :  { %4872 = vst.msk [vmem:[#allocation3] sm:$0xff] %vm4871_vm3, %v4776_v3  ;;  %v4174_v24 = vsel %vm9844_vm11, %v4169_v47, %v4173_v21  ;;  %v8971_v48 = vrot.slane %v4937_v9, 9  ;;  %v5169_v38 = vsel %vm10368_vm14, %v8970_v33, %v5168_v29  ;;  %v5170_v28 = vrot.slane %v5168_v29, 4  ;;  %v7022_v62 = vld [vmem:[#allocation2 + $0xa0] sm:$0xf] }
 0x200   :  { %7518 = vrot.lane.b32.xlu1 %v9129_v54, %s9682_s26  ;;  %5514 = vst.msk [vmem:[#allocation3 + $0x8] sm:$0xff] %vm5512_vm9, %v5419_v52  ;;  %v8938_v18 = vcombine.low %v4164_v43, %v4174_v24  ;;  %v4183_v13 = vrot.slane %v4182_v5, 4  ;;  %v4193_v7 = vrot.slane %v4192_v42, 4  ;;  %v5175_v61 = vrot.slane %v4938_v49, 5 }
 0x201   :  { %v5178_v12 = vrot.slane %v4939_v6, 5  ;;  %v5172_v53 = vsel %vm10368_vm14, %v5170_v28, %v5171_v50  ;;  %v7780_v54 = vsel %vm7778_vm13, %v9516_v25, 0  ;;  %v6236_v40 = vshrl.u32 %v5929_v17, 16  ;;  %v7023_v50 = vld [vmem:[#allocation2 + $0xa4] sm:$0x1] }
 0x202   :  { %3353 = vrot.lane.b32.xlu0 %v8874_v15, %s9676_s3  ;;  %v5417_v58 = vpop.permute.xlu1 %5416  ;;  %v4188_v4 = vsel %vm9844_vm11, %v4183_v13, %v4187_v37  ;;  %v5773_v55 = vpop.permute.xlu0 %5772  ;;  %v4198_v26 = vsel %vm9844_vm11, %v4193_v7, %v4197_v1  ;;  %v11146_v15 = vsel %vm10368_vm14, %v8971_v48, %v5175_v61  ;;  %v5177_v14 = vrot.slane %v5175_v61, 4  ;;  %9355 = vmatpush3.bf16.msra.mxu0 %v7780_v54  ;;  %v7021_v37 = vld [vmem:[#allocation2 + $0x9c] sm:$0xe]  ;;  %v9514_v1 = vld [vmem:[#allocation2 + $0x90] sm:$0xff]   ;;  %v2856_v61 = vld [vmem:[#allocation2 + $0x98] sm:$0x1] }
 0x203   :  { %5513 = vst.msk [vmem:[#allocation3] sm:$0xff] %vm5512_vm9, %v5417_v58  ;;  %9425 = vmatpush3.bf16.msra.mxu1 %v7780_v54  ;;  %v9002_v20 = vcombine.low %v5169_v38, %v5172_v53  ;;  %v6238_v46 = vrot.slane %v6236_v40, 4  ;;  %v6239_v11 = vshll.u32 %v5929_v17, 16  ;;  %v6245_v34 = vshll.u32 %v5930_v63, 16  ;;  %v2854_v48 = vld [vmem:[#allocation2 + $0x90] sm:$0xe] }
 0x204   :  { %3355 = vrot.lane.b32.xlu1 %v8875_v60, %s9676_s3  ;;  %5868 = vst.msk [vmem:[#allocation3 + $0x8] sm:$0xff] %vm5866_vm10, %v5773_v55  ;;  %v8939_v27 = vcombine.low %v4188_v4, %v4198_v26  ;;  %v11153_v23 = vsel %vm10368_vm14, %v5177_v14, %v5178_v12  ;;  %v6249_v36 = vshrl.u32 %v5930_v63, 16  ;;  %v6255_v21 = vshll.u32 %v5931_v19, 16  ;;  %v2855_v7 = vld [vmem:[#allocation2 + $0x94] sm:$0xf] }
 0x205   :  { %v9003_v9 = vcombine.low %v11146_v15, %v11153_v23  ;;  %v6241_v45 = vrot.slane %v6239_v11, 5  ;;  %v6247_v2 = vrot.slane %v6245_v34, 5  ;;  %v6260_v59 = vshrl.u32 %v5932_v22, 16  ;;  %v2857_v55 = vld [vmem:[#allocation2 + $0x9c] sm:$0xe] }
 0x206   :  { %3706 = vrot.lane.b32.xlu0 %v9510_v56, %s9677_s21  ;;  %v5771_v16 = vpop.permute.xlu1 %5770  ;;  %v6862_v51 = vpop.permute.xlu0 %6861  ;;  %v6251_v60 = vrot.slane %v6249_v36, 4  ;;  %v6257_v56 = vrot.slane %v6255_v21, 5  ;;  %v6263_v57 = vshll.u32 %v5932_v22, 16  ;;  %v6269_v31 = vshll.u32 %v5933_v35, 16  ;;  %v3851_v21 = vld [vmem:[#allocation2 + $0x9c] sm:$0xf] }
 0x207   :  { %5867 = vst.msk [vmem:[#allocation3] sm:$0xff] %vm5866_vm10, %v5771_v16  ;;  %v6242_v49 = vor.u32 %v6241_v45, %v6238_v46  ;;  %v6262_v6 = vrot.slane %v6260_v59, 4  ;;  %v6273_v0 = vshrl.u32 %v5933_v35, 16  ;;  %v6279_v47 = vshll.u32 %v5934_v41, 16  ;;  %v2859_v46 = vld [vmem:[#allocation2 + $0xa4] sm:$0x1] }
 0x208   :  { %3708 = vrot.lane.b32.xlu1 %v9511_v30, %s9677_s21  ;;  %6957 = vst.msk [vmem:[#allocation3 + $0x8] sm:$0xff] %vm6955_vm12, %v6862_v51  ;;  %v6252_v3 = vor.u32 %v6251_v60, %v6247_v2  ;;  %v6265_v5 = vrot.slane %v6263_v57, 5  ;;  %v6271_v33 = vrot.slane %v6269_v31, 5  ;;  %v9098_v29 = vrot.slane %v7018_v32, 9  ;;  %v9515_v32 = vld [vmem:[#allocation2 + $0x9c] sm:$0xff]  }
 0x209   :  { %v6243_v52 = vrot.slane %v6242_v49, 4  ;;  %v6275_v43 = vrot.slane %v6273_v0, 4  ;;  %v6281_v24 = vrot.slane %v6279_v47, 5  ;;  %v7252_v42 = vrot.slane %v7019_v39, 5  ;;  %v3852_v59 = vld [vmem:[#allocation2 + $0xa0] sm:$0xf] }
 0x20a   :  { %4795 = vrot.lane.b32.xlu0 %v8938_v18, %s9678_s22  ;;  %v6860_v25 = vpop.permute.xlu1 %6859  ;;  %v7503_v17 = vpop.permute.xlu0 %7502  ;;  %v6253_v18 = vrot.slane %v6252_v3, 4  ;;  %v6266_v13 = vor.u32 %v6265_v5, %v6262_v6  ;;  %v7255_v38 = vrot.slane %v7020_v8, 5  ;;  %v9099_v28 = vrot.slane %v7021_v37, 9  ;;  %v3853_v23 = vld [vmem:[#allocation2 + $0xa4] sm:$0x1] }
 0x20b   :  { %6956 = vst.msk [vmem:[#allocation3] sm:$0xff] %vm6955_vm12, %v6860_v25  ;;  %v6248_v12 = vsel %vm9844_vm11, %v6243_v52, %v6247_v2  ;;  %vm7681_vm0 = vcmask 293888   ;;  %v6276_v63 = vor.u32 %v6275_v43, %v6271_v33  ;;  %v7253_v58 = vsel %vm10368_vm14, %v9098_v29, %v7252_v42  ;;  %v3854_v49 = vld [vmem:[#allocation2 + $0xa8] sm:$0xf]  ;;  %v3855_v6 = vld [vmem:[#allocation2 + $0xac] sm:$0xf] }
 0x20c   :  { %4797 = vrot.lane.b32.xlu1 %v8939_v27, %s9678_s22  ;;  %7598 = vst.msk [vmem:[#allocation3 + $0x8] sm:$0xff] %vm7596_vm15, %v7503_v17  ;;  %v7254_v4 = vrot.slane %v7252_v42, 4  ;;  %v6258_v53 = vsel %vm9844_vm11, %v6253_v18, %v6257_v56  ;;  %v6267_v54 = vrot.slane %v6266_v13, 4  ;;  %v7259_v19 = vrot.slane %v7022_v62, 5  ;;  %v3856_v5 = vld [vmem:[#allocation2 + $0xb0] sm:$0x1] }
 0x20d   :  { %v7262_v40 = vrot.slane %v7023_v50, 5  ;;  %v9066_v14 = vcombine.low %v6248_v12, %v6258_v53  ;;  %v6277_v22 = vrot.slane %v6276_v63, 4  ;;  %v8844_v30 = vrot.slane %v2854_v48, 9  ;;  %v4940_v17 = vld [vmem:[#allocation2 + $0x9c] sm:$0xe] }
 0x20e   :  { %5436 = vrot.lane.b32.xlu0 %v9002_v20, %s9679_s23  ;;  %v7501_v26 = vpop.permute.xlu1 %7500  ;;  %v7256_v35 = vsel %vm10368_vm14, %v7254_v4, %v7255_v38  ;;  %v2858_v20 = vld [vmem:[#allocation2 + $0xa0] sm:$0xf]  ;;  %v3693_v11 = vpop.permute.xlu0 %3692  ;;  %v6272_v34 = vsel %vm9844_vm11, %v6267_v54, %v6271_v33  ;;  %v11178_v27 = vsel %vm10368_vm14, %v9099_v28, %v7259_v19  ;;  %v7261_v36 = vrot.slane %v7259_v19, 4  ;;  %v4942_v19 = vld [vmem:[#allocation2 + $0xa4] sm:$0x1] }
 0x20f   :  { %7597 = vst.msk [vmem:[#allocation3] sm:$0xff] %vm7596_vm15, %v7501_v26  ;;  %v9130_v41 = vcombine.low %v7253_v58, %v7256_v35  ;;  %v6282_v39 = vsel %vm9844_vm11, %v6277_v22, %v6281_v24  ;;  %v3099_v16 = vrot.slane %v2855_v7, 5  ;;  %v3102_v45 = vrot.slane %v2856_v61, 5  ;;  %v4941_v12 = vld [vmem:[#allocation2 + $0xa0] sm:$0xf] }
 0x210   :  { %5438 = vrot.lane.b32.xlu1 %v9003_v9, %s9679_s23  ;;  %3786 = vst.msk [vmem:[#allocation3 + $0x18] sm:$0xff] %vm3782_vm2, %v3693_v11  ;;  %v8845_v2 = vrot.slane %v2857_v55, 9  ;;  %v9067_v8 = vcombine.low %v6272_v34, %v6282_v39  ;;  %v11190_v51 = vsel %vm10368_vm14, %v7261_v36, %v7262_v40  ;;  %v3106_v60 = vrot.slane %v2858_v20, 5  ;;  %v9517_v40 = vld [vmem:[#allocation2 + $0x9c] sm:$0xff]   ;;  %v4943_v35 = vld [vmem:[#allocation2 + $0xa8] sm:$0xe] }
 0x211   :  { %v3109_v15 = vrot.slane %v2859_v46, 5  ;;  %v9131_v56 = vcombine.low %v11178_v27, %v11190_v51  ;;  %v3100_v57 = vsel %vm10368_vm14, %v8844_v30, %v3099_v16  ;;  %v3101_v31 = vrot.slane %v3099_v16, 4  ;;  %v4944_v34 = vld [vmem:[#allocation2 + $0xac] sm:$0xf]  ;;  %v4945_v16 = vld [vmem:[#allocation2 + $0xb0] sm:$0x1] }
 0x212   :  { %5790 = vrot.lane.b32.xlu0 %v9514_v1, %s9680_s24  ;;  %v3691_v9 = vpop.permute.xlu1 %3690  ;;  %v4200_v37 = vshrl.u32 %v3851_v21, 16  ;;  %v4782_v0 = vpop.permute.xlu0 %4781  ;;  %v11199_v47 = vsel %vm10368_vm14, %v8845_v2, %v3106_v60  ;;  %v3108_v62 = vrot.slane %v3106_v60, 4  ;;  %v4203_v1 = vshll.u32 %v3851_v21, 16 }
 0x213   :  { %3785 = vst.msk [vmem:[#allocation3 + $0x10] sm:$0xff] %vm3782_vm2, %v3691_v9  ;;  %v4209_v3 = vshll.u32 %v3852_v59, 16  ;;  %v3103_v33 = vsel %vm10368_vm14, %v3101_v31, %v3102_v45  ;;  %v4213_v50 = vshrl.u32 %v3852_v59, 16  ;;  %v4219_v25 = vshll.u32 %v3853_v23, 16  ;;  %v7630_v52 = vld [vmem:[#allocation3 + $0x8] sm:$0xff] }
 0x214   :  { %5792 = vrot.lane.b32.xlu1 %v9515_v32, %s9680_s24  ;;  %4875 = vst.msk [vmem:[#allocation3 + $0x18] sm:$0xff] %vm4871_vm3, %v4782_v0  ;;  %v4202_v29 = vrot.slane %v4200_v37, 4  ;;  %v8876_v43 = vcombine.low %v3100_v57, %v3103_v33  ;;  %v11208_v24 = vsel %vm10368_vm14, %v3108_v62, %v3109_v15  ;;  %v4205_v42 = vrot.slane %v4203_v1, 5  ;;  %v5935_v15 = vld [vmem:[#allocation2 + $0xa8] sm:$0xf] }
 0x215   :  { %v4211_v48 = vrot.slane %v4209_v3, 5  ;;  %v8877_v38 = vcombine.low %v11199_v47, %v11208_v24  ;;  %v4215_v28 = vrot.slane %v4213_v50, 4  ;;  %v4221_v7 = vrot.slane %v4219_v25, 5  ;;  %v5936_v23 = vld [vmem:[#allocation2 + $0xac] sm:$0xf] }
 0x216   :  { %6879 = vrot.lane.b32.xlu0 %v9066_v14, %s9681_s25  ;;  %v4780_v18 = vpop.permute.xlu1 %4779  ;;  %v7629_v13 = vld [vmem:[#allocation3] sm:$0xff]  ;;  %v4224_v61 = vshrl.u32 %v3854_v49, 16  ;;  %v5423_v63 = vpop.permute.xlu0 %5422  ;;  %v4206_v58 = vor.u32 %v4205_v42, %v4202_v29  ;;  %v4227_v4 = vshll.u32 %v3854_v49, 16  ;;  %v4233_v53 = vshll.u32 %v3855_v6, 16  ;;  %v5939_v42 = vld [vmem:[#allocation2 + $0xb8] sm:$0xf] }
 0x217   :  { %4874 = vst.msk [vmem:[#allocation3 + $0x10] sm:$0xff] %vm4871_vm3, %v4780_v18  ;;  %9356 = vmatprep.mubr.msk.bf16.mxu0 %vm7681_vm0, %v7629_v13  ;;  %v4237_v54 = vshrl.u32 %v3855_v6, 16  ;;  %v4216_v55 = vor.u32 %v4215_v28, %v4211_v48  ;;  %v4243_v14 = vshll.u32 %v3856_v5, 16  ;;  %v8972_v22 = vrot.slane %v4940_v17, 9  ;;  %v9518_v5 = vld [vmem:[#allocation2 + $0xa8] sm:$0xff]  }
 0x218   :  { %6881 = vrot.lane.b32.xlu1 %v9067_v8, %s9681_s25  ;;  %9357 = vmatmul.mubr.msk.bf16.vlgmr.msra.gmra.mrb[0].mxu0 %vm7681_vm0, %v7630_v52  ;;  %5516 = vst.msk [vmem:[#allocation3 + $0x18] sm:$0xff] %vm5512_vm9, %v5423_v63  ;;  %v4226_v26 = vrot.slane %v4224_v61, 4  ;;  %v4207_v30 = vrot.slane %v4206_v58, 4  ;;  %v4229_v20 = vrot.slane %v4227_v4, 5  ;;  %v4235_v46 = vrot.slane %v4233_v53, 5 }
 0x219   :  { %v4239_v11 = vrot.slane %v4237_v54, 4  ;;  %v4217_v36 = vrot.slane %v4216_v55, 4  ;;  %v4245_v21 = vrot.slane %v4243_v14, 5  ;;  %v5182_v32 = vrot.slane %v4941_v12, 5  ;;  %v5940_v28 = vld [vmem:[#allocation2 + $0xbc] sm:$0x1] }
 0x21a   :  { %7520 = vrot.lane.b32.xlu0 %v9130_v41, %s9682_s26  ;;  %v5421_v41 = vpop.permute.xlu1 %5420  ;;  %v5185_v39 = vrot.slane %v4942_v19, 5  ;;  %v5777_v45 = vpop.permute.xlu0 %5776  ;;  %v4212_v2 = vsel %vm9844_vm11, %v4207_v30, %v4211_v48  ;;  %v4230_v59 = vor.u32 %v4229_v20, %v4226_v26  ;;  %v8973_v60 = vrot.slane %v4943_v35, 9  ;;  %v7025_v4 = vld [vmem:[#allocation2 + $0xac] sm:$0xf]  ;;  %v7026_v19 = vld [vmem:[#allocation2 + $0xb0] sm:$0x1] }
 0x21b   :  { %5515 = vst.msk [vmem:[#allocation3 + $0x10] sm:$0xff] %vm5512_vm9, %v5421_v41  ;;  %v4240_v8 = vor.u32 %v4239_v11, %v4235_v46  ;;  %v4222_v9 = vsel %vm9844_vm11, %v4217_v36, %v4221_v7  ;;  %v5183_v57 = vsel %vm10368_vm14, %v8972_v22, %v5182_v32  ;;  %v5184_v31 = vrot.slane %v5182_v32, 4  ;;  %v7024_v7 = vld [vmem:[#allocation2 + $0xa8] sm:$0xe]  ;;  %v7027_v35 = vld [vmem:[#allocation2 + $0xb4] sm:$0xe] }
 0x21c   :  { %7522 = vrot.lane.b32.xlu1 %v9131_v56, %s9682_s26  ;;  %5870 = vst.msk [vmem:[#allocation3 + $0x18] sm:$0xff] %vm5866_vm10, %v5777_v45  ;;  %v5189_v37 = vrot.slane %v4944_v34, 5  ;;  %v8940_v49 = vcombine.low %v4212_v2, %v4222_v9  ;;  %v4231_v6 = vrot.slane %v4230_v59, 4  ;;  %v5192_v62 = vrot.slane %v4945_v16, 5  ;;  %v5937_v56 = vld [vmem:[#allocation2 + $0xb0] sm:$0x1] }
 0x21d   :  { %v4241_v0 = vrot.slane %v4240_v8, 4  ;;  %v5186_v27 = vsel %vm10368_vm14, %v5184_v31, %v5185_v39  ;;  %v6284_v3 = vshrl.u32 %v5935_v15, 16  ;;  %v6287_v52 = vshll.u32 %v5935_v15, 16  ;;  %v7028_v34 = vld [vmem:[#allocation2 + $0xb8] sm:$0xf]  ;;  %v9519_v41 = vld [vmem:[#allocation2 + $0xa8] sm:$0xff]  }
 0x21e   :  { %3357 = vrot.lane.b32.xlu0 %v8876_v43, %s9676_s3  ;;  %v5775_v1 = vpop.permute.xlu1 %5774  ;;  %v5191_v51 = vrot.slane %v5189_v37, 4  ;;  %v4236_v29 = vsel %vm9844_vm11, %v4231_v6, %v4235_v46  ;;  %v11240_v25 = vsel %vm10368_vm14, %v8973_v60, %v5189_v37  ;;  %v5938_v43 = vld [vmem:[#allocation2 + $0xb4] sm:$0xf]  ;;  %v9004_v17 = vcombine.low %v5183_v57, %v5186_v27  ;;  %v7029_v16 = vld [vmem:[#allocation2 + $0xbc] sm:$0x1] }
 0x21f   :  { %5869 = vst.msk [vmem:[#allocation3 + $0x10] sm:$0xff] %vm5866_vm10, %v5775_v1  ;;  %v4246_v50 = vsel %vm9844_vm11, %v4241_v0, %v4245_v21  ;;  %v6286_v18 = vrot.slane %v6284_v3, 4  ;;  %v6293_v13 = vshll.u32 %v5936_v23, 16  ;;  %v6289_v12 = vrot.slane %v6287_v52, 5  ;;  %v2860_v15 = vld [vmem:[#allocation2 + $0xa8] sm:$0xe] }
 0x220   :  { %3359 = vrot.lane.b32.xlu1 %v8877_v38, %s9676_s3  ;;  %v8941_v48 = vcombine.low %v4236_v29, %v4246_v50  ;;  %v11250_v61 = vsel %vm10368_vm14, %v5191_v51, %v5192_v62  ;;  %v6297_v63 = vshrl.u32 %v5936_v23, 16  ;;  %v6303_v58 = vshll.u32 %v5937_v56, 16  ;;  %v2861_v23 = vld [vmem:[#allocation2 + $0xac] sm:$0xf]  ;;  %v2862_v6 = vld [vmem:[#allocation2 + $0xb0] sm:$0x1] }
 0x221   :  { %v6295_v24 = vrot.slane %v6293_v13, 5  ;;  %v6308_v38 = vshrl.u32 %v5938_v43, 16  ;;  %v6311_v53 = vshll.u32 %v5938_v43, 16  ;;  %v6317_v54 = vshll.u32 %v5939_v42, 16  ;;  %v11261_v0 = vld [vmem:[#allocation2 + $0xb4] sm:$0xe] }
 0x222   :  { %3710 = vrot.lane.b32.xlu0 %v9517_v40, %s9677_s21  ;;  %v6864_v47 = vpop.permute.xlu1 %6863  ;;  %v6290_v55 = vor.u32 %v6289_v12, %v6286_v18  ;;  %v6299_v26 = vrot.slane %v6297_v63, 4  ;;  %v6305_v14 = vrot.slane %v6303_v58, 5  ;;  %v6321_v22 = vshrl.u32 %v5939_v42, 16  ;;  %v2864_v29 = vld [vmem:[#allocation2 + $0xb8] sm:$0xf] }
 0x223   :  { %6958 = vst.msk [vmem:[#allocation3 + $0x10] sm:$0xff] %vm6955_vm12, %v6864_v47  ;;  %v6310_v30 = vrot.slane %v6308_v38, 4  ;;  %v6313_v20 = vrot.slane %v6311_v53, 5  ;;  %v6319_v46 = vrot.slane %v6317_v54, 5  ;;  %v6327_v11 = vshll.u32 %v5940_v28, 16  ;;  %v9520_v12 = vld [vmem:[#allocation2 + $0xb4] sm:$0xff]  }
 0x224   :  { %v6866_v33 = vpop.permute.xlu0 %6865  ;;  %3712 = vrot.lane.b32.xlu1 %v9518_v5, %s9677_s21  ;;  %v6291_v36 = vrot.slane %v6290_v55, 4  ;;  %v6300_v21 = vor.u32 %v6299_v26, %v6295_v24  ;;  %v6323_v32 = vrot.slane %v6321_v22, 4  ;;  %v9100_v39 = vrot.slane %v7024_v7, 9  ;;  %v204_v7 = vld [vmem:[#allocation2 + $0xc0] sm:$0x1] }
 0x225   :  { %6959 = vst.msk [vmem:[#allocation3 + $0x18] sm:$0xff] %vm6955_vm12, %v6866_v33  ;;  %v9005_v2 = vcombine.low %v11240_v25, %v11250_v61  ;;  %v6314_v59 = vor.u32 %v6313_v20, %v6310_v30  ;;  %v7266_v8 = vrot.slane %v7025_v4, 5  ;;  %v7269_v60 = vrot.slane %v7026_v19, 5  ;;  %v404_v61 = vld [vmem:[#allocation4 + $0x78] sm:$0xf] }
 0x226   :  { %4799 = vrot.lane.b32.xlu0 %v8940_v49, %s9678_s22  ;;  %v7505_v45 = vpop.permute.xlu1 %7504  ;;  %v6296_v57 = vsel %vm9844_vm11, %v6291_v36, %v6295_v24  ;;  %v6301_v31 = vrot.slane %v6300_v21, 4  ;;  %v6324_v37 = vor.u32 %v6323_v32, %v6319_v46  ;;  %v6329_v49 = vrot.slane %v6327_v11, 5  ;;  %v405_v24 = vld [vmem:[#allocation4 + $0x7c] sm:$0xf]  ;;  %v3857_v55 = vld [vmem:[#allocation2 + $0xb4] sm:$0xf] }
 0x227   :  { %7599 = vst.msk [vmem:[#allocation3 + $0x10] sm:$0xff] %vm7596_vm15, %v7505_v45  ;;  %v6315_v62 = vrot.slane %v6314_v59, 4  ;;  %v7268_v1 = vrot.slane %v7266_v8, 4  ;;  %v9101_v27 = vrot.slane %v7027_v35, 9  ;;  %v7273_v51 = vrot.slane %v7028_v34, 5 }
 0x228   :  { %v7507_v40 = vpop.permute.xlu0 %7506  ;;  %4801 = vrot.lane.b32.xlu1 %v8941_v48, %s9678_s22  ;;  %v6306_v56 = vsel %vm9844_vm11, %v6301_v31, %v6305_v14  ;;  %v6325_v3 = vrot.slane %v6324_v37, 4  ;;  %v7267_v5 = vsel %vm10368_vm14, %v9100_v39, %v7266_v8  ;;  %v7276_v33 = vrot.slane %v7029_v16, 5  ;;  %v11274_v48 = vld [vmem:[#allocation2 + $0xbc] sm:$0x1]  ;;  %v3858_v11 = vld [vmem:[#allocation2 + $0xb8] sm:$0xf] }
 0x229   :  { %7600 = vst.msk [vmem:[#allocation3 + $0x18] sm:$0xff] %vm7596_vm15, %v7507_v40  ;;  %v9068_v25 = vcombine.low %v6296_v57, %v6306_v56  ;;  %v6320_v52 = vsel %vm9844_vm11, %v6315_v62, %v6319_v46  ;;  %v7270_v43 = vsel %vm10368_vm14, %v7268_v1, %v7269_v60  ;;  %v8846_v42 = vrot.slane %v2860_v15, 9  ;;  %v3859_v39 = vld [vmem:[#allocation2 + $0xbc] sm:$0x1]  ;;  %v314_v8 = vld [vmem:[#allocation2 + $0xc8] sm:$0x1] }
 0x22a   :  { %5440 = vrot.lane.b32.xlu0 %v9004_v17, %s9679_s23  ;;  %v3695_v50 = vpop.permute.xlu1 %3694  ;;  %v6330_v18 = vsel %vm9844_vm11, %v6325_v3, %v6329_v49  ;;  %v7275_v13 = vrot.slane %v7273_v51, 4  ;;  %v3113_v28 = vrot.slane %v2861_v23, 5  ;;  %v11283_v63 = vsel %vm10368_vm14, %v9101_v27, %v7273_v51  ;;  %v11309_v60 = vld [vmem:[#allocation2 + $0xb4] sm:$0xe]  ;;  %v11314_v31 = vld [vmem:[#allocation2 + $0xb8] sm:$0xf] }
 0x22b   :  { %3787 = vst.msk [vmem:[#allocation3 + $0x20] sm:$0xff] %vm3782_vm2, %v3695_v50  ;;  %v3116_v58 = vrot.slane %v2862_v6, 5  ;;  %v8847_v4 = vrot.slane %v11261_v0, 9  ;;  %v3120_v47 = vrot.slane %v2864_v29, 5  ;;  %v9069_v53 = vcombine.low %v6320_v52, %v6330_v18  ;;  %v4948_v1 = vld [vmem:[#allocation2 + $0xbc] sm:$0x1] }
 0x22c   :  { %v3697_v9 = vpop.permute.xlu0 %3696  ;;  %5442 = vrot.lane.b32.xlu1 %v9005_v2, %s9679_s23  ;;  %v9132_v54 = vcombine.low %v7267_v5, %v7270_v43  ;;  %v11289_v19 = vsel %vm10368_vm14, %v7275_v13, %v7276_v33  ;;  %v3115_v40 = vrot.slane %v3113_v28, 4  ;;  %v3114_v22 = vsel %vm10368_vm14, %v8846_v42, %v3113_v28  ;;  %v207_v33 = vld [vmem:[#allocation2 + $0xcc] sm:$0x1]  ;;  %v317_v29 = vld [vmem:[#allocation2 + $0xd4] sm:$0x1] }
 0x22d   :  { %3788 = vst.msk [vmem:[#allocation3 + $0x28] sm:$0xff] %vm3782_vm2, %v3697_v9  ;;  %v3122_v35 = vrot.slane %v3120_v47, 4  ;;  %v3123_v30 = vrot.slane %v11274_v48, 5  ;;  %v205_v46 = vsel %vm9757_vm5, 0, %v204_v7  ;;  %v696_v36 = vshrl.u32 %v404_v61, 16  ;;  %v9521_v48 = vld [vmem:[#allocation2 + $0xb4] sm:$0xff]  }
 0x22e   :  { %5794 = vrot.lane.b32.xlu0 %v9519_v41, %s9680_s24  ;;  %v4784_v26 = vpop.permute.xlu1 %4783  ;;  %v7631_v14 = vld [vmem:[#allocation3 + $0x10] sm:$0xff]  ;;  %v3117_v41 = vsel %vm10368_vm14, %v3115_v40, %v3116_v58  ;;  %206 = vst [vmem:[#allocation2 + $0xc0] sm:$0x1] %v205_v46  ;;  %v699_v21 = vshll.u32 %v404_v61, 16  ;;  %v704_v32 = vshrl.u32 %v405_v24, 16  ;;  %v9133_v16 = vcombine.low %v11283_v63, %v11289_v19 }
 0x22f   :  { %4876 = vst.msk [vmem:[#allocation3 + $0x20] sm:$0xff] %vm4871_vm3, %v4784_v26  ;;  %9360 = vmatprep.mubr.msk.bf16.mxu0 %vm7681_vm0, %v7631_v14  ;;  %v11307_v45 = vsel %vm10368_vm14, %v8847_v4, %v3120_v47  ;;  %v707_v2 = vshll.u32 %v405_v24, 16  ;;  %v4248_v59 = vshrl.u32 %v3857_v55, 16  ;;  %v8878_v15 = vcombine.low %v3114_v22, %v3117_v41  ;;  %v5945_v42 = vld [vmem:[#allocation2 + $0xd0] sm:$0xf] }
 0x230   :  { %v4786_v17 = vpop.permute.xlu0 %4785  ;;  %v7632_v38 = vld [vmem:[#allocation3 + $0x18] sm:$0xff]  ;;  %5796 = vrot.lane.b32.xlu1 %v9520_v12, %s9680_s24  ;;  %v698_v23 = vrot.slane %v696_v36, 7  ;;  %v11312_v9 = vrot.slane %v704_v32, 7  ;;  %v4251_v57 = vshll.u32 %v3857_v55, 16  ;;  %v4257_v6 = vshll.u32 %v3858_v11, 16 }
 0x231   :  { %4877 = vst.msk [vmem:[#allocation3 + $0x28] sm:$0xff] %vm4871_vm3, %v4786_v17  ;;  %9361 = vmatmul.mubr.msk.bf16.gmra.mrb[4].mxu0 %vm7681_vm0, %v7632_v38  ;;  %v4250_v49 = vrot.slane %v4248_v59, 4  ;;  %v4261_v0 = vshrl.u32 %v3858_v11, 16  ;;  %v4267_v62 = vshll.u32 %v3859_v39, 16  ;;  %v3124_v51 = vsel %vm10368_vm14, %v3122_v35, %v3123_v30  ;;  %v11329_v12 = vld [vmem:[#allocation2 + $0xd0] sm:$0xf] }
 0x232   :  { %6883 = vrot.lane.b32.xlu0 %v9068_v25, %s9681_s25  ;;  %v5425_v37 = vpop.permute.xlu1 %5424  ;;  %v701_v56 = vor.u32 %v699_v21, %v698_v23  ;;  %v702_v3 = vrot.slane %v698_v23, 4  ;;  %v709_v5 = vor.u32 %v707_v2, %v11312_v9  ;;  %v4253_v50 = vrot.slane %v4251_v57, 5  ;;  %v11344_v35 = vld [vmem:[#allocation2 + $0xe0] sm:$0x1]  ;;  %v11346_v30 = vld [vmem:[#allocation2 + $0xe4] sm:$0xe] }
 0x233   :  { %5517 = vst.msk [vmem:[#allocation3 + $0x20] sm:$0xff] %vm5512_vm9, %v5425_v37  ;;  %v4259_v25 = vrot.slane %v4257_v6, 5  ;;  %v4263_v52 = vrot.slane %v4261_v0, 4  ;;  %v4269_v43 = vrot.slane %v4267_v62, 5  ;;  %v315_v28 = vsel %vm9765_vm6, 0, %v314_v8 }
 0x234   :  { %v5427_v34 = vpop.permute.xlu0 %5426  ;;  %6885 = vrot.lane.b32.xlu1 %v9069_v53, %s9681_s25  ;;  %v710_v18 = vsel %vm9753_vm4, %v702_v3, %v709_v5  ;;  %v8974_v7 = vrot.slane %v11309_v60, 9  ;;  %v5196_v61 = vrot.slane %v11314_v31, 5  ;;  %v4254_v4 = vor.u32 %v4253_v50, %v4250_v49  ;;  %316 = vst [vmem:[#allocation2 + $0xc8] sm:$0x1] %v315_v28  ;;  %v11334_v53 = vld [vmem:[#allocation2 + $0xd8] sm:$0xe] }
 0x235   :  { %5518 = vst.msk [vmem:[#allocation3 + $0x28] sm:$0xff] %vm5512_vm9, %v5427_v34  ;;  %v1189_v58 = vld [vmem:[#allocation2 + $0xc0] sm:$0xf]  ;;  %v4264_v47 = vor.u32 %v4263_v52, %v4259_v25  ;;  %v5199_v24 = vrot.slane %v4948_v1, 5  ;;  %v208_v38 = vsel %vm9757_vm5, 0, %v207_v33  ;;  %v8879_v19 = vcombine.low %v11307_v45, %v3124_v51 }
 0x236   :  { %7524 = vrot.lane.b32.xlu0 %v9132_v54, %s9682_s26  ;;  %v5779_v63 = vpop.permute.xlu1 %5778  ;;  %1192 = vst.msk [vmem:[#allocation2 + $0xc4] sm:$0xf] %vm12780_vm7, %v710_v18  ;;  %v11336_v54 = vld [vmem:[#allocation2 + $0xdc] sm:$0xf]  ;;  %v1190_v26 = vsel %vm9791_vm8, %v701_v56, %v1189_v58  ;;  %v5198_v14 = vrot.slane %v5196_v61, 4  ;;  %v318_v22 = vsel %vm9765_vm6, 0, %v317_v29  ;;  %v5197_v2 = vsel %vm10368_vm14, %v8974_v7, %v5196_v61 }
 0x237   :  { %5871 = vst.msk [vmem:[#allocation3 + $0x20] sm:$0xff] %vm5866_vm10, %v5779_v63  ;;  %209 = vst [vmem:[#allocation2 + $0xcc] sm:$0x1] %v208_v38  ;;  %v4255_v46 = vrot.slane %v4254_v4, 4  ;;  %v4265_v11 = vrot.slane %v4264_v47, 4  ;;  %v6365_v34 = vshll.u32 %v5945_v42, 16 }
 0x238   :  { %v5781_v27 = vpop.permute.xlu0 %5780  ;;  %7526 = vrot.lane.b32.xlu1 %v9133_v16, %s9682_s26  ;;  %1191 = vst [vmem:[#allocation2 + $0xc0] sm:$0xf] %v1190_v26  ;;  %319 = vst [vmem:[#allocation2 + $0xd4] sm:$0x1] %v318_v22  ;;  %v6369_v41 = vshrl.u32 %v5945_v42, 16  ;;  %v711_v36 = vrot.slane %v11312_v9, 4  ;;  %v5200_v59 = vsel %vm10368_vm14, %v5198_v14, %v5199_v24 }
 0x239   :  { %5872 = vst.msk [vmem:[#allocation3 + $0x28] sm:$0xff] %vm5866_vm10, %v5781_v27  ;;  %v7287_v21 = vrot.slane %v11329_v12, 5  ;;  %v3127_v32 = vrot.slane %v11336_v54, 5  ;;  %v4260_v16 = vsel %vm9844_vm11, %v4255_v46, %v4259_v25  ;;  %v4270_v45 = vsel %vm9844_vm11, %v4265_v11, %v4269_v43  ;;  %v11373_v49 = vld [vmem:[#allocation2 + $0xe8] sm:$0xf] }
 0x23a   :  { %3361 = vrot.lane.b32.xlu0 %v8878_v15, %s9676_s3  ;;  %v6868_v39 = vpop.permute.xlu1 %6867  ;;  %v8942_v60 = vcombine.low %v4260_v16, %v4270_v45  ;;  %v11363_v15 = vrot.slane %v6365_v34, 5  ;;  %v6371_v23 = vrot.slane %v6369_v41, 4  ;;  %v8848_v9 = vrot.slane %v11334_v53, 9  ;;  %v12844_v14 = vld [vmem:[#allocation24_spill] sm:$0xff] }
 0x23b   :  { %6960 = vst.msk [vmem:[#allocation3 + $0x20] sm:$0xff] %vm6955_vm12, %v6868_v39  ;;  %v11370_v57 = vrot.slane %v7287_v21, 4  ;;  %v3129_v31 = vrot.slane %v3127_v32, 4  ;;  %v3130_v37 = vrot.slane %v11344_v35, 5  ;;  %v8849_v6 = vrot.slane %v11346_v30, 9 }
 0x23c   :  { %v6870_v40 = vpop.permute.xlu0 %6869  ;;  %3363 = vrot.lane.b32.xlu1 %v8879_v19, %s9676_s3  ;;  %v1193_v0 = vld [vmem:[#allocation2 + $0xc8] sm:$0x1]  ;;  %v9006_v1 = vcombine.low %v5197_v2, %v5200_v59  ;;  %v6372_v52 = vor.u32 %v6371_v23, %v11363_v15  ;;  %v11391_v58 = vsel %vm10368_vm14, %v8848_v9, %v3127_v32  ;;  %v3134_v4 = vrot.slane %v11373_v49, 5 }
 0x23d   :  { %6961 = vst.msk [vmem:[#allocation3 + $0x28] sm:$0xff] %vm6955_vm12, %v6870_v40  ;;  %v3861_v62 = vld [vmem:[#allocation2 + $0xc4] sm:$0xf]  ;;  %v1194_v51 = vsel %vm9757_vm5, %v711_v36, %v1193_v0  ;;  %v11397_v40 = vsel %vm10368_vm14, %v3129_v31, %v3130_v37  ;;  %vm8392_vm13 = vcmask 523264   ;;  %vm12781_vm7 = vcmask 519168  }
 0x23e   :  { %3714 = vrot.lane.b32.xlu0 %v9521_v48, %s9677_s21  ;;  %v7509_v27 = vpop.permute.xlu1 %7508  ;;  %v4281_v56 = vshll.u32 %v3861_v62, 16  ;;  %v4285_v3 = vshrl.u32 %v3861_v62, 16  ;;  %v11379_v5 = vld [vmem:[#allocation2 + $0xc4] sm:$0xf]  ;;  %1195 = vst [vmem:[#allocation2 + $0xc8] sm:$0x1] %v1194_v51 }
 0x23f   :  { %7601 = vst.msk [vmem:[#allocation3 + $0x20] sm:$0xff] %vm7596_vm15, %v7509_v27  ;;  %v9522_v33 = vld [vmem:[#allocation2 + $0xc0] sm:$0xff]   ;;  %v5203_v25 = vrot.slane %v11379_v5, 5  ;;  %v1423_v54 = vld [vmem:[#allocation2 + $0xcc] sm:$0xf]  ;;  %v11403_v34 = vrot.slane %v6372_v52, 4  ;;  %v8880_v27 = vcombine.low %v11391_v58, %v11397_v40 }
 0x240   :  { %v7511_v8 = vpop.permute.xlu0 %7510  ;;  %v3860_v29 = vld [vmem:[#allocation2 + $0xc0] sm:$0xf]  ;;  %v11384_v48 = vrot.slane %v4281_v56, 5  ;;  %v4287_v18 = vrot.slane %v4285_v3, 4  ;;  %3716 = vrot.lane.b32.xlu1 %v9522_v33, %s9677_s21  ;;  %v1424_v22 = vsel %vm9791_vm8, %v12844_v14, %v1423_v54  ;;  %v5942_v35 = vld [vmem:[#allocation2 + $0xc4] sm:$0xf] }
 0x241   :  { %7602 = vst.msk [vmem:[#allocation3 + $0x28] sm:$0xff] %vm7596_vm15, %v7511_v8  ;;  %v4272_v43 = vshrl.u32 %v3860_v29, 16  ;;  %v4275_v42 = vshll.u32 %v3860_v29, 16  ;;  %v4949_v28 = vld [vmem:[#allocation2 + $0xc0] sm:$0xe]  ;;  %v5205_v61 = vrot.slane %v5203_v25, 4 }
 0x242   :  { %4803 = vrot.lane.b32.xlu0 %v8942_v60, %s9678_s22  ;;  %v8975_v7 = vrot.slane %v4949_v28, 9  ;;  %v9523_v63 = vld [vmem:[#allocation2 + $0xc0] sm:$0xff]   ;;  %v3699_v47 = vpop.permute.xlu1 %3698  ;;  %v4288_v53 = vor.u32 %v4287_v18, %v11384_v48  ;;  %1425 = vst [vmem:[#allocation2 + $0xcc] sm:$0xf] %v1424_v22  ;;  %v6341_v39 = vshll.u32 %v5942_v35, 16  ;;  %v6345_v16 = vshrl.u32 %v5942_v35, 16 }
 0x243   :  { %v4274_v24 = vrot.slane %v4272_v43, 4  ;;  %v4277_v38 = vrot.slane %v4275_v42, 5  ;;  %v5941_v19 = vld [vmem:[#allocation2 + $0xc0] sm:$0xf]  ;;  %3789 = vst.msk [vmem:[#allocation3 + $0x30] sm:$0xff] %vm3782_vm2, %v3699_v47 }
 0x244   :  { %v3701_v50 = vpop.permute.xlu0 %3700  ;;  %v6332_v46 = vshrl.u32 %v5941_v19, 16  ;;  %v6335_v11 = vshll.u32 %v5941_v19, 16  ;;  %v4289_v36 = vrot.slane %v4288_v53, 4  ;;  %v1427_v45 = vld [vmem:[#allocation2 + $0xd4] sm:$0x1]  ;;  %v12845_v8 = vld [vmem:[#allocation27_spill] sm:$0xff] }
 0x245   :  { %3790 = vst.msk [vmem:[#allocation3 + $0x38] sm:$0xff] %vm3782_vm2, %v3701_v50  ;;  %v4278_v41 = vor.u32 %v4277_v38, %v4274_v24  ;;  %v1428_v60 = vsel %vm9757_vm5, %v12845_v8, %v1427_v45  ;;  %v7030_v23 = vld [vmem:[#allocation2 + $0xc0] sm:$0xe]  ;;  %v7031_v9 = vld [vmem:[#allocation2 + $0xc4] sm:$0xf]  ;;  %v6343_v29 = vrot.slane %v6341_v39, 5  ;;  %v11416_v50 = vsel %vm10368_vm14, %v8975_v7, %v5203_v25 }
 0x246   :  { %5444 = vrot.lane.b32.xlu0 %v9006_v1, %s9679_s23  ;;  %v6334_v2 = vrot.slane %v6332_v46, 4  ;;  %v6337_v59 = vrot.slane %v6335_v11, 5  ;;  %v3862_v31 = vld [vmem:[#allocation2 + $0xc8] sm:$0x1]  ;;  %v4788_v0 = vpop.permute.xlu1 %4787  ;;  %v7633_v62 = vld [vmem:[#allocation3 + $0x20] sm:$0xff]  ;;  %v6347_v52 = vrot.slane %v6345_v16, 4 }
 0x247   :  { %v4279_v37 = vrot.slane %v4278_v41, 4  ;;  %v4951_v1 = vld [vmem:[#allocation2 + $0xc8] sm:$0x1]  ;;  %1429 = vst [vmem:[#allocation2 + $0xd4] sm:$0x1] %v1428_v60  ;;  %v4291_v51 = vshll.u32 %v3862_v31, 16  ;;  %9364 = vmatprep.mubr.msk.bf16.mxu0 %vm7681_vm0, %v7633_v62 }
 0x248   :  { %v4790_v26 = vpop.permute.xlu0 %4789  ;;  %v7634_v32 = vld [vmem:[#allocation3 + $0x28] sm:$0xff]  ;;  %4878 = vst.msk [vmem:[#allocation3 + $0x30] sm:$0xff] %vm4871_vm3, %v4788_v0  ;;  %v5206_v56 = vrot.slane %v4951_v1, 5  ;;  %v5943_v5 = vld [vmem:[#allocation2 + $0xc8] sm:$0x1]  ;;  %v6338_v33 = vor.u32 %v6337_v59, %v6334_v2  ;;  %v9102_v18 = vrot.slane %v7030_v23, 9  ;;  %v6348_v7 = vor.u32 %v6347_v52, %v6343_v29 }
 0x249   :  { %4879 = vst.msk [vmem:[#allocation3 + $0x38] sm:$0xff] %vm4871_vm3, %v4790_v26  ;;  %9365 = vmatmul.mubr.msk.bf16.gmra.mrb[8].mxu0 %vm7681_vm0, %v7634_v32  ;;  %v6351_v43 = vshll.u32 %v5943_v5, 16  ;;  %v7032_v42 = vld [vmem:[#allocation2 + $0xc8] sm:$0x1]  ;;  %v4284_v28 = vsel %vm9844_vm11, %v4279_v37, %v11384_v48  ;;  %v7280_v24 = vrot.slane %v7031_v9, 5  ;;  %v3136_v9 = vrot.slane %v3134_v4, 4 }
 0x24a   :  { %5798 = vrot.lane.b32.xlu0 %v9523_v63, %s9680_s24  ;;  %v4293_v63 = vrot.slane %v4291_v51, 5  ;;  %v6339_v47 = vrot.slane %v6338_v33, 4  ;;  %v5207_v38 = vsel %vm10368_vm14, %v5205_v61, %v5206_v56  ;;  %v5429_v25 = vpop.permute.xlu1 %5428  ;;  %v7283_v54 = vrot.slane %v7032_v42, 5  ;;  %v5944_v22 = vld [vmem:[#allocation2 + $0xcc] sm:$0xf] }
 0x24b   :  { %v6353_v53 = vrot.slane %v6351_v43, 5  ;;  %5519 = vst.msk [vmem:[#allocation3 + $0x30] sm:$0xff] %vm5512_vm9, %v5429_v25  ;;  %v7281_v35 = vsel %vm10368_vm14, %v9102_v18, %v7280_v24  ;;  %v7282_v46 = vrot.slane %v7280_v24, 4  ;;  %v2871_v11 = vld [vmem:[#allocation2 + $0xec] sm:$0x1]  ;;  %v6349_v32 = vrot.slane %v6348_v7, 4 }
 0x24c   :  { %v5431_v3 = vpop.permute.xlu0 %5430  ;;  %v4294_v19 = vsel %vm9844_vm11, %v4289_v36, %v4293_v63  ;;  %v6344_v26 = vsel %vm9844_vm11, %v6339_v47, %v6343_v29  ;;  %v3863_v61 = vld [vmem:[#allocation2 + $0xe4] sm:$0xf]  ;;  %v6356_v39 = vshrl.u32 %v5944_v22, 16  ;;  %v6359_v16 = vshll.u32 %v5944_v22, 16  ;;  %v7033_v36 = vld [vmem:[#allocation2 + $0xcc] sm:$0xe] }
 0x24d   :  { %5520 = vst.msk [vmem:[#allocation3 + $0x38] sm:$0xff] %vm5512_vm9, %v5431_v3  ;;  %v8943_v41 = vcombine.low %v4284_v28, %v4294_v19  ;;  %v9007_v45 = vcombine.low %v11416_v50, %v5207_v38  ;;  %v7284_v59 = vsel %vm10368_vm14, %v7282_v46, %v7283_v54  ;;  %v9103_v23 = vrot.slane %v7033_v36, 9  ;;  %v3864_v51 = vld [vmem:[#allocation2 + $0xe8] sm:$0xf]  ;;  %v3865_v50 = vld [vmem:[#allocation2 + $0xec] sm:$0x1] }
 0x24e   :  { %v5946_v2 = vld [vmem:[#allocation2 + $0xd4] sm:$0x1]  ;;  %v5783_v31 = vpop.permute.xlu1 %5782  ;;  %v6354_v37 = vsel %vm9844_vm11, %v6349_v32, %v6353_v53  ;;  %v6358_v0 = vrot.slane %v6356_v39, 4  ;;  %v6361_v62 = vrot.slane %v6359_v16, 5  ;;  %v9134_v3 = vcombine.low %v7281_v35, %v7284_v59  ;;  %v3866_v28 = vld [vmem:[#allocation2 + $0xf0] sm:$0xf] }
 0x24f   :  { %v7035_v60 = vld [vmem:[#allocation2 + $0xd4] sm:$0x1]  ;;  %4805 = vrot.lane.b32.xlu1 %v8943_v41, %s9678_s22  ;;  %v6375_v1 = vshll.u32 %v5946_v2, 16  ;;  %5873 = vst.msk [vmem:[#allocation3 + $0x30] sm:$0xff] %vm5866_vm10, %v5783_v31  ;;  %v9070_v56 = vcombine.low %v6344_v26, %v6354_v37  ;;  %v11446_v5 = vsel %vm10368_vm14, %v9103_v23, %v7287_v21  ;;  %v3137_v42 = vrot.slane %v2871_v11, 5  ;;  %v9524_v38 = vld [vmem:[#allocation2 + $0xcc] sm:$0xff]  }
 0x250   :  { %v5785_v48 = vpop.permute.xlu0 %5784  ;;  %v7290_v33 = vrot.slane %v7035_v60, 5  ;;  %v6362_v52 = vor.u32 %v6361_v62, %v6358_v0  ;;  %v4296_v18 = vshrl.u32 %v3863_v61, 16  ;;  %v4299_v63 = vshll.u32 %v3863_v61, 16  ;;  %v3867_v24 = vld [vmem:[#allocation2 + $0xf4] sm:$0xf] }
 0x251   :  { %5874 = vst.msk [vmem:[#allocation3 + $0x38] sm:$0xff] %vm5866_vm10, %v5785_v48  ;;  %v6377_v43 = vrot.slane %v6375_v1, 5  ;;  %6887 = vrot.lane.b32.xlu0 %v9070_v56, %s9681_s25  ;;  %v4305_v21 = vshll.u32 %v3864_v51, 16  ;;  %v4309_v47 = vshrl.u32 %v3864_v51, 16  ;;  %v3868_v19 = vld [vmem:[#allocation2 + $0xf8] sm:$0x1]  ;;  %v11472_v26 = vsel %vm10368_vm14, %v3136_v9, %v3137_v42 }
 0x252   :  { %v11453_v12 = vsel %vm10368_vm14, %v11370_v57, %v7290_v33  ;;  %v6363_v25 = vrot.slane %v6362_v52, 4  ;;  %v6872_v53 = vpop.permute.xlu1 %6871  ;;  %v11467_v57 = vsel %vm10368_vm14, %v8849_v6, %v3134_v4  ;;  %v4298_v22 = vrot.slane %v4296_v18, 4  ;;  %v4952_v32 = vld [vmem:[#allocation2 + $0xe4] sm:$0xe]  ;;  %v4953_v39 = vld [vmem:[#allocation2 + $0xe8] sm:$0xf] }
 0x253   :  { %5446 = vrot.lane.b32.xlu1 %v9007_v45, %s9679_s23  ;;  %v6378_v7 = vsel %vm9844_vm11, %v11403_v34, %v6377_v43  ;;  %v9135_v54 = vcombine.low %v11446_v5, %v11453_v12  ;;  %6962 = vst.msk [vmem:[#allocation3 + $0x30] sm:$0xff] %vm6955_vm12, %v6872_v53  ;;  %v4301_v48 = vrot.slane %v4299_v63, 5  ;;  %v4307_v35 = vrot.slane %v4305_v21, 5  ;;  %v4954_v59 = vld [vmem:[#allocation2 + $0xec] sm:$0x1]  ;;  %v9525_v33 = vld [vmem:[#allocation2 + $0xe4] sm:$0xff]  }
 0x254   :  { %v6874_v29 = vpop.permute.xlu0 %6873  ;;  %v6368_v49 = vsel %vm9844_vm11, %v6363_v25, %v11363_v15  ;;  %v4311_v30 = vrot.slane %v4309_v47, 4  ;;  %v4315_v6 = vshll.u32 %v3865_v50, 16  ;;  %v4320_v4 = vshrl.u32 %v3866_v28, 16  ;;  %v4955_v0 = vld [vmem:[#allocation2 + $0xf0] sm:$0xe] }
 0x255   :  { %6963 = vst.msk [vmem:[#allocation3 + $0x38] sm:$0xff] %vm6955_vm12, %v6874_v29  ;;  %v9071_v46 = vcombine.low %v6368_v49, %v6378_v7  ;;  %7528 = vrot.lane.b32.xlu0 %v9134_v3, %s9682_s26  ;;  %v4302_v11 = vor.u32 %v4301_v48, %v4298_v22  ;;  %v4323_v61 = vshll.u32 %v3866_v28, 16  ;;  %v4329_v41 = vshll.u32 %v3867_v24, 16  ;;  %v4956_v3 = vld [vmem:[#allocation2 + $0xf4] sm:$0xf] }
 0x256   :  { %v7513_v16 = vpop.permute.xlu1 %7512  ;;  %v4312_v36 = vor.u32 %v4311_v30, %v4307_v35  ;;  %v4317_v45 = vrot.slane %v4315_v6, 5  ;;  %v4322_v2 = vrot.slane %v4320_v4, 4  ;;  %v4333_v15 = vshrl.u32 %v3867_v24, 16  ;;  %v5947_v42 = vld [vmem:[#allocation2 + $0xf0] sm:$0xf] }
 0x257   :  { %5800 = vrot.lane.b32.xlu1 %v9524_v38, %s9680_s24  ;;  %7603 = vst.msk [vmem:[#allocation3 + $0x30] sm:$0xff] %vm7596_vm15, %v7513_v16  ;;  %v4303_v23 = vrot.slane %v4302_v11, 4  ;;  %v4325_v9 = vrot.slane %v4323_v61, 5  ;;  %v4331_v31 = vrot.slane %v4329_v41, 5  ;;  %v4339_v37 = vshll.u32 %v3868_v19, 16 }
 0x258   :  { %v7515_v34 = vpop.permute.xlu0 %7514  ;;  %v4313_v62 = vrot.slane %v4312_v36, 4  ;;  %v4335_v1 = vrot.slane %v4333_v15, 4  ;;  %v8976_v51 = vrot.slane %v4952_v32, 9  ;;  %v5210_v56 = vrot.slane %v4953_v39, 5  ;;  %v11495_v40 = vld [vmem:[#allocation2 + $0xf8] sm:$0x1] }
 0x259   :  { %7604 = vst.msk [vmem:[#allocation3 + $0x38] sm:$0xff] %vm7596_vm15, %v7515_v34  ;;  %3365 = vrot.lane.b32.xlu0 %v8880_v27, %s9676_s3  ;;  %v4308_v29 = vsel %vm9844_vm11, %v4303_v23, %v4307_v35  ;;  %v4326_v50 = vor.u32 %v4325_v9, %v4322_v2  ;;  %v4341_v52 = vrot.slane %v4339_v37, 5  ;;  %v5213_v43 = vrot.slane %v4954_v59, 5  ;;  %v5948_v25 = vld [vmem:[#allocation2 + $0xf4] sm:$0xf] }
 0x25a   :  { %v3352_v18 = vpop.permute.xlu1 %3351  ;;  %v4318_v28 = vsel %vm9844_vm11, %v4313_v62, %v4317_v45  ;;  %v4336_v63 = vor.u32 %v4335_v1, %v4331_v31  ;;  %v11493_v21 = vsel %vm10368_vm14, %v8976_v51, %v5210_v56  ;;  %v5212_v58 = vrot.slane %v5210_v56, 4  ;;  %v5949_v34 = vld [vmem:[#allocation2 + $0xf8] sm:$0x1]  ;;  %v5950_v48 = vld [vmem:[#allocation2 + $0xfc] sm:$0xf]  ;;  %v9526_v51 = vld [vmem:[#allocation2 + $0xf0] sm:$0xff]  }
 0x25b   :  { %6889 = vrot.lane.b32.xlu1 %v9071_v46, %s9681_s25  ;;  %3439 = vst.msk [vmem:[#allocation3 + $0x48] sm:$0xff] %vm3429_vm1, %v3352_v18  ;;  %v4327_v27 = vrot.slane %v4326_v50, 4  ;;  %v8977_v24 = vrot.slane %v4955_v0, 9  ;;  %v5217_v38 = vrot.slane %v4956_v3, 5  ;;  %v8881_v7 = vcombine.low %v11467_v57, %v11472_v26  ;;  %v5951_v26 = vld [vmem:[#allocation2 + $0x100] sm:$0xf] }
 0x25c   :  { %v3703_v60 = vpop.permute.xlu0 %3702  ;;  %v4337_v53 = vrot.slane %v4336_v63, 4  ;;  %v5214_v19 = vsel %vm10368_vm14, %v5212_v58, %v5213_v43  ;;  %v6380_v22 = vshrl.u32 %v5947_v42, 16  ;;  %v8944_v35 = vcombine.low %v4308_v29, %v4318_v28  ;;  %v5952_v4 = vld [vmem:[#allocation2 + $0x104] sm:$0x1]  ;;  %v7036_v16 = vld [vmem:[#allocation2 + $0xf0] sm:$0xe] }
 0x25d   :  { %3791 = vst.msk [vmem:[#allocation3 + $0x40] sm:$0xff] %vm3782_vm2, %v3703_v60  ;;  %3718 = vrot.lane.b32.xlu0 %v9525_v33, %s9677_s21  ;;  %v4332_v49 = vsel %vm9844_vm11, %v4327_v27, %v4331_v31  ;;  %v9008_v6 = vcombine.low %v11493_v21, %v5214_v19  ;;  %v5220_v57 = vrot.slane %v11495_v40, 5  ;;  %v6383_v32 = vshll.u32 %v5947_v42, 16  ;;  %v7037_v2 = vld [vmem:[#allocation2 + $0xf4] sm:$0xf] }
 0x25e   :  { %v3705_v46 = vpop.permute.xlu1 %3704  ;;  %v7635_v11 = vld [vmem:[#allocation3 + $0x30] sm:$0xff]  ;;  %v4342_v61 = vsel %vm9844_vm11, %v4337_v53, %v4341_v52  ;;  %v6382_v41 = vrot.slane %v6380_v22, 4  ;;  %v6389_v39 = vshll.u32 %v5948_v25, 16  ;;  %v11518_v36 = vsel %vm10368_vm14, %v8977_v24, %v5217_v38  ;;  %v7038_v9 = vld [vmem:[#allocation2 + $0xf8] sm:$0x1]  ;;  %v9527_v24 = vld [vmem:[#allocation2 + $0xf0] sm:$0xff]  }
 0x25f   :  { %7530 = vrot.lane.b32.xlu1 %v9135_v54, %s9682_s26  ;;  %3792 = vst.msk [vmem:[#allocation3 + $0x48] sm:$0xff] %vm3782_vm2, %v3705_v46  ;;  %9368 = vmatprep.mubr.msk.bf16.mxu0 %vm7681_vm0, %v7635_v11  ;;  %v5219_v45 = vrot.slane %v5217_v38, 4  ;;  %v6393_v12 = vshrl.u32 %v5948_v25, 16  ;;  %v6399_v54 = vshll.u32 %v5949_v34, 16  ;;  %v11520_v15 = vcombine.low %v4332_v49, %v4342_v61  ;;  %v11525_v1 = vld [vmem:[#allocation2 + $0xfc] sm:$0xe] }
 0x260   :  { %v4792_v47 = vpop.permute.xlu0 %4791  ;;  %v7636_v30 = vld [vmem:[#allocation3 + $0x38] sm:$0xff]  ;;  %v6385_v59 = vrot.slane %v6383_v32, 5  ;;  %v6391_v60 = vrot.slane %v6389_v39, 5  ;;  %v6404_v23 = vshrl.u32 %v5950_v48, 16  ;;  %v6407_v0 = vshll.u32 %v5950_v48, 16 }
 0x261   :  { %4880 = vst.msk [vmem:[#allocation3 + $0x40] sm:$0xff] %vm4871_vm3, %v4792_v47  ;;  %9369 = vmatmul.mubr.msk.bf16.gmra.mrb[12].mxu0 %vm7681_vm0, %v7636_v30  ;;  %4807 = vrot.lane.b32.xlu0 %v8944_v35, %s9678_s22  ;;  %v6395_v31 = vrot.slane %v6393_v12, 4  ;;  %v6401_v37 = vrot.slane %v6399_v54, 5  ;;  %v6413_v62 = vshll.u32 %v5951_v26, 16  ;;  %v6417_v29 = vshrl.u32 %v5951_v26, 16 }
 0x262   :  { %v4794_v56 = vpop.permute.xlu1 %4793  ;;  %v6386_v3 = vor.u32 %v6385_v59, %v6382_v41  ;;  %v6406_v33 = vrot.slane %v6404_v23, 4  ;;  %v6423_v50 = vshll.u32 %v5952_v4, 16  ;;  %v7040_v52 = vld [vmem:[#allocation2 + $0x100] sm:$0xf]  ;;  %v6409_v18 = vrot.slane %v6407_v0, 5 }
 0x263   :  { %3367 = vrot.lane.b32.xlu1 %v8881_v7, %s9676_s3  ;;  %4881 = vst.msk [vmem:[#allocation3 + $0x48] sm:$0xff] %vm4871_vm3, %v4794_v56  ;;  %v6396_v42 = vor.u32 %v6395_v31, %v6391_v60  ;;  %v6415_v28 = vrot.slane %v6413_v62, 5  ;;  %v9104_v63 = vrot.slane %v7036_v16, 9  ;;  %v7041_v21 = vld [vmem:[#allocation2 + $0x104] sm:$0x1]  ;;  %v11531_v58 = vsel %vm10368_vm14, %v5219_v45, %v5220_v57 }
 0x264   :  { %v5433_v5 = vpop.permute.xlu0 %5432  ;;  %v6387_v40 = vrot.slane %v6386_v3, 4  ;;  %v6419_v27 = vrot.slane %v6417_v29, 4  ;;  %v7294_v47 = vrot.slane %v7037_v2, 5  ;;  %v6410_v25 = vor.u32 %v6409_v18, %v6406_v33  ;;  %v2872_v49 = vld [vmem:[#allocation2 + $0xf0] sm:$0xe] }
 0x265   :  { %5521 = vst.msk [vmem:[#allocation3 + $0x40] sm:$0xff] %vm5512_vm9, %v5433_v5  ;;  %5448 = vrot.lane.b32.xlu0 %v9008_v6, %s9679_s23  ;;  %v6397_v38 = vrot.slane %v6396_v42, 4  ;;  %v6425_v7 = vrot.slane %v6423_v50, 5  ;;  %v7297_v53 = vrot.slane %v7038_v9, 5  ;;  %v9105_v35 = vrot.slane %v11525_v1, 9 }
 0x266   :  { %v5435_v19 = vpop.permute.xlu1 %5434  ;;  %v6392_v34 = vsel %vm9844_vm11, %v6387_v40, %v6391_v60  ;;  %v6420_v22 = vor.u32 %v6419_v27, %v6415_v28  ;;  %v7296_v48 = vrot.slane %v7294_v47, 4  ;;  %v6411_v6 = vrot.slane %v6410_v25, 4  ;;  %v2873_v46 = vld [vmem:[#allocation2 + $0xf4] sm:$0xf]  ;;  %v2874_v11 = vld [vmem:[#allocation2 + $0xf8] sm:$0x1] }
 0x267   :  { %3720 = vrot.lane.b32.xlu1 %v9526_v51, %s9677_s21  ;;  %5522 = vst.msk [vmem:[#allocation3 + $0x48] sm:$0xff] %vm5512_vm9, %v5435_v19  ;;  %v6402_v30 = vsel %vm9844_vm11, %v6397_v38, %v6401_v37  ;;  %v11544_v26 = vsel %vm10368_vm14, %v9104_v63, %v7294_v47  ;;  %v7301_v4 = vrot.slane %v7040_v52, 5  ;;  %v9009_v61 = vcombine.low %v11518_v36, %v11531_v58  ;;  %v2875_v16 = vld [vmem:[#allocation2 + $0xfc] sm:$0xe]  ;;  %v2876_v45 = vld [vmem:[#allocation2 + $0x100] sm:$0xf] }
 0x268   :  { %v5787_v43 = vpop.permute.xlu0 %5786  ;;  %v6421_v41 = vrot.slane %v6420_v22, 4  ;;  %v7298_v32 = vsel %vm10368_vm14, %v7296_v48, %v7297_v53  ;;  %v7304_v39 = vrot.slane %v7041_v21, 5  ;;  %v9072_v5 = vcombine.low %v6392_v34, %v6402_v30  ;;  %v11554_v59 = vld [vmem:[#allocation2 + $0x104] sm:$0x1]  ;;  %v3869_v36 = vld [vmem:[#allocation2 + $0xfc] sm:$0xf] }
 0x269   :  { %5875 = vst.msk [vmem:[#allocation3 + $0x40] sm:$0xff] %vm5866_vm10, %v5787_v43  ;;  %5802 = vrot.lane.b32.xlu0 %v9527_v24, %s9680_s24  ;;  %v6416_v12 = vsel %vm9844_vm11, %v6411_v6, %v6415_v28  ;;  %v7303_v54 = vrot.slane %v7301_v4, 4  ;;  %v8850_v2 = vrot.slane %v2872_v49, 9  ;;  %v9136_v9 = vcombine.low %v11544_v26, %v7298_v32  ;;  %v3870_v0 = vld [vmem:[#allocation2 + $0x100] sm:$0xf] }
 0x26a   :  { %v5789_v60 = vpop.permute.xlu1 %5788  ;;  %v6426_v23 = vsel %vm9844_vm11, %v6421_v41, %v6425_v7  ;;  %v3141_v31 = vrot.slane %v2873_v46, 5  ;;  %v3144_v37 = vrot.slane %v2874_v11, 5  ;;  %v11566_v1 = vsel %vm10368_vm14, %v9105_v35, %v7301_v4  ;;  %v3871_v3 = vld [vmem:[#allocation2 + $0x104] sm:$0x1]  ;;  %v3872_v33 = vld [vmem:[#allocation2 + $0x108] sm:$0xf] }
 0x26b   :  { %4809 = vrot.lane.b32.xlu1 %v11520_v15, %s9678_s22  ;;  %5876 = vst.msk [vmem:[#allocation3 + $0x48] sm:$0xff] %vm5866_vm10, %v5789_v60  ;;  %v11562_v62 = vcombine.low %v6416_v12, %v6426_v23  ;;  %v8851_v56 = vrot.slane %v2875_v16, 9  ;;  %v3148_v15 = vrot.slane %v2876_v45, 5  ;;  %v11570_v29 = vsel %vm10368_vm14, %v7303_v54, %v7304_v39  ;;  %v3873_v42 = vld [vmem:[#allocation2 + $0x10c] sm:$0xf]  ;;  %v9528_v27 = vld [vmem:[#allocation2 + $0xfc] sm:$0xff]  }
 0x26c   :  { %v6876_v57 = vpop.permute.xlu0 %6875  ;;  %v3143_v50 = vrot.slane %v3141_v31, 4  ;;  %v3151_v52 = vrot.slane %v11554_v59, 5  ;;  %v4344_v43 = vshrl.u32 %v3869_v36, 16  ;;  %v3142_v18 = vsel %vm10368_vm14, %v8850_v2, %v3141_v31  ;;  %v3874_v58 = vld [vmem:[#allocation2 + $0x110] sm:$0x1] }
 0x26d   :  { %6964 = vst.msk [vmem:[#allocation3 + $0x40] sm:$0xff] %vm6955_vm12, %v6876_v57  ;;  %6891 = vrot.lane.b32.xlu0 %v9072_v5, %s9681_s25  ;;  %v3150_v28 = vrot.slane %v3148_v15, 4  ;;  %v4347_v63 = vshll.u32 %v3869_v36, 16  ;;  %v4353_v21 = vshll.u32 %v3870_v0, 16  ;;  %v11577_v40 = vld [vmem:[#allocation2 + $0xfc] sm:$0xe]  ;;  %v9137_v53 = vcombine.low %v11566_v1, %v11570_v29 }
 0x26e   :  { %v6878_v47 = vpop.permute.xlu1 %6877  ;;  %v3145_v24 = vsel %vm10368_vm14, %v3143_v50, %v3144_v37  ;;  %v4346_v38 = vrot.slane %v4344_v43, 4  ;;  %v4357_v25 = vshrl.u32 %v3870_v0, 16  ;;  %v4363_v7 = vshll.u32 %v3871_v3, 16  ;;  %v4959_v35 = vld [vmem:[#allocation2 + $0x100] sm:$0xf] }
 0x26f   :  { %5450 = vrot.lane.b32.xlu1 %v9009_v61, %s9679_s23  ;;  %6965 = vst.msk [vmem:[#allocation3 + $0x48] sm:$0xff] %vm6955_vm12, %v6878_v47  ;;  %v11587_v19 = vsel %vm10368_vm14, %v8851_v56, %v3148_v15  ;;  %v4349_v22 = vrot.slane %v4347_v63, 5  ;;  %v4355_v48 = vrot.slane %v4353_v21, 5  ;;  %v8882_v49 = vcombine.low %v3142_v18, %v3145_v24  ;;  %v4960_v26 = vld [vmem:[#allocation2 + $0x104] sm:$0x1] }
 0x270   :  { %v7517_v51 = vpop.permute.xlu0 %7516  ;;  %v4359_v30 = vrot.slane %v4357_v25, 4  ;;  %v4365_v6 = vrot.slane %v4363_v7, 5  ;;  %v4368_v57 = vshrl.u32 %v3872_v33, 16  ;;  %v4371_v46 = vshll.u32 %v3872_v33, 16  ;;  %v4961_v41 = vld [vmem:[#allocation2 + $0x108] sm:$0xe] }
 0x271   :  { %7605 = vst.msk [vmem:[#allocation3 + $0x40] sm:$0xff] %vm7596_vm15, %v7517_v51  ;;  %7532 = vrot.lane.b32.xlu0 %v9136_v9, %s9682_s26  ;;  %v4350_v4 = vor.u32 %v4349_v22, %v4346_v38  ;;  %v4377_v11 = vshll.u32 %v3873_v42, 16  ;;  %v4381_v61 = vshrl.u32 %v3873_v42, 16  ;;  %v4387_v45 = vshll.u32 %v3874_v58, 16  ;;  %v4962_v12 = vld [vmem:[#allocation2 + $0x10c] sm:$0xf] }
 0x272   :  { %v7519_v32 = vpop.permute.xlu1 %7518  ;;  %v4360_v39 = vor.u32 %v4359_v30, %v4355_v48  ;;  %v4370_v16 = vrot.slane %v4368_v57, 4  ;;  %v8978_v5 = vrot.slane %v11577_v40, 9  ;;  %v4373_v36 = vrot.slane %v4371_v46, 5  ;;  %v9529_v51 = vld [vmem:[#allocation2 + $0xfc] sm:$0xff]   ;;  %v4963_v50 = vld [vmem:[#allocation2 + $0x110] sm:$0x1] }
 0x273   :  { %5804 = vrot.lane.b32.xlu1 %v9528_v27, %s9680_s24  ;;  %7606 = vst.msk [vmem:[#allocation3 + $0x48] sm:$0xff] %vm7596_vm15, %v7519_v32  ;;  %v4351_v59 = vrot.slane %v4350_v4, 4  ;;  %v4379_v60 = vrot.slane %v4377_v11, 5  ;;  %v4383_v23 = vrot.slane %v4381_v61, 4  ;;  %v11596_v9 = vsel %vm10368_vm14, %v3150_v28, %v3151_v52  ;;  %v5953_v43 = vld [vmem:[#allocation2 + $0x108] sm:$0xf] }
 0x274   :  { %v3354_v34 = vpop.permute.xlu0 %3353  ;;  %v4361_v31 = vrot.slane %v4360_v39, 4  ;;  %v5224_v37 = vrot.slane %v4959_v35, 5  ;;  %v5227_v0 = vrot.slane %v4960_v26, 5  ;;  %v4374_v15 = vor.u32 %v4373_v36, %v4370_v16  ;;  %v5955_v7 = vld [vmem:[#allocation2 + $0x110] sm:$0x1] }
 0x275   :  { %3440 = vst.msk [vmem:[#allocation3 + $0x50] sm:$0xff] %vm3429_vm1, %v3354_v34  ;;  %3369 = vrot.lane.b32.xlu0 %v8882_v49, %s9676_s3  ;;  %v4356_v56 = vsel %vm9844_vm11, %v4351_v59, %v4355_v48  ;;  %v4384_v3 = vor.u32 %v4383_v23, %v4379_v60  ;;  %v4389_v33 = vrot.slane %v4387_v45, 5  ;;  %v8979_v28 = vrot.slane %v4961_v41, 9  ;;  %v5956_v49 = vld [vmem:[#allocation2 + $0x114] sm:$0xf]  ;;  %v9530_v45 = vld [vmem:[#allocation2 + $0x108] sm:$0xff]  }
 0x276   :  { %v3356_v52 = vpop.permute.xlu1 %3355  ;;  %v4366_v42 = vsel %vm9844_vm11, %v4361_v31, %v4365_v6  ;;  %v5226_v18 = vrot.slane %v5224_v37, 4  ;;  %v5231_v63 = vrot.slane %v4962_v12, 5  ;;  %v8883_v21 = vcombine.low %v11587_v19, %v11596_v9  ;;  %v5957_v30 = vld [vmem:[#allocation2 + $0x118] sm:$0xf]  ;;  %v5958_v61 = vld [vmem:[#allocation2 + $0x11c] sm:$0x1] }
 0x277   :  { %6893 = vrot.lane.b32.xlu1 %v11562_v62, %s9681_s25  ;;  %3441 = vst.msk [vmem:[#allocation3 + $0x58] sm:$0xff] %vm3429_vm1, %v3356_v52  ;;  %v4375_v58 = vrot.slane %v4374_v15, 4  ;;  %v4385_v40 = vrot.slane %v4384_v3, 4  ;;  %v11612_v47 = vsel %vm10368_vm14, %v8978_v5, %v5224_v37  ;;  %v5954_v62 = vld [vmem:[#allocation2 + $0x10c] sm:$0xf]  ;;  %v8946_v24 = vcombine.low %v4356_v56, %v4366_v42 }
 0x278   :  { %v3707_v54 = vpop.permute.xlu0 %3706  ;;  %v7637_v2 = vld [vmem:[#allocation3 + $0x40] sm:$0xff]  ;;  %v11617_v38 = vsel %vm10368_vm14, %v5226_v18, %v5227_v0  ;;  %v5234_v25 = vrot.slane %v4963_v50, 5  ;;  %v6428_v19 = vshrl.u32 %v5953_v43, 16  ;;  %v5233_v48 = vrot.slane %v5231_v63, 4  ;;  %v7042_v39 = vld [vmem:[#allocation2 + $0x108] sm:$0xe] }
 0x279   :  { %3793 = vst.msk [vmem:[#allocation3 + $0x50] sm:$0xff] %vm3782_vm2, %v3707_v54  ;;  %9372 = vmatprep.mubr.msk.bf16.mxu0 %vm7681_vm0, %v7637_v2  ;;  %3722 = vrot.lane.b32.xlu0 %v9529_v51, %s9677_s21  ;;  %v4380_v34 = vsel %vm9844_vm11, %v4375_v58, %v4379_v60  ;;  %v4390_v22 = vsel %vm9844_vm11, %v4385_v40, %v4389_v33  ;;  %v6431_v35 = vshll.u32 %v5953_v43, 16  ;;  %v6437_v11 = vshll.u32 %v5954_v62, 16  ;;  %v7043_v16 = vld [vmem:[#allocation2 + $0x10c] sm:$0xf] }
 0x27a   :  { %v3709_v6 = vpop.permute.xlu1 %3708  ;;  %v7638_v57 = vld [vmem:[#allocation3 + $0x48] sm:$0xff]  ;;  %v9010_v26 = vcombine.low %v11612_v47, %v11617_v38  ;;  %v11632_v4 = vsel %vm10368_vm14, %v8979_v28, %v5231_v63  ;;  %v6430_v46 = vrot.slane %v6428_v19, 4  ;;  %v11636_v41 = vcombine.low %v4380_v34, %v4390_v22  ;;  %v7044_v59 = vld [vmem:[#allocation2 + $0x110] sm:$0x1]  ;;  %v7045_v31 = vld [vmem:[#allocation2 + $0x114] sm:$0xe] }
 0x27b   :  { %7534 = vrot.lane.b32.xlu1 %v9137_v53, %s9682_s26  ;;  %3794 = vst.msk [vmem:[#allocation3 + $0x58] sm:$0xff] %vm3782_vm2, %v3709_v6  ;;  %9373 = vmatmul.mubr.msk.bf16.gmra.mrb[16].mxu0 %vm7681_vm0, %v7638_v57  ;;  %v6433_v29 = vrot.slane %v6431_v35, 5  ;;  %v6441_v53 = vshrl.u32 %v5954_v62, 16  ;;  %v6447_v32 = vshll.u32 %v5955_v7, 16  ;;  %v6439_v5 = vrot.slane %v6437_v11, 5  ;;  %v9531_v63 = vld [vmem:[#allocation2 + $0x108] sm:$0xff]  }
 0x27c   :  { %v4796_v27 = vpop.permute.xlu0 %4795  ;;  %v6452_v12 = vshrl.u32 %v5956_v49, 16  ;;  %v6455_v54 = vshll.u32 %v5956_v49, 16  ;;  %v6461_v2 = vshll.u32 %v5957_v30, 16  ;;  %v11642_v36 = vsel %vm10368_vm14, %v5233_v48, %v5234_v25  ;;  %v7046_v37 = vld [vmem:[#allocation2 + $0x118] sm:$0xf] }
 0x27d   :  { %4882 = vst.msk [vmem:[#allocation3 + $0x50] sm:$0xff] %vm4871_vm3, %v4796_v27  ;;  %4811 = vrot.lane.b32.xlu0 %v8946_v24, %s9678_s22  ;;  %v6434_v60 = vor.u32 %v6433_v29, %v6430_v46  ;;  %v6443_v23 = vrot.slane %v6441_v53, 4  ;;  %v6465_v9 = vshrl.u32 %v5957_v30, 16  ;;  %v6471_v3 = vshll.u32 %v5958_v61, 16  ;;  %v2878_v33 = vld [vmem:[#allocation2 + $0x108] sm:$0xe] }
 0x27e   :  { %v4798_v0 = vpop.permute.xlu1 %4797  ;;  %v6454_v51 = vrot.slane %v6452_v12, 4  ;;  %v6457_v56 = vrot.slane %v6455_v54, 5  ;;  %v11645_v15 = vrot.slane %v6461_v2, 5  ;;  %v6449_v42 = vrot.slane %v6447_v32, 5  ;;  %v7047_v28 = vld [vmem:[#allocation2 + $0x11c] sm:$0x1] }
 0x27f   :  { %3371 = vrot.lane.b32.xlu1 %v8883_v21, %s9676_s3  ;;  %4883 = vst.msk [vmem:[#allocation3 + $0x58] sm:$0xff] %vm4871_vm3, %v4798_v0  ;;  %v6435_v43 = vrot.slane %v6434_v60, 4  ;;  %v6444_v52 = vor.u32 %v6443_v23, %v6439_v5  ;;  %v6467_v18 = vrot.slane %v6465_v9, 4  ;;  %v9106_v21 = vrot.slane %v7042_v39, 9  ;;  %v2879_v47 = vld [vmem:[#allocation2 + $0x10c] sm:$0xf] }
 0x280   :  { %v5437_v1 = vpop.permute.xlu0 %5436  ;;  %v6458_v58 = vor.u32 %v6457_v56, %v6454_v51  ;;  %v7308_v40 = vrot.slane %v7043_v16, 5  ;;  %v7311_v27 = vrot.slane %v7044_v59, 5  ;;  %v6473_v25 = vrot.slane %v6471_v3, 5  ;;  %v2880_v35 = vld [vmem:[#allocation2 + $0x110] sm:$0x1] }
 0x281   :  { %5523 = vst.msk [vmem:[#allocation3 + $0x50] sm:$0xff] %vm5512_vm9, %v5437_v1  ;;  %5452 = vrot.lane.b32.xlu0 %v9010_v26, %s9679_s23  ;;  %v6440_v62 = vsel %vm9844_vm11, %v6435_v43, %v6439_v5  ;;  %v6445_v24 = vrot.slane %v6444_v52, 4  ;;  %v6468_v38 = vor.u32 %v6467_v18, %v11645_v15  ;;  %v9107_v22 = vrot.slane %v7045_v31, 9  ;;  %v2881_v46 = vld [vmem:[#allocation2 + $0x114] sm:$0xe] }
 0x282   :  { %v5439_v7 = vpop.permute.xlu1 %5438  ;;  %v6459_v19 = vrot.slane %v6458_v58, 4  ;;  %v7310_v34 = vrot.slane %v7308_v40, 4  ;;  %v7315_v48 = vrot.slane %v7046_v37, 5  ;;  %v9011_v49 = vcombine.low %v11632_v4, %v11642_v36  ;;  %v2882_v11 = vld [vmem:[#allocation2 + $0x118] sm:$0xf] }
 0x283   :  { %3724 = vrot.lane.b32.xlu1 %v9530_v45, %s9677_s21  ;;  %5524 = vst.msk [vmem:[#allocation3 + $0x58] sm:$0xff] %vm5512_vm9, %v5439_v7  ;;  %v6450_v30 = vsel %vm9844_vm11, %v6445_v24, %v6449_v42  ;;  %v6469_v6 = vrot.slane %v6468_v38, 4  ;;  %v8852_v26 = vrot.slane %v2878_v33, 9  ;;  %v7309_v1 = vsel %vm10368_vm14, %v9106_v21, %v7308_v40  ;;  %v2883_v53 = vld [vmem:[#allocation2 + $0x11c] sm:$0x1]  ;;  %v9532_v52 = vld [vmem:[#allocation2 + $0x114] sm:$0xff]  }
 0x284   :  { %v5791_v50 = vpop.permute.xlu0 %5790  ;;  %v9074_v61 = vcombine.low %v6440_v62, %v6450_v30  ;;  %v7312_v29 = vsel %vm10368_vm14, %v7310_v34, %v7311_v27  ;;  %v7318_v4 = vrot.slane %v7047_v28, 5  ;;  %v6464_v32 = vsel %vm9844_vm11, %v6459_v19, %v11645_v15  ;;  %v3875_v5 = vld [vmem:[#allocation2 + $0x114] sm:$0xf]  ;;  %v3876_v60 = vld [vmem:[#allocation2 + $0x118] sm:$0xf] }
 0x285   :  { %5877 = vst.msk [vmem:[#allocation3 + $0x50] sm:$0xff] %vm5866_vm10, %v5791_v50  ;;  %5806 = vrot.lane.b32.xlu0 %v9531_v63, %s9680_s24  ;;  %v6474_v39 = vsel %vm9844_vm11, %v6469_v6, %v6473_v25  ;;  %v7317_v16 = vrot.slane %v7315_v48, 4  ;;  %v3155_v45 = vrot.slane %v2879_v47, 5  ;;  %v11674_v54 = vsel %vm10368_vm14, %v9107_v22, %v7315_v48  ;;  %v3878_v51 = vld [vmem:[#allocation2 + $0x120] sm:$0xf] }
 0x286   :  { %v5793_v12 = vpop.permute.xlu1 %5792  ;;  %v3158_v2 = vrot.slane %v2880_v35, 5  ;;  %v8853_v59 = vrot.slane %v2881_v46, 9  ;;  %v3162_v36 = vrot.slane %v2882_v11, 5  ;;  %v9138_v23 = vcombine.low %v7309_v1, %v7312_v29  ;;  %v3879_v50 = vld [vmem:[#allocation2 + $0x124] sm:$0xf] }
 0x287   :  { %4813 = vrot.lane.b32.xlu1 %v11636_v41, %s9678_s22  ;;  %5878 = vst.msk [vmem:[#allocation3 + $0x58] sm:$0xff] %vm5866_vm10, %v5793_v12  ;;  %v11679_v31 = vsel %vm10368_vm14, %v8852_v26, %v3155_v45  ;;  %v3157_v37 = vrot.slane %v3155_v45, 4  ;;  %v3165_v0 = vrot.slane %v2883_v53, 5  ;;  %v3877_v41 = vld [vmem:[#allocation2 + $0x11c] sm:$0x1]  ;;  %v11681_v56 = vcombine.low %v6464_v32, %v6474_v39 }
 0x288   :  { %v6880_v57 = vpop.permute.xlu0 %6879  ;;  %v11685_v15 = vsel %vm10368_vm14, %v7317_v16, %v7318_v4  ;;  %v3164_v3 = vrot.slane %v3162_v36, 4  ;;  %v4392_v33 = vshrl.u32 %v3875_v5, 16  ;;  %v3880_v43 = vld [vmem:[#allocation2 + $0x128] sm:$0x1]  ;;  %v4395_v18 = vshll.u32 %v3875_v5, 16 }
 0x289   :  { %6966 = vst.msk [vmem:[#allocation3 + $0x50] sm:$0xff] %vm6955_vm12, %v6880_v57  ;;  %6895 = vrot.lane.b32.xlu0 %v9074_v61, %s9681_s25  ;;  %v3159_v42 = vsel %vm10368_vm14, %v3157_v37, %v3158_v2  ;;  %v4401_v28 = vshll.u32 %v3876_v60, 16  ;;  %v4405_v63 = vshrl.u32 %v3876_v60, 16  ;;  %v11691_v58 = vld [vmem:[#allocation2 + $0x114] sm:$0xe]  ;;  %v11697_v27 = vsel %vm10368_vm14, %v8853_v59, %v3162_v36 }
 0x28a   :  { %v6882_v21 = vpop.permute.xlu1 %6881  ;;  %v8884_v40 = vcombine.low %v11679_v31, %v3159_v42  ;;  %v4394_v47 = vrot.slane %v4392_v33, 4  ;;  %v4411_v62 = vshll.u32 %v3877_v41, 16  ;;  %v11702_v24 = vsel %vm10368_vm14, %v3164_v3, %v3165_v0  ;;  %v4966_v46 = vld [vmem:[#allocation2 + $0x11c] sm:$0x1]  ;;  %v4967_v11 = vld [vmem:[#allocation2 + $0x120] sm:$0xe] }
 0x28b   :  { %5454 = vrot.lane.b32.xlu1 %v9011_v49, %s9679_s23  ;;  %6967 = vst.msk [vmem:[#allocation3 + $0x58] sm:$0xff] %vm6955_vm12, %v6882_v21  ;;  %v4397_v25 = vrot.slane %v4395_v18, 5  ;;  %v4403_v7 = vrot.slane %v4401_v28, 5  ;;  %v4407_v19 = vrot.slane %v4405_v63, 4  ;;  %v4416_v22 = vshrl.u32 %v3878_v51, 16  ;;  %v9533_v31 = vld [vmem:[#allocation2 + $0x114] sm:$0xff]  }
 0x28c   :  { %v7521_v9 = vpop.permute.xlu0 %7520  ;;  %v4413_v34 = vrot.slane %v4411_v62, 5  ;;  %v4419_v48 = vshll.u32 %v3878_v51, 16  ;;  %v4425_v35 = vshll.u32 %v3879_v50, 16  ;;  %v4965_v49 = vld [vmem:[#allocation2 + $0x118] sm:$0xf]  ;;  %v4429_v57 = vshrl.u32 %v3879_v50, 16 }
 0x28d   :  { %7607 = vst.msk [vmem:[#allocation3 + $0x50] sm:$0xff] %vm7596_vm15, %v7521_v9  ;;  %7536 = vrot.lane.b32.xlu0 %v9138_v23, %s9682_s26  ;;  %v4398_v30 = vor.u32 %v4397_v25, %v4394_v47  ;;  %v4408_v6 = vor.u32 %v4407_v19, %v4403_v7  ;;  %v4435_v26 = vshll.u32 %v3880_v43, 16  ;;  %v4418_v1 = vrot.slane %v4416_v22, 4  ;;  %v4968_v32 = vld [vmem:[#allocation2 + $0x124] sm:$0xf] }
 0x28e   :  { %v7523_v61 = vpop.permute.xlu1 %7522  ;;  %v4421_v29 = vrot.slane %v4419_v48, 5  ;;  %v11707_v4 = vrot.slane %v4425_v35, 5  ;;  %v8980_v53 = vrot.slane %v11691_v58, 9  ;;  %v4431_v12 = vrot.slane %v4429_v57, 4  ;;  %v4969_v23 = vld [vmem:[#allocation2 + $0x128] sm:$0x1] }
 0x28f   :  { %5808 = vrot.lane.b32.xlu1 %v9532_v52, %s9680_s24  ;;  %7608 = vst.msk [vmem:[#allocation3 + $0x58] sm:$0xff] %vm7596_vm15, %v7523_v61  ;;  %v4399_v45 = vrot.slane %v4398_v30, 4  ;;  %v4409_v5 = vrot.slane %v4408_v6, 4  ;;  %v11711_v2 = vrot.slane %v4435_v26, 5  ;;  %v5238_v36 = vrot.slane %v4965_v49, 5 }
 0x290   :  { %v3358_v38 = vpop.permute.xlu0 %3357  ;;  %v4422_v59 = vor.u32 %v4421_v29, %v4418_v1  ;;  %v5241_v60 = vrot.slane %v4966_v46, 5  ;;  %v8981_v9 = vrot.slane %v4967_v11, 9  ;;  %v4432_v41 = vor.u32 %v4431_v12, %v11707_v4  ;;  %v5959_v3 = vld [vmem:[#allocation2 + $0x120] sm:$0xf]  ;;  %v5960_v18 = vld [vmem:[#allocation2 + $0x124] sm:$0xf] }
 0x291   :  { %3442 = vst.msk [vmem:[#allocation3 + $0x60] sm:$0xff] %vm3429_vm1, %v3358_v38  ;;  %3373 = vrot.lane.b32.xlu0 %v8884_v40, %s9676_s3  ;;  %v4404_v37 = vsel %vm9844_vm11, %v4399_v45, %v4403_v7  ;;  %v4414_v0 = vsel %vm9844_vm11, %v4409_v5, %v4413_v34  ;;  %v5245_v51 = vrot.slane %v4968_v32, 5  ;;  %v9139_v33 = vcombine.low %v11674_v54, %v11685_v15  ;;  %v5961_v15 = vld [vmem:[#allocation2 + $0x128] sm:$0x1]  ;;  %v5962_v62 = vld [vmem:[#allocation2 + $0x12c] sm:$0xf] }
 0x292   :  { %v8885_v50 = vcombine.low %v11697_v27, %v11702_v24  ;;  %v3360_v43 = vpop.permute.xlu1 %3359  ;;  %v4423_v52 = vrot.slane %v4422_v59, 4  ;;  %v5240_v42 = vrot.slane %v5238_v36, 4  ;;  %v4433_v28 = vrot.slane %v4432_v41, 4  ;;  %v5963_v19 = vld [vmem:[#allocation2 + $0x130] sm:$0xf]  ;;  %v9534_v5 = vld [vmem:[#allocation2 + $0x120] sm:$0xff]  }
 0x293   :  { %6897 = vrot.lane.b32.xlu1 %v11681_v56, %s9681_s25  ;;  %3443 = vst.msk [vmem:[#allocation3 + $0x68] sm:$0xff] %vm3429_vm1, %v3360_v43  ;;  %v11730_v58 = vsel %vm10368_vm14, %v8980_v53, %v5238_v36  ;;  %v5247_v21 = vrot.slane %v5245_v51, 4  ;;  %v5248_v56 = vrot.slane %v4969_v23, 5  ;;  %v8948_v40 = vcombine.low %v4404_v37, %v4414_v0  ;;  %v5964_v34 = vld [vmem:[#allocation2 + $0x134] sm:$0x1] }
 0x294   :  { %v3711_v39 = vpop.permute.xlu0 %3710  ;;  %v7639_v16 = vld [vmem:[#allocation3 + $0x50] sm:$0xff]  ;;  %v5242_v54 = vsel %vm10368_vm14, %v5240_v42, %v5241_v60  ;;  %v6476_v27 = vshrl.u32 %v5959_v3, 16  ;;  %v6479_v47 = vshll.u32 %v5959_v3, 16  ;;  %v4428_v24 = vsel %vm9844_vm11, %v4423_v52, %v11707_v4  ;;  %v7050_v4 = vld [vmem:[#allocation2 + $0x128] sm:$0x1] }
 0x295   :  { %3795 = vst.msk [vmem:[#allocation3 + $0x60] sm:$0xff] %vm3782_vm2, %v3711_v39  ;;  %9376 = vmatprep.mubr.msk.bf16.mxu0 %vm7681_vm0, %v7639_v16  ;;  %3726 = vrot.lane.b32.xlu0 %v9533_v31, %s9677_s21  ;;  %v4438_v38 = vsel %vm9844_vm11, %v4433_v28, %v11711_v2  ;;  %v11744_v25 = vsel %vm10368_vm14, %v8981_v9, %v5245_v51  ;;  %v6485_v7 = vshll.u32 %v5960_v18, 16  ;;  %v7048_v57 = vld [vmem:[#allocation2 + $0x120] sm:$0xe]  ;;  %v7049_v26 = vld [vmem:[#allocation2 + $0x124] sm:$0xf] }
 0x296   :  { %v3713_v22 = vpop.permute.xlu1 %3712  ;;  %v7640_v48 = vld [vmem:[#allocation3 + $0x58] sm:$0xff]  ;;  %v9012_v35 = vcombine.low %v11730_v58, %v5242_v54  ;;  %v11750_v49 = vsel %vm10368_vm14, %v5247_v21, %v5248_v56  ;;  %v6478_v30 = vrot.slane %v6476_v27, 4  ;;  %v6481_v6 = vrot.slane %v6479_v47, 5  ;;  %v7052_v60 = vld [vmem:[#allocation2 + $0x130] sm:$0xf]  ;;  %v9535_v58 = vld [vmem:[#allocation2 + $0x120] sm:$0xff]  }
 0x297   :  { %7538 = vrot.lane.b32.xlu1 %v9139_v33, %s9682_s26  ;;  %3796 = vst.msk [vmem:[#allocation3 + $0x68] sm:$0xff] %vm3782_vm2, %v3713_v22  ;;  %9377 = vmatmul.mubr.msk.bf16.gmra.mrb[20].mxu0 %vm7681_vm0, %v7640_v48  ;;  %v11754_v11 = vrot.slane %v6485_v7, 5  ;;  %v6489_v61 = vshrl.u32 %v5960_v18, 16  ;;  %v6495_v1 = vshll.u32 %v5961_v15, 16  ;;  %v6500_v29 = vshrl.u32 %v5962_v62, 16 }
 0x298   :  { %v4800_v63 = vpop.permute.xlu0 %4799  ;;  %v6482_v53 = vor.u32 %v6481_v6, %v6478_v30  ;;  %v6503_v32 = vshll.u32 %v5962_v62, 16  ;;  %v6509_v39 = vshll.u32 %v5963_v19, 16  ;;  %v6513_v16 = vshrl.u32 %v5963_v19, 16  ;;  %v7051_v45 = vld [vmem:[#allocation2 + $0x12c] sm:$0xe] }
 0x299   :  { %4884 = vst.msk [vmem:[#allocation3 + $0x60] sm:$0xff] %vm4871_vm3, %v4800_v63  ;;  %4815 = vrot.lane.b32.xlu0 %v8948_v40, %s9678_s22  ;;  %v8949_v12 = vcombine.low %v4428_v24, %v4438_v38  ;;  %v6491_v2 = vrot.slane %v6489_v61, 4  ;;  %v6502_v59 = vrot.slane %v6500_v29, 4  ;;  %v6519_v36 = vshll.u32 %v5964_v34, 16  ;;  %v7053_v41 = vld [vmem:[#allocation2 + $0x134] sm:$0x1] }
 0x29a   :  { %v4802_v23 = vpop.permute.xlu1 %4801  ;;  %v6483_v9 = vrot.slane %v6482_v53, 4  ;;  %v6505_v31 = vrot.slane %v6503_v32, 5  ;;  %v6511_v37 = vrot.slane %v6509_v39, 5  ;;  %v6515_v0 = vrot.slane %v6513_v16, 4  ;;  %v11759_v51 = vld [vmem:[#allocation2 + $0x124] sm:$0xf] }
 0x29b   :  { %3375 = vrot.lane.b32.xlu1 %v8885_v50, %s9676_s3  ;;  %4885 = vst.msk [vmem:[#allocation3 + $0x68] sm:$0xff] %vm4871_vm3, %v4802_v23  ;;  %v6492_v33 = vor.u32 %v6491_v2, %v11754_v11  ;;  %v6497_v43 = vrot.slane %v6495_v1, 5  ;;  %v9108_v52 = vrot.slane %v7048_v57, 9  ;;  %v7322_v42 = vrot.slane %v7049_v26, 5  ;;  %v2884_v15 = vld [vmem:[#allocation2 + $0x120] sm:$0xe] }
 0x29c   :  { %v5441_v46 = vpop.permute.xlu0 %5440  ;;  %v6506_v18 = vor.u32 %v6505_v31, %v6502_v59  ;;  %v6516_v50 = vor.u32 %v6515_v0, %v6511_v37  ;;  %v6521_v28 = vrot.slane %v6519_v36, 5  ;;  %v7325_v63 = vrot.slane %v7050_v4, 5  ;;  %v2886_v7 = vld [vmem:[#allocation2 + $0x128] sm:$0x1]  ;;  %v2887_v30 = vld [vmem:[#allocation2 + $0x12c] sm:$0xe] }
 0x29d   :  { %5525 = vst.msk [vmem:[#allocation3 + $0x60] sm:$0xff] %vm5512_vm9, %v5441_v46  ;;  %5456 = vrot.lane.b32.xlu0 %v9012_v35, %s9679_s23  ;;  %v6488_v21 = vsel %vm9844_vm11, %v6483_v9, %v11754_v11  ;;  %v6493_v56 = vrot.slane %v6492_v33, 4  ;;  %v7324_v40 = vrot.slane %v7322_v42, 4  ;;  %v9109_v54 = vrot.slane %v7051_v45, 9  ;;  %v2888_v6 = vld [vmem:[#allocation2 + $0x130] sm:$0xf] }
 0x29e   :  { %v5443_v27 = vpop.permute.xlu1 %5442  ;;  %v6507_v47 = vrot.slane %v6506_v18, 4  ;;  %v6517_v62 = vrot.slane %v6516_v50, 4  ;;  %v11771_v24 = vsel %vm10368_vm14, %v9108_v52, %v7322_v42  ;;  %v7329_v38 = vrot.slane %v7052_v60, 5  ;;  %v3881_v61 = vld [vmem:[#allocation2 + $0x12c] sm:$0xf] }
 0x29f   :  { %3728 = vrot.lane.b32.xlu1 %v9534_v5, %s9677_s21  ;;  %5526 = vst.msk [vmem:[#allocation3 + $0x68] sm:$0xff] %vm5512_vm9, %v5443_v27  ;;  %v6498_v19 = vsel %vm9844_vm11, %v6493_v56, %v6497_v43  ;;  %v11778_v22 = vsel %vm10368_vm14, %v7324_v40, %v7325_v63  ;;  %v7332_v48 = vrot.slane %v7053_v41, 5  ;;  %v3169_v35 = vrot.slane %v11759_v51, 5  ;;  %v3882_v53 = vld [vmem:[#allocation2 + $0x130] sm:$0xf] }
 0x2a0   :  { %v5795_v3 = vpop.permute.xlu0 %5794  ;;  %v9013_v57 = vcombine.low %v11744_v25, %v11750_v49  ;;  %v6512_v26 = vsel %vm9844_vm11, %v6507_v47, %v6511_v37  ;;  %v6522_v46 = vsel %vm9844_vm11, %v6517_v62, %v6521_v28  ;;  %v8854_v11 = vrot.slane %v2884_v15, 9  ;;  %v11795_v49 = vld [vmem:[#allocation2 + $0x134] sm:$0x1]  ;;  %v3884_v31 = vld [vmem:[#allocation2 + $0x138] sm:$0xf]  ;;  %v9536_v33 = vld [vmem:[#allocation2 + $0x12c] sm:$0xff]  }
 0x2a1   :  { %5879 = vst.msk [vmem:[#allocation3 + $0x60] sm:$0xff] %vm5866_vm10, %v5795_v3  ;;  %5810 = vrot.lane.b32.xlu0 %v9535_v58, %s9680_s24  ;;  %v9076_v1 = vcombine.low %v6488_v21, %v6498_v19  ;;  %v9140_v29 = vcombine.low %v11771_v24, %v11778_v22  ;;  %v11793_v4 = vsel %vm10368_vm14, %v9109_v54, %v7329_v38  ;;  %v7331_v25 = vrot.slane %v7329_v38, 4  ;;  %v3883_v2 = vld [vmem:[#allocation2 + $0x134] sm:$0x1]  ;;  %v3885_v37 = vld [vmem:[#allocation2 + $0x13c] sm:$0xf] }
 0x2a2   :  { %v5797_v32 = vpop.permute.xlu1 %5796  ;;  %v3171_v39 = vrot.slane %v3169_v35, 4  ;;  %v3172_v16 = vrot.slane %v2886_v7, 5  ;;  %v8855_v45 = vrot.slane %v2887_v30, 9  ;;  %v3176_v5 = vrot.slane %v2888_v6, 5  ;;  %v3886_v3 = vld [vmem:[#allocation2 + $0x140] sm:$0x1] }
 0x2a3   :  { %4817 = vrot.lane.b32.xlu1 %v8949_v12, %s9678_s22  ;;  %5880 = vst.msk [vmem:[#allocation3 + $0x68] sm:$0xff] %vm5866_vm10, %v5797_v32  ;;  %v11799_v59 = vcombine.low %v6512_v26, %v6522_v46  ;;  %v11803_v36 = vsel %vm10368_vm14, %v7331_v25, %v7332_v48  ;;  %v4440_v23 = vshrl.u32 %v3881_v61, 16  ;;  %v4443_v9 = vshll.u32 %v3881_v61, 16  ;;  %v4970_v50 = vld [vmem:[#allocation2 + $0x12c] sm:$0xe] }
 0x2a4   :  { %v6884_v34 = vpop.permute.xlu0 %6883  ;;  %v9141_v12 = vcombine.low %v11793_v4, %v11803_v36  ;;  %v3170_v0 = vsel %vm10368_vm14, %v8854_v11, %v3169_v35  ;;  %v3173_v41 = vsel %vm10368_vm14, %v3171_v39, %v3172_v16  ;;  %v3179_v51 = vrot.slane %v11795_v49, 5  ;;  %v4971_v62 = vld [vmem:[#allocation2 + $0x130] sm:$0xf]  ;;  %v4972_v30 = vld [vmem:[#allocation2 + $0x134] sm:$0x1] }
 0x2a5   :  { %6968 = vst.msk [vmem:[#allocation3 + $0x60] sm:$0xff] %vm6955_vm12, %v6884_v34  ;;  %6899 = vrot.lane.b32.xlu0 %v9076_v1, %s9681_s25  ;;  %v11816_v43 = vsel %vm10368_vm14, %v8855_v45, %v3176_v5  ;;  %v4442_v52 = vrot.slane %v4440_v23, 4  ;;  %v4445_v42 = vrot.slane %v4443_v9, 5  ;;  %v4449_v18 = vshll.u32 %v3882_v53, 16  ;;  %v4973_v61 = vld [vmem:[#allocation2 + $0x138] sm:$0xe] }
 0x2a6   :  { %v6886_v28 = vpop.permute.xlu1 %6885  ;;  %v3178_v63 = vrot.slane %v3176_v5, 4  ;;  %v4453_v58 = vshrl.u32 %v3882_v53, 16  ;;  %v4459_v21 = vshll.u32 %v3883_v2, 16  ;;  %v4464_v56 = vshrl.u32 %v3884_v31, 16  ;;  %v4974_v39 = vld [vmem:[#allocation2 + $0x13c] sm:$0xf] }
 0x2a7   :  { %5458 = vrot.lane.b32.xlu1 %v9013_v57, %s9679_s23  ;;  %6969 = vst.msk [vmem:[#allocation3 + $0x68] sm:$0xff] %vm6955_vm12, %v6886_v28  ;;  %v8886_v40 = vcombine.low %v3170_v0, %v3173_v41  ;;  %v4446_v15 = vor.u32 %v4445_v42, %v4442_v52  ;;  %v4451_v27 = vrot.slane %v4449_v18, 5  ;;  %v4467_v47 = vshll.u32 %v3884_v31, 16  ;;  %v5965_v16 = vld [vmem:[#allocation2 + $0x138] sm:$0xf]  ;;  %v9537_v9 = vld [vmem:[#allocation2 + $0x12c] sm:$0xff]  }
 0x2a8   :  { %v7525_v60 = vpop.permute.xlu0 %7524  ;;  %v4455_v24 = vrot.slane %v4453_v58, 4  ;;  %v4461_v38 = vrot.slane %v4459_v21, 5  ;;  %v4466_v7 = vrot.slane %v4464_v56, 4  ;;  %v4473_v19 = vshll.u32 %v3885_v37, 16  ;;  %v11834_v23 = vld [vmem:[#allocation2 + $0x140] sm:$0x1] }
 0x2a9   :  { %7609 = vst.msk [vmem:[#allocation3 + $0x60] sm:$0xff] %vm7596_vm15, %v7525_v60  ;;  %7540 = vrot.lane.b32.xlu0 %v9140_v29, %s9682_s26  ;;  %v4447_v34 = vrot.slane %v4446_v15, 4  ;;  %v4469_v22 = vrot.slane %v4467_v47, 5  ;;  %v4477_v48 = vshrl.u32 %v3885_v37, 16  ;;  %v4483_v35 = vshll.u32 %v3886_v3, 16 }
 0x2aa   :  { %v7527_v6 = vpop.permute.xlu1 %7526  ;;  %v4456_v57 = vor.u32 %v4455_v24, %v4451_v27  ;;  %v11823_v26 = vrot.slane %v4473_v19, 5  ;;  %v8982_v46 = vrot.slane %v4970_v50, 9  ;;  %v5252_v11 = vrot.slane %v4971_v62, 5  ;;  %v5966_v42 = vld [vmem:[#allocation2 + $0x13c] sm:$0xf] }
 0x2ab   :  { %5812 = vrot.lane.b32.xlu1 %v9536_v33, %s9680_s24  ;;  %7610 = vst.msk [vmem:[#allocation3 + $0x68] sm:$0xff] %vm7596_vm15, %v7527_v6  ;;  %v11828_v1 = vsel %vm10368_vm14, %v3178_v63, %v3179_v51  ;;  %v4452_v49 = vsel %vm9844_vm11, %v4447_v34, %v4451_v27  ;;  %v4470_v53 = vor.u32 %v4469_v22, %v4466_v7  ;;  %v4479_v32 = vrot.slane %v4477_v48, 4  ;;  %v5967_v18 = vld [vmem:[#allocation2 + $0x140] sm:$0x1]  ;;  %v5968_v56 = vld [vmem:[#allocation2 + $0x144] sm:$0xf] }
 0x2ac   :  { %v3362_v54 = vpop.permute.xlu0 %3361  ;;  %v4457_v45 = vrot.slane %v4456_v57, 4  ;;  %v4485_v5 = vrot.slane %v4483_v35, 5  ;;  %v5254_v2 = vrot.slane %v5252_v11, 4  ;;  %v5255_v60 = vrot.slane %v4972_v30, 5  ;;  %v5970_v7 = vld [vmem:[#allocation2 + $0x14c] sm:$0x1] }
 0x2ad   :  { %3444 = vst.msk [vmem:[#allocation3 + $0x70] sm:$0xff] %vm3429_vm1, %v3362_v54  ;;  %3377 = vrot.lane.b32.xlu0 %v8886_v40, %s9676_s3  ;;  %v4471_v31 = vrot.slane %v4470_v53, 4  ;;  %v4480_v37 = vor.u32 %v4479_v32, %v11823_v26  ;;  %v11840_v0 = vsel %vm10368_vm14, %v8982_v46, %v5252_v11  ;;  %v8983_v41 = vrot.slane %v4973_v61, 9  ;;  %v7054_v30 = vld [vmem:[#allocation2 + $0x138] sm:$0xe] }
 0x2ae   :  { %v3364_v51 = vpop.permute.xlu1 %3363  ;;  %v4462_v3 = vsel %vm9844_vm11, %v4457_v45, %v4461_v38  ;;  %v11848_v33 = vsel %vm10368_vm14, %v5254_v2, %v5255_v60  ;;  %v5259_v52 = vrot.slane %v4974_v39, 5  ;;  %v6524_v50 = vshrl.u32 %v5965_v16, 16  ;;  %v7055_v4 = vld [vmem:[#allocation2 + $0x13c] sm:$0xf]  ;;  %v7057_v45 = vld [vmem:[#allocation2 + $0x144] sm:$0xe] }
 0x2af   :  { %6901 = vrot.lane.b32.xlu1 %v11799_v59, %s9681_s25  ;;  %v8887_v28 = vcombine.low %v11816_v43, %v11828_v1  ;;  %3445 = vst.msk [vmem:[#allocation3 + $0x78] sm:$0xff] %vm3429_vm1, %v3364_v51  ;;  %v8950_v63 = vcombine.low %v4452_v49, %v4462_v3  ;;  %v4481_v58 = vrot.slane %v4480_v37, 4  ;;  %v5262_v21 = vrot.slane %v11834_v23, 5  ;;  %v5969_v43 = vld [vmem:[#allocation2 + $0x148] sm:$0xf]  ;;  %v9538_v49 = vld [vmem:[#allocation2 + $0x138] sm:$0xff]  }
 0x2b0   :  { %v3715_v29 = vpop.permute.xlu0 %3714  ;;  %v7641_v25 = vld [vmem:[#allocation3 + $0x60] sm:$0xff]  ;;  %v4476_v40 = vsel %vm9844_vm11, %v4471_v31, %v11823_v26  ;;  %v9014_v54 = vcombine.low %v11840_v0, %v11848_v33  ;;  %v6526_v15 = vrot.slane %v6524_v50, 4  ;;  %v6527_v27 = vshll.u32 %v5965_v16, 16  ;;  %v7059_v31 = vld [vmem:[#allocation2 + $0x14c] sm:$0x1] }
 0x2b1   :  { %3797 = vst.msk [vmem:[#allocation3 + $0x70] sm:$0xff] %vm3782_vm2, %v3715_v29  ;;  %9380 = vmatprep.mubr.msk.bf16.mxu0 %vm7681_vm0, %v7641_v25  ;;  %3730 = vrot.lane.b32.xlu0 %v9537_v9, %s9677_s21  ;;  %v4486_v47 = vsel %vm9844_vm11, %v4481_v58, %v4485_v5  ;;  %v6533_v62 = vshll.u32 %v5966_v42, 16  ;;  %v6537_v24 = vshrl.u32 %v5966_v42, 16  ;;  %v6543_v38 = vshll.u32 %v5967_v18, 16  ;;  %v7056_v25 = vld [vmem:[#allocation2 + $0x140] sm:$0x1] }
 0x2b2   :  { %v7642_v19 = vld [vmem:[#allocation3 + $0x68] sm:$0xff]  ;;  %v11869_v34 = vsel %vm10368_vm14, %v8983_v41, %v5259_v52  ;;  %v5261_v22 = vrot.slane %v5259_v52, 4  ;;  %v6529_v48 = vrot.slane %v6527_v27, 5  ;;  %v6548_v35 = vshrl.u32 %v5968_v56, 16  ;;  %v3717_v6 = vpop.permute.xlu1 %3716  ;;  %v7058_v5 = vld [vmem:[#allocation2 + $0x148] sm:$0xf] }
 0x2b3   :  { %7542 = vrot.lane.b32.xlu1 %v9141_v12, %s9682_s26  ;;  %9381 = vmatmul.mubr.msk.bf16.gmra.mrb[24].mxu0 %vm7681_vm0, %v7642_v19  ;;  %v11872_v57 = vcombine.low %v4476_v40, %v4486_v47  ;;  %v6535_v46 = vrot.slane %v6533_v62, 5  ;;  %v6539_v11 = vrot.slane %v6537_v24, 4  ;;  %v6545_v61 = vrot.slane %v6543_v38, 5  ;;  %3798 = vst.msk [vmem:[#allocation3 + $0x78] sm:$0xff] %vm3782_vm2, %v3717_v6  ;;  %v2890_v33 = vld [vmem:[#allocation2 + $0x138] sm:$0xe] }
 0x2b4   :  { %v4804_v59 = vpop.permute.xlu0 %4803  ;;  %v6530_v36 = vor.u32 %v6529_v48, %v6526_v15  ;;  %v6550_v12 = vrot.slane %v6548_v35, 4  ;;  %v6551_v1 = vshll.u32 %v5968_v56, 16  ;;  %v6557_v29 = vshll.u32 %v5969_v43, 16  ;;  %v2891_v52 = vld [vmem:[#allocation2 + $0x13c] sm:$0xf] }
 0x2b5   :  { %4886 = vst.msk [vmem:[#allocation3 + $0x70] sm:$0xff] %vm4871_vm3, %v4804_v59  ;;  %4819 = vrot.lane.b32.xlu0 %v8950_v63, %s9678_s22  ;;  %v6540_v53 = vor.u32 %v6539_v11, %v6535_v46  ;;  %v6561_v32 = vshrl.u32 %v5969_v43, 16  ;;  %v6567_v39 = vshll.u32 %v5970_v7, 16  ;;  %v9110_v16 = vrot.slane %v7054_v30, 9  ;;  %v2892_v42 = vld [vmem:[#allocation2 + $0x140] sm:$0x1] }
 0x2b6   :  { %v6531_v2 = vrot.slane %v6530_v36, 4  ;;  %v6553_v60 = vrot.slane %v6551_v1, 5  ;;  %v6559_v23 = vrot.slane %v6557_v29, 5  ;;  %v7336_v9 = vrot.slane %v7055_v4, 5  ;;  %v9539_v58 = vld [vmem:[#allocation2 + $0x138] sm:$0xff]  }
 0x2b7   :  { %3379 = vrot.lane.b32.xlu1 %v8887_v28, %s9676_s3  ;;  %v11880_v37 = vsel %vm10368_vm14, %v5261_v22, %v5262_v21  ;;  %v6541_v41 = vrot.slane %v6540_v53, 4  ;;  %v6563_v51 = vrot.slane %v6561_v32, 4  ;;  %v7339_v3 = vrot.slane %v7056_v25, 5  ;;  %v2893_v15 = vld [vmem:[#allocation2 + $0x144] sm:$0xe] }
 0x2b8   :  { %v5445_v26 = vpop.permute.xlu0 %5444  ;;  %v6536_v18 = vsel %vm9844_vm11, %v6531_v2, %v6535_v46  ;;  %v6554_v50 = vor.u32 %v6553_v60, %v6550_v12  ;;  %v6569_v28 = vrot.slane %v6567_v39, 5  ;;  %v7338_v63 = vrot.slane %v7336_v9, 4  ;;  %v2894_v62 = vld [vmem:[#allocation2 + $0x148] sm:$0xf]  ;;  %v2895_v22 = vld [vmem:[#allocation2 + $0x14c] sm:$0x1] }
 0x2b9   :  { %5527 = vst.msk [vmem:[#allocation3 + $0x70] sm:$0xff] %vm5512_vm9, %v5445_v26  ;;  %5460 = vrot.lane.b32.xlu0 %v9014_v54, %s9679_s23  ;;  %v6546_v59 = vsel %vm9844_vm11, %v6541_v41, %v6545_v61  ;;  %v6564_v21 = vor.u32 %v6563_v51, %v6559_v23  ;;  %v11890_v56 = vsel %vm10368_vm14, %v9110_v16, %v7336_v9  ;;  %v7343_v40 = vrot.slane %v7058_v5, 5  ;;  %v3887_v26 = vld [vmem:[#allocation2 + $0x144] sm:$0xf]  ;;  %v3888_v4 = vld [vmem:[#allocation2 + $0x148] sm:$0xf] }
 0x2ba   :  { %v6555_v27 = vrot.slane %v6554_v50, 4  ;;  %v11895_v43 = vsel %vm10368_vm14, %v7338_v63, %v7339_v3  ;;  %v9111_v47 = vrot.slane %v7057_v45, 9  ;;  %v7346_v54 = vrot.slane %v7059_v31, 5  ;;  %v3889_v36 = vld [vmem:[#allocation2 + $0x14c] sm:$0x1]  ;;  %v9540_v3 = vld [vmem:[#allocation2 + $0x144] sm:$0xff]  }
 0x2bb   :  { %3732 = vrot.lane.b32.xlu1 %v9538_v49, %s9677_s21  ;;  %v9015_v24 = vcombine.low %v11869_v34, %v11880_v37  ;;  %v9078_v38 = vcombine.low %v6536_v18, %v6546_v59  ;;  %v6565_v7 = vrot.slane %v6564_v21, 4  ;;  %v7345_v19 = vrot.slane %v7343_v40, 4  ;;  %v3890_v49 = vld [vmem:[#allocation2 + $0x150] sm:$0xf]  ;;  %v3891_v53 = vld [vmem:[#allocation2 + $0x154] sm:$0xf] }
 0x2bc   :  { %v5799_v0 = vpop.permute.xlu0 %5798  ;;  %v6560_v48 = vsel %vm9844_vm11, %v6555_v27, %v6559_v23  ;;  %v8856_v35 = vrot.slane %v2890_v33, 9  ;;  %v3183_v30 = vrot.slane %v2891_v52, 5  ;;  %v3186_v6 = vrot.slane %v2892_v42, 5  ;;  %v3892_v45 = vld [vmem:[#allocation2 + $0x158] sm:$0x1] }
 0x2bd   :  { %5881 = vst.msk [vmem:[#allocation3 + $0x70] sm:$0xff] %vm5866_vm10, %v5799_v0  ;;  %5814 = vrot.lane.b32.xlu0 %v9539_v58, %s9680_s24  ;;  %v6570_v46 = vsel %vm9844_vm11, %v6565_v7, %v6569_v28  ;;  %v9142_v11 = vcombine.low %v11890_v56, %v11895_v43  ;;  %v8857_v34 = vrot.slane %v2893_v15, 9  ;;  %v3190_v61 = vrot.slane %v2894_v62, 5  ;;  %v11924_v31 = vld [vmem:[#allocation2 + $0x144] sm:$0xe] }
 0x2be   :  { %v11910_v12 = vsel %vm10368_vm14, %v9111_v47, %v7343_v40  ;;  %v11914_v1 = vsel %vm10368_vm14, %v7345_v19, %v7346_v54  ;;  %v11918_v29 = vsel %vm10368_vm14, %v8856_v35, %v3183_v30  ;;  %v3185_v25 = vrot.slane %v3183_v30, 4  ;;  %v4977_v50 = vld [vmem:[#allocation2 + $0x148] sm:$0xf]  ;;  %v4978_v47 = vld [vmem:[#allocation2 + $0x14c] sm:$0x1] }
 0x2bf   :  { %4821 = vrot.lane.b32.xlu1 %v11872_v57, %s9678_s22  ;;  %v11920_v32 = vcombine.low %v6560_v48, %v6570_v46  ;;  %v3192_v39 = vrot.slane %v3190_v61, 4  ;;  %v3193_v16 = vrot.slane %v2895_v22, 5  ;;  %v4488_v57 = vshrl.u32 %v3887_v26, 16  ;;  %v4979_v54 = vld [vmem:[#allocation2 + $0x150] sm:$0xe] }
 0x2c0   :  { %v3187_v2 = vsel %vm10368_vm14, %v3185_v25, %v3186_v6  ;;  %v4491_v60 = vshll.u32 %v3887_v26, 16  ;;  %v4497_v23 = vshll.u32 %v3888_v4, 16  ;;  %v4501_v9 = vshrl.u32 %v3888_v4, 16  ;;  %v4980_v19 = vld [vmem:[#allocation2 + $0x154] sm:$0xf] }
 0x2c1   :  { %v4806_v5 = vpop.permute.xlu1 %4805  ;;  %6903 = vrot.lane.b32.xlu0 %v9078_v38, %s9681_s25  ;;  %v8888_v37 = vcombine.low %v11918_v29, %v3187_v2  ;;  %v11931_v0 = vsel %vm10368_vm14, %v8857_v34, %v3190_v61  ;;  %v4490_v41 = vrot.slane %v4488_v57, 4  ;;  %v4507_v51 = vshll.u32 %v3889_v36, 16  ;;  %v4981_v61 = vld [vmem:[#allocation2 + $0x158] sm:$0x1]  ;;  %v9541_v57 = vld [vmem:[#allocation2 + $0x144] sm:$0xff]  }
 0x2c2   :  { %4887 = vst.msk [vmem:[#allocation3 + $0x78] sm:$0xff] %vm4871_vm3, %v4806_v5  ;;  %v11936_v33 = vsel %vm10368_vm14, %v3192_v39, %v3193_v16  ;;  %v4493_v52 = vrot.slane %v4491_v60, 5  ;;  %v4499_v42 = vrot.slane %v4497_v23, 5  ;;  %v4503_v18 = vrot.slane %v4501_v9, 4  ;;  %v5972_v2 = vld [vmem:[#allocation2 + $0x154] sm:$0xf] }
 0x2c3   :  { %5462 = vrot.lane.b32.xlu1 %v9015_v24, %s9679_s23  ;;  %v6888_v28 = vpop.permute.xlu0 %6887  ;;  %v4509_v63 = vrot.slane %v4507_v51, 5  ;;  %v4512_v58 = vshrl.u32 %v3890_v49, 16  ;;  %v4515_v59 = vshll.u32 %v3890_v49, 16  ;;  %v4521_v21 = vshll.u32 %v3891_v53, 16 }
 0x2c4   :  { %6970 = vst.msk [vmem:[#allocation3 + $0x70] sm:$0xff] %vm6955_vm12, %v6888_v28  ;;  %v4494_v40 = vor.u32 %v4493_v52, %v4490_v41  ;;  %v4504_v15 = vor.u32 %v4503_v18, %v4499_v42  ;;  %v4525_v27 = vshrl.u32 %v3891_v53, 16  ;;  %v4531_v43 = vshll.u32 %v3892_v45, 16  ;;  %v5971_v53 = vld [vmem:[#allocation2 + $0x150] sm:$0xf] }
 0x2c5   :  { %v5447_v56 = vpop.permute.xlu1 %5446  ;;  %7544 = vrot.lane.b32.xlu0 %v9142_v11, %s9682_s26  ;;  %v4514_v62 = vrot.slane %v4512_v58, 4  ;;  %v4517_v24 = vrot.slane %v4515_v59, 5  ;;  %v11941_v38 = vrot.slane %v4521_v21, 5  ;;  %v8984_v7 = vrot.slane %v11924_v31, 9  ;;  %v5976_v21 = vld [vmem:[#allocation2 + $0x164] sm:$0x1] }
 0x2c6   :  { %5528 = vst.msk [vmem:[#allocation3 + $0x78] sm:$0xff] %vm5512_vm9, %v5447_v56  ;;  %v4495_v22 = vrot.slane %v4494_v40, 4  ;;  %v4505_v48 = vrot.slane %v4504_v15, 4  ;;  %v4527_v35 = vrot.slane %v4525_v27, 4  ;;  %v11945_v30 = vrot.slane %v4531_v43, 5 }
 0x2c7   :  { %5816 = vrot.lane.b32.xlu1 %v9540_v3, %s9680_s24  ;;  %v7529_v6 = vpop.permute.xlu0 %7528  ;;  %v4518_v26 = vor.u32 %v4517_v24, %v4514_v62  ;;  %v5266_v46 = vrot.slane %v4977_v50, 5  ;;  %v5269_v34 = vrot.slane %v4978_v47, 5  ;;  %v8985_v11 = vrot.slane %v4979_v54, 9  ;;  %v5974_v3 = vld [vmem:[#allocation2 + $0x15c] sm:$0xf] }
 0x2c8   :  { %7611 = vst.msk [vmem:[#allocation3 + $0x70] sm:$0xff] %vm7596_vm15, %v7529_v6  ;;  %v4500_v36 = vsel %vm9844_vm11, %v4495_v22, %v4499_v42  ;;  %v4510_v29 = vsel %vm9844_vm11, %v4505_v48, %v4509_v63  ;;  %v4528_v25 = vor.u32 %v4527_v35, %v11941_v38  ;;  %v5273_v49 = vrot.slane %v4980_v19, 5  ;;  %v5975_v50 = vld [vmem:[#allocation2 + $0x160] sm:$0xf]  ;;  %v7060_v56 = vld [vmem:[#allocation2 + $0x150] sm:$0xe] }
 0x2c9   :  { %v5801_v4 = vpop.permute.xlu1 %5800  ;;  %v9143_v39 = vcombine.low %v11910_v12, %v11914_v1  ;;  %3381 = vrot.lane.b32.xlu0 %v8888_v37, %s9676_s3  ;;  %v8889_v16 = vcombine.low %v11931_v0, %v11936_v33  ;;  %v4519_v45 = vrot.slane %v4518_v26, 4  ;;  %v5268_v5 = vrot.slane %v5266_v46, 4  ;;  %v5973_v0 = vld [vmem:[#allocation2 + $0x158] sm:$0x1]  ;;  %v7061_v47 = vld [vmem:[#allocation2 + $0x154] sm:$0xf] }
 0x2ca   :  { %5882 = vst.msk [vmem:[#allocation3 + $0x78] sm:$0xff] %vm5866_vm10, %v5801_v4  ;;  %v4529_v60 = vrot.slane %v4528_v25, 4  ;;  %v11963_v23 = vsel %vm10368_vm14, %v8984_v7, %v5266_v46  ;;  %v5275_v9 = vrot.slane %v5273_v49, 4  ;;  %v5276_v31 = vrot.slane %v4981_v61, 5  ;;  %v7062_v22 = vld [vmem:[#allocation2 + $0x158] sm:$0x1] }
 0x2cb   :  { %6905 = vrot.lane.b32.xlu1 %v11920_v32, %s9681_s25  ;;  %v3366_v12 = vpop.permute.xlu0 %3365  ;;  %v8952_v1 = vcombine.low %v4500_v36, %v4510_v29  ;;  %v11967_v37 = vsel %vm10368_vm14, %v5268_v5, %v5269_v34  ;;  %v6572_v41 = vshrl.u32 %v5971_v53, 16  ;;  %v6575_v51 = vshll.u32 %v5971_v53, 16  ;;  %v11995_v46 = vld [vmem:[#allocation2 + $0x160] sm:$0xf]  ;;  %v11999_v36 = vld [vmem:[#allocation2 + $0x15c] sm:$0xe] }
 0x2cc   :  { %3446 = vst.msk [vmem:[#allocation3 + $0x80] sm:$0xff] %vm3429_vm1, %v3366_v12  ;;  %v4524_v32 = vsel %vm9844_vm11, %v4519_v45, %v11941_v38  ;;  %v4534_v52 = vsel %vm9844_vm11, %v4529_v60, %v11945_v30  ;;  %v11978_v42 = vsel %vm10368_vm14, %v8985_v11, %v5273_v49  ;;  %v6581_v18 = vshll.u32 %v5972_v2, 16  ;;  %v9542_v29 = vld [vmem:[#allocation2 + $0x150] sm:$0xff]  }
 0x2cd   :  { %v6890_v33 = vpop.permute.xlu1 %6889  ;;  %3734 = vrot.lane.b32.xlu0 %v9541_v57, %s9677_s21  ;;  %v9016_v28 = vcombine.low %v11963_v23, %v11967_v37  ;;  %v11986_v63 = vsel %vm10368_vm14, %v5275_v9, %v5276_v31  ;;  %v6574_v58 = vrot.slane %v6572_v41, 4  ;;  %v6577_v59 = vrot.slane %v6575_v51, 5  ;;  %v2897_v23 = vld [vmem:[#allocation2 + $0x154] sm:$0xf]  ;;  %v7065_v37 = vld [vmem:[#allocation2 + $0x164] sm:$0x1] }
 0x2ce   :  { %6971 = vst.msk [vmem:[#allocation3 + $0x78] sm:$0xff] %vm6955_vm12, %v6890_v33  ;;  %v11989_v40 = vrot.slane %v6581_v18, 5  ;;  %v6585_v15 = vshrl.u32 %v5972_v2, 16  ;;  %v6591_v27 = vshll.u32 %v5973_v0, 16  ;;  %v6596_v43 = vshrl.u32 %v5974_v3, 16  ;;  %v9543_v41 = vld [vmem:[#allocation2 + $0x150] sm:$0xff]  }
 0x2cf   :  { %7546 = vrot.lane.b32.xlu1 %v9143_v39, %s9682_s26  ;;  %v3719_v54 = vpop.permute.xlu0 %3718  ;;  %v7643_v62 = vld [vmem:[#allocation3 + $0x70] sm:$0xff]  ;;  %v6578_v24 = vor.u32 %v6577_v59, %v6574_v58  ;;  %v6599_v38 = vshll.u32 %v5974_v3, 16  ;;  %v6605_v7 = vshll.u32 %v5975_v50, 16  ;;  %v6609_v19 = vshrl.u32 %v5975_v50, 16  ;;  %v2896_v0 = vld [vmem:[#allocation2 + $0x150] sm:$0xe] }
 0x2d0   :  { %3799 = vst.msk [vmem:[#allocation3 + $0x80] sm:$0xff] %vm3782_vm2, %v3719_v54  ;;  %9384 = vmatprep.mubr.msk.bf16.mxu0 %vm7681_vm0, %v7643_v62  ;;  %v11993_v35 = vcombine.low %v4524_v32, %v4534_v52  ;;  %v6587_v30 = vrot.slane %v6585_v15, 4  ;;  %v6598_v6 = vrot.slane %v6596_v43, 4  ;;  %v6615_v26 = vshll.u32 %v5976_v21, 16  ;;  %v2898_v52 = vld [vmem:[#allocation2 + $0x158] sm:$0x1] }
 0x2d1   :  { %v7531_v48 = vpop.permute.xlu1 %7530  ;;  %4823 = vrot.lane.b32.xlu0 %v8952_v1, %s9678_s22  ;;  %v6579_v34 = vrot.slane %v6578_v24, 4  ;;  %v6601_v61 = vrot.slane %v6599_v38, 5  ;;  %v6607_v11 = vrot.slane %v6605_v7, 5  ;;  %v6611_v4 = vrot.slane %v6609_v19, 4  ;;  %v2899_v59 = vld [vmem:[#allocation2 + $0x15c] sm:$0xe] }
 0x2d2   :  { %7612 = vst.msk [vmem:[#allocation3 + $0x78] sm:$0xff] %vm7596_vm15, %v7531_v48  ;;  %v6588_v25 = vor.u32 %v6587_v30, %v11989_v40  ;;  %v6593_v49 = vrot.slane %v6591_v27, 5  ;;  %v9112_v53 = vrot.slane %v7060_v56, 9  ;;  %v7350_v39 = vrot.slane %v7061_v47, 5  ;;  %v2900_v21 = vld [vmem:[#allocation2 + $0x160] sm:$0xf] }
 0x2d3   :  { %3383 = vrot.lane.b32.xlu1 %v8889_v16, %s9676_s3  ;;  %v4808_v57 = vpop.permute.xlu0 %4807  ;;  %v6602_v45 = vor.u32 %v6601_v61, %v6598_v6  ;;  %v6612_v5 = vor.u32 %v6611_v4, %v6607_v11  ;;  %v6617_v2 = vrot.slane %v6615_v26, 5  ;;  %v7353_v60 = vrot.slane %v7062_v22, 5  ;;  %v2901_v47 = vld [vmem:[#allocation2 + $0x164] sm:$0x1]  ;;  %v3893_v54 = vld [vmem:[#allocation2 + $0x15c] sm:$0xf] }
 0x2d4   :  { %4888 = vst.msk [vmem:[#allocation3 + $0x80] sm:$0xff] %vm4871_vm3, %v4808_v57  ;;  %v9017_v31 = vcombine.low %v11978_v42, %v11986_v63  ;;  %v6584_v16 = vsel %vm9844_vm11, %v6579_v34, %v11989_v40  ;;  %v6589_v12 = vrot.slane %v6588_v25, 4  ;;  %v7352_v1 = vrot.slane %v7350_v39, 4  ;;  %v3894_v48 = vld [vmem:[#allocation2 + $0x160] sm:$0xf] }
 0x2d5   :  { %v3368_v9 = vpop.permute.xlu1 %3367  ;;  %5464 = vrot.lane.b32.xlu0 %v9016_v28, %s9679_s23  ;;  %v6603_v51 = vrot.slane %v6602_v45, 4  ;;  %v6613_v3 = vrot.slane %v6612_v5, 4  ;;  %v12013_v33 = vsel %vm10368_vm14, %v9112_v53, %v7350_v39  ;;  %v7357_v32 = vrot.slane %v11995_v46, 5  ;;  %v3895_v30 = vld [vmem:[#allocation2 + $0x164] sm:$0x1] }
 0x2d6   :  { %3447 = vst.msk [vmem:[#allocation3 + $0x88] sm:$0xff] %vm3429_vm1, %v3368_v9  ;;  %v6594_v18 = vsel %vm9844_vm11, %v6589_v12, %v6593_v49  ;;  %v12021_v50 = vsel %vm10368_vm14, %v7352_v1, %v7353_v60  ;;  %v9113_v28 = vrot.slane %v11999_v36, 9  ;;  %v3197_v58 = vrot.slane %v2897_v23, 5  ;;  %v3896_v61 = vld [vmem:[#allocation2 + $0x168] sm:$0xf] }
 0x2d7   :  { %3736 = vrot.lane.b32.xlu1 %v9542_v29, %s9677_s21  ;;  %v5449_v56 = vpop.permute.xlu0 %5448  ;;  %v6608_v40 = vsel %vm9844_vm11, %v6603_v51, %v6607_v11  ;;  %v6618_v15 = vsel %vm9844_vm11, %v6613_v3, %v6617_v2  ;;  %v7360_v27 = vrot.slane %v7065_v37, 5  ;;  %v8858_v43 = vrot.slane %v2896_v0, 9  ;;  %v3897_v25 = vld [vmem:[#allocation2 + $0x16c] sm:$0xf]  ;;  %v3898_v45 = vld [vmem:[#allocation2 + $0x170] sm:$0x1] }
 0x2d8   :  { %5529 = vst.msk [vmem:[#allocation3 + $0x80] sm:$0xff] %vm5512_vm9, %v5449_v56  ;;  %v9080_v38 = vcombine.low %v6584_v16, %v6594_v18  ;;  %v12029_v7 = vcombine.low %v6608_v40, %v6618_v15  ;;  %v9144_v19 = vcombine.low %v12013_v33, %v12021_v50  ;;  %v7359_v22 = vrot.slane %v7357_v32, 4  ;;  %v9544_v16 = vld [vmem:[#allocation2 + $0x15c] sm:$0xff]   ;;  %v4985_v15 = vld [vmem:[#allocation2 + $0x168] sm:$0xe] }
 0x2d9   :  { %v3721_v62 = vpop.permute.xlu1 %3720  ;;  %v7644_v24 = vld [vmem:[#allocation3 + $0x78] sm:$0xff]  ;;  %5818 = vrot.lane.b32.xlu0 %v9543_v41, %s9680_s24  ;;  %v3199_v6 = vrot.slane %v3197_v58, 4  ;;  %v3200_v26 = vrot.slane %v2898_v52, 5  ;;  %v8859_v46 = vrot.slane %v2899_v59, 9  ;;  %v3204_v34 = vrot.slane %v2900_v21, 5 }
 0x2da   :  { %3800 = vst.msk [vmem:[#allocation3 + $0x88] sm:$0xff] %vm3782_vm2, %v3721_v62  ;;  %9385 = vmatmul.mubr.msk.bf16.gmra.mrb[28].mxu0 %vm7681_vm0, %v7644_v24  ;;  %v12040_v11 = vsel %vm10368_vm14, %v9113_v28, %v7357_v32  ;;  %v3207_v4 = vrot.slane %v2901_v47, 5  ;;  %v4536_v36 = vshrl.u32 %v3893_v54, 16  ;;  %v4539_v29 = vshll.u32 %v3893_v54, 16  ;;  %v4982_v32 = vld [vmem:[#allocation2 + $0x15c] sm:$0xe] }
 0x2db   :  { %4825 = vrot.lane.b32.xlu1 %v11993_v35, %s9678_s22  ;;  %v5803_v49 = vpop.permute.xlu0 %5802  ;;  %v12044_v53 = vsel %vm10368_vm14, %v7359_v22, %v7360_v27  ;;  %v12048_v39 = vsel %vm10368_vm14, %v8858_v43, %v3197_v58  ;;  %v12052_v35 = vsel %vm10368_vm14, %v3199_v6, %v3200_v26  ;;  %v3206_v57 = vrot.slane %v3204_v34, 4  ;;  %v4983_v52 = vld [vmem:[#allocation2 + $0x160] sm:$0xf]  ;;  %v4984_v21 = vld [vmem:[#allocation2 + $0x164] sm:$0x1] }
 0x2dc   :  { %5883 = vst.msk [vmem:[#allocation3 + $0x80] sm:$0xff] %vm5866_vm10, %v5803_v49  ;;  %v12057_v2 = vsel %vm10368_vm14, %v8859_v46, %v3204_v34  ;;  %v4538_v60 = vrot.slane %v4536_v36, 4  ;;  %v4541_v23 = vrot.slane %v4539_v29, 5  ;;  %v4545_v9 = vshll.u32 %v3894_v48, 16  ;;  %v4986_v62 = vld [vmem:[#allocation2 + $0x16c] sm:$0xf] }
 0x2dd   :  { %v4810_v5 = vpop.permute.xlu1 %4809  ;;  %6907 = vrot.lane.b32.xlu0 %v9080_v38, %s9681_s25  ;;  %v12063_v12 = vsel %vm10368_vm14, %v3206_v57, %v3207_v4  ;;  %v4549_v1 = vshrl.u32 %v3894_v48, 16  ;;  %v4555_v37 = vshll.u32 %v3895_v30, 16  ;;  %v4560_v0 = vshrl.u32 %v3896_v61, 16  ;;  %v4987_v48 = vld [vmem:[#allocation2 + $0x170] sm:$0x1]  ;;  %v9545_v49 = vld [vmem:[#allocation2 + $0x15c] sm:$0xff]  }
 0x2de   :  { %4889 = vst.msk [vmem:[#allocation3 + $0x88] sm:$0xff] %vm4871_vm3, %v4810_v5  ;;  %v9145_v41 = vcombine.low %v12040_v11, %v12044_v53  ;;  %v4542_v51 = vor.u32 %v4541_v23, %v4538_v60  ;;  %v12071_v3 = vrot.slane %v4545_v9, 5  ;;  %v4563_v33 = vshll.u32 %v3896_v61, 16  ;;  %v5978_v5 = vld [vmem:[#allocation2 + $0x16c] sm:$0xf] }
 0x2df   :  { %5466 = vrot.lane.b32.xlu1 %v9017_v31, %s9679_s23  ;;  %v6892_v18 = vpop.permute.xlu0 %6891  ;;  %v8890_v50 = vcombine.low %v12048_v39, %v12052_v35  ;;  %v4551_v28 = vrot.slane %v4549_v1, 4  ;;  %v4562_v58 = vrot.slane %v4560_v0, 4  ;;  %v4569_v59 = vshll.u32 %v3897_v25, 16 }
 0x2e0   :  { %6972 = vst.msk [vmem:[#allocation3 + $0x80] sm:$0xff] %vm6955_vm12, %v6892_v18  ;;  %v8891_v42 = vcombine.low %v12057_v2, %v12063_v12  ;;  %v4565_v63 = vrot.slane %v4563_v33, 5  ;;  %v4573_v31 = vshrl.u32 %v3897_v25, 16  ;;  %v4579_v40 = vshll.u32 %v3898_v45, 16  ;;  %v5977_v25 = vld [vmem:[#allocation2 + $0x168] sm:$0xf] }
 0x2e1   :  { %v5451_v56 = vpop.permute.xlu1 %5450  ;;  %7548 = vrot.lane.b32.xlu0 %v9144_v19, %s9682_s26  ;;  %v4543_v27 = vrot.slane %v4542_v51, 4  ;;  %v4552_v43 = vor.u32 %v4551_v28, %v12071_v3  ;;  %v4557_v47 = vrot.slane %v4555_v37, 5  ;;  %v4571_v54 = vrot.slane %v4569_v59, 5  ;;  %v12111_v28 = vld [vmem:[#allocation2 + $0x174] sm:$0xf] }
 0x2e2   :  { %5530 = vst.msk [vmem:[#allocation3 + $0x88] sm:$0xff] %vm5512_vm9, %v5451_v56  ;;  %v4566_v24 = vor.u32 %v4565_v63, %v4562_v58  ;;  %v4575_v38 = vrot.slane %v4573_v31, 4  ;;  %v4581_v22 = vrot.slane %v4579_v40, 5  ;;  %v8986_v26 = vrot.slane %v4982_v32, 9  ;;  %v12121_v63 = vld [vmem:[#allocation2 + $0x178] sm:$0xf] }
 0x2e3   :  { %5820 = vrot.lane.b32.xlu1 %v9544_v16, %s9680_s24  ;;  %v7533_v30 = vpop.permute.xlu0 %7532  ;;  %v4553_v6 = vrot.slane %v4552_v43, 4  ;;  %v5280_v46 = vrot.slane %v4983_v52, 5  ;;  %v5283_v34 = vrot.slane %v4984_v21, 5  ;;  %v8987_v36 = vrot.slane %v4985_v15, 9  ;;  %v12109_v52 = vld [vmem:[#allocation2 + $0x170] sm:$0x1] }
 0x2e4   :  { %7613 = vst.msk [vmem:[#allocation3 + $0x80] sm:$0xff] %vm7596_vm15, %v7533_v30  ;;  %v4567_v61 = vrot.slane %v4566_v24, 4  ;;  %v4576_v4 = vor.u32 %v4575_v38, %v4571_v54  ;;  %v5287_v29 = vrot.slane %v4986_v62, 5  ;;  %v4548_v39 = vsel %vm9844_vm11, %v4543_v27, %v12071_v3 }
 0x2e5   :  { %v5805_v19 = vpop.permute.xlu1 %5804  ;;  %3385 = vrot.lane.b32.xlu0 %v8890_v50, %s9676_s3  ;;  %v4558_v35 = vsel %vm9844_vm11, %v4553_v6, %v4557_v47  ;;  %v5282_v57 = vrot.slane %v5280_v46, 4  ;;  %v5290_v45 = vrot.slane %v4987_v48, 5  ;;  %v12096_v9 = vsel %vm10368_vm14, %v8986_v26, %v5280_v46 }
 0x2e6   :  { %5884 = vst.msk [vmem:[#allocation3 + $0x88] sm:$0xff] %vm5866_vm10, %v5805_v19  ;;  %v4572_v60 = vsel %vm9844_vm11, %v4567_v61, %v4571_v54  ;;  %v4577_v23 = vrot.slane %v4576_v4, 4  ;;  %v12100_v16 = vsel %vm10368_vm14, %v8987_v36, %v5287_v29  ;;  %v5289_v0 = vrot.slane %v5287_v29, 4  ;;  %v9546_v4 = vld [vmem:[#allocation2 + $0x168] sm:$0xff]  }
 0x2e7   :  { %6909 = vrot.lane.b32.xlu1 %v12029_v7, %s9681_s25  ;;  %v3370_v1 = vpop.permute.xlu0 %3369  ;;  %v12104_v37 = vsel %vm10368_vm14, %v5282_v57, %v5283_v34  ;;  %v6620_v51 = vshrl.u32 %v5977_v25, 16  ;;  %v6623_v7 = vshll.u32 %v5977_v25, 16  ;;  %v8954_v33 = vcombine.low %v4548_v39, %v4558_v35 }
 0x2e8   :  { %3448 = vst.msk [vmem:[#allocation3 + $0x90] sm:$0xff] %vm3429_vm1, %v3370_v1  ;;  %v4582_v32 = vsel %vm9844_vm11, %v4577_v23, %v4581_v22  ;;  %v6629_v18 = vshll.u32 %v5978_v5, 16  ;;  %v6633_v50 = vshrl.u32 %v5978_v5, 16  ;;  %v9018_v58 = vcombine.low %v12096_v9, %v12104_v37  ;;  %v5982_v5 = vld [vmem:[#allocation2 + $0x17c] sm:$0x1] }
 0x2e9   :  { %v6894_v3 = vpop.permute.xlu1 %6893  ;;  %3738 = vrot.lane.b32.xlu0 %v9545_v49, %s9677_s21  ;;  %v12119_v59 = vsel %vm10368_vm14, %v5289_v0, %v5290_v45  ;;  %v6622_v21 = vrot.slane %v6620_v51, 4  ;;  %v6625_v56 = vrot.slane %v6623_v7, 5  ;;  %v12127_v31 = vcombine.low %v4572_v60, %v4582_v32  ;;  %v7066_v60 = vld [vmem:[#allocation2 + $0x168] sm:$0xe]  ;;  %v7067_v51 = vld [vmem:[#allocation2 + $0x16c] sm:$0xf] }
 0x2ea   :  { %6973 = vst.msk [vmem:[#allocation3 + $0x88] sm:$0xff] %vm6955_vm12, %v6894_v3  ;;  %v9019_v40 = vcombine.low %v12100_v16, %v12119_v59  ;;  %v12131_v15 = vrot.slane %v6629_v18, 5  ;;  %v6635_v27 = vrot.slane %v6633_v50, 4  ;;  %v6639_v24 = vshll.u32 %v12109_v52, 16  ;;  %v7068_v7 = vld [vmem:[#allocation2 + $0x170] sm:$0x1] }
 0x2eb   :  { %7550 = vrot.lane.b32.xlu1 %v9145_v41, %s9682_s26  ;;  %v3723_v43 = vpop.permute.xlu0 %3722  ;;  %v7645_v47 = vld [vmem:[#allocation3 + $0x80] sm:$0xff]  ;;  %v9358_v54 = vpop.f32.mrb[0].mxu0  ;;  %v6626_v62 = vor.u32 %v6625_v56, %v6622_v21  ;;  %v6644_v38 = vshrl.u32 %v12111_v28, 16  ;;  %v6647_v22 = vshll.u32 %v12111_v28, 16  ;;  %v6653_v6 = vshll.u32 %v12121_v63, 16 }
 0x2ec   :  { %3801 = vst.msk [vmem:[#allocation3 + $0x90] sm:$0xff] %vm3782_vm2, %v3723_v43  ;;  %9388 = vmatprep.mubr.msk.bf16.mxu1 %vm7681_vm0, %v7645_v47  ;;  %v9253_v53 = vpack.c.bf16 %v9358_v54, %v9358_v54  ;;  %v8528_v41 = vmul.f32 %v9358_v54, %v9358_v54  ;;  %v7816_v48 = vpop.f32.mrb[1].mxu0  ;;  %v6636_v30 = vor.u32 %v6635_v27, %v12131_v15  ;;  %v8396_v26 = vsel %vm8392_vm13, %v9358_v54, 0.0  ;;  %v7069_v18 = vld [vmem:[#allocation2 + $0x174] sm:$0xe] }
 0x2ed   :  { %v7535_v11 = vpop.permute.xlu1 %7534  ;;  %4827 = vrot.lane.b32.xlu0 %v8954_v33, %s9678_s22  ;;  %v9251_v46 = vpack.c.bf16 %v7816_v48, %v7816_v48  ;;  %v8526_v34 = vmul.f32 %v7816_v48, %v7816_v48  ;;  %v9359_v19 = vpop.f32.mrb[2].mxu0  ;;  %v6627_v61 = vrot.slane %v6626_v62, 4  ;;  %v8393_v29 = vsel %vm8392_vm13, %v7816_v48, 0.0  ;;  %v7071_v27 = vld [vmem:[#allocation2 + $0x17c] sm:$0x1] }
 0x2ee   :  { %7614 = vst.msk [vmem:[#allocation3 + $0x88] sm:$0xff] %vm7596_vm15, %v7535_v11  ;;  %v8593_v36 = vsel %vm8392_vm13, %v8528_v41, 0.0  ;;  %v9254_v25 = vpack.c.bf16 %v9359_v19, %v9359_v19  ;;  %v12151_v49 = vsel %vm8392_vm13, %v9359_v19, 0.0  ;;  %v7819_v39 = vpop.f32.mrb[3].mxu0  ;;  %v8529_v57 = vmul.f32 %v9359_v19, %v9359_v19 }
 0x2ef   :  { %3387 = vrot.lane.b32.xlu1 %v8891_v42, %s9676_s3  ;;  %8330 = vst.msk [vmem:[#allocation12 + $0x8] sm:$0xf] %vm12781_vm7, %v9253_v53  ;;  %v4812_v35 = vpop.permute.xlu0 %4811  ;;  %8328 = vst.msk [vmem:[#allocation12] sm:$0xf] %vm12781_vm7, %v9251_v46  ;;  %v9252_v45 = vpack.c.bf16 %v7819_v39, %v7819_v39  ;;  %v8394_v2 = vsel %vm8392_vm13, %v7819_v39, 0.0  ;;  %v8527_v12 = vmul.f32 %v7819_v39, %v7819_v39  ;;  %v9547_v42 = vld [vmem:[#allocation2 + $0x168] sm:$0xff]  }
 0x2f0   :  { %4890 = vst.msk [vmem:[#allocation3 + $0x90] sm:$0xff] %vm4871_vm3, %v4812_v35  ;;  %v8590_v9 = vsel %vm8392_vm13, %v8526_v34, 0.0  ;;  %v8395_v1 = vadd.f32 %v8394_v2, %v8393_v29  ;;  %v6632_v37 = vsel %vm9844_vm11, %v6627_v61, %v12131_v15  ;;  %v6637_v0 = vrot.slane %v6636_v30, 4  ;;  %v7070_v15 = vld [vmem:[#allocation2 + $0x178] sm:$0xf] }
 0x2f1   :  { %v3372_v23 = vpop.permute.xlu1 %3371  ;;  %8331 = vst.msk [vmem:[#allocation12 + $0xc] sm:$0xf] %vm12781_vm7, %v9254_v25  ;;  %5468 = vrot.lane.b32.xlu0 %v9018_v58, %s9679_s23  ;;  %8329 = vst.msk [vmem:[#allocation12 + $0x4] sm:$0xf] %vm12781_vm7, %v9252_v45  ;;  %v8591_v3 = vsel %vm8392_vm13, %v8527_v12, 0.0  ;;  %v6641_v33 = vrot.slane %v6639_v24, 5 }
 0x2f2   :  { %3449 = vst.msk [vmem:[#allocation3 + $0x98] sm:$0xff] %vm3429_vm1, %v3372_v23  ;;  %v6646_v32 = vrot.slane %v6644_v38, 4  ;;  %v6649_v52 = vrot.slane %v6647_v22, 5  ;;  %v12166_v50 = vadd.f32 %v8396_v26, %v8395_v1  ;;  %v8592_v28 = vadd.f32 %v8591_v3, %v8590_v9  ;;  %v2902_v24 = vld [vmem:[#allocation2 + $0x168] sm:$0xe] }
 0x2f3   :  { %3740 = vrot.lane.b32.xlu1 %v9546_v4, %s9677_s21  ;;  %v6655_v21 = vrot.slane %v6653_v6, 5  ;;  %v6657_v56 = vshrl.u32 %v12121_v63, 16  ;;  %v5453_v43 = vpop.permute.xlu0 %5452  ;;  %v6642_v58 = vsel %vm9844_vm11, %v6637_v0, %v6641_v33  ;;  %v6663_v54 = vshll.u32 %v5982_v5, 16  ;;  %v2903_v30 = vld [vmem:[#allocation2 + $0x16c] sm:$0xf] }
 0x2f4   :  { %v6650_v47 = vor.u32 %v6649_v52, %v6646_v32  ;;  %v9114_v62 = vrot.slane %v7066_v60, 9  ;;  %v8594_v11 = vadd.f32 %v8593_v36, %v8592_v28  ;;  %5531 = vst.msk [vmem:[#allocation3 + $0x90] sm:$0xff] %vm5512_vm9, %v5453_v43  ;;  %v9082_v53 = vcombine.low %v6632_v37, %v6642_v58  ;;  %v2904_v36 = vld [vmem:[#allocation2 + $0x170] sm:$0x1]  ;;  %v2905_v29 = vld [vmem:[#allocation2 + $0x174] sm:$0xe] }
 0x2f5   :  { %v3725_v38 = vpop.permute.xlu1 %3724  ;;  %v7646_v22 = vld [vmem:[#allocation3 + $0x88] sm:$0xff]  ;;  %v6659_v41 = vrot.slane %v6657_v56, 4  ;;  %v7364_v48 = vrot.slane %v7067_v51, 5  ;;  %5822 = vrot.lane.b32.xlu0 %v9547_v42, %s9680_s24  ;;  %v6665_v6 = vrot.slane %v6663_v54, 5  ;;  %v7367_v26 = vrot.slane %v7068_v7, 5 }
 0x2f6   :  { %3802 = vst.msk [vmem:[#allocation3 + $0x98] sm:$0xff] %vm3782_vm2, %v3725_v38  ;;  %9389 = vmatmul.mubr.msk.bf16.vlgmr.msra.gmra.mrb[0].mxu1 %vm7681_vm0, %v7646_v22  ;;  %v6651_v63 = vrot.slane %v6650_v47, 4  ;;  %v9115_v46 = vrot.slane %v7069_v18, 9  ;;  %v7371_v4 = vrot.slane %v7070_v15, 5  ;;  %v8595_v25 = vsel %vm8392_vm13, %v8529_v57, 0.0  ;;  %v9548_v57 = vld [vmem:[#allocation2 + $0x174] sm:$0xff]  }
 0x2f7   :  { %4829 = vrot.lane.b32.xlu1 %v12127_v31, %s9678_s22  ;;  %v6660_v34 = vor.u32 %v6659_v41, %v6655_v21  ;;  %v7365_v19 = vsel %vm10368_vm14, %v9114_v62, %v7364_v48  ;;  %v7366_v61 = vrot.slane %v7364_v48, 4  ;;  %v5807_v39 = vpop.permute.xlu0 %5806  ;;  %v7374_v35 = vrot.slane %v7071_v27, 5  ;;  %v2906_v12 = vld [vmem:[#allocation2 + $0x178] sm:$0xf]  ;;  %v2907_v9 = vld [vmem:[#allocation2 + $0x17c] sm:$0x1] }
 0x2f8   :  { %v8860_v45 = vrot.slane %v2902_v24, 9  ;;  %v3211_v2 = vrot.slane %v2903_v30, 5  ;;  %5885 = vst.msk [vmem:[#allocation3 + $0x90] sm:$0xff] %vm5866_vm10, %v5807_v39  ;;  %v6656_v31 = vsel %vm9844_vm11, %v6651_v63, %v6655_v21  ;;  %v7373_v23 = vrot.slane %v7371_v4, 4  ;;  %v3899_v52 = vld [vmem:[#allocation2 + $0x174] sm:$0xf] }
 0x2f9   :  { %v4814_v42 = vpop.permute.xlu1 %4813  ;;  %v6661_v5 = vrot.slane %v6660_v34, 4  ;;  %v7368_v60 = vsel %vm10368_vm14, %v7366_v61, %v7367_v26  ;;  %6911 = vrot.lane.b32.xlu0 %v9082_v53, %s9681_s25  ;;  %v3214_v51 = vrot.slane %v2904_v36, 5  ;;  %v12197_v3 = vsel %vm10368_vm14, %v9115_v46, %v7371_v4  ;;  %v3900_v18 = vld [vmem:[#allocation2 + $0x178] sm:$0xf]  ;;  %v3902_v15 = vld [vmem:[#allocation2 + $0x180] sm:$0xf] }
 0x2fa   :  { %4891 = vst.msk [vmem:[#allocation3 + $0x98] sm:$0xff] %vm4871_vm3, %v4814_v42  ;;  %v9146_v1 = vcombine.low %v7365_v19, %v7368_v60  ;;  %v3212_v37 = vsel %vm10368_vm14, %v8860_v45, %v3211_v2  ;;  %v3213_v0 = vrot.slane %v3211_v2, 4  ;;  %v8861_v33 = vrot.slane %v2905_v29, 9  ;;  %v3903_v30 = vld [vmem:[#allocation2 + $0x184] sm:$0xf] }
 0x2fb   :  { %5470 = vrot.lane.b32.xlu1 %v9019_v40, %s9679_s23  ;;  %v6666_v7 = vsel %vm9844_vm11, %v6661_v5, %v6665_v6  ;;  %v3218_v32 = vrot.slane %v2906_v12, 5  ;;  %v6896_v21 = vpop.permute.xlu0 %6895  ;;  %v12201_v56 = vsel %vm10368_vm14, %v7373_v23, %v7374_v35  ;;  %v3221_v59 = vrot.slane %v2907_v9, 5  ;;  %v3901_v40 = vld [vmem:[#allocation2 + $0x17c] sm:$0x1]  ;;  %v3904_v46 = vld [vmem:[#allocation2 + $0x188] sm:$0x1] }
 0x2fc   :  { %v9083_v28 = vcombine.low %v6656_v31, %v6666_v7  ;;  %v3215_v16 = vsel %vm10368_vm14, %v3213_v0, %v3214_v51  ;;  %6974 = vst.msk [vmem:[#allocation3 + $0x90] sm:$0xff] %vm6955_vm12, %v6896_v21  ;;  %v8399_v54 = vadd.f32 %v12151_v49, %v12166_v50  ;;  %v12214_v62 = vadd.f32 %v8595_v25, %v8594_v11  ;;  %v12226_v36 = vld [vmem:[#allocation2 + $0x174] sm:$0xe]  ;;  %v12228_v29 = vld [vmem:[#allocation2 + $0x178] sm:$0xf] }
 0x2fd   :  { %v5455_v27 = vpop.permute.xlu1 %5454  ;;  %v8892_v43 = vcombine.low %v3212_v37, %v3215_v16  ;;  %v12208_v58 = vsel %vm10368_vm14, %v8861_v33, %v3218_v32  ;;  %v3220_v47 = vrot.slane %v3218_v32, 4  ;;  %7552 = vrot.lane.b32.xlu0 %v9146_v1, %s9682_s26  ;;  %v4584_v24 = vshrl.u32 %v3899_v52, 16  ;;  %v9549_v25 = vld [vmem:[#allocation2 + $0x174] sm:$0xff]  }
 0x2fe   :  { %5532 = vst.msk [vmem:[#allocation3 + $0x98] sm:$0xff] %vm5512_vm9, %v5455_v27  ;;  %v4587_v38 = vshll.u32 %v3899_v52, 16  ;;  %v4593_v22 = vshll.u32 %v3900_v18, 16  ;;  %v4597_v41 = vshrl.u32 %v3900_v18, 16  ;;  %v4603_v48 = vshll.u32 %v3901_v40, 16 }
 0x2ff   :  { %5824 = vrot.lane.b32.xlu1 %v9548_v57, %s9680_s24  ;;  %v12219_v53 = vsel %vm10368_vm14, %v3220_v47, %v3221_v59  ;;  %v4608_v63 = vshrl.u32 %v3902_v15, 16  ;;  %v7537_v49 = vpop.permute.xlu0 %7536  ;;  %v4586_v50 = vrot.slane %v4584_v24, 4  ;;  %v9147_v34 = vcombine.low %v12197_v3, %v12201_v56 }
 0x300   :  { %v4589_v6 = vrot.slane %v4587_v38, 5  ;;  %v4595_v26 = vrot.slane %v4593_v22, 5  ;;  %7615 = vst.msk [vmem:[#allocation3 + $0x90] sm:$0xff] %vm7596_vm15, %v7537_v49  ;;  %v8893_v19 = vcombine.low %v12208_v58, %v12219_v53  ;;  %v4599_v61 = vrot.slane %v4597_v41, 4 }
 0x301   :  { %v5809_v11 = vpop.permute.xlu1 %5808  ;;  %v4611_v4 = vshll.u32 %v3902_v15, 16  ;;  %3389 = vrot.lane.b32.xlu0 %v8892_v43, %s9676_s3  ;;  %v4605_v35 = vrot.slane %v4603_v48, 5  ;;  %v4617_v45 = vshll.u32 %v3903_v30, 16  ;;  %v4621_v2 = vshrl.u32 %v3903_v30, 16 }
 0x302   :  { %5886 = vst.msk [vmem:[#allocation3 + $0x98] sm:$0xff] %vm5866_vm10, %v5809_v11  ;;  %v4590_v39 = vor.u32 %v4589_v6, %v4586_v50  ;;  %v4600_v12 = vor.u32 %v4599_v61, %v4595_v26  ;;  %v4610_v42 = vrot.slane %v4608_v63, 4  ;;  %v4627_v5 = vshll.u32 %v3904_v46, 16  ;;  %v4990_v50 = vld [vmem:[#allocation2 + $0x17c] sm:$0x1]  ;;  %v9550_v61 = vld [vmem:[#allocation2 + $0x180] sm:$0xff]  }
 0x303   :  { %6913 = vrot.lane.b32.xlu1 %v9083_v28, %s9681_s25  ;;  %v4613_v31 = vrot.slane %v4611_v4, 5  ;;  %v3374_v60 = vpop.permute.xlu0 %3373  ;;  %v12233_v57 = vrot.slane %v4617_v45, 5  ;;  %v8988_v1 = vrot.slane %v12226_v36, 9  ;;  %v5294_v37 = vrot.slane %v12228_v29, 5  ;;  %v4991_v6 = vld [vmem:[#allocation2 + $0x180] sm:$0xe] }
 0x304   :  { %v9362_v23 = vpop.f32.mrb[4].mxu0  ;;  %v4591_v9 = vrot.slane %v4590_v39, 4  ;;  %3450 = vst.msk [vmem:[#allocation3 + $0xa0] sm:$0xff] %vm3429_vm1, %v3374_v60  ;;  %v4601_v33 = vrot.slane %v4600_v12, 4  ;;  %v4623_v32 = vrot.slane %v4621_v2, 4  ;;  %v4629_v15 = vrot.slane %v4627_v5, 5 }
 0x305   :  { %v6898_v0 = vpop.permute.xlu1 %6897  ;;  %v9257_v51 = vpack.c.bf16 %v9362_v23, %v9362_v23  ;;  %v8532_v7 = vmul.f32 %v9362_v23, %v9362_v23  ;;  %v7832_v3 = vpop.f32.mrb[5].mxu0  ;;  %3742 = vrot.lane.b32.xlu0 %v9549_v25, %s9677_s21  ;;  %v8404_v47 = vsel %vm8392_vm13, %v9362_v23, 0.0  ;;  %v4614_v30 = vor.u32 %v4613_v31, %v4610_v42  ;;  %v4993_v39 = vld [vmem:[#allocation2 + $0x188] sm:$0x1]  ;;  %v5983_v31 = vld [vmem:[#allocation2 + $0x180] sm:$0xf] }
 0x306   :  { %6975 = vst.msk [vmem:[#allocation3 + $0x98] sm:$0xff] %vm6955_vm12, %v6898_v0  ;;  %v9255_v52 = vpack.c.bf16 %v7832_v3, %v7832_v3  ;;  %v8400_v18 = vsel %vm8392_vm13, %v7832_v3, 0.0  ;;  %v8530_v28 = vmul.f32 %v7832_v3, %v7832_v3  ;;  %v4596_v21 = vsel %vm9844_vm11, %v4591_v9, %v4595_v26  ;;  %v12243_v56 = vpop.f32.mrb[6].mxu0  ;;  %v4992_v26 = vld [vmem:[#allocation2 + $0x184] sm:$0xf] }
 0x307   :  { %7554 = vrot.lane.b32.xlu1 %v9147_v34, %s9682_s26  ;;  %8334 = vst.msk [vmem:[#allocation12 + $0x18] sm:$0xf] %vm12781_vm7, %v9257_v51  ;;  %v8401_v16 = vadd.f32 %v8400_v18, %v8399_v54  ;;  %v4606_v59 = vsel %vm9844_vm11, %v4601_v33, %v4605_v35  ;;  %v9258_v40 = vpack.c.bf16 %v12243_v56, %v12243_v56  ;;  %v7835_v27 = vpop.f32.mrb[7].mxu0  ;;  %v3727_v43 = vpop.permute.xlu0 %3726  ;;  %v8601_v24 = vsel %vm8392_vm13, %v8532_v7, 0.0  ;;  %v7647_v22 = vld [vmem:[#allocation3 + $0x90] sm:$0xff] }
 0x308   :  { %8332 = vst.msk [vmem:[#allocation12 + $0x10] sm:$0xf] %vm12781_vm7, %v9255_v52  ;;  %v8597_v38 = vsel %vm8392_vm13, %v8530_v28, 0.0  ;;  %v8956_v41 = vcombine.low %v4596_v21, %v4606_v59  ;;  %9392 = vmatprep.mubr.msk.bf16.mxu1 %vm7681_vm0, %v7647_v22  ;;  %v4624_v63 = vor.u32 %v4623_v32, %v12233_v57  ;;  %v9256_v49 = vpack.c.bf16 %v7835_v27, %v7835_v27  ;;  %v5984_v23 = vld [vmem:[#allocation2 + $0x184] sm:$0xf] }
 0x309   :  { %v7539_v54 = vpop.permute.xlu1 %7538  ;;  %3803 = vst.msk [vmem:[#allocation3 + $0xa0] sm:$0xff] %vm3782_vm2, %v3727_v43  ;;  %v8598_v48 = vadd.f32 %v8597_v38, %v12214_v62  ;;  %v12264_v46 = vmul.f32 %v12243_v56, %v12243_v56  ;;  %v8402_v62 = vsel %vm8392_vm13, %v7835_v27, 0.0  ;;  %v8531_v11 = vmul.f32 %v7835_v27, %v7835_v27  ;;  %v5985_v9 = vld [vmem:[#allocation2 + $0x188] sm:$0x1]  ;;  %v5986_v51 = vld [vmem:[#allocation2 + $0x18c] sm:$0xf] }
 0x30a   :  { %8335 = vst.msk [vmem:[#allocation12 + $0x1c] sm:$0xf] %vm12781_vm7, %v9258_v40  ;;  %4831 = vrot.lane.b32.xlu0 %v8956_v41, %s9678_s22  ;;  %v5295_v34 = vsel %vm10368_vm14, %v8988_v1, %v5294_v37  ;;  %v4615_v4 = vrot.slane %v4614_v30, 4  ;;  %v4625_v36 = vrot.slane %v4624_v63, 4  ;;  %8333 = vst.msk [vmem:[#allocation12 + $0x14] sm:$0xf] %vm12781_vm7, %v9256_v49  ;;  %v8403_v29 = vadd.f32 %v8402_v62, %v8401_v16 }
 0x30b   :  { %7616 = vst.msk [vmem:[#allocation3 + $0x98] sm:$0xff] %vm7596_vm15, %v7539_v54  ;;  %3391 = vrot.lane.b32.xlu1 %v8893_v19, %s9676_s3  ;;  %v5296_v25 = vrot.slane %v5294_v37, 4  ;;  %v8599_v35 = vsel %vm8392_vm13, %v8531_v11, 0.0  ;;  %v4816_v45 = vpop.permute.xlu0 %4815  ;;  %v5297_v2 = vrot.slane %v4990_v50, 5  ;;  %v8989_v12 = vrot.slane %v4991_v6, 9  ;;  %v9551_v32 = vld [vmem:[#allocation2 + $0x180] sm:$0xff]  }
 0x30c   :  { %v5301_v42 = vrot.slane %v4992_v26, 5  ;;  %v4620_v58 = vsel %vm9844_vm11, %v4615_v4, %v12233_v57  ;;  %v4630_v53 = vsel %vm9844_vm11, %v4625_v36, %v4629_v15  ;;  %v12280_v19 = vadd.f32 %v8404_v47, %v8403_v29  ;;  %4892 = vst.msk [vmem:[#allocation3 + $0xa0] sm:$0xff] %vm4871_vm3, %v4816_v45  ;;  %v5987_v18 = vld [vmem:[#allocation2 + $0x190] sm:$0xf]  ;;  %v5988_v15 = vld [vmem:[#allocation2 + $0x194] sm:$0x1] }
 0x30d   :  { %v3376_v5 = vpop.permute.xlu1 %3375  ;;  %v8600_v60 = vadd.f32 %v8599_v35, %v8598_v48  ;;  %v8957_v1 = vcombine.low %v4620_v58, %v4630_v53  ;;  %v5298_v37 = vsel %vm10368_vm14, %v5296_v25, %v5297_v2  ;;  %v5304_v33 = vrot.slane %v4993_v39, 5  ;;  %v7072_v41 = vld [vmem:[#allocation2 + $0x180] sm:$0xe]  ;;  %v7073_v49 = vld [vmem:[#allocation2 + $0x184] sm:$0xf] }
 0x30e   :  { %3451 = vst.msk [vmem:[#allocation3 + $0xa8] sm:$0xff] %vm3429_vm1, %v3376_v5  ;;  %v5302_v0 = vsel %vm10368_vm14, %v8989_v12, %v5301_v42  ;;  %v5303_v57 = vrot.slane %v5301_v42, 4  ;;  %v9020_v3 = vcombine.low %v5295_v34, %v5298_v37  ;;  %v6668_v52 = vshrl.u32 %v5983_v31, 16  ;;  %v7074_v11 = vld [vmem:[#allocation2 + $0x188] sm:$0x1] }
 0x30f   :  { %3744 = vrot.lane.b32.xlu1 %v9550_v61, %s9677_s21  ;;  %v12289_v7 = vadd.f32 %v8601_v24, %v8600_v60  ;;  %v5457_v28 = vpop.permute.xlu0 %5456  ;;  %v6671_v21 = vshll.u32 %v5983_v31, 16  ;;  %v6677_v16 = vshll.u32 %v5984_v23, 16  ;;  %v6681_v59 = vshrl.u32 %v5984_v23, 16  ;;  %v7075_v25 = vld [vmem:[#allocation2 + $0x18c] sm:$0xe] }
 0x310   :  { %v6687_v40 = vshll.u32 %v5985_v9, 16  ;;  %5472 = vrot.lane.b32.xlu0 %v9020_v3, %s9679_s23  ;;  %v5305_v47 = vsel %vm10368_vm14, %v5303_v57, %v5304_v33  ;;  %5533 = vst.msk [vmem:[#allocation3 + $0xa0] sm:$0xff] %vm5512_vm9, %v5457_v28  ;;  %v6670_v24 = vrot.slane %v6668_v52, 4  ;;  %v6692_v38 = vshrl.u32 %v5986_v51, 16  ;;  %v7076_v39 = vld [vmem:[#allocation2 + $0x190] sm:$0xf] }
 0x311   :  { %v3729_v27 = vpop.permute.xlu1 %3728  ;;  %v6695_v22 = vshll.u32 %v5986_v51, 16  ;;  %v9021_v54 = vcombine.low %v5302_v0, %v5305_v47  ;;  %v6673_v48 = vrot.slane %v6671_v21, 5  ;;  %v6679_v30 = vrot.slane %v6677_v16, 5  ;;  %v7077_v31 = vld [vmem:[#allocation2 + $0x194] sm:$0x1]  ;;  %v9552_v9 = vld [vmem:[#allocation2 + $0x18c] sm:$0xff]  }
 0x312   :  { %v7648_v43 = vld [vmem:[#allocation3 + $0x98] sm:$0xff]  ;;  %3804 = vst.msk [vmem:[#allocation3 + $0xa8] sm:$0xff] %vm3782_vm2, %v3729_v27  ;;  %v6683_v63 = vrot.slane %v6681_v59, 4  ;;  %v6689_v50 = vrot.slane %v6687_v40, 5  ;;  %v6694_v6 = vrot.slane %v6692_v38, 4  ;;  %v6701_v62 = vshll.u32 %v5987_v18, 16 }
 0x313   :  { %9393 = vmatmul.mubr.msk.bf16.gmra.mrb[4].mxu1 %vm7681_vm0, %v7648_v43  ;;  %4833 = vrot.lane.b32.xlu1 %v8957_v1, %s9678_s22  ;;  %v6697_v26 = vrot.slane %v6695_v22, 5  ;;  %v5811_v34 = vpop.permute.xlu0 %5810  ;;  %v6674_v61 = vor.u32 %v6673_v48, %v6670_v24  ;;  %v6705_v36 = vshrl.u32 %v5987_v18, 16  ;;  %v6711_v29 = vshll.u32 %v5988_v15, 16  ;;  %v2908_v23 = vld [vmem:[#allocation2 + $0x180] sm:$0xe] }
 0x314   :  { %v6684_v4 = vor.u32 %v6683_v63, %v6679_v30  ;;  %5826 = vrot.lane.b32.xlu0 %v9551_v32, %s9680_s24  ;;  %5887 = vst.msk [vmem:[#allocation3 + $0xa0] sm:$0xff] %vm5866_vm10, %v5811_v34  ;;  %v6703_v2 = vrot.slane %v6701_v62, 5  ;;  %v9116_v12 = vrot.slane %v7072_v41, 9  ;;  %v7378_v42 = vrot.slane %v7073_v49, 5  ;;  %v2909_v51 = vld [vmem:[#allocation2 + $0x184] sm:$0xf] }
 0x315   :  { %v4818_v35 = vpop.permute.xlu1 %4817  ;;  %v6698_v45 = vor.u32 %v6697_v26, %v6694_v6  ;;  %v6675_v5 = vrot.slane %v6674_v61, 4  ;;  %v6707_v53 = vrot.slane %v6705_v36, 4  ;;  %v6713_v60 = vrot.slane %v6711_v29, 5  ;;  %v2910_v28 = vld [vmem:[#allocation2 + $0x188] sm:$0x1] }
 0x316   :  { %4893 = vst.msk [vmem:[#allocation3 + $0xa8] sm:$0xff] %vm4871_vm3, %v4818_v35  ;;  %v6685_v58 = vrot.slane %v6684_v4, 4  ;;  %v7379_v37 = vsel %vm10368_vm14, %v9116_v12, %v7378_v42  ;;  %v7380_v0 = vrot.slane %v7378_v42, 4  ;;  %v7381_v57 = vrot.slane %v7074_v11, 5  ;;  %v2911_v21 = vld [vmem:[#allocation2 + $0x18c] sm:$0xe] }
 0x317   :  { %5474 = vrot.lane.b32.xlu1 %v9021_v54, %s9679_s23  ;;  %v6699_v1 = vrot.slane %v6698_v45, 4  ;;  %v6680_v3 = vsel %vm9844_vm11, %v6675_v5, %v6679_v30  ;;  %v6708_v32 = vor.u32 %v6707_v53, %v6703_v2  ;;  %v6900_v52 = vpop.permute.xlu0 %6899  ;;  %v9117_v18 = vrot.slane %v7075_v25, 9  ;;  %v2912_v43 = vld [vmem:[#allocation2 + $0x190] sm:$0xf]  ;;  %v2913_v47 = vld [vmem:[#allocation2 + $0x194] sm:$0x1] }
 0x318   :  { %v6690_v33 = vsel %vm9844_vm11, %v6685_v58, %v6689_v50  ;;  %6976 = vst.msk [vmem:[#allocation3 + $0xa0] sm:$0xff] %vm6955_vm12, %v6900_v52  ;;  %v7382_v15 = vsel %vm10368_vm14, %v7380_v0, %v7381_v57  ;;  %v7385_v27 = vrot.slane %v7076_v39, 5  ;;  %v7388_v22 = vrot.slane %v7077_v31, 5 }
 0x319   :  { %v5459_v16 = vpop.permute.xlu1 %5458  ;;  %v9084_v59 = vcombine.low %v6680_v3, %v6690_v33  ;;  %v6704_v40 = vsel %vm9844_vm11, %v6699_v1, %v6703_v2  ;;  %v6709_v24 = vrot.slane %v6708_v32, 4  ;;  %v9148_v38 = vcombine.low %v7379_v37, %v7382_v15  ;;  %v258_v1 = vld [vmem:[#allocation2 + $0x198] sm:$0x1]  ;;  %v436_v37 = vld [vmem:[#allocation4 + $0xf8] sm:$0xf] }
 0x31a   :  { %5534 = vst.msk [vmem:[#allocation3 + $0xa8] sm:$0xff] %vm5512_vm9, %v5459_v16  ;;  %v8862_v41 = vrot.slane %v2908_v23, 9  ;;  %v7386_v54 = vsel %vm10368_vm14, %v9117_v18, %v7385_v27  ;;  %v7387_v48 = vrot.slane %v7385_v27, 4  ;;  %v3225_v30 = vrot.slane %v2909_v51, 5  ;;  %v437_v3 = vld [vmem:[#allocation4 + $0xfc] sm:$0xf] }
 0x31b   :  { %5828 = vrot.lane.b32.xlu1 %v9552_v9, %s9680_s24  ;;  %6915 = vrot.lane.b32.xlu0 %v9084_v59, %s9681_s25  ;;  %v3228_v63 = vrot.slane %v2910_v28, 5  ;;  %v6714_v49 = vsel %vm9844_vm11, %v6709_v24, %v6713_v60  ;;  %v7541_v50 = vpop.permute.xlu0 %7540  ;;  %v8863_v6 = vrot.slane %v2911_v21, 9  ;;  %v3232_v26 = vrot.slane %v2912_v43, 5  ;;  %v9553_v21 = vld [vmem:[#allocation2 + $0x18c] sm:$0xff]  }
 0x31c   :  { %v3235_v62 = vrot.slane %v2913_v47, 5  ;;  %v9366_v11 = vpop.f32.mrb[8].mxu0  ;;  %v9085_v61 = vcombine.low %v6704_v40, %v6714_v49  ;;  %v7389_v4 = vsel %vm10368_vm14, %v7387_v48, %v7388_v22  ;;  %7617 = vst.msk [vmem:[#allocation3 + $0xa0] sm:$0xff] %vm7596_vm15, %v7541_v50  ;;  %v3226_v36 = vsel %vm10368_vm14, %v8862_v41, %v3225_v30  ;;  %v3905_v59 = vld [vmem:[#allocation2 + $0x18c] sm:$0xf] }
 0x31d   :  { %v5813_v34 = vpop.permute.xlu1 %5812  ;;  %v3227_v29 = vrot.slane %v3225_v30, 4  ;;  %v7848_v25 = vpop.f32.mrb[9].mxu0  ;;  %v8406_v39 = vsel %vm8392_vm13, %v12243_v56, 0.0  ;;  %v9149_v35 = vcombine.low %v7386_v54, %v7389_v4  ;;  %v3234_v45 = vrot.slane %v3232_v26, 4  ;;  %v3907_v50 = vld [vmem:[#allocation2 + $0x194] sm:$0x1] }
 0x31e   :  { %5888 = vst.msk [vmem:[#allocation3 + $0xa8] sm:$0xff] %vm5866_vm10, %v5813_v34  ;;  %v9261_v2 = vpack.c.bf16 %v9366_v11, %v9366_v11  ;;  %v12328_v12 = vpop.f32.mrb[10].mxu0  ;;  %v8603_v42 = vsel %vm8392_vm13, %v12264_v46, 0.0  ;;  %v3233_v56 = vsel %vm10368_vm14, %v8863_v6, %v3232_v26  ;;  %v9259_v5 = vpack.c.bf16 %v7848_v25, %v7848_v25  ;;  %v368_v4 = vld [vmem:[#allocation2 + $0x1a0] sm:$0x1] }
 0x31f   :  { %6917 = vrot.lane.b32.xlu1 %v9085_v61, %s9681_s25  ;;  %7556 = vrot.lane.b32.xlu0 %v9148_v38, %s9682_s26  ;;  %v3229_v31 = vsel %vm10368_vm14, %v3227_v29, %v3228_v63  ;;  %v7851_v58 = vpop.f32.mrb[11].mxu0  ;;  %v3236_v60 = vsel %vm10368_vm14, %v3234_v45, %v3235_v62  ;;  %v3378_v23 = vpop.permute.xlu0 %3377  ;;  %v8407_v46 = vadd.f32 %v8406_v39, %v12280_v19  ;;  %v8408_v9 = vsel %vm8392_vm13, %v7848_v25, 0.0  ;;  %v3906_v38 = vld [vmem:[#allocation2 + $0x190] sm:$0xf]  ;;  %v4994_v45 = vld [vmem:[#allocation2 + $0x18c] sm:$0xe] }
 0x320   :  { %v8894_v53 = vcombine.low %v3226_v36, %v3229_v31  ;;  %8338 = vst.msk [vmem:[#allocation12 + $0x28] sm:$0xf] %vm12781_vm7, %v9261_v2  ;;  %8336 = vst.msk [vmem:[#allocation12 + $0x20] sm:$0xf] %vm12781_vm7, %v9259_v5  ;;  %v8534_v57 = vmul.f32 %v7848_v25, %v7848_v25  ;;  %v8604_v51 = vadd.f32 %v8603_v42, %v12289_v7  ;;  %v8412_v33 = vsel %vm8392_vm13, %v9366_v11, 0.0 }
 0x321   :  { %v6902_v0 = vpop.permute.xlu1 %6901  ;;  %3452 = vst.msk [vmem:[#allocation3 + $0xb0] sm:$0xff] %vm3429_vm1, %v3378_v23  ;;  %v8536_v32 = vmul.f32 %v9366_v11, %v9366_v11  ;;  %v8409_v52 = vadd.f32 %v8408_v9, %v8407_v46  ;;  %v9262_v19 = vpack.c.bf16 %v12328_v12, %v12328_v12  ;;  %v8895_v18 = vcombine.low %v3233_v56, %v3236_v60  ;;  %v4995_v2 = vld [vmem:[#allocation2 + $0x190] sm:$0xf] }
 0x322   :  { %6977 = vst.msk [vmem:[#allocation3 + $0xa8] sm:$0xff] %vm6955_vm12, %v6902_v0  ;;  %v8605_v28 = vsel %vm8392_vm13, %v8534_v57, 0.0  ;;  %v259_v7 = vsel %vm9757_vm5, 0, %v258_v1  ;;  %v968_v16 = vshrl.u32 %v436_v37, 16  ;;  %v971_v15 = vshll.u32 %v436_v37, 16 }
 0x323   :  { %7558 = vrot.lane.b32.xlu1 %v9149_v35, %s9682_s26  ;;  %3393 = vrot.lane.b32.xlu0 %v8894_v53, %s9676_s3  ;;  %v8606_v40 = vadd.f32 %v8605_v28, %v8604_v51  ;;  %8339 = vst.msk [vmem:[#allocation12 + $0x2c] sm:$0xf] %vm12781_vm7, %v9262_v19  ;;  %260 = vst [vmem:[#allocation2 + $0x198] sm:$0x1] %v259_v7  ;;  %v976_v27 = vshrl.u32 %v437_v3, 16  ;;  %v979_v43 = vshll.u32 %v437_v3, 16  ;;  %v3731_v47 = vpop.permute.xlu0 %3730 }
 0x324   :  { %v7649_v24 = vld [vmem:[#allocation3 + $0xa0] sm:$0xff]  ;;  %v970_v41 = vrot.slane %v968_v16, 7  ;;  %v9260_v54 = vpack.c.bf16 %v7851_v58, %v7851_v58  ;;  %v8410_v48 = vsel %vm8392_vm13, %v7851_v58, 0.0  ;;  %v8535_v30 = vmul.f32 %v7851_v58, %v7851_v58  ;;  %3805 = vst.msk [vmem:[#allocation3 + $0xb0] sm:$0xff] %vm3782_vm2, %v3731_v47  ;;  %v261_v53 = vld [vmem:[#allocation2 + $0x1a4] sm:$0x1] }
 0x325   :  { %v7543_v22 = vpop.permute.xlu1 %7542  ;;  %9396 = vmatprep.mubr.msk.bf16.mxu1 %vm7681_vm0, %v7649_v24  ;;  %v12360_v63 = vrot.slane %v976_v27, 7  ;;  %v8411_v49 = vadd.f32 %v8410_v48, %v8409_v52  ;;  %v4632_v6 = vshrl.u32 %v3905_v59, 16  ;;  %v4635_v26 = vshll.u32 %v3905_v59, 16  ;;  %v4996_v1 = vld [vmem:[#allocation2 + $0x194] sm:$0x1] }
 0x326   :  { %7618 = vst.msk [vmem:[#allocation3 + $0xa8] sm:$0xff] %vm7596_vm15, %v7543_v22  ;;  %v8609_v62 = vsel %vm8392_vm13, %v8536_v32, 0.0  ;;  %v974_v11 = vrot.slane %v970_v41, 4  ;;  %v8607_v34 = vsel %vm8392_vm13, %v8535_v30, 0.0  ;;  %v4641_v61 = vshll.u32 %v3906_v38, 16 }
 0x327   :  { %3395 = vrot.lane.b32.xlu1 %v8895_v18, %s9676_s3  ;;  %3746 = vrot.lane.b32.xlu0 %v9553_v21, %s9677_s21  ;;  %8337 = vst.msk [vmem:[#allocation12 + $0x24] sm:$0xf] %vm12781_vm7, %v9260_v54  ;;  %v973_v36 = vor.u32 %v971_v15, %v970_v41  ;;  %v981_v29 = vor.u32 %v979_v43, %v12360_v63  ;;  %v4820_v35 = vpop.permute.xlu0 %4819  ;;  %v4634_v31 = vrot.slane %v4632_v6, 4  ;;  %v4637_v56 = vrot.slane %v4635_v26, 5  ;;  %v5993_v15 = vld [vmem:[#allocation2 + $0x1a8] sm:$0xf] }
 0x328   :  { %v8413_v25 = vadd.f32 %v8412_v33, %v8411_v49  ;;  %v8608_v39 = vadd.f32 %v8607_v34, %v8606_v40  ;;  %v4643_v5 = vrot.slane %v4641_v61, 5  ;;  %v4645_v58 = vshrl.u32 %v3906_v38, 16  ;;  %4894 = vst.msk [vmem:[#allocation3 + $0xb0] sm:$0xff] %vm4871_vm3, %v4820_v35  ;;  %v371_v33 = vld [vmem:[#allocation2 + $0x1ac] sm:$0x1] }
 0x329   :  { %v3380_v42 = vpop.permute.xlu1 %3379  ;;  %v982_v60 = vsel %vm9753_vm4, %v974_v11, %v981_v29  ;;  %v4651_v46 = vshll.u32 %v3907_v50, 16  ;;  %v369_v9 = vsel %vm9765_vm6, 0, %v368_v4  ;;  %v8537_v37 = vmul.f32 %v12328_v12, %v12328_v12  ;;  %v12388_v47 = vld [vmem:[#allocation2 + $0x1a8] sm:$0xf] }
 0x32a   :  { %3453 = vst.msk [vmem:[#allocation3 + $0xb8] sm:$0xff] %vm3429_vm1, %v3380_v42  ;;  %v8610_v23 = vadd.f32 %v8609_v62, %v8608_v39  ;;  %v1301_v0 = vld [vmem:[#allocation2 + $0x198] sm:$0xf]  ;;  %vm12846_vm7 = vcmask 27648   ;;  %v4638_v57 = vor.u32 %v4637_v56, %v4634_v31  ;;  %v4647_v51 = vrot.slane %v4645_v58, 4 }
 0x32b   :  { %1304 = vst.msk [vmem:[#allocation2 + $0x19c] sm:$0xf] %vm12846_vm7, %v982_v60  ;;  %370 = vst [vmem:[#allocation2 + $0x1a0] sm:$0x1] %v369_v9  ;;  %v5308_v3 = vrot.slane %v4995_v2, 5  ;;  %v1302_v17 = vsel %vm9791_vm8, %v973_v36, %v1301_v0  ;;  %v4653_v32 = vrot.slane %v4651_v46, 5  ;;  %v5461_v19 = vpop.permute.xlu0 %5460 }
 0x32c   :  { %v8990_v52 = vrot.slane %v4994_v45, 9  ;;  %v262_v18 = vsel %vm9757_vm5, 0, %v261_v53  ;;  %1303 = vst [vmem:[#allocation2 + $0x198] sm:$0xf] %v1302_v17  ;;  %v4639_v21 = vrot.slane %v4638_v57, 4  ;;  %v4648_v7 = vor.u32 %v4647_v51, %v4643_v5  ;;  %5535 = vst.msk [vmem:[#allocation3 + $0xb0] sm:$0xff] %vm5512_vm9, %v5461_v19 }
 0x32d   :  { %v3733_v28 = vpop.permute.xlu1 %3732  ;;  %v7650_v16 = vld [vmem:[#allocation3 + $0xa8] sm:$0xff]  ;;  %v5310_v59 = vrot.slane %v5308_v3, 4  ;;  %v5311_v40 = vrot.slane %v4996_v1, 5  ;;  %263 = vst [vmem:[#allocation2 + $0x1a4] sm:$0x1] %v262_v18  ;;  %v8414_v27 = vsel %vm8392_vm13, %v12328_v12, 0.0 }
 0x32e   :  { %3806 = vst.msk [vmem:[#allocation3 + $0xb8] sm:$0xff] %vm3782_vm2, %v3733_v28  ;;  %9397 = vmatmul.mubr.msk.bf16.gmra.mrb[8].mxu1 %vm7681_vm0, %v7650_v16  ;;  %v372_v43 = vsel %vm9765_vm6, 0, %v371_v33  ;;  %v983_v24 = vrot.slane %v12360_v63, 4  ;;  %v4644_v38 = vsel %vm9844_vm11, %v4639_v21, %v4643_v5  ;;  %v4649_v22 = vrot.slane %v4648_v7, 4 }
 0x32f   :  { %373 = vst [vmem:[#allocation2 + $0x1ac] sm:$0x1] %v372_v43  ;;  %v12393_v41 = vadd.f32 %v8414_v27, %v8413_v25  ;;  %v8611_v12 = vsel %vm8392_vm13, %v8537_v37, 0.0  ;;  %v5309_v54 = vsel %vm10368_vm14, %v8990_v52, %v5308_v3  ;;  %v5815_v48 = vpop.permute.xlu0 %5814  ;;  %v6749_v30 = vshll.u32 %v5993_v15, 16 }
 0x330   :  { %v6753_v13 = vshrl.u32 %v5993_v15, 16  ;;  %v4654_v49 = vsel %vm9844_vm11, %v4649_v22, %v4653_v32  ;;  %v5312_v63 = vsel %vm10368_vm14, %v5310_v59, %v5311_v40  ;;  %5889 = vst.msk [vmem:[#allocation3 + $0xb0] sm:$0xff] %vm5866_vm10, %v5815_v48  ;;  %v7399_v6 = vrot.slane %v12388_v47, 5 }
 0x331   :  { %v4822_v50 = vpop.permute.xlu1 %4821  ;;  %v12404_v26 = vadd.f32 %v8611_v12, %v8610_v23  ;;  %v8958_v62 = vcombine.low %v4644_v38, %v4654_v49  ;;  %v9022_v35 = vcombine.low %v5309_v54, %v5312_v63  ;;  %v12421_v46 = vrot.slane %v6749_v30, 5 }
 0x332   :  { %v1305_v11 = vld [vmem:[#allocation2 + $0x1a0] sm:$0x1]  ;;  %v3909_v34 = vld [vmem:[#allocation2 + $0x19c] sm:$0xf]  ;;  %4895 = vst.msk [vmem:[#allocation3 + $0xb8] sm:$0xff] %vm4871_vm3, %v4822_v50  ;;  %v12423_v9 = vrot.slane %v6753_v13, 4 }
 0x333   :  { %v1306_v61 = vsel %vm9757_vm5, %v983_v24, %v1305_v11  ;;  %v4665_v4 = vshll.u32 %v3909_v34, 16  ;;  %v4669_v36 = vshrl.u32 %v3909_v34, 16  ;;  %v12409_v29 = vld [vmem:[#allocation2 + $0x19c] sm:$0xf]  ;;  %4835 = vrot.lane.b32.xlu0 %v8958_v62, %s9678_s22  ;;  %v3908_v39 = vld [vmem:[#allocation2 + $0x198] sm:$0xf]  ;;  %v6904_v2 = vpop.permute.xlu0 %6903 }
 0x334   :  { %v9554_v25 = vld [vmem:[#allocation2 + $0x198] sm:$0xff]   ;;  %1307 = vst [vmem:[#allocation2 + $0x1a0] sm:$0x1] %v1306_v61  ;;  %v5315_v45 = vrot.slane %v12409_v29, 5  ;;  %v4656_v42 = vshrl.u32 %v3908_v39, 16  ;;  %v4659_v31 = vshll.u32 %v3908_v39, 16  ;;  %v6756_v11 = vor.u32 %v12423_v9, %v12421_v46 }
 0x335   :  { %v12413_v56 = vrot.slane %v4665_v4, 5  ;;  %v4671_v5 = vrot.slane %v4669_v36, 4  ;;  %v12415_v58 = vld [vmem:[#allocation2 + $0x198] sm:$0xe]  ;;  %v5463_v53 = vpop.permute.xlu1 %5462  ;;  %6978 = vst.msk [vmem:[#allocation3 + $0xb0] sm:$0xff] %vm6955_vm12, %v6904_v2  ;;  %3748 = vrot.lane.b32.xlu1 %v9554_v25, %s9677_s21  ;;  %v12433_v40 = vpop.f32.mrb[12].mxu0 }
 0x336   :  { %v8991_v60 = vrot.slane %v12415_v58, 9  ;;  %5536 = vst.msk [vmem:[#allocation3 + $0xb8] sm:$0xff] %vm5512_vm9, %v5463_v53  ;;  %v9555_v23 = vld [vmem:[#allocation2 + $0x198] sm:$0xff]   ;;  %v4658_v1 = vrot.slane %v4656_v42, 4  ;;  %v4661_v37 = vrot.slane %v4659_v31, 5  ;;  %v5317_v28 = vrot.slane %v5315_v45, 4 }
 0x337   :  { %v4672_v0 = vor.u32 %v4671_v5, %v12413_v56  ;;  %v1430_v57 = vld [vmem:[#allocation2 + $0x1a4] sm:$0xf]  ;;  %v5989_v51 = vld [vmem:[#allocation2 + $0x198] sm:$0xf]  ;;  %5476 = vrot.lane.b32.xlu0 %v9022_v35, %s9679_s23  ;;  %v5990_v33 = vld [vmem:[#allocation2 + $0x19c] sm:$0xf]  ;;  %v7545_v19 = vpop.permute.xlu0 %7544  ;;  %v9265_v48 = vpack.c.bf16 %v12433_v40, %v12433_v40 }
 0x338   :  { %v1431_v3 = vsel %vm9791_vm8, %v12844_v14, %v1430_v57  ;;  %v6716_v17 = vshrl.u32 %v5989_v51, 16  ;;  %v6719_v32 = vshll.u32 %v5989_v51, 16  ;;  %v1434_v52 = vld [vmem:[#allocation2 + $0x1ac] sm:$0x1]  ;;  %v4662_v18 = vor.u32 %v4661_v37, %v4658_v1  ;;  %v7078_v59 = vld [vmem:[#allocation2 + $0x198] sm:$0xe] }
 0x339   :  { %1432 = vst [vmem:[#allocation2 + $0x1a4] sm:$0xf] %v1431_v3  ;;  %v5817_v21 = vpop.permute.xlu1 %5816  ;;  %v6725_v7 = vshll.u32 %v5990_v33, 16  ;;  %v6729_v16 = vshrl.u32 %v5990_v33, 16  ;;  %7619 = vst.msk [vmem:[#allocation3 + $0xb0] sm:$0xff] %vm7596_vm15, %v7545_v19  ;;  %v4673_v55 = vrot.slane %v4672_v0, 4  ;;  %v1435_v27 = vsel %vm9757_vm5, %v12845_v8, %v1434_v52 }
 0x33a   :  { %5890 = vst.msk [vmem:[#allocation3 + $0xb8] sm:$0xff] %vm5866_vm10, %v5817_v21  ;;  %v6718_v14 = vrot.slane %v6716_v17, 4  ;;  %v6721_v15 = vrot.slane %v6719_v32, 5  ;;  %v7079_v43 = vld [vmem:[#allocation2 + $0x19c] sm:$0xf]  ;;  %v12439_v24 = vpop.f32.mrb[13].mxu0  ;;  %v5316_v31 = vsel %vm10368_vm14, %v8991_v60, %v5315_v45 }
 0x33b   :  { %v3910_v38 = vld [vmem:[#allocation2 + $0x1a0] sm:$0x1]  ;;  %v4663_v22 = vrot.slane %v4662_v18, 4  ;;  %v6727_v54 = vrot.slane %v6725_v7, 5  ;;  %1436 = vst [vmem:[#allocation2 + $0x1ac] sm:$0x1] %v1435_v27  ;;  %5830 = vrot.lane.b32.xlu0 %v9555_v23, %s9680_s24  ;;  %v3382_v8 = vpop.permute.xlu0 %3381  ;;  %v9263_v37 = vpack.c.bf16 %v12439_v24, %v12439_v24  ;;  %v8538_v19 = vmul.f32 %v12439_v24, %v12439_v24 }
 0x33c   :  { %v4999_v12 = vld [vmem:[#allocation2 + $0x1a0] sm:$0x1]  ;;  %v4675_v30 = vshll.u32 %v3910_v38, 16  ;;  %v6722_v50 = vor.u32 %v6721_v15, %v6718_v14  ;;  %v6731_v63 = vrot.slane %v6729_v16, 4  ;;  %v12444_v20 = vpop.f32.mrb[14].mxu0  ;;  %v9118_v61 = vrot.slane %v7078_v59, 9 }
 0x33d   :  { %v5318_v13 = vrot.slane %v4999_v12, 5  ;;  %v5991_v49 = vld [vmem:[#allocation2 + $0x1a0] sm:$0x1]  ;;  %v6906_v34 = vpop.permute.xlu1 %6905  ;;  %v7392_v4 = vrot.slane %v7079_v43, 5  ;;  %vm12847_vm4 = vcmask 519168   ;;  %v12449_v36 = vpop.f32.mrb[15].mxu0  ;;  %v4668_v25 = vsel %vm9844_vm11, %v4663_v22, %v12413_v56 }
 0x33e   :  { %v6735_v62 = vshll.u32 %v5991_v49, 16  ;;  %8342 = vst.msk [vmem:[#allocation12 + $0x38] sm:$0xf] %vm12847_vm4, %v9265_v48  ;;  %v4677_v39 = vrot.slane %v4675_v30, 5  ;;  %v6723_v35 = vrot.slane %v6722_v50, 4  ;;  %v6732_v2 = vor.u32 %v6731_v63, %v6727_v54  ;;  %vm12848_vm5 = vmmov %vm12847_vm4 }
 0x33f   :  { %3454 = vst.msk [vmem:[#allocation3 + $0xc0] sm:$0xff] %vm3429_vm1, %v3382_v8  ;;  %v7080_v42 = vld [vmem:[#allocation2 + $0x1a0] sm:$0x1]  ;;  %v5319_v5 = vsel %vm10368_vm14, %v5317_v28, %v5318_v13  ;;  %v7394_v53 = vrot.slane %v7392_v4, 4  ;;  %v3735_v29 = vpop.permute.xlu0 %3734  ;;  %v7393_v52 = vsel %vm10368_vm14, %v9118_v61, %v7392_v4  ;;  %v6757_v16 = vrot.slane %v6756_v11, 4  ;;  %vm12849_vm6 = vmmov %vm12847_vm4 }
 0x340   :  { %6979 = vst.msk [vmem:[#allocation3 + $0xb8] sm:$0xff] %vm6955_vm12, %v6906_v34  ;;  %v6737_v58 = vrot.slane %v6735_v62, 5  ;;  %v4678_v23 = vsel %vm9844_vm11, %v4673_v55, %v4677_v39  ;;  %v6728_v56 = vsel %vm9844_vm11, %v6723_v35, %v6727_v54  ;;  %v6733_v9 = vrot.slane %v6732_v2, 4  ;;  %v5992_v1 = vld [vmem:[#allocation2 + $0x1a4] sm:$0xf]  ;;  %vm12850_vm7 = vmmov %vm12847_vm4 }
 0x341   :  { %v8959_v0 = vcombine.low %v4668_v25, %v4678_v23  ;;  %v6740_v57 = vshrl.u32 %v5992_v1, 16  ;;  %v6743_v45 = vshll.u32 %v5992_v1, 16  ;;  %v7395_v60 = vrot.slane %v7080_v42, 5  ;;  %v7547_v51 = vpop.permute.xlu1 %7546  ;;  %3807 = vst.msk [vmem:[#allocation3 + $0xc0] sm:$0xff] %vm3782_vm2, %v3735_v29  ;;  %v7651_v3 = vld [vmem:[#allocation3 + $0xb0] sm:$0xff]  ;;  %vm12851_vm8 = vmmov %vm12847_vm4 }
 0x342   :  { %v9023_v33 = vcombine.low %v5316_v31, %v5319_v5  ;;  %v6738_v17 = vsel %vm9844_vm11, %v6733_v9, %v6737_v58  ;;  %v5994_v32 = vld [vmem:[#allocation2 + $0x1ac] sm:$0x1]  ;;  %7620 = vst.msk [vmem:[#allocation3 + $0xb8] sm:$0xff] %vm7596_vm15, %v7547_v51  ;;  %9400 = vmatprep.mubr.msk.bf16.mxu1 %vm7681_vm0, %v7651_v3  ;;  %v7081_v55 = vld [vmem:[#allocation2 + $0x1a4] sm:$0xe]  ;;  %v8416_v15 = vsel %vm8392_vm13, %v12439_v24, 0.0  ;;  %v8540_v30 = vmul.f32 %v12433_v40, %v12433_v40 }
 0x343   :  { %8340 = vst.msk [vmem:[#allocation12 + $0x30] sm:$0xf] %vm12848_vm5, %v9263_v37  ;;  %4837 = vrot.lane.b32.xlu1 %v8959_v0, %s9678_s22  ;;  %v9086_v18 = vcombine.low %v6728_v56, %v6738_v17  ;;  %v6742_v28 = vrot.slane %v6740_v57, 4  ;;  %v6745_v21 = vrot.slane %v6743_v45, 5  ;;  %v6759_v7 = vshll.u32 %v5994_v32, 16  ;;  %v4824_v27 = vpop.permute.xlu0 %4823  ;;  %v9556_v49 = vld [vmem:[#allocation2 + $0x1a4] sm:$0xff]   ;;  %vm12854_vm5 = vmmov %vm12847_vm4 }
 0x344   :  { %v7396_v59 = vsel %vm10368_vm14, %v7394_v53, %v7395_v60  ;;  %v7083_v14 = vld [vmem:[#allocation2 + $0x1ac] sm:$0x1]  ;;  %v8417_v12 = vadd.f32 %v8416_v15, %v12393_v41  ;;  %4896 = vst.msk [vmem:[#allocation3 + $0xc0] sm:$0xff] %vm4871_vm3, %v4824_v27  ;;  %v7401_v48 = vrot.slane %v7399_v6, 4  ;;  %v8613_v13 = vsel %vm8392_vm13, %v8538_v19, 0.0 }
 0x345   :  { %6919 = vrot.lane.b32.xlu0 %v9086_v18, %s9681_s25  ;;  %v6746_v43 = vor.u32 %v6745_v21, %v6742_v28  ;;  %v6761_v38 = vrot.slane %v6759_v7, 5  ;;  %v9150_v22 = vcombine.low %v7393_v52, %v7396_v59  ;;  %v3384_v54 = vpop.permute.xlu1 %3383  ;;  %v9266_v24 = vpack.c.bf16 %v12444_v20, %v12444_v20 }
 0x346   :  { %3455 = vst.msk [vmem:[#allocation3 + $0xc8] sm:$0xff] %vm3429_vm1, %v3384_v54  ;;  %v9119_v50 = vrot.slane %v7081_v55, 9  ;;  %v7402_v63 = vrot.slane %v7083_v14, 5  ;;  %v8614_v8 = vadd.f32 %v8613_v13, %v12404_v26  ;;  %v9264_v11 = vpack.c.bf16 %v12449_v36, %v12449_v36 }
 0x347   :  { %5478 = vrot.lane.b32.xlu1 %v9023_v33, %s9679_s23  ;;  %v6747_v41 = vrot.slane %v6746_v43, 4  ;;  %v6762_v62 = vsel %vm9844_vm11, %v6757_v16, %v6761_v38  ;;  %8343 = vst.msk [vmem:[#allocation12 + $0x3c] sm:$0xf] %vm12849_vm6, %v9266_v24  ;;  %v8418_v34 = vsel %vm8392_vm13, %v12449_v36, 0.0  ;;  %v8539_v61 = vmul.f32 %v12449_v36, %v12449_v36  ;;  %v5465_v4 = vpop.permute.xlu0 %5464  ;;  %vm12855_vm6 = vmmov %vm12847_vm4 }
 0x348   :  { %v8419_v26 = vadd.f32 %v8418_v34, %v8417_v12  ;;  %5537 = vst.msk [vmem:[#allocation3 + $0xc0] sm:$0xff] %vm5512_vm9, %v5465_v4  ;;  %v8420_v2 = vsel %vm8392_vm13, %v12433_v40, 0.0  ;;  %v8541_v42 = vmul.f32 %v12444_v20, %v12444_v20  ;;  %v7400_v40 = vsel %vm10368_vm14, %v9119_v50, %v7399_v6 }
 0x349   :  { %v6752_v25 = vsel %vm9844_vm11, %v6747_v41, %v12421_v46  ;;  %7560 = vrot.lane.b32.xlu0 %v9150_v22, %s9682_s26  ;;  %v3737_v39 = vpop.permute.xlu1 %3736  ;;  %v7652_v35 = vld [vmem:[#allocation3 + $0xb8] sm:$0xff]  ;;  %8341 = vst.msk [vmem:[#allocation12 + $0x34] sm:$0xf] %vm12850_vm7, %v9264_v11  ;;  %v8615_v36 = vsel %vm8392_vm13, %v8539_v61, 0.0  ;;  %v7403_v5 = vsel %vm10368_vm14, %v7401_v48, %v7402_v63  ;;  %v8617_v58 = vsel %vm8392_vm13, %v8540_v30, 0.0  ;;  %vm12852_vm11 = vmmov %vm12847_vm4 }
 0x34a   :  { %3808 = vst.msk [vmem:[#allocation3 + $0xc8] sm:$0xff] %vm3782_vm2, %v3737_v39  ;;  %9401 = vmatmul.mubr.msk.bf16.gmra.mrb[12].mxu1 %vm7681_vm0, %v7652_v35  ;;  %v9087_v44 = vcombine.low %v6752_v25, %v6762_v62  ;;  %v8421_v46 = vadd.f32 %v8420_v2, %v8419_v26  ;;  %v8616_v31 = vadd.f32 %v8615_v36, %v8614_v8  ;;  %v8422_v53 = vsel %vm8392_vm13, %v12444_v20, 0.0  ;;  %vm12853_vm14 = vmmov %vm12847_vm4 }
 0x34b   :  { %5832 = vrot.lane.b32.xlu1 %v9556_v49, %s9680_s24  ;;  %v5819_v23 = vpop.permute.xlu0 %5818  ;;  %v8619_v37 = vsel %vm8392_vm13, %v8541_v42, 0.0  ;;  %v9151_v47 = vcombine.low %v7400_v40, %v7403_v5  ;;  %vm12856_vm7 = vmmov %vm12847_vm4 }
 0x34c   :  { %v8618_v56 = vadd.f32 %v8617_v58, %v8616_v31  ;;  %5891 = vst.msk [vmem:[#allocation3 + $0xc0] sm:$0xff] %vm5866_vm10, %v5819_v23  ;;  %v8423_v1 = vadd.f32 %v8422_v53, %v8421_v46 }
 0x34d   :  { %v4826_v9 = vpop.permute.xlu1 %4825 }
 0x34e   :  { %4897 = vst.msk [vmem:[#allocation3 + $0xc8] sm:$0xff] %vm4871_vm3, %v4826_v9  ;;  %v9374_v10 = vpop.f32.mrb[16].mxu0  ;;  %v8620_v6 = vadd.f32 %v8619_v37, %v8618_v56 }
 0x34f   :  { %6921 = vrot.lane.b32.xlu1 %v9087_v44, %s9681_s25  ;;  %v6908_v29 = vpop.permute.xlu0 %6907  ;;  %v9269_v0 = vpack.c.bf16 %v9374_v10, %v9374_v10  ;;  %v7880_v57 = vpop.f32.mrb[17].mxu0  ;;  %v8544_v28 = vmul.f32 %v9374_v10, %v9374_v10  ;;  %v8428_v14 = vsel %vm8392_vm13, %v9374_v10, 0.0 }
 0x350   :  { %6980 = vst.msk [vmem:[#allocation3 + $0xc0] sm:$0xff] %vm6955_vm12, %v6908_v29  ;;  %v9267_v20 = vpack.c.bf16 %v7880_v57, %v7880_v57  ;;  %v8424_v60 = vsel %vm8392_vm13, %v7880_v57, 0.0  ;;  %v8542_v51 = vmul.f32 %v7880_v57, %v7880_v57  ;;  %v9375_v3 = vpop.f32.mrb[18].mxu0 }
 0x351   :  { %v5467_v45 = vpop.permute.xlu1 %5466  ;;  %8346 = vst.msk [vmem:[#allocation12 + $0x48] sm:$0xf] %vm12851_vm8, %v9269_v0  ;;  %v8425_v33 = vadd.f32 %v8424_v60, %v8423_v1  ;;  %v9270_v17 = vpack.c.bf16 %v9375_v3, %v9375_v3  ;;  %v7883_v32 = vpop.f32.mrb[19].mxu0  ;;  %v8545_v15 = vmul.f32 %v9375_v3, %v9375_v3  ;;  %v8430_v38 = vsel %vm8392_vm13, %v9375_v3, 0.0  ;;  %vm12857_vm8 = vmmov %vm12847_vm4 }
 0x352   :  { %5538 = vst.msk [vmem:[#allocation3 + $0xc8] sm:$0xff] %vm5512_vm9, %v5467_v45  ;;  %v8621_v52 = vsel %vm8392_vm13, %v8542_v51, 0.0  ;;  %v9268_v19 = vpack.c.bf16 %v7883_v32, %v7883_v32  ;;  %v8426_v18 = vsel %vm8392_vm13, %v7883_v32, 0.0  ;;  %v8543_v59 = vmul.f32 %v7883_v32, %v7883_v32 }
 0x353   :  { %7562 = vrot.lane.b32.xlu1 %v9151_v47, %s9682_s26  ;;  %8344 = vst.msk [vmem:[#allocation12 + $0x40] sm:$0xf] %vm12852_vm11, %v9267_v20  ;;  %v8622_v21 = vadd.f32 %v8621_v52, %v8620_v6  ;;  %v7549_v7 = vpop.permute.xlu0 %7548  ;;  %v8427_v16 = vadd.f32 %v8426_v18, %v8425_v33  ;;  %v8625_v12 = vsel %vm8392_vm13, %v8544_v28, 0.0  ;;  %v8627_v24 = vsel %vm8392_vm13, %v8545_v15, 0.0  ;;  %vm12858_vm11 = vmmov %vm12847_vm4 }
 0x354   :  { %8347 = vst.msk [vmem:[#allocation12 + $0x4c] sm:$0xf] %vm12853_vm14, %v9270_v17  ;;  %v8623_v43 = vsel %vm8392_vm13, %v8543_v59, 0.0  ;;  %vm12859_vm14 = vmmov %vm12847_vm4 }
 0x355   :  { %v5821_v55 = vpop.permute.xlu1 %5820  ;;  %7621 = vst.msk [vmem:[#allocation3 + $0xc0] sm:$0xff] %vm7596_vm15, %v7549_v7  ;;  %v8429_v27 = vadd.f32 %v8428_v14, %v8427_v16  ;;  %v8624_v22 = vadd.f32 %v8623_v43, %v8622_v21 }
 0x356   :  { %8345 = vst.msk [vmem:[#allocation12 + $0x44] sm:$0xf] %vm12847_vm4, %v9268_v19 }
 0x357   :  { %5892 = vst.msk [vmem:[#allocation3 + $0xc8] sm:$0xff] %vm5866_vm10, %v5821_v55  ;;  %v3386_v54 = vpop.permute.xlu0 %3385  ;;  %v8431_v48 = vadd.f32 %v8430_v38, %v8429_v27  ;;  %v8626_v13 = vadd.f32 %v8625_v12, %v8624_v22 }
 0x358   :  { %3456 = vst.msk [vmem:[#allocation3 + $0xd0] sm:$0xff] %vm3429_vm1, %v3386_v54 }
 0x359   :  { %v6910_v30 = vpop.permute.xlu1 %6909  ;;  %v8628_v49 = vadd.f32 %v8627_v24, %v8626_v13 }
 0x35a   :  { %6981 = vst.msk [vmem:[#allocation3 + $0xc8] sm:$0xff] %vm6955_vm12, %v6910_v30 }
 0x35b   :  { %v3739_v41 = vpop.permute.xlu0 %3738 }
 0x35c   :  { %v7653_v50 = vld [vmem:[#allocation3 + $0xc0] sm:$0xff]  ;;  %3809 = vst.msk [vmem:[#allocation3 + $0xd0] sm:$0xff] %vm3782_vm2, %v3739_v41 }
 0x35d   :  { %v7551_v63 = vpop.permute.xlu1 %7550  ;;  %9404 = vmatprep.mubr.msk.bf16.mxu1 %vm7681_vm0, %v7653_v50 }
 0x35e   :  { %7622 = vst.msk [vmem:[#allocation3 + $0xc8] sm:$0xff] %vm7596_vm15, %v7551_v63 }
 0x35f   :  { %v4828_v8 = vpop.permute.xlu0 %4827 }
 0x360   :  { %4898 = vst.msk [vmem:[#allocation3 + $0xd0] sm:$0xff] %vm4871_vm3, %v4828_v8 }
 0x361   :  { %v3388_v62 = vpop.permute.xlu1 %3387 }
 0x362   :  { %3457 = vst.msk [vmem:[#allocation3 + $0xd8] sm:$0xff] %vm3429_vm1, %v3388_v62 }
 0x363   :  { %v5469_v11 = vpop.permute.xlu0 %5468 }
 0x364   :  { %5539 = vst.msk [vmem:[#allocation3 + $0xd0] sm:$0xff] %vm5512_vm9, %v5469_v11 }
 0x365   :  { %v3741_v34 = vpop.permute.xlu1 %3740  ;;  %v7654_v61 = vld [vmem:[#allocation3 + $0xc8] sm:$0xff] }
 0x366   :  { %3810 = vst.msk [vmem:[#allocation3 + $0xd8] sm:$0xff] %vm3782_vm2, %v3741_v34  ;;  %9405 = vmatmul.mubr.msk.bf16.gmra.mrb[16].mxu1 %vm7681_vm0, %v7654_v61 }
 0x367   :  { %v5823_v4 = vpop.permute.xlu0 %5822 }
 0x368   :  { %5893 = vst.msk [vmem:[#allocation3 + $0xd0] sm:$0xff] %vm5866_vm10, %v5823_v4 }
 0x369   :  { %v4830_v25 = vpop.permute.xlu1 %4829 }
 0x36a   :  { %4899 = vst.msk [vmem:[#allocation3 + $0xd8] sm:$0xff] %vm4871_vm3, %v4830_v25  ;;  %v9378_v26 = vpop.f32.mrb[20].mxu0 }
 0x36b   :  { %v6912_v39 = vpop.permute.xlu0 %6911  ;;  %v9273_v35 = vpack.c.bf16 %v9378_v26, %v9378_v26  ;;  %v7896_v2 = vpop.f32.mrb[21].mxu0  ;;  %v8548_v9 = vmul.f32 %v9378_v26, %v9378_v26  ;;  %v8436_v29 = vsel %vm8392_vm13, %v9378_v26, 0.0 }
 0x36c   :  { %6982 = vst.msk [vmem:[#allocation3 + $0xd0] sm:$0xff] %vm6955_vm12, %v6912_v39  ;;  %v9271_v36 = vpack.c.bf16 %v7896_v2, %v7896_v2  ;;  %v8432_v44 = vsel %vm8392_vm13, %v7896_v2, 0.0  ;;  %v8546_v46 = vmul.f32 %v7896_v2, %v7896_v2  ;;  %v9379_v31 = vpop.f32.mrb[22].mxu0 }
 0x36d   :  { %v5471_v42 = vpop.permute.xlu1 %5470  ;;  %8350 = vst.msk [vmem:[#allocation12 + $0x58] sm:$0xf] %vm12854_vm5, %v9273_v35  ;;  %v8433_v40 = vadd.f32 %v8432_v44, %v8431_v48  ;;  %v9274_v5 = vpack.c.bf16 %v9379_v31, %v9379_v31  ;;  %v7899_v58 = vpop.f32.mrb[23].mxu0  ;;  %v8549_v0 = vmul.f32 %v9379_v31, %v9379_v31  ;;  %v8438_v20 = vsel %vm8392_vm13, %v9379_v31, 0.0  ;;  %vm12860_vm5 = vmmov %vm12847_vm4 }
 0x36e   :  { %5540 = vst.msk [vmem:[#allocation3 + $0xd8] sm:$0xff] %vm5512_vm9, %v5471_v42  ;;  %v8629_v53 = vsel %vm8392_vm13, %v8546_v46, 0.0  ;;  %v9272_v23 = vpack.c.bf16 %v7899_v58, %v7899_v58  ;;  %v8434_v56 = vsel %vm8392_vm13, %v7899_v58, 0.0  ;;  %v8547_v10 = vmul.f32 %v7899_v58, %v7899_v58 }
 0x36f   :  { %8348 = vst.msk [vmem:[#allocation12 + $0x50] sm:$0xf] %vm12855_vm6, %v9271_v36  ;;  %v8630_v1 = vadd.f32 %v8629_v53, %v8628_v49  ;;  %v7553_v37 = vpop.permute.xlu0 %7552  ;;  %v8435_v47 = vadd.f32 %v8434_v56, %v8433_v40  ;;  %v8633_v51 = vsel %vm8392_vm13, %v8548_v9, 0.0  ;;  %v8635_v52 = vsel %vm8392_vm13, %v8549_v0, 0.0 }
 0x370   :  { %8351 = vst.msk [vmem:[#allocation12 + $0x5c] sm:$0xf] %vm12856_vm7, %v9274_v5  ;;  %v8631_v45 = vsel %vm8392_vm13, %v8547_v10, 0.0 }
 0x371   :  { %v5825_v6 = vpop.permute.xlu1 %5824  ;;  %7623 = vst.msk [vmem:[#allocation3 + $0xd0] sm:$0xff] %vm7596_vm15, %v7553_v37  ;;  %v8437_v57 = vadd.f32 %v8436_v29, %v8435_v47  ;;  %v8632_v60 = vadd.f32 %v8631_v45, %v8630_v1 }
 0x372   :  { %8349 = vst.msk [vmem:[#allocation12 + $0x54] sm:$0xf] %vm12857_vm8, %v9272_v23 }
 0x373   :  { %5894 = vst.msk [vmem:[#allocation3 + $0xd8] sm:$0xff] %vm5866_vm10, %v5825_v6  ;;  %v3390_v3 = vpop.permute.xlu0 %3389  ;;  %v8439_v33 = vadd.f32 %v8438_v20, %v8437_v57  ;;  %v8634_v32 = vadd.f32 %v8633_v51, %v8632_v60 }
 0x374   :  { %3458 = vst.msk [vmem:[#allocation3 + $0xe0] sm:$0xff] %vm3429_vm1, %v3390_v3 }
 0x375   :  { %v6914_v17 = vpop.permute.xlu1 %6913  ;;  %v8636_v19 = vadd.f32 %v8635_v52, %v8634_v32 }
 0x376   :  { %6983 = vst.msk [vmem:[#allocation3 + $0xd8] sm:$0xff] %vm6955_vm12, %v6914_v17 }
 0x377   :  { %v3743_v18 = vpop.permute.xlu0 %3742 }
 0x378   :  { %v7655_v28 = vld [vmem:[#allocation3 + $0xd0] sm:$0xff]  ;;  %3811 = vst.msk [vmem:[#allocation3 + $0xe0] sm:$0xff] %vm3782_vm2, %v3743_v18 }
 0x379   :  { %v7555_v21 = vpop.permute.xlu1 %7554  ;;  %9408 = vmatprep.mubr.msk.bf16.mxu1 %vm7681_vm0, %v7655_v28 }
 0x37a   :  { %7624 = vst.msk [vmem:[#allocation3 + $0xd8] sm:$0xff] %vm7596_vm15, %v7555_v21 }
 0x37c   :  { %v4832_v7 = vpop.permute.xlu0 %4831 }
 0x37d   :  { %v3392_v16 = vpop.permute.xlu1 %3391  ;;  %4900 = vst.msk [vmem:[#allocation3 + $0xe0] sm:$0xff] %vm4871_vm3, %v4832_v7 }
 0x37e   :  { %3459 = vst.msk [vmem:[#allocation3 + $0xe8] sm:$0xff] %vm3429_vm1, %v3392_v16 }
 0x381   :  { %v3745_v59 = vpop.permute.xlu1 %3744  ;;  %v7656_v55 = vld [vmem:[#allocation3 + $0xd8] sm:$0xff] }
 0x382   :  { %3812 = vst.msk [vmem:[#allocation3 + $0xe8] sm:$0xff] %vm3782_vm2, %v3745_v59  ;;  %9409 = vmatmul.mubr.msk.bf16.gmra.mrb[20].mxu1 %vm7681_vm0, %v7656_v55  ;;  %v5473_v14 = vpop.permute.xlu0 %5472 }
 0x383   :  { %5541 = vst.msk [vmem:[#allocation3 + $0xe0] sm:$0xff] %vm5512_vm9, %v5473_v14 }
 0x385   :  { %v4834_v15 = vpop.permute.xlu1 %4833 }
 0x386   :  { %4901 = vst.msk [vmem:[#allocation3 + $0xe8] sm:$0xff] %vm4871_vm3, %v4834_v15  ;;  %v5827_v27 = vpop.permute.xlu0 %5826  ;;  %v9382_v43 = vpop.f32.mrb[24].mxu0 }
 0x387   :  { %5895 = vst.msk [vmem:[#allocation3 + $0xe0] sm:$0xff] %vm5866_vm10, %v5827_v27  ;;  %v9277_v38 = vpack.c.bf16 %v9382_v43, %v9382_v43  ;;  %v7912_v22 = vpop.f32.mrb[25].mxu0  ;;  %v8552_v62 = vmul.f32 %v9382_v43, %v9382_v43  ;;  %v8444_v26 = vsel %vm8392_vm13, %v9382_v43, 0.0 }
 0x388   :  { %v9275_v54 = vpack.c.bf16 %v7912_v22, %v7912_v22  ;;  %v8440_v48 = vsel %vm8392_vm13, %v7912_v22, 0.0  ;;  %v8550_v30 = vmul.f32 %v7912_v22, %v7912_v22  ;;  %v9383_v13 = vpop.f32.mrb[26].mxu0 }
 0x389   :  { %v5475_v12 = vpop.permute.xlu1 %5474  ;;  %8354 = vst.msk [vmem:[#allocation12 + $0x68] sm:$0xf] %vm12858_vm11, %v9277_v38  ;;  %v8441_v24 = vadd.f32 %v8440_v48, %v8439_v33  ;;  %v9278_v49 = vpack.c.bf16 %v9383_v13, %v9383_v13  ;;  %v7915_v41 = vpop.f32.mrb[27].mxu0  ;;  %v8553_v39 = vmul.f32 %v9383_v13, %v9383_v13  ;;  %v8446_v42 = vsel %vm8392_vm13, %v9383_v13, 0.0 }
 0x38a   :  { %5542 = vst.msk [vmem:[#allocation3 + $0xe8] sm:$0xff] %vm5512_vm9, %v5475_v12  ;;  %v8637_v50 = vsel %vm8392_vm13, %v8550_v30, 0.0  ;;  %v9276_v63 = vpack.c.bf16 %v7915_v41, %v7915_v41  ;;  %v8442_v8 = vsel %vm8392_vm13, %v7915_v41, 0.0  ;;  %v8551_v61 = vmul.f32 %v7915_v41, %v7915_v41 }
 0x38b   :  { %8352 = vst.msk [vmem:[#allocation12 + $0x60] sm:$0xf] %vm12859_vm14, %v9275_v54  ;;  %v8638_v11 = vadd.f32 %v8637_v50, %v8636_v19  ;;  %v8443_v34 = vadd.f32 %v8442_v8, %v8441_v24  ;;  %v8641_v44 = vsel %vm8392_vm13, %v8552_v62, 0.0  ;;  %v8643_v58 = vsel %vm8392_vm13, %v8553_v39, 0.0 }
 0x38c   :  { %8355 = vst.msk [vmem:[#allocation12 + $0x6c] sm:$0xf] %vm12847_vm4, %v9278_v49  ;;  %v8639_v2 = vsel %vm8392_vm13, %v8551_v61, 0.0 }
 0x38d   :  { %v5829_v4 = vpop.permute.xlu1 %5828  ;;  %v6916_v25 = vpop.permute.xlu0 %6915  ;;  %8353 = vst.msk [vmem:[#allocation12 + $0x64] sm:$0xf] %vm12860_vm5, %v9276_v63  ;;  %v8445_v35 = vadd.f32 %v8444_v26, %v8443_v34  ;;  %v8640_v36 = vadd.f32 %v8639_v2, %v8638_v11 }
 0x38e   :  { %5896 = vst.msk [vmem:[#allocation3 + $0xe8] sm:$0xff] %vm5866_vm10, %v5829_v4 }
 0x38f   :  { %6984 = vst.msk [vmem:[#allocation3 + $0xe0] sm:$0xff] %vm6955_vm12, %v6916_v25  ;;  %v8447_v46 = vadd.f32 %v8446_v42, %v8445_v35  ;;  %v8642_v5 = vadd.f32 %v8641_v44, %v8640_v36 }
 0x391   :  { %v6918_v31 = vpop.permute.xlu1 %6917  ;;  %v7557_v40 = vpop.permute.xlu0 %7556  ;;  %v8644_v53 = vadd.f32 %v8643_v58, %v8642_v5 }
 0x392   :  { %6985 = vst.msk [vmem:[#allocation3 + $0xe8] sm:$0xff] %vm6955_vm12, %v6918_v31 }
 0x393   :  { %7625 = vst.msk [vmem:[#allocation3 + $0xe0] sm:$0xff] %vm7596_vm15, %v7557_v40 }
 0x395   :  { %v7559_v23 = vpop.permute.xlu1 %7558  ;;  %v3394_v56 = vpop.permute.xlu0 %3393 }
 0x396   :  { %7626 = vst.msk [vmem:[#allocation3 + $0xe8] sm:$0xff] %vm7596_vm15, %v7559_v23 }
 0x397   :  { %3460 = vst.msk [vmem:[#allocation3 + $0xf0] sm:$0xff] %vm3429_vm1, %v3394_v56 }
 0x399   :  { %v3396_v9 = vpop.permute.xlu1 %3395  ;;  %v3747_v1 = vpop.permute.xlu0 %3746 }
 0x39a   :  { %v7657_v37 = vld [vmem:[#allocation3 + $0xe0] sm:$0xff]  ;;  %3461 = vst.msk [vmem:[#allocation3 + $0xf8] sm:$0xff] %vm3429_vm1, %v3396_v9  ;;  %vm12861_vm1 = vmmov %vm12847_vm4 }
 0x39b   :  { %3813 = vst.msk [vmem:[#allocation3 + $0xf0] sm:$0xff] %vm3782_vm2, %v3747_v1  ;;  %9412 = vmatprep.mubr.msk.bf16.mxu1 %vm7681_vm0, %v7657_v37  ;;  %vm12863_vm6 = vmmov %vm12861_vm1 }
 0x39c   :  { %vm12864_vm7 = vmmov %vm12861_vm1 }
 0x39d   :  { %v7658_v47 = vld [vmem:[#allocation3 + $0xe8] sm:$0xff] }
 0x39e   :  { %9413 = vmatmul.mubr.msk.bf16.gmra.mrb[24].mxu1 %vm7681_vm0, %v7658_v47 }
 0x3a5   :  { %v4836_v10 = vpop.permute.xlu0 %4835 }
 0x3a6   :  { %4902 = vst.msk [vmem:[#allocation3 + $0xf0] sm:$0xff] %vm4871_vm3, %v4836_v10 }
 0x3a7   :  { %v3749_v6 = vpop.permute.xlu1 %3748 }
 0x3a8   :  { %3814 = vst.msk [vmem:[#allocation3 + $0xf8] sm:$0xff] %vm3782_vm2, %v3749_v6  ;;  %vm12862_vm2 = vmmov %vm12861_vm1 }
 0x3a9   :  { %v5477_v29 = vpop.permute.xlu0 %5476 }
 0x3aa   :  { %5543 = vst.msk [vmem:[#allocation3 + $0xf0] sm:$0xff] %vm5512_vm9, %v5477_v29 }
 0x3ad   :  { %v9386_v0 = vpop.f32.mrb[28].mxu0  ;;  %v5831_v57 = vpop.permute.xlu0 %5830 }
 0x3ae   :  { %v9281_v45 = vpack.c.bf16 %v9386_v0, %v9386_v0  ;;  %v7928_v20 = vpop.f32.mrb[29].mxu0  ;;  %5897 = vst.msk [vmem:[#allocation3 + $0xf0] sm:$0xff] %vm5866_vm10, %v5831_v57  ;;  %v8556_v21 = vmul.f32 %v9386_v0, %v9386_v0  ;;  %v8452_v55 = vsel %vm8392_vm13, %v9386_v0, 0.0 }
 0x3af   :  { %v9279_v60 = vpack.c.bf16 %v7928_v20, %v7928_v20  ;;  %v8448_v51 = vsel %vm8392_vm13, %v7928_v20, 0.0  ;;  %v8554_v3 = vmul.f32 %v7928_v20, %v7928_v20  ;;  %v9387_v33 = vpop.f32.mrb[30].mxu0 }
 0x3b0   :  { %8358 = vst.msk [vmem:[#allocation12 + $0x78] sm:$0xf] %vm12861_vm1, %v9281_v45  ;;  %v8449_v17 = vadd.f32 %v8448_v51, %v8447_v46  ;;  %v9282_v32 = vpack.c.bf16 %v9387_v33, %v9387_v33  ;;  %v7931_v52 = vpop.f32.mrb[31].mxu0  ;;  %v8557_v14 = vmul.f32 %v9387_v33, %v9387_v33  ;;  %v8454_v38 = vsel %vm8392_vm13, %v9387_v33, 0.0 }
 0x3b1   :  { %8356 = vst.msk [vmem:[#allocation12 + $0x70] sm:$0xf] %vm12862_vm2, %v9279_v60  ;;  %v8645_v19 = vsel %vm8392_vm13, %v8554_v3, 0.0  ;;  %v9280_v18 = vpack.c.bf16 %v7931_v52, %v7931_v52  ;;  %v8450_v28 = vsel %vm8392_vm13, %v7931_v52, 0.0  ;;  %v8555_v59 = vmul.f32 %v7931_v52, %v7931_v52 }
 0x3b2   :  { %v8646_v7 = vadd.f32 %v8645_v19, %v8644_v53  ;;  %8359 = vst.msk [vmem:[#allocation12 + $0x7c] sm:$0xf] %vm12863_vm6, %v9282_v32  ;;  %v8451_v16 = vadd.f32 %v8450_v28, %v8449_v17  ;;  %v8649_v12 = vsel %vm8392_vm13, %v8556_v21, 0.0  ;;  %v8651_v13 = vsel %vm8392_vm13, %v8557_v14, 0.0 }
 0x3b3   :  { %8357 = vst.msk [vmem:[#allocation12 + $0x74] sm:$0xf] %vm12864_vm7, %v9280_v18  ;;  %v8647_v27 = vsel %vm8392_vm13, %v8555_v59, 0.0 }
 0x3b4   :  { %v8453_v15 = vadd.f32 %v8452_v55, %v8451_v16  ;;  %v8648_v22 = vadd.f32 %v8647_v27, %v8646_v7 }
 0x3b5   :  { %v4838_v43 = vpop.permute.xlu1 %4837 }
 0x3b6   :  { %4903 = vst.msk [vmem:[#allocation3 + $0xf8] sm:$0xff] %vm4871_vm3, %v4838_v43  ;;  %v8455_v54 = vadd.f32 %v8454_v38, %v8453_v15  ;;  %v8650_v30 = vadd.f32 %v8649_v12, %v8648_v22  ;;  %vm12865_vm3 = vmmov %vm12861_vm1 }
 0x3b7   :  { %v6920_v48 = vpop.permute.xlu0 %6919 }
 0x3b8   :  { %6986 = vst.msk [vmem:[#allocation3 + $0xf0] sm:$0xff] %vm6955_vm12, %v6920_v48  ;;  %v8652_v49 = vadd.f32 %v8651_v13, %v8650_v30 }
 0x3b9   :  { %v5479_v24 = vpop.permute.xlu1 %5478 }
 0x3ba   :  { %5544 = vst.msk [vmem:[#allocation3 + $0xf8] sm:$0xff] %vm5512_vm9, %v5479_v24  ;;  %vm12866_vm9 = vmmov %vm12861_vm1 }
 0x3bb   :  { %v7561_v41 = vpop.permute.xlu0 %7560 }
 0x3bc   :  { %7627 = vst.msk [vmem:[#allocation3 + $0xf0] sm:$0xff] %vm7596_vm15, %v7561_v41 }
 0x3bd   :  { %v5833_v50 = vpop.permute.xlu1 %5832 }
 0x3be   :  { %5898 = vst.msk [vmem:[#allocation3 + $0xf8] sm:$0xff] %vm5866_vm10, %v5833_v50  ;;  %vm12867_vm10 = vmmov %vm12861_vm1 }
 0x3c1   :  { %v6922_v63 = vpop.permute.xlu1 %6921 }
 0x3c2   :  { %6987 = vst.msk [vmem:[#allocation3 + $0xf8] sm:$0xff] %vm6955_vm12, %v6922_v63  ;;  %vm12868_vm12 = vmmov %vm12861_vm1 }
 0x3c3   :  { %v7659_v8 = vld [vmem:[#allocation3 + $0xf0] sm:$0xff] }
 0x3c4   :  { %9416 = vmatprep.mubr.msk.bf16.mxu1 %vm7681_vm0, %v7659_v8 }
 0x3c5   :  { %v7563_v62 = vpop.permute.xlu1 %7562 }
 0x3c6   :  { %7628 = vst.msk [vmem:[#allocation3 + $0xf8] sm:$0xff] %vm7596_vm15, %v7563_v62  ;;  %vm12869_vm15 = vmmov %vm12861_vm1 }
 0x3c9   :  { %v9390_v11 = vpop.f32.mrb[0].mxu1 }
 0x3ca   :  { %v9285_v34 = vpack.c.bf16 %v9390_v11, %v9390_v11  ;;  %v7944_v61 = vpop.f32.mrb[1].mxu1  ;;  %v8560_v40 = vmul.f32 %v9390_v11, %v9390_v11  ;;  %v8460_v23 = vsel %vm8392_vm13, %v9390_v11, 0.0 }
 0x3cb   :  { %v9283_v4 = vpack.c.bf16 %v7944_v61, %v7944_v61  ;;  %v8456_v25 = vsel %vm8392_vm13, %v7944_v61, 0.0  ;;  %v8558_v26 = vmul.f32 %v7944_v61, %v7944_v61  ;;  %v9391_v39 = vpop.f32.mrb[2].mxu1 }
 0x3cc   :  { %8362 = vst.msk [vmem:[#allocation12 + $0x88] sm:$0xf] %vm12865_vm3, %v9285_v34  ;;  %v8457_v35 = vadd.f32 %v8456_v25, %v8455_v54  ;;  %v9286_v2 = vpack.c.bf16 %v9391_v39, %v9391_v39  ;;  %v7947_v42 = vpop.f32.mrb[3].mxu1  ;;  %v8561_v56 = vmul.f32 %v9391_v39, %v9391_v39  ;;  %v8462_v37 = vsel %vm8392_vm13, %v9391_v39, 0.0 }
 0x3cd   :  { %v7660_v36 = vld [vmem:[#allocation3 + $0xf8] sm:$0xff]  ;;  %8360 = vst.msk [vmem:[#allocation12 + $0x80] sm:$0xf] %vm12866_vm9, %v9283_v4  ;;  %v8653_v44 = vsel %vm8392_vm13, %v8558_v26, 0.0  ;;  %v9284_v46 = vpack.c.bf16 %v7947_v42, %v7947_v42  ;;  %v8458_v31 = vsel %vm8392_vm13, %v7947_v42, 0.0  ;;  %v8559_v53 = vmul.f32 %v7947_v42, %v7947_v42 }
 0x3ce   :  { %9417 = vmatmul.mubr.msk.bf16.gmra.mrb[28].mxu1 %vm7681_vm0, %v7660_v36  ;;  %v8654_v5 = vadd.f32 %v8653_v44, %v8652_v49  ;;  %8363 = vst.msk [vmem:[#allocation12 + $0x8c] sm:$0xf] %vm12867_vm10, %v9286_v2  ;;  %v8459_v58 = vadd.f32 %v8458_v31, %v8457_v35  ;;  %v8657_v10 = vsel %vm8392_vm13, %v8560_v40, 0.0  ;;  %v8659_v0 = vsel %vm8392_vm13, %v8561_v56, 0.0  ;;  %vm12870_vm0 = vmmov %vm12861_vm1 }
 0x3cf   :  { %8361 = vst.msk [vmem:[#allocation12 + $0x84] sm:$0xf] %vm12868_vm12, %v9284_v46  ;;  %v8655_v1 = vsel %vm8392_vm13, %v8559_v53, 0.0  ;;  %vm12871_vm8 = vmmov %vm12870_vm0 }
 0x3d0   :  { %v8461_v9 = vadd.f32 %v8460_v23, %v8459_v58  ;;  %v8656_v47 = vadd.f32 %v8655_v1, %v8654_v5  ;;  %vm12872_vm11 = vmmov %vm12870_vm0 }
 0x3d1   :  { %vm12873_vm14 = vmmov %vm12870_vm0 }
 0x3d2   :  { %v8463_v6 = vadd.f32 %v8462_v37, %v8461_v9  ;;  %v8658_v29 = vadd.f32 %v8657_v10, %v8656_v47  ;;  %vm12874_vm4 = vmmov %vm12870_vm0 }
 0x3d3   :  { %vm12875_vm5 = vmmov %vm12870_vm0 }
 0x3d4   :  { %v8660_v57 = vadd.f32 %v8659_v0, %v8658_v29  ;;  %vm12876_vm1 = vmmov %vm12870_vm0 }
 0x3d5   :  { %vm12877_vm2 = vmmov %vm12870_vm0 }
 0x3d6   :  { %vm12878_vm6 = vmmov %vm12870_vm0 }
 0x3d7   :  { %vm12879_vm7 = vmmov %vm12870_vm0 }
 0x3d8   :  { %vm12880_vm3 = vmmov %vm12870_vm0 }
 0x3d9   :  { %vm12881_vm9 = vmmov %vm12870_vm0 }
 0x3da   :  { %vm12882_vm10 = vmmov %vm12870_vm0 }
 0x3db   :  { %vm12883_vm12 = vmmov %vm12870_vm0 }
 0x3e6   :  { %v9394_v45 = vpop.f32.mrb[4].mxu1 }
 0x3e7   :  { %v9289_v20 = vpack.c.bf16 %v9394_v45, %v9394_v45  ;;  %v7960_v60 = vpop.f32.mrb[5].mxu1  ;;  %v8564_v7 = vmul.f32 %v9394_v45, %v9394_v45  ;;  %v8468_v14 = vsel %vm8392_vm13, %v9394_v45, 0.0 }
 0x3e8   :  { %v9287_v51 = vpack.c.bf16 %v7960_v60, %v7960_v60  ;;  %v8464_v3 = vsel %vm8392_vm13, %v7960_v60, 0.0  ;;  %v8562_v33 = vmul.f32 %v7960_v60, %v7960_v60  ;;  %v9395_v17 = vpop.f32.mrb[6].mxu1 }
 0x3e9   :  { %8366 = vst.msk [vmem:[#allocation12 + $0x98] sm:$0xf] %vm12869_vm15, %v9289_v20  ;;  %v8465_v32 = vadd.f32 %v8464_v3, %v8463_v6  ;;  %v9290_v52 = vpack.c.bf16 %v9395_v17, %v9395_v17  ;;  %v7963_v19 = vpop.f32.mrb[7].mxu1  ;;  %v8565_v15 = vmul.f32 %v9395_v17, %v9395_v17  ;;  %v8470_v38 = vsel %vm8392_vm13, %v9395_v17, 0.0  ;;  %vm12884_vm15 = vmmov %vm12870_vm0 }
 0x3ea   :  { %8364 = vst.msk [vmem:[#allocation12 + $0x90] sm:$0xf] %vm12870_vm0, %v9287_v51  ;;  %v8661_v18 = vsel %vm8392_vm13, %v8562_v33, 0.0  ;;  %v9288_v28 = vpack.c.bf16 %v7963_v19, %v7963_v19  ;;  %v8466_v21 = vsel %vm8392_vm13, %v7963_v19, 0.0  ;;  %v8563_v55 = vmul.f32 %v7963_v19, %v7963_v19 }
 0x3eb   :  { %v8662_v16 = vadd.f32 %v8661_v18, %v8660_v57  ;;  %8367 = vst.msk [vmem:[#allocation12 + $0x9c] sm:$0xf] %vm12871_vm8, %v9290_v52  ;;  %v8467_v59 = vadd.f32 %v8466_v21, %v8465_v32  ;;  %v8665_v12 = vsel %vm8392_vm13, %v8564_v7, 0.0  ;;  %v8667_v30 = vsel %vm8392_vm13, %v8565_v15, 0.0  ;;  %vm12885_vm8 = vmmov %vm12870_vm0 }
 0x3ec   :  { %8365 = vst.msk [vmem:[#allocation12 + $0x94] sm:$0xf] %vm12872_vm11, %v9288_v28  ;;  %v8663_v43 = vsel %vm8392_vm13, %v8563_v55, 0.0  ;;  %vm12886_vm11 = vmmov %vm12870_vm0 }
 0x3ed   :  { %v8469_v27 = vadd.f32 %v8468_v14, %v8467_v59  ;;  %v8664_v22 = vadd.f32 %v8663_v43, %v8662_v16 }
 0x3ef   :  { %v8471_v54 = vadd.f32 %v8470_v38, %v8469_v27  ;;  %v8666_v48 = vadd.f32 %v8665_v12, %v8664_v22 }
 0x3f1   :  { %v8668_v13 = vadd.f32 %v8667_v30, %v8666_v48 }
 0x401   :  { %v9398_v24 = vpop.f32.mrb[8].mxu1 }
 0x402   :  { %v9293_v49 = vpack.c.bf16 %v9398_v24, %v9398_v24  ;;  %v7976_v41 = vpop.f32.mrb[9].mxu1  ;;  %v8568_v39 = vmul.f32 %v9398_v24, %v9398_v24  ;;  %v8476_v36 = vsel %vm8392_vm13, %v9398_v24, 0.0 }
 0x403   :  { %v9291_v50 = vpack.c.bf16 %v7976_v41, %v7976_v41  ;;  %v8472_v63 = vsel %vm8392_vm13, %v7976_v41, 0.0  ;;  %v8566_v8 = vmul.f32 %v7976_v41, %v7976_v41  ;;  %v9399_v62 = vpop.f32.mrb[10].mxu1 }
 0x404   :  { %8370 = vst.msk [vmem:[#allocation12 + $0xa8] sm:$0xf] %vm12873_vm14, %v9293_v49  ;;  %v8473_v11 = vadd.f32 %v8472_v63, %v8471_v54  ;;  %v9294_v34 = vpack.c.bf16 %v9399_v62, %v9399_v62  ;;  %v7979_v61 = vpop.f32.mrb[11].mxu1  ;;  %v8569_v44 = vmul.f32 %v9399_v62, %v9399_v62  ;;  %v8478_v40 = vsel %vm8392_vm13, %v9399_v62, 0.0  ;;  %vm12887_vm14 = vmmov %vm12870_vm0 }
 0x405   :  { %8368 = vst.msk [vmem:[#allocation12 + $0xa0] sm:$0xf] %vm12874_vm4, %v9291_v50  ;;  %v8669_v4 = vsel %vm8392_vm13, %v8566_v8, 0.0  ;;  %v9292_v25 = vpack.c.bf16 %v7979_v61, %v7979_v61  ;;  %v8474_v26 = vsel %vm8392_vm13, %v7979_v61, 0.0  ;;  %v8567_v42 = vmul.f32 %v7979_v61, %v7979_v61  ;;  %vm12888_vm4 = vmmov %vm12870_vm0 }
 0x406   :  { %v8670_v35 = vadd.f32 %v8669_v4, %v8668_v13  ;;  %8371 = vst.msk [vmem:[#allocation12 + $0xac] sm:$0xf] %vm12875_vm5, %v9294_v34  ;;  %v8475_v2 = vadd.f32 %v8474_v26, %v8473_v11  ;;  %v8673_v58 = vsel %vm8392_vm13, %v8568_v39, 0.0  ;;  %v8675_v56 = vsel %vm8392_vm13, %v8569_v44, 0.0  ;;  %vm12889_vm5 = vmmov %vm12870_vm0 }
 0x407   :  { %8369 = vst.msk [vmem:[#allocation12 + $0xa4] sm:$0xf] %vm12876_vm1, %v9292_v25  ;;  %v8671_v31 = vsel %vm8392_vm13, %v8567_v42, 0.0  ;;  %vm12890_vm1 = vmmov %vm12870_vm0 }
 0x408   :  { %v8477_v46 = vadd.f32 %v8476_v36, %v8475_v2  ;;  %v8672_v5 = vadd.f32 %v8671_v31, %v8670_v35 }
 0x40a   :  { %v8479_v53 = vadd.f32 %v8478_v40, %v8477_v46  ;;  %v8674_v23 = vadd.f32 %v8673_v58, %v8672_v5 }
 0x40c   :  { %v8676_v9 = vadd.f32 %v8675_v56, %v8674_v23 }
 0x41d   :  { %v9402_v1 = vpop.f32.mrb[12].mxu1 }
 0x41e   :  { %v9297_v37 = vpack.c.bf16 %v9402_v1, %v9402_v1  ;;  %v7992_v47 = vpop.f32.mrb[13].mxu1  ;;  %v8572_v33 = vmul.f32 %v9402_v1, %v9402_v1  ;;  %v8484_v19 = vsel %vm8392_vm13, %v9402_v1, 0.0 }
 0x41f   :  { %v9295_v10 = vpack.c.bf16 %v7992_v47, %v7992_v47  ;;  %v8480_v6 = vsel %vm8392_vm13, %v7992_v47, 0.0  ;;  %v8570_v29 = vmul.f32 %v7992_v47, %v7992_v47  ;;  %v9403_v0 = vpop.f32.mrb[14].mxu1 }
 0x420   :  { %8374 = vst.msk [vmem:[#allocation12 + $0xb8] sm:$0xf] %vm12877_vm2, %v9297_v37  ;;  %v8481_v57 = vadd.f32 %v8480_v6, %v8479_v53  ;;  %v9298_v45 = vpack.c.bf16 %v9403_v0, %v9403_v0  ;;  %v7995_v20 = vpop.f32.mrb[15].mxu1  ;;  %v8573_v18 = vmul.f32 %v9403_v0, %v9403_v0  ;;  %v8486_v7 = vsel %vm8392_vm13, %v9403_v0, 0.0  ;;  %vm12891_vm2 = vmmov %vm12870_vm0 }
 0x421   :  { %8372 = vst.msk [vmem:[#allocation12 + $0xb0] sm:$0xf] %vm12878_vm6, %v9295_v10  ;;  %v8677_v60 = vsel %vm8392_vm13, %v8570_v29, 0.0  ;;  %v9296_v51 = vpack.c.bf16 %v7995_v20, %v7995_v20  ;;  %v8482_v3 = vsel %vm8392_vm13, %v7995_v20, 0.0  ;;  %v8571_v52 = vmul.f32 %v7995_v20, %v7995_v20  ;;  %vm12892_vm6 = vmmov %vm12870_vm0 }
 0x422   :  { %v8678_v17 = vadd.f32 %v8677_v60, %v8676_v9  ;;  %8375 = vst.msk [vmem:[#allocation12 + $0xbc] sm:$0xf] %vm12879_vm7, %v9298_v45  ;;  %v8483_v32 = vadd.f32 %v8482_v3, %v8481_v57  ;;  %v8681_v59 = vsel %vm8392_vm13, %v8572_v33, 0.0  ;;  %v8683_v15 = vsel %vm8392_vm13, %v8573_v18, 0.0  ;;  %vm12893_vm7 = vmmov %vm12870_vm0 }
 0x423   :  { %8373 = vst.msk [vmem:[#allocation12 + $0xb4] sm:$0xf] %vm12880_vm3, %v9296_v51  ;;  %v8679_v21 = vsel %vm8392_vm13, %v8571_v52, 0.0  ;;  %vm12894_vm3 = vmmov %vm12870_vm0 }
 0x424   :  { %v8485_v28 = vadd.f32 %v8484_v19, %v8483_v32  ;;  %v8680_v16 = vadd.f32 %v8679_v21, %v8678_v17 }
 0x426   :  { %v8487_v55 = vadd.f32 %v8486_v7, %v8485_v28  ;;  %v8682_v14 = vadd.f32 %v8681_v59, %v8680_v16 }
 0x428   :  { %v8684_v27 = vadd.f32 %v8683_v15, %v8682_v14 }
 0x439   :  { %v9406_v43 = vpop.f32.mrb[16].mxu1 }
 0x43a   :  { %v9301_v38 = vpack.c.bf16 %v9406_v43, %v9406_v43  ;;  %v8008_v22 = vpop.f32.mrb[17].mxu1  ;;  %v8576_v8 = vmul.f32 %v9406_v43, %v9406_v43  ;;  %v8492_v61 = vsel %vm8392_vm13, %v9406_v43, 0.0 }
 0x43b   :  { %v9299_v12 = vpack.c.bf16 %v8008_v22, %v8008_v22  ;;  %v8488_v54 = vsel %vm8392_vm13, %v8008_v22, 0.0  ;;  %v8574_v48 = vmul.f32 %v8008_v22, %v8008_v22  ;;  %v9407_v30 = vpop.f32.mrb[18].mxu1 }
 0x43c   :  { %8378 = vst.msk [vmem:[#allocation12 + $0xc8] sm:$0xf] %vm12881_vm9, %v9301_v38  ;;  %v8489_v13 = vadd.f32 %v8488_v54, %v8487_v55  ;;  %v9302_v24 = vpack.c.bf16 %v9407_v30, %v9407_v30  ;;  %v8011_v49 = vpop.f32.mrb[19].mxu1  ;;  %v8577_v4 = vmul.f32 %v9407_v30, %v9407_v30  ;;  %v8494_v39 = vsel %vm8392_vm13, %v9407_v30, 0.0  ;;  %vm12895_vm9 = vmmov %vm12870_vm0 }
 0x43d   :  { %8376 = vst.msk [vmem:[#allocation12 + $0xc0] sm:$0xf] %vm12882_vm10, %v9299_v12  ;;  %v8685_v41 = vsel %vm8392_vm13, %v8574_v48, 0.0  ;;  %v9300_v50 = vpack.c.bf16 %v8011_v49, %v8011_v49  ;;  %v8490_v63 = vsel %vm8392_vm13, %v8011_v49, 0.0  ;;  %v8575_v34 = vmul.f32 %v8011_v49, %v8011_v49 }
 0x43e   :  { %v8686_v62 = vadd.f32 %v8685_v41, %v8684_v27  ;;  %8379 = vst.msk [vmem:[#allocation12 + $0xcc] sm:$0xf] %vm12883_vm12, %v9302_v24  ;;  %v8491_v11 = vadd.f32 %v8490_v63, %v8489_v13  ;;  %v8689_v2 = vsel %vm8392_vm13, %v8576_v8, 0.0  ;;  %v8691_v44 = vsel %vm8392_vm13, %v8577_v4, 0.0 }
 0x43f   :  { %8377 = vst.msk [vmem:[#allocation12 + $0xc4] sm:$0xf] %vm12884_vm15, %v9300_v50  ;;  %v8687_v26 = vsel %vm8392_vm13, %v8575_v34, 0.0 }
 0x440   :  { %v8493_v25 = vadd.f32 %v8492_v61, %v8491_v11  ;;  %v8688_v35 = vadd.f32 %v8687_v26, %v8686_v62 }
 0x442   :  { %v8495_v42 = vadd.f32 %v8494_v39, %v8493_v25  ;;  %v8690_v36 = vadd.f32 %v8689_v2, %v8688_v35 }
 0x444   :  { %v8692_v46 = vadd.f32 %v8691_v44, %v8690_v36 }
 0x455   :  { %v9410_v31 = vpop.f32.mrb[20].mxu1 }
 0x456   :  { %v9305_v40 = vpack.c.bf16 %v9410_v31, %v9410_v31  ;;  %v8024_v5 = vpop.f32.mrb[21].mxu1  ;;  %v8580_v29 = vmul.f32 %v9410_v31, %v9410_v31  ;;  %v8500_v20 = vsel %vm8392_vm13, %v9410_v31, 0.0 }
 0x457   :  { %v9303_v58 = vpack.c.bf16 %v8024_v5, %v8024_v5  ;;  %v8496_v53 = vsel %vm8392_vm13, %v8024_v5, 0.0  ;;  %v8578_v23 = vmul.f32 %v8024_v5, %v8024_v5  ;;  %v9411_v56 = vpop.f32.mrb[22].mxu1 }
 0x458   :  { %8382 = vst.msk [vmem:[#allocation12 + $0xd8] sm:$0xf] %vm12870_vm0, %v9305_v40  ;;  %v8497_v9 = vadd.f32 %v8496_v53, %v8495_v42  ;;  %v9306_v1 = vpack.c.bf16 %v9411_v56, %v9411_v56  ;;  %v8027_v37 = vpop.f32.mrb[23].mxu1  ;;  %v8581_v60 = vmul.f32 %v9411_v56, %v9411_v56  ;;  %v8502_v33 = vsel %vm8392_vm13, %v9411_v56, 0.0 }
 0x459   :  { %8380 = vst.msk [vmem:[#allocation12 + $0xd0] sm:$0xf] %vm12885_vm8, %v9303_v58  ;;  %v8693_v47 = vsel %vm8392_vm13, %v8578_v23, 0.0  ;;  %v9304_v10 = vpack.c.bf16 %v8027_v37, %v8027_v37  ;;  %v8498_v6 = vsel %vm8392_vm13, %v8027_v37, 0.0  ;;  %v8579_v45 = vmul.f32 %v8027_v37, %v8027_v37 }
 0x45a   :  { %v8694_v0 = vadd.f32 %v8693_v47, %v8692_v46  ;;  %8383 = vst.msk [vmem:[#allocation12 + $0xdc] sm:$0xf] %vm12886_vm11, %v9306_v1  ;;  %v8499_v57 = vadd.f32 %v8498_v6, %v8497_v9  ;;  %v8697_v32 = vsel %vm8392_vm13, %v8580_v29, 0.0  ;;  %v8699_v18 = vsel %vm8392_vm13, %v8581_v60, 0.0 }
 0x45b   :  { %8381 = vst.msk [vmem:[#allocation12 + $0xd4] sm:$0xf] %vm12887_vm14, %v9304_v10  ;;  %v8695_v3 = vsel %vm8392_vm13, %v8579_v45, 0.0 }
 0x45c   :  { %v8501_v51 = vadd.f32 %v8500_v20, %v8499_v57  ;;  %v8696_v17 = vadd.f32 %v8695_v3, %v8694_v0 }
 0x45e   :  { %v8503_v52 = vadd.f32 %v8502_v33, %v8501_v51  ;;  %v8698_v19 = vadd.f32 %v8697_v32, %v8696_v17 }
 0x460   :  { %v8700_v28 = vadd.f32 %v8699_v18, %v8698_v19 }
 0x471   :  { %v9414_v21 = vpop.f32.mrb[24].mxu1 }
 0x472   :  { %v9309_v7 = vpack.c.bf16 %v9414_v21, %v9414_v21  ;;  %v8040_v16 = vpop.f32.mrb[25].mxu1  ;;  %v8584_v48 = vmul.f32 %v9414_v21, %v9414_v21  ;;  %v8508_v49 = vsel %vm8392_vm13, %v9414_v21, 0.0 }
 0x473   :  { %v9307_v59 = vpack.c.bf16 %v8040_v16, %v8040_v16  ;;  %v8504_v55 = vsel %vm8392_vm13, %v8040_v16, 0.0  ;;  %v8582_v14 = vmul.f32 %v8040_v16, %v8040_v16  ;;  %v9415_v15 = vpop.f32.mrb[26].mxu1 }
 0x474   :  { %8386 = vst.msk [vmem:[#allocation12 + $0xe8] sm:$0xf] %vm12888_vm4, %v9309_v7  ;;  %v8505_v27 = vadd.f32 %v8504_v55, %v8503_v52  ;;  %v9310_v43 = vpack.c.bf16 %v9415_v15, %v9415_v15  ;;  %v8043_v38 = vpop.f32.mrb[27].mxu1  ;;  %v8585_v41 = vmul.f32 %v9415_v15, %v9415_v15  ;;  %v8510_v8 = vsel %vm8392_vm13, %v9415_v15, 0.0 }
 0x475   :  { %8384 = vst.msk [vmem:[#allocation12 + $0xe0] sm:$0xf] %vm12889_vm5, %v9307_v59  ;;  %v8701_v22 = vsel %vm8392_vm13, %v8582_v14, 0.0  ;;  %v9308_v12 = vpack.c.bf16 %v8043_v38, %v8043_v38  ;;  %v8506_v54 = vsel %vm8392_vm13, %v8043_v38, 0.0  ;;  %v8583_v24 = vmul.f32 %v8043_v38, %v8043_v38 }
 0x476   :  { %v8702_v30 = vadd.f32 %v8701_v22, %v8700_v28  ;;  %8387 = vst.msk [vmem:[#allocation12 + $0xec] sm:$0xf] %vm12890_vm1, %v9310_v43  ;;  %v8507_v13 = vadd.f32 %v8506_v54, %v8505_v27  ;;  %v8705_v11 = vsel %vm8392_vm13, %v8584_v48, 0.0  ;;  %v8707_v4 = vsel %vm8392_vm13, %v8585_v41, 0.0 }
 0x477   :  { %8385 = vst.msk [vmem:[#allocation12 + $0xe4] sm:$0xf] %vm12891_vm2, %v9308_v12  ;;  %v8703_v63 = vsel %vm8392_vm13, %v8583_v24, 0.0 }
 0x478   :  { %v8509_v50 = vadd.f32 %v8508_v49, %v8507_v13  ;;  %v8704_v62 = vadd.f32 %v8703_v63, %v8702_v30 }
 0x47a   :  { %v8511_v34 = vadd.f32 %v8510_v8, %v8509_v50  ;;  %v8706_v61 = vadd.f32 %v8705_v11, %v8704_v62 }
 0x47c   :  { %v8708_v25 = vadd.f32 %v8707_v4, %v8706_v61 }
 0x4a1   :  { %v9418_v26 = vpop.f32.mrb[28].mxu1 }
 0x4a2   :  { %v9313_v39 = vpack.c.bf16 %v9418_v26, %v9418_v26  ;;  %v8056_v35 = vpop.f32.mrb[29].mxu1  ;;  %v8588_v23 = vmul.f32 %v9418_v26, %v9418_v26  ;;  %v8516_v37 = vsel %vm8392_vm13, %v9418_v26, 0.0 }
 0x4a3   :  { %v9311_v2 = vpack.c.bf16 %v8056_v35, %v8056_v35  ;;  %v8512_v42 = vsel %vm8392_vm13, %v8056_v35, 0.0  ;;  %v8586_v36 = vmul.f32 %v8056_v35, %v8056_v35  ;;  %v9419_v44 = vpop.f32.mrb[30].mxu1 }
 0x4a4   :  { %8390 = vst.msk [vmem:[#allocation12 + $0xf8] sm:$0xf] %vm12892_vm6, %v9313_v39  ;;  %v8513_v46 = vadd.f32 %v8512_v42, %v8511_v34  ;;  %v9314_v31 = vpack.c.bf16 %v9419_v44, %v9419_v44  ;;  %v8059_v40 = vpop.f32.mrb[31].mxu1  ;;  %v8589_v47 = vmul.f32 %v9419_v44, %v9419_v44 }
 0x4a5   :  { %8388 = vst.msk [vmem:[#allocation12 + $0xf0] sm:$0xf] %vm12893_vm7, %v9311_v2  ;;  %v8709_v5 = vsel %vm8392_vm13, %v8586_v36, 0.0  ;;  %v9312_v58 = vpack.c.bf16 %v8059_v40, %v8059_v40  ;;  %v8514_v53 = vsel %vm8392_vm13, %v8059_v40, 0.0  ;;  %v8587_v1 = vmul.f32 %v8059_v40, %v8059_v40 }
 0x4a6   :  { %v8710_v56 = vadd.f32 %v8709_v5, %v8708_v25  ;;  %8391 = vst.msk [vmem:[#allocation12 + $0xfc] sm:$0xf] %vm12894_vm3, %v9314_v31  ;;  %v8515_v9 = vadd.f32 %v8514_v53, %v8513_v46 }
 0x4a7   :  { %8389 = vst.msk [vmem:[#allocation12 + $0xf4] sm:$0xf] %vm12895_vm9, %v9312_v58  ;;  %v8711_v6 = vsel %vm8392_vm13, %v8587_v1, 0.0 }
 0x4a8   :  { %v8517_v10 = vadd.f32 %v8516_v37, %v8515_v9 }
 0x4a9   :  { %9612 = shalt.err (!%p9609_p6)
}
 0x4aa   :  { %s9613_s1 = scalar_lea.hbm %s12764_s4, 4096 }
 0x4ab   :  { %p9614_p7 = scmp.ne.s32.totalorder %s12764_s4, %s9613_s1  ;;  %p9617_p8 = scmp.lt.u32.totalorder %s9613_s1, %s12764_s4 }
 0x4ad   :  { %p9619_p9 = pnand %p9617_p8, %p9614_p7 }
 0x4af   :  { %9622 = shalt.err (!%p9619_p9)
}
 0x4b0   :  { %8738 = dma.vmem_to_hbm [thread:$0]  %s8733_s30, 4096, %s12764_s4, [#allocation6], %s9656_s28, %s9656_s28, %s9657_s29   ;;  %v8518_v29 = vsel %vm8392_vm13, %v9419_v44, 0.0  ;;  %v8712_v0 = vadd.f32 %v8711_v6, %v8710_v56  ;;  %v8713_v57 = vsel %vm8392_vm13, %v8588_v23, 0.0  ;;  %v8715_v60 = vsel %vm8392_vm13, %v8589_v47, 0.0 }
 0x4b1   :  { %v8519_v45 = vadd.f32 %v8518_v29, %v8517_v10  ;;  %s9684_s4 = smov [#allocation13]   ;;  %vm8723_vm10 = vcmask 1040384   ;;  %vm8725_vm12 = vcmask 517120  }
 0x4b2   :  { %v8714_v20 = vadd.f32 %v8713_v57, %v8712_v0  ;;  %s8745_s28 = sshll.u32 %s9684_s4, 4  ;;  %s8746_s28 = int_to_ptr.vmem [resolvable:$true] %s8745_s28 }
 0x4b3   :  { %v8520_v51 = vrot.slane %v8519_v45, 4  ;;  %s9623_s29 = scalar_lea.vmem %s8746_s28, 32  ;;  %p9628_p11 = scmp.lt.s32.totalorder %s8746_s28, %s8746_s28 }
 0x4b4   :  { %v8716_v3 = vadd.f32 %v8715_v60, %v8714_v20  ;;  %p9624_p10 = scmp.ne.s32.totalorder %s8746_s28, %s9623_s29  ;;  %p9629_p12 = scmp.lt.s32.totalorder %s9623_s29, %s9623_s29 }
 0x4b5   :  { %v8521_v33 = vadd.f32 %v8520_v51, %v8519_v45 }
 0x4b6   :  { %v8717_v17 = vrot.slane %v8716_v3, 4  ;;  %p9630_p13 = por %p9629_p12, %p9628_p11 }
 0x4b7   :  { %v8522_v32 = vrot.slane %v8521_v33, 2 }
 0x4b8   :  { %v8718_v52 = vadd.f32 %v8717_v17, %v8716_v3  ;;  %p9631_p0 = pnand %p9630_p13, %p9624_p10 }
 0x4b9   :  { %v8523_v19 = vadd.f32 %v8522_v32, %v8521_v33 }
 0x4ba   :  { %v8719_v18 = vrot.slane %v8718_v52, 2 }
 0x4bb   :  { %v8524_v28 = vrot.slane %v8523_v19, 1 }
 0x4bc   :  { %v8720_v21 = vadd.f32 %v8719_v18, %v8718_v52 }
 0x4bd   :  { %v8525_v16 = vadd.f32 %v8524_v28, %v8523_v19 }
 0x4be   :  { %v8721_v7 = vrot.slane %v8720_v21, 1 }
 0x4c0   :  { %v8722_v59 = vadd.f32 %v8721_v7, %v8720_v21 }
 0x4c2   :  { %v8724_v55 = vsel %vm8723_vm10, %v8525_v16, %v8722_v59 }
 0x4c3   :  { %8726 = vst.msk [vmem:[#allocation13] sm:$0x3] %vm8725_vm12, %v8724_v55 }
 0x4c4   :  { %9634 = shalt.err (!%p9631_p0)
}
 0x4c5   :  { %s9635_s16 = scalar_lea.hbm %s12765_s5, 32 }
 0x4c6   :  { %p9636_p1 = scmp.ne.s32.totalorder %s12765_s5, %s9635_s16  ;;  %p9639_p2 = scmp.lt.u32.totalorder %s9635_s16, %s12765_s5 }
 0x4c8   :  { %p9641_p3 = pnand %p9639_p2, %p9636_p1 }
 0x4ca   :  { %9644 = shalt.err (!%p9641_p3)
}
 0x4cb   :  { %8748 = dma.vmem_to_hbm [thread:$0]  %s8746_s28, 32, %s12765_s5, [#allocation14]  }
 0x4cc   :  { %9651 = dma.done.wait [#allocation6], 4096  }
 0x4cd   :  { %9652 = vsyncadd [#allocation6], 4294963200 }
 0x4ce   :  { %9653 = dma.done.wait [#allocation14], 32  }
 0x4cf   :  { %9654 = vsyncadd [#allocation14], 4294967264 }
 0x4d0   :  { %8755 = vsyncpa [#allocation5], 1 }
 0x4d1   :  { %8756 = vsyncpa [#allocation8], 1 }
 0x4d2   :  { %8757 = vsyncpa [#allocation11], 1 }
 0x4d3   :  { %8758 = vsyncpa [#allocation6], 1 }
 0x4d4   :  { %8759 = vsyncpa [#allocation14], 1 }

</bundles_post_ra>
